<compile_context>
chip_gen: v7x
topology: tpu7x:2x2x1
jax: 0.10.0
libtpu: 0.0.40
codegen_flags: <defaults>
</compile_context>

<pallas_src>
import functools

import jax
import jax.numpy as jnp
from jax import lax
from jax.experimental import pallas as pl
from jax.experimental.pallas import tpu as pltpu

CPAD = 128                        # lane-padded channel count
LRELU_SLOPE = 0.2
RES_SCALE = 0.2
TILE_M = 256                      # rows per register-accumulated M tile (<=32 f32 vregs)
VMEM_LIMIT_BYTES = 48 * 1024 * 1024   # v7x-safe scoped VMEM budget


# ---------------------------------------------------------------------------
# Pallas kernel: fused 3x3x3 conv (+bias, act, residuals/passthrough)
# processes DP output depth planes per grid step.
# ---------------------------------------------------------------------------
def _conv3d_pf_kernel(*refs, n_src, n_res, dp, H, W, prows, tile_m, act,
                      out_scale, res_scales, self_res, passthrough):
    """refs = [src_0_plane_0 .. src_0_plane_{dp+1}, ..., src_{n_src-1}_plane_{dp+1},
               w_ref, b_ref, res_0 .. res_{n_res-1}, o_ref]"""
    n_planes = dp + 2
    src_refs = refs[:n_src * n_planes]
    w_ref = refs[n_src * n_planes]
    b_ref = refs[n_src * n_planes + 1]
    res_refs = refs[n_src * n_planes + 2: n_src * n_planes + 2 + n_res]
    o_ref = refs[n_src * n_planes + 2 + n_res]

    d = pl.program_id(1)
    last_d = pl.num_programs(1) - 1
    wp2 = W + 2
    r_out = H * wp2
    base = W + 3                     # first interior row of a padded plane

    bias = b_ref[...].astype(jnp.float32)                      # (1, CPAD)

    for p in range(dp):
        # ---- pad rows of this output plane stay exactly zero (PF invariant) --
        o_ref[p, pl.ds(0, base), :] = jnp.zeros((base, CPAD), o_ref.dtype)
        tail = prows - base - r_out
        if tail > 0:
            o_ref[p, pl.ds(base + r_out, tail), :] = jnp.zeros((tail, CPAD),
                                                               o_ref.dtype)

        # ---- register-accumulated M tiles --------------------------------
        for m0 in range(0, r_out, tile_m):
            tm = min(tile_m, r_out - m0)
            acc = None
            for s in range(n_src):
                for kd in range(3):
                    plane = src_refs[s * n_planes + p + kd]
                    wbase = 27 * s + 9 * kd
                    part = None
                    for kh in range(3):
                        for kw in range(3):
                            a = plane[pl.ds(m0 + kh * wp2 + kw, tm), :]
                            t = jnp.dot(a, w_ref[wbase + 3 * kh + kw],
                                        preferred_element_type=jnp.float32)
                            part = t if part is None else part + t
                    # depth-boundary gating (clamped planes contribute zero)
                    if kd == 0 and p == 0:
                        part = part * (d > 0).astype(jnp.float32)
                    elif kd == 2 and p == dp - 1:
                        part = part * (d < last_d).astype(jnp.float32)
                    acc = part if acc is None else acc + part

            # ---- fused epilogue (f32) -------------------------------------
            y = acc + bias
            if act == "lrelu":
                y = jnp.where(y >= 0.0, y, LRELU_SLOPE * y)
            elif act == "tanh":
                y = jnp.tanh(y)
            if out_scale != 1.0:
                y = y * out_scale

            if self_res is not None or passthrough is not None:
                lane = lax.broadcasted_iota(jnp.int32, (tm, CPAD), 1)
                ctr = src_refs[p + 1][pl.ds(base + m0, tm), :].astype(jnp.float32)
                if self_res is not None:          # + scale * src0[:, :nch]
                    sc, nch = self_res
                    y = y + sc * jnp.where(lane < nch, ctr, 0.0)
                if passthrough is not None:       # copy lanes outside [lo, hi)
                    lo, hi = passthrough
                    y = y + jnp.where((lane >= lo) & (lane < hi), 0.0, ctr)

            for i in range(n_res):                # external residual adds
                r = res_refs[i][p, pl.ds(base + m0, tm), :].astype(jnp.float32)
                y = y + res_scales[i] * r

            # zero in-row spatial-pad columns (keep PF invariant)
            rows = base + m0 + lax.broadcasted_iota(jnp.int32, (tm, CPAD), 0)
            wp = rows % wp2
            y = jnp.where((wp >= 1) & (wp <= W), y, 0.0)

            o_ref[p, pl.ds(base + m0, tm), :] = y.astype(o_ref.dtype)


def _src_index_map(n, d, *, j, dp, nd):
    # clamped depth plane index (no depth-pad planes stored; boundary taps gated)
    return (n, jnp.minimum(jnp.maximum(d * dp + j - 1, 0), nd - 1), 0, 0)


def _out_index_map(n, d):
    return (n, d, 0, 0)


def conv3d_pf(srcs, conv_p, H, W, act=None, out_scale=1.0, self_res=None,
              passthrough=None, residuals=()):
    """Fused 3x3x3 conv over PF-layout sources.  Returns a PF activation."""
    a0 = srcs[0]
    N, D, prows, cpad = a0.shape
    assert cpad == CPAD and prows == _pf_rows(H, W)
    n_src, n_res = len(srcs), len(residuals)
    assert conv_p["w"].shape == (27 * n_src, CPAD, CPAD)
    dp = 2 if D % 2 == 0 else 1
    n_planes = dp + 2

    inputs, in_specs = [], []
    for s in srcs:
        for j in range(n_planes):
            inputs.append(s)
            in_specs.append(pl.BlockSpec(
                (None, None, prows, CPAD),
                functools.partial(_src_index_map, j=j, dp=dp, nd=D)))
    inputs.append(conv_p["w"])
    in_specs.append(pl.BlockSpec(conv_p["w"].shape, lambda n, d: (0, 0, 0)))
    inputs.append(conv_p["b"])
    in_specs.append(pl.BlockSpec((1, CPAD), lambda n, d: (0, 0)))
    res_scales = []
    for r, sc in residuals:
        inputs.append(r)
        in_specs.append(pl.BlockSpec((None, dp, prows, CPAD), _out_index_map))
        res_scales.append(float(sc))

    kernel = functools.partial(
        _conv3d_pf_kernel, n_src=n_src, n_res=n_res, dp=dp, H=H, W=W,
        prows=prows, tile_m=TILE_M, act=act, out_scale=float(out_scale),
        res_scales=tuple(res_scales), self_res=self_res, passthrough=passthrough)

    return pl.pallas_call(
        kernel,
        out_shape=jax.ShapeDtypeStruct((N, D, prows, CPAD), jnp.bfloat16),
        grid_spec=pltpu.PrefetchScalarGridSpec(
            num_scalar_prefetch=0,
            grid=(N, D // dp),
            in_specs=in_specs,
            out_specs=pl.BlockSpec((None, dp, prows, CPAD), _out_index_map),
        ),
        compiler_params=pltpu.CompilerParams(
            dimension_semantics=("parallel", "parallel"),
            vmem_limit_bytes=VMEM_LIMIT_BYTES,
        ),
    )(*inputs)


# ---------------------------------------------------------------------------
# PF layout helpers (host-side glue).  PF = [N, D, PROWS, 128] bf16 where each
# depth plane is a flattened (H+2)x(W+2) zero-padded plane, rows padded to a
# multiple of 8 (+2 slack rows for the shifted tap reads), channels -> 128 lanes.
# ---------------------------------------------------------------------------
def _pf_rows(H, W):
    return (((H + 2) * (W + 2) + 2) + 7) // 8 * 8


def dense_to_pf(x):
    N, D, H, W, C = x.shape
    assert C <= CPAD
    prows = _pf_rows(H, W)
    xp = jnp.pad(x, ((0, 0), (0, 0), (1, 1), (1, 1), (0, CPAD - C)))
    xp = xp.reshape(N, D, (H + 2) * (W + 2), CPAD)
    xp = jnp.pad(xp, ((0, 0), (0, 0), (0, prows - (H + 2) * (W + 2)), (0, 0)))
    return xp.astype(jnp.bfloat16)


def pf_to_dense(a, H, W, C, dtype=jnp.float32):
    N, D = a.shape[0], a.shape[1]
    x = a[:, :, :(H + 2) * (W + 2), :C]
    x = x.reshape(N, D, H + 2, W + 2, C)[:, :, 1:H + 1, 1:W + 1, :]
    return x.astype(dtype)


def upsample_hw2_pf(a, H, W, C):
    """trilinear scale_factor=[1,2,2] on a PF tensor (only the C real lanes)."""
    x = pf_to_dense(a, H, W, C, dtype=jnp.float32)
    N, D = x.shape[0], x.shape[1]
    y = jax.image.resize(x, (N, D, 2 * H, 2 * W, C), method="trilinear")
    return dense_to_pf(y)


# ---------------------------------------------------------------------------
# Parameters: xavier_uniform + zero bias + spectral norm, packed for the kernel
# ---------------------------------------------------------------------------
def _xavier_conv3d(key, cout, cin, k=(3, 3, 3)):
    fan_in = cin * k[0] * k[1] * k[2]
    fan_out = cout * k[0] * k[1] * k[2]
    bound = (6.0 / (fan_in + fan_out)) ** 0.5
    return jax.random.uniform(key, (cout, cin, *k), minval=-bound, maxval=bound,
                              dtype=jnp.float32)


def _spectral_normalize(w):
    mat = w.reshape(w.shape[0], -1)
    sigma = jnp.linalg.svd(mat, compute_uv=False)[0]
    return w / sigma


def _pack_conv(w, cin_list, cout, out_lo=0):
    """torch-layout [Cout, Cin, 3,3,3] -> per-source [27, 128, 128] bf16 blocks.
    Output channels are placed at lanes [out_lo, out_lo+Cout)."""
    assert w.shape[0] == cout and w.shape[1] == sum(cin_list)
    assert out_lo + cout <= CPAD
    blocks, off = [], 0
    for c in cin_list:
        assert c <= CPAD
        ws = w[:, off:off + c]
        off += c
        ws = jnp.transpose(ws, (2, 3, 4, 1, 0))            # [kd, kh, kw, Cin, Cout]
        ws = jnp.pad(ws, ((0, 0), (0, 0), (0, 0),
                          (0, CPAD - c), (out_lo, CPAD - out_lo - cout)))
        blocks.append(ws.reshape(27, CPAD, CPAD))
    wp = jnp.concatenate(blocks, axis=0).astype(jnp.bfloat16)
    bp = jnp.zeros((1, CPAD), jnp.float32)                 # G5 init: bias = 0
    return {"w": wp, "b": bp}


def init_g5_raw(key, ngf, nbf, nblock, nup):
    """Raw (torch-layout, spectrally-normalized f32) weights for G5."""
    keys = iter(jax.random.split(key, 1 + 15 * nblock + 1 + nup + 2))

    def conv_w(cout, cin):
        return _spectral_normalize(_xavier_conv3d(next(keys), cout, cin))

    def rdb_w():
        ws, cin = [], ngf
        for _ in range(4):
            ws.append(conv_w(nbf, cin))
            cin += nbf
        ws.append(conv_w(ngf, cin))
        return ws

    raw = {"convin": conv_w(ngf, 3)}
    raw["rrdbs"] = [{"rdb1": rdb_w(), "rdb2": rdb_w(), "rdb3": rdb_w()}
                    for _ in range(nblock)]
    raw["convbout"] = conv_w(ngf, ngf)
    raw["ups"] = [conv_w(ngf, ngf) for _ in range(nup)]
    raw["conv1"] = conv_w(ngf, ngf)
    raw["conv2"] = conv_w(3, ngf)
    return raw


def pack_g5_params(raw, ngf, nbf):
    assert ngf + 4 * nbf <= CPAD, \
        "TODO(synk): >128 packed lanes needs the 2-buffer dense-block layout"

    def pk(w, out_lo=0):
        return _pack_conv(w, (w.shape[1],), w.shape[0], out_lo)

    def pk_rdb(ws):
        out, used = [], ngf
        for i in range(4):
            out.append(pk(ws[i], out_lo=used))       # write x_{i+1} at lanes [used, used+nbf)
            used += nbf
        out.append(pk(ws[4], out_lo=0))              # conv5 writes lanes [0, ngf)
        return out

    return {
        "convin": pk(raw["convin"]),
        "rrdbs": [{k: pk_rdb(v) for k, v in r.items()} for r in raw["rrdbs"]],
        "convbout": pk(raw["convbout"]),
        "ups": [pk(w) for w in raw["ups"]],
        "conv1": pk(raw["conv1"]),
        "conv2": pk(raw["conv2"]),
    }


# ---------------------------------------------------------------------------
# Forward pass: all convs / concats / residuals run inside the Pallas kernel.
# An RDB keeps (x, x1..x4) packed as lane slices of ONE 128-lane PF buffer.
# ---------------------------------------------------------------------------
def rdb_forward(x, p, ngf, nbf, H, W, out_scale=RES_SCALE, self_scale=1.0,
                residuals=()):
    buf, used = x, ngf
    for i in range(4):
        buf = conv3d_pf([buf], p[i], H, W, act="lrelu",
                        passthrough=(used, used + nbf))
        used += nbf
    # conv5 fused with the RDB residual:  out = out_scale*conv5 + self_scale*x (+ ext)
    return conv3d_pf([buf], p[4], H, W, act=None, out_scale=out_scale,
                     self_res=(self_scale, ngf), residuals=residuals)


def rrdb_forward(x, p, ngf, nbf, H, W):
    y1 = rdb_forward(x, p["rdb1"], ngf, nbf, H, W)
    y2 = rdb_forward(y1, p["rdb2"], ngf, nbf, H, W)
    # RRDB residual fused into rdb3's conv5:  out = 0.04*conv5 + 0.2*y2 + x
    return rdb_forward(y2, p["rdb3"], ngf, nbf, H, W,
                       out_scale=RES_SCALE * RES_SCALE, self_scale=RES_SCALE,
                       residuals=((x, 1.0),))


def g5_forward(x_ncdhw, params, ngf, nbf):
    x = jnp.transpose(x_ncdhw, (0, 2, 3, 4, 1))            # NCDHW -> NDHWC
    _, _, H, W, _ = x.shape
    a = dense_to_pf(x)

    c1 = conv3d_pf([a], params["convin"], H, W, act=None)
    y = c1
    for rp in params["rrdbs"]:
        y = rrdb_forward(y, rp, ngf, nbf, H, W)
    # convbout fused with the global skip (+ c1)
    y = conv3d_pf([y], params["convbout"], H, W, act=None, residuals=((c1, 1.0),))
    for up in params["ups"]:
        y = upsample_hw2_pf(y, H, W, ngf)
        H, W = 2 * H, 2 * W
        y = conv3d_pf([y], up, H, W, act="lrelu")
    y = conv3d_pf([y], params["conv1"], H, W, act="lrelu")
    y = conv3d_pf([y], params["conv2"], H, W, act="tanh")

    out = pf_to_dense(y, H, W, 3, dtype=jnp.float32)
    return jnp.transpose(out, (0, 4, 1, 2, 3))             # NDHWC -> NCDHW


# ---------------------------------------------------------------------------
# Pure-JAX reference (mirrors bf16 storage points) for end-to-end validation
# ---------------------------------------------------------------------------
def _q(x):
    return x.astype(jnp.bfloat16).astype(jnp.float32)


def _ref_conv(x, w, act=None):
    wt = jnp.transpose(_q(w), (2, 3, 4, 1, 0))             # DHWIO
    y = lax.conv_general_dilated(
        x, wt, window_strides=(1, 1, 1),
        padding=((1, 1), (1, 1), (1, 1)),
        dimension_numbers=("NDHWC", "DHWIO", "NDHWC"))
    if act == "lrelu":
        y = jnp.where(y >= 0.0, y, LRELU_SLOPE * y)
    elif act == "tanh":
        y = jnp.tanh(y)
    return _q(y)


def _ref_rdb(x, ws):
    x1 = _ref_conv(x, ws[0], "lrelu")
    x2 = _ref_conv(jnp.concatenate([x, x1], -1), ws[1], "lrelu")
    x3 = _ref_conv(jnp.concatenate([x, x1, x2], -1), ws[2], "lrelu")
    x4 = _ref_conv(jnp.concatenate([x, x1, x2, x3], -1), ws[3], "lrelu")
    x5 = _ref_conv(jnp.concatenate([x, x1, x2, x3, x4], -1), ws[4], None)
    return _q(RES_SCALE * x5 + x)


def _ref_rrdb(x, d):
    o = _ref_rdb(x, d["rdb1"])
    o = _ref_rdb(o, d["rdb2"])
    o = _ref_rdb(o, d["rdb3"])
    return _q(RES_SCALE * o + x)


def g5_reference(x_ncdhw, raw):
    x = _q(jnp.transpose(x_ncdhw, (0, 2, 3, 4, 1)))
    c1 = _ref_conv(x, raw["convin"], None)
    y = c1
    for r in raw["rrdbs"]:
        y = _ref_rrdb(y, r)
    y = _ref_conv(y, raw["convbout"], None)
    y = _q(y + c1)
    for w in raw["ups"]:
        N, D, H, W, C = y.shape
        y = _q(jax.image.resize(y, (N, D, 2 * H, 2 * W, C), method="trilinear"))
        y = _ref_conv(y, w, "lrelu")
    y = _ref_conv(y, raw["conv1"], "lrelu")
    y = _ref_conv(y, raw["conv2"], "tanh")
    return jnp.transpose(y, (0, 4, 1, 2, 3))


# ---------------------------------------------------------------------------
if __name__ == "__main__":
    key = jax.random.PRNGKey(0)
    k_raw, k_x, k_cw, k_cx = jax.random.split(key, 4)

    # --- unit check: one fused Pallas conv vs. XLA conv reference -----------
    cin, cout, D0, H0, W0 = 8, 16, 4, 8, 8
    xc = jax.random.normal(k_cx, (1, D0, H0, W0, cin), dtype=jnp.float32)
    wc = _spectral_normalize(_xavier_conv3d(k_cw, cout, cin))
    y_pal = pf_to_dense(
        conv3d_pf([dense_to_pf(xc)], _pack_conv(wc, (cin,), cout), H0, W0,
                  act=None),
        H0, W0, cout)
    y_ref = _ref_conv(_q(xc), wc, None)
    err1 = float(jnp.max(jnp.abs(jax.block_until_ready(y_pal) - y_ref)))
    assert err1 < 0.03, f"conv kernel mismatch: max abs err {err1}"

    # --- full G5 forward vs. pure-JAX reference ------------------------------
    ngf, nbf, nblock, nup = 8, 4, 1, 1
    raw = init_g5_raw(k_raw, ngf, nbf, nblock, nup)
    params = pack_g5_params(raw, ngf, nbf)
    x = jax.random.normal(k_x, (1, 3, 4, 8, 8), dtype=jnp.float32)   # N,C,T,H,W

    fwd = jax.jit(g5_forward, static_argnums=(2, 3))
    out = jax.block_until_ready(fwd(x, params, ngf, nbf))
    assert out.shape == (1, 3, 4, 8 * 2 ** nup, 8 * 2 ** nup), out.shape
    assert bool(jnp.all(jnp.isfinite(out)))

    ref = g5_reference(x, raw)
    err2 = float(jnp.max(jnp.abs(out - ref)))
    assert err2 < 0.05, f"end-to-end mismatch: max abs err {err2}"

    print("KERNEL_OK")
</pallas_src>

<mosaic_0001>
module attributes {stable_mosaic.version = 11 : i64} {
  func.func @_conv3d_pf_kernel(%arg0: i32, %arg1: i32, %arg2: memref<1x1x104x128xbf16, #tpu.memory_space<vmem>>, %arg3: memref<1x1x104x128xbf16, #tpu.memory_space<vmem>>, %arg4: memref<1x1x104x128xbf16, #tpu.memory_space<vmem>>, %arg5: memref<1x1x104x128xbf16, #tpu.memory_space<vmem>>, %arg6: memref<27x128x128xbf16, #tpu.memory_space<vmem>>, %arg7: memref<1x128xf32, #tpu.memory_space<vmem>>, %arg8: memref<1x2x104x128xbf16, #tpu.memory_space<vmem>>) attributes {dimension_semantics = [#tpu.dimension_semantics<parallel>, #tpu.dimension_semantics<parallel>], iteration_bounds = array<i64: 1, 2>, scalar_prefetch = 0 : i64, scratch_operands = 0 : i64, tpu.core_type = #tpu.core_type<tc>, window_params = [{transform_indices = @transform_0, window_bounds = array<i64: 1, 1, 104, 128>}, {transform_indices = @transform_1, window_bounds = array<i64: 1, 1, 104, 128>}, {transform_indices = @transform_2, window_bounds = array<i64: 1, 1, 104, 128>}, {transform_indices = @transform_3, window_bounds = array<i64: 1, 1, 104, 128>}, {pipeline_mode = #tpu.pipeline_mode<synchronous>, transform_indices = @transform_4, window_bounds = array<i64: 27, 128, 128>}, {pipeline_mode = #tpu.pipeline_mode<synchronous>, transform_indices = @transform_5, window_bounds = array<i64: 1, 128>}, {transform_indices = @transform_6, window_bounds = array<i64: 1, 2, 104, 128>}]} {
    %c0 = arith.constant 0 : index
    %c0_0 = arith.constant 0 : index
    %0 = vector.load %arg7[%c0, %c0_0] : memref<1x128xf32, #tpu.memory_space<vmem>>, vector<1x128xf32>
    %cst = arith.constant 0.000000e+00 : bf16
    %1 = vector.broadcast %cst : bf16 to vector<11x128xbf16>
    %c0_1 = arith.constant 0 : index
    %c0_2 = arith.constant 0 : index
    %c0_3 = arith.constant 0 : index
    %c0_4 = arith.constant 0 : index
    %2 = vector.load %arg8[%c0_1, %c0_2, %c0_3, %c0_4] : memref<1x2x104x128xbf16, #tpu.memory_space<vmem>>, vector<1x1x11x128xbf16>
    %3 = vector.shape_cast %2 : vector<1x1x11x128xbf16> to vector<11x128xbf16>
    %4 = vector.shape_cast %1 : vector<11x128xbf16> to vector<1x1x11x128xbf16>
    tpu.vector_store %arg8[%c0_1, %c0_2, %c0_3, %c0_4], %4 {strides = array<i32>} : memref<1x2x104x128xbf16, #tpu.memory_space<vmem>>, vector<1x1x11x128xbf16>,
    %cst_5 = arith.constant 0.000000e+00 : bf16
    %5 = vector.broadcast %cst_5 : bf16 to vector<13x128xbf16>
    %c0_6 = arith.constant 0 : index
    %c0_7 = arith.constant 0 : index
    %c91 = arith.constant 91 : index
    %c0_8 = arith.constant 0 : index
    %6 = vector.load %arg8[%c0_6, %c0_7, %c91, %c0_8] : memref<1x2x104x128xbf16, #tpu.memory_space<vmem>>, vector<1x1x13x128xbf16>
    %7 = vector.shape_cast %6 : vector<1x1x13x128xbf16> to vector<13x128xbf16>
    %8 = vector.shape_cast %5 : vector<13x128xbf16> to vector<1x1x13x128xbf16>
    tpu.vector_store %arg8[%c0_6, %c0_7, %c91, %c0_8], %8 {strides = array<i32>} : memref<1x2x104x128xbf16, #tpu.memory_space<vmem>>, vector<1x1x13x128xbf16>,
    %c0_9 = arith.constant 0 : index
    %c0_10 = arith.constant 0 : index
    %c0_11 = arith.constant 0 : index
    %c0_12 = arith.constant 0 : index
    %9 = vector.load %arg2[%c0_9, %c0_10, %c0_11, %c0_12] : memref<1x1x104x128xbf16, #tpu.memory_space<vmem>>, vector<1x1x80x128xbf16>
    %10 = vector.shape_cast %9 : vector<1x1x80x128xbf16> to vector<80x128xbf16>
    %c0_13 = arith.constant 0 : index
    %c0_14 = arith.constant 0 : index
    %c0_15 = arith.constant 0 : index
    %11 = vector.load %arg6[%c0_13, %c0_14, %c0_15] : memref<27x128x128xbf16, #tpu.memory_space<vmem>>, vector<1x128x128xbf16>
    %12 = vector.shape_cast %11 : vector<1x128x128xbf16> to vector<128x128xbf16>
    %cst_16 = arith.constant dense<0.000000e+00> : vector<80x128xf32>
    %13 = tpu.matmul %10, %12, %cst_16 {dimension_numbers = #tpu.dot_dimension_numbers<[1], [0], [0], [1], [0, 0, 1, 1], [], []>} : vector<80x128xbf16>, vector<128x128xbf16>, vector<80x128xf32> -> vector<80x128xf32>
    %c0_17 = arith.constant 0 : index
    %c0_18 = arith.constant 0 : index
    %c1 = arith.constant 1 : index
    %c0_19 = arith.constant 0 : index
    %14 = vector.load %arg2[%c0_17, %c0_18, %c1, %c0_19] : memref<1x1x104x128xbf16, #tpu.memory_space<vmem>>, vector<1x1x80x128xbf16>
    %15 = vector.shape_cast %14 : vector<1x1x80x128xbf16> to vector<80x128xbf16>
    %c1_20 = arith.constant 1 : index
    %c0_21 = arith.constant 0 : index
    %c0_22 = arith.constant 0 : index
    %16 = vector.load %arg6[%c1_20, %c0_21, %c0_22] : memref<27x128x128xbf16, #tpu.memory_space<vmem>>, vector<1x128x128xbf16>
    %17 = vector.shape_cast %16 : vector<1x128x128xbf16> to vector<128x128xbf16>
    %cst_23 = arith.constant dense<0.000000e+00> : vector<80x128xf32>
    %18 = tpu.matmul %15, %17, %cst_23 {dimension_numbers = #tpu.dot_dimension_numbers<[1], [0], [0], [1], [0, 0, 1, 1], [], []>} : vector<80x128xbf16>, vector<128x128xbf16>, vector<80x128xf32> -> vector<80x128xf32>
    %19 = arith.addf %13, %18 : vector<80x128xf32>
    %c0_24 = arith.constant 0 : index
    %c0_25 = arith.constant 0 : index
    %c2 = arith.constant 2 : index
    %c0_26 = arith.constant 0 : index
    %20 = vector.load %arg2[%c0_24, %c0_25, %c2, %c0_26] : memref<1x1x104x128xbf16, #tpu.memory_space<vmem>>, vector<1x1x80x128xbf16>
    %21 = vector.shape_cast %20 : vector<1x1x80x128xbf16> to vector<80x128xbf16>
    %c2_27 = arith.constant 2 : index
    %c0_28 = arith.constant 0 : index
    %c0_29 = arith.constant 0 : index
    %22 = vector.load %arg6[%c2_27, %c0_28, %c0_29] : memref<27x128x128xbf16, #tpu.memory_space<vmem>>, vector<1x128x128xbf16>
    %23 = vector.shape_cast %22 : vector<1x128x128xbf16> to vector<128x128xbf16>
    %cst_30 = arith.constant dense<0.000000e+00> : vector<80x128xf32>
    %24 = tpu.matmul %21, %23, %cst_30 {dimension_numbers = #tpu.dot_dimension_numbers<[1], [0], [0], [1], [0, 0, 1, 1], [], []>} : vector<80x128xbf16>, vector<128x128xbf16>, vector<80x128xf32> -> vector<80x128xf32>
    %25 = arith.addf %19, %24 : vector<80x128xf32>
    %c0_31 = arith.constant 0 : index
    %c0_32 = arith.constant 0 : index
    %c10 = arith.constant 10 : index
    %c0_33 = arith.constant 0 : index
    %26 = vector.load %arg2[%c0_31, %c0_32, %c10, %c0_33] : memref<1x1x104x128xbf16, #tpu.memory_space<vmem>>, vector<1x1x80x128xbf16>
    %27 = vector.shape_cast %26 : vector<1x1x80x128xbf16> to vector<80x128xbf16>
    %c3 = arith.constant 3 : index
    %c0_34 = arith.constant 0 : index
    %c0_35 = arith.constant 0 : index
    %28 = vector.load %arg6[%c3, %c0_34, %c0_35] : memref<27x128x128xbf16, #tpu.memory_space<vmem>>, vector<1x128x128xbf16>
    %29 = vector.shape_cast %28 : vector<1x128x128xbf16> to vector<128x128xbf16>
    %cst_36 = arith.constant dense<0.000000e+00> : vector<80x128xf32>
    %30 = tpu.matmul %27, %29, %cst_36 {dimension_numbers = #tpu.dot_dimension_numbers<[1], [0], [0], [1], [0, 0, 1, 1], [], []>} : vector<80x128xbf16>, vector<128x128xbf16>, vector<80x128xf32> -> vector<80x128xf32>
    %31 = arith.addf %25, %30 : vector<80x128xf32>
    %c0_37 = arith.constant 0 : index
    %c0_38 = arith.constant 0 : index
    %c11 = arith.constant 11 : index
    %c0_39 = arith.constant 0 : index
    %32 = vector.load %arg2[%c0_37, %c0_38, %c11, %c0_39] : memref<1x1x104x128xbf16, #tpu.memory_space<vmem>>, vector<1x1x80x128xbf16>
    %33 = vector.shape_cast %32 : vector<1x1x80x128xbf16> to vector<80x128xbf16>
    %c4 = arith.constant 4 : index
    %c0_40 = arith.constant 0 : index
    %c0_41 = arith.constant 0 : index
    %34 = vector.load %arg6[%c4, %c0_40, %c0_41] : memref<27x128x128xbf16, #tpu.memory_space<vmem>>, vector<1x128x128xbf16>
    %35 = vector.shape_cast %34 : vector<1x128x128xbf16> to vector<128x128xbf16>
    %cst_42 = arith.constant dense<0.000000e+00> : vector<80x128xf32>
    %36 = tpu.matmul %33, %35, %cst_42 {dimension_numbers = #tpu.dot_dimension_numbers<[1], [0], [0], [1], [0, 0, 1, 1], [], []>} : vector<80x128xbf16>, vector<128x128xbf16>, vector<80x128xf32> -> vector<80x128xf32>
    %37 = arith.addf %31, %36 : vector<80x128xf32>
    %c0_43 = arith.constant 0 : index
    %c0_44 = arith.constant 0 : index
    %c12 = arith.constant 12 : index
    %c0_45 = arith.constant 0 : index
    %38 = vector.load %arg2[%c0_43, %c0_44, %c12, %c0_45] : memref<1x1x104x128xbf16, #tpu.memory_space<vmem>>, vector<1x1x80x128xbf16>
    %39 = vector.shape_cast %38 : vector<1x1x80x128xbf16> to vector<80x128xbf16>
    %c5 = arith.constant 5 : index
    %c0_46 = arith.constant 0 : index
    %c0_47 = arith.constant 0 : index
    %40 = vector.load %arg6[%c5, %c0_46, %c0_47] : memref<27x128x128xbf16, #tpu.memory_space<vmem>>, vector<1x128x128xbf16>
    %41 = vector.shape_cast %40 : vector<1x128x128xbf16> to vector<128x128xbf16>
    %cst_48 = arith.constant dense<0.000000e+00> : vector<80x128xf32>
    %42 = tpu.matmul %39, %41, %cst_48 {dimension_numbers = #tpu.dot_dimension_numbers<[1], [0], [0], [1], [0, 0, 1, 1], [], []>} : vector<80x128xbf16>, vector<128x128xbf16>, vector<80x128xf32> -> vector<80x128xf32>
    %43 = arith.addf %37, %42 : vector<80x128xf32>
    %c0_49 = arith.constant 0 : index
    %c0_50 = arith.constant 0 : index
    %c20 = arith.constant 20 : index
    %c0_51 = arith.constant 0 : index
    %44 = vector.load %arg2[%c0_49, %c0_50, %c20, %c0_51] : memref<1x1x104x128xbf16, #tpu.memory_space<vmem>>, vector<1x1x80x128xbf16>
    %45 = vector.shape_cast %44 : vector<1x1x80x128xbf16> to vector<80x128xbf16>
    %c6 = arith.constant 6 : index
    %c0_52 = arith.constant 0 : index
    %c0_53 = arith.constant 0 : index
    %46 = vector.load %arg6[%c6, %c0_52, %c0_53] : memref<27x128x128xbf16, #tpu.memory_space<vmem>>, vector<1x128x128xbf16>
    %47 = vector.shape_cast %46 : vector<1x128x128xbf16> to vector<128x128xbf16>
    %cst_54 = arith.constant dense<0.000000e+00> : vector<80x128xf32>
    %48 = tpu.matmul %45, %47, %cst_54 {dimension_numbers = #tpu.dot_dimension_numbers<[1], [0], [0], [1], [0, 0, 1, 1], [], []>} : vector<80x128xbf16>, vector<128x128xbf16>, vector<80x128xf32> -> vector<80x128xf32>
    %49 = arith.addf %43, %48 : vector<80x128xf32>
    %c0_55 = arith.constant 0 : index
    %c0_56 = arith.constant 0 : index
    %c21 = arith.constant 21 : index
    %c0_57 = arith.constant 0 : index
    %50 = vector.load %arg2[%c0_55, %c0_56, %c21, %c0_57] : memref<1x1x104x128xbf16, #tpu.memory_space<vmem>>, vector<1x1x80x128xbf16>
    %51 = vector.shape_cast %50 : vector<1x1x80x128xbf16> to vector<80x128xbf16>
    %c7 = arith.constant 7 : index
    %c0_58 = arith.constant 0 : index
    %c0_59 = arith.constant 0 : index
    %52 = vector.load %arg6[%c7, %c0_58, %c0_59] : memref<27x128x128xbf16, #tpu.memory_space<vmem>>, vector<1x128x128xbf16>
    %53 = vector.shape_cast %52 : vector<1x128x128xbf16> to vector<128x128xbf16>
    %cst_60 = arith.constant dense<0.000000e+00> : vector<80x128xf32>
    %54 = tpu.matmul %51, %53, %cst_60 {dimension_numbers = #tpu.dot_dimension_numbers<[1], [0], [0], [1], [0, 0, 1, 1], [], []>} : vector<80x128xbf16>, vector<128x128xbf16>, vector<80x128xf32> -> vector<80x128xf32>
    %55 = arith.addf %49, %54 : vector<80x128xf32>
    %c0_61 = arith.constant 0 : index
    %c0_62 = arith.constant 0 : index
    %c22 = arith.constant 22 : index
    %c0_63 = arith.constant 0 : index
    %56 = vector.load %arg2[%c0_61, %c0_62, %c22, %c0_63] : memref<1x1x104x128xbf16, #tpu.memory_space<vmem>>, vector<1x1x80x128xbf16>
    %57 = vector.shape_cast %56 : vector<1x1x80x128xbf16> to vector<80x128xbf16>
    %c8 = arith.constant 8 : index
    %c0_64 = arith.constant 0 : index
    %c0_65 = arith.constant 0 : index
    %58 = vector.load %arg6[%c8, %c0_64, %c0_65] : memref<27x128x128xbf16, #tpu.memory_space<vmem>>, vector<1x128x128xbf16>
    %59 = vector.shape_cast %58 : vector<1x128x128xbf16> to vector<128x128xbf16>
    %cst_66 = arith.constant dense<0.000000e+00> : vector<80x128xf32>
    %60 = tpu.matmul %57, %59, %cst_66 {dimension_numbers = #tpu.dot_dimension_numbers<[1], [0], [0], [1], [0, 0, 1, 1], [], []>} : vector<80x128xbf16>, vector<128x128xbf16>, vector<80x128xf32> -> vector<80x128xf32>
    %61 = arith.addf %55, %60 : vector<80x128xf32>
    %c0_i32 = arith.constant 0 : i32
    %62 = arith.cmpi sgt, %arg1, %c0_i32 : i32
    %63 = arith.extui %62 : i1 to i32
    %64 = arith.sitofp %63 : i32 to f32
    %65 = vector.broadcast %64 : f32 to vector<80x128xf32>
    %66 = arith.mulf %61, %65 : vector<80x128xf32>
    %c0_67 = arith.constant 0 : index
    %c0_68 = arith.constant 0 : index
    %c0_69 = arith.constant 0 : index
    %c0_70 = arith.constant 0 : index
    %67 = vector.load %arg3[%c0_67, %c0_68, %c0_69, %c0_70] : memref<1x1x104x128xbf16, #tpu.memory_space<vmem>>, vector<1x1x80x128xbf16>
    %68 = vector.shape_cast %67 : vector<1x1x80x128xbf16> to vector<80x128xbf16>
    %c9 = arith.constant 9 : index
    %c0_71 = arith.constant 0 : index
    %c0_72 = arith.constant 0 : index
    %69 = vector.load %arg6[%c9, %c0_71, %c0_72] : memref<27x128x128xbf16, #tpu.memory_space<vmem>>, vector<1x128x128xbf16>
    %70 = vector.shape_cast %69 : vector<1x128x128xbf16> to vector<128x128xbf16>
    %cst_73 = arith.constant dense<0.000000e+00> : vector<80x128xf32>
    %71 = tpu.matmul %68, %70, %cst_73 {dimension_numbers = #tpu.dot_dimension_numbers<[1], [0], [0], [1], [0, 0, 1, 1], [], []>} : vector<80x128xbf16>, vector<128x128xbf16>, vector<80x128xf32> -> vector<80x128xf32>
    %c0_74 = arith.constant 0 : index
    %c0_75 = arith.constant 0 : index
    %c1_76 = arith.constant 1 : index
    %c0_77 = arith.constant 0 : index
    %72 = vector.load %arg3[%c0_74, %c0_75, %c1_76, %c0_77] : memref<1x1x104x128xbf16, #tpu.memory_space<vmem>>, vector<1x1x80x128xbf16>
    %73 = vector.shape_cast %72 : vector<1x1x80x128xbf16> to vector<80x128xbf16>
    %c10_78 = arith.constant 10 : index
    %c0_79 = arith.constant 0 : index
    %c0_80 = arith.constant 0 : index
    %74 = vector.load %arg6[%c10_78, %c0_79, %c0_80] : memref<27x128x128xbf16, #tpu.memory_space<vmem>>, vector<1x128x128xbf16>
    %75 = vector.shape_cast %74 : vector<1x128x128xbf16> to vector<128x128xbf16>
    %cst_81 = arith.constant dense<0.000000e+00> : vector<80x128xf32>
    %76 = tpu.matmul %73, %75, %cst_81 {dimension_numbers = #tpu.dot_dimension_numbers<[1], [0], [0], [1], [0, 0, 1, 1], [], []>} : vector<80x128xbf16>, vector<128x128xbf16>, vector<80x128xf32> -> vector<80x128xf32>
    %77 = arith.addf %71, %76 : vector<80x128xf32>
    %c0_82 = arith.constant 0 : index
    %c0_83 = arith.constant 0 : index
    %c2_84 = arith.constant 2 : index
    %c0_85 = arith.constant 0 : index
    %78 = vector.load %arg3[%c0_82, %c0_83, %c2_84, %c0_85] : memref<1x1x104x128xbf16, #tpu.memory_space<vmem>>, vector<1x1x80x128xbf16>
    %79 = vector.shape_cast %78 : vector<1x1x80x128xbf16> to vector<80x128xbf16>
    %c11_86 = arith.constant 11 : index
    %c0_87 = arith.constant 0 : index
    %c0_88 = arith.constant 0 : index
    %80 = vector.load %arg6[%c11_86, %c0_87, %c0_88] : memref<27x128x128xbf16, #tpu.memory_space<vmem>>, vector<1x128x128xbf16>
    %81 = vector.shape_cast %80 : vector<1x128x128xbf16> to vector<128x128xbf16>
    %cst_89 = arith.constant dense<0.000000e+00> : vector<80x128xf32>
    %82 = tpu.matmul %79, %81, %cst_89 {dimension_numbers = #tpu.dot_dimension_numbers<[1], [0], [0], [1], [0, 0, 1, 1], [], []>} : vector<80x128xbf16>, vector<128x128xbf16>, vector<80x128xf32> -> vector<80x128xf32>
    %83 = arith.addf %77, %82 : vector<80x128xf32>
    %c0_90 = arith.constant 0 : index
    %c0_91 = arith.constant 0 : index
    %c10_92 = arith.constant 10 : index
    %c0_93 = arith.constant 0 : index
    %84 = vector.load %arg3[%c0_90, %c0_91, %c10_92, %c0_93] : memref<1x1x104x128xbf16, #tpu.memory_space<vmem>>, vector<1x1x80x128xbf16>
    %85 = vector.shape_cast %84 : vector<1x1x80x128xbf16> to vector<80x128xbf16>
    %c12_94 = arith.constant 12 : index
    %c0_95 = arith.constant 0 : index
    %c0_96 = arith.constant 0 : index
    %86 = vector.load %arg6[%c12_94, %c0_95, %c0_96] : memref<27x128x128xbf16, #tpu.memory_space<vmem>>, vector<1x128x128xbf16>
    %87 = vector.shape_cast %86 : vector<1x128x128xbf16> to vector<128x128xbf16>
    %cst_97 = arith.constant dense<0.000000e+00> : vector<80x128xf32>
    %88 = tpu.matmul %85, %87, %cst_97 {dimension_numbers = #tpu.dot_dimension_numbers<[1], [0], [0], [1], [0, 0, 1, 1], [], []>} : vector<80x128xbf16>, vector<128x128xbf16>, vector<80x128xf32> -> vector<80x128xf32>
    %89 = arith.addf %83, %88 : vector<80x128xf32>
    %c0_98 = arith.constant 0 : index
    %c0_99 = arith.constant 0 : index
    %c11_100 = arith.constant 11 : index
    %c0_101 = arith.constant 0 : index
    %90 = vector.load %arg3[%c0_98, %c0_99, %c11_100, %c0_101] : memref<1x1x104x128xbf16, #tpu.memory_space<vmem>>, vector<1x1x80x128xbf16>
    %91 = vector.shape_cast %90 : vector<1x1x80x128xbf16> to vector<80x128xbf16>
    %c13 = arith.constant 13 : index
    %c0_102 = arith.constant 0 : index
    %c0_103 = arith.constant 0 : index
    %92 = vector.load %arg6[%c13, %c0_102, %c0_103] : memref<27x128x128xbf16, #tpu.memory_space<vmem>>, vector<1x128x128xbf16>
    %93 = vector.shape_cast %92 : vector<1x128x128xbf16> to vector<128x128xbf16>
    %cst_104 = arith.constant dense<0.000000e+00> : vector<80x128xf32>
    %94 = tpu.matmul %91, %93, %cst_104 {dimension_numbers = #tpu.dot_dimension_numbers<[1], [0], [0], [1], [0, 0, 1, 1], [], []>} : vector<80x128xbf16>, vector<128x128xbf16>, vector<80x128xf32> -> vector<80x128xf32>
    %95 = arith.addf %89, %94 : vector<80x128xf32>
    %c0_105 = arith.constant 0 : index
    %c0_106 = arith.constant 0 : index
    %c12_107 = arith.constant 12 : index
    %c0_108 = arith.constant 0 : index
    %96 = vector.load %arg3[%c0_105, %c0_106, %c12_107, %c0_108] : memref<1x1x104x128xbf16, #tpu.memory_space<vmem>>, vector<1x1x80x128xbf16>
    %97 = vector.shape_cast %96 : vector<1x1x80x128xbf16> to vector<80x128xbf16>
    %c14 = arith.constant 14 : index
    %c0_109 = arith.constant 0 : index
    %c0_110 = arith.constant 0 : index
    %98 = vector.load %arg6[%c14, %c0_109, %c0_110] : memref<27x128x128xbf16, #tpu.memory_space<vmem>>, vector<1x128x128xbf16>
    %99 = vector.shape_cast %98 : vector<1x128x128xbf16> to vector<128x128xbf16>
    %cst_111 = arith.constant dense<0.000000e+00> : vector<80x128xf32>
    %100 = tpu.matmul %97, %99, %cst_111 {dimension_numbers = #tpu.dot_dimension_numbers<[1], [0], [0], [1], [0, 0, 1, 1], [], []>} : vector<80x128xbf16>, vector<128x128xbf16>, vector<80x128xf32> -> vector<80x128xf32>
    %101 = arith.addf %95, %100 : vector<80x128xf32>
    %c0_112 = arith.constant 0 : index
    %c0_113 = arith.constant 0 : index
    %c20_114 = arith.constant 20 : index
    %c0_115 = arith.constant 0 : index
    %102 = vector.load %arg3[%c0_112, %c0_113, %c20_114, %c0_115] : memref<1x1x104x128xbf16, #tpu.memory_space<vmem>>, vector<1x1x80x128xbf16>
    %103 = vector.shape_cast %102 : vector<1x1x80x128xbf16> to vector<80x128xbf16>
    %c15 = arith.constant 15 : index
    %c0_116 = arith.constant 0 : index
    %c0_117 = arith.constant 0 : index
    %104 = vector.load %arg6[%c15, %c0_116, %c0_117] : memref<27x128x128xbf16, #tpu.memory_space<vmem>>, vector<1x128x128xbf16>
    %105 = vector.shape_cast %104 : vector<1x128x128xbf16> to vector<128x128xbf16>
    %cst_118 = arith.constant dense<0.000000e+00> : vector<80x128xf32>
    %106 = tpu.matmul %103, %105, %cst_118 {dimension_numbers = #tpu.dot_dimension_numbers<[1], [0], [0], [1], [0, 0, 1, 1], [], []>} : vector<80x128xbf16>, vector<128x128xbf16>, vector<80x128xf32> -> vector<80x128xf32>
    %107 = arith.addf %101, %106 : vector<80x128xf32>
    %c0_119 = arith.constant 0 : index
    %c0_120 = arith.constant 0 : index
    %c21_121 = arith.constant 21 : index
    %c0_122 = arith.constant 0 : index
    %108 = vector.load %arg3[%c0_119, %c0_120, %c21_121, %c0_122] : memref<1x1x104x128xbf16, #tpu.memory_space<vmem>>, vector<1x1x80x128xbf16>
    %109 = vector.shape_cast %108 : vector<1x1x80x128xbf16> to vector<80x128xbf16>
    %c16 = arith.constant 16 : index
    %c0_123 = arith.constant 0 : index
    %c0_124 = arith.constant 0 : index
    %110 = vector.load %arg6[%c16, %c0_123, %c0_124] : memref<27x128x128xbf16, #tpu.memory_space<vmem>>, vector<1x128x128xbf16>
    %111 = vector.shape_cast %110 : vector<1x128x128xbf16> to vector<128x128xbf16>
    %cst_125 = arith.constant dense<0.000000e+00> : vector<80x128xf32>
    %112 = tpu.matmul %109, %111, %cst_125 {dimension_numbers = #tpu.dot_dimension_numbers<[1], [0], [0], [1], [0, 0, 1, 1], [], []>} : vector<80x128xbf16>, vector<128x128xbf16>, vector<80x128xf32> -> vector<80x128xf32>
    %113 = arith.addf %107, %112 : vector<80x128xf32>
    %c0_126 = arith.constant 0 : index
    %c0_127 = arith.constant 0 : index
    %c22_128 = arith.constant 22 : index
    %c0_129 = arith.constant 0 : index
    %114 = vector.load %arg3[%c0_126, %c0_127, %c22_128, %c0_129] : memref<1x1x104x128xbf16, #tpu.memory_space<vmem>>, vector<1x1x80x128xbf16>
    %115 = vector.shape_cast %114 : vector<1x1x80x128xbf16> to vector<80x128xbf16>
    %c17 = arith.constant 17 : index
    %c0_130 = arith.constant 0 : index
    %c0_131 = arith.constant 0 : index
    %116 = vector.load %arg6[%c17, %c0_130, %c0_131] : memref<27x128x128xbf16, #tpu.memory_space<vmem>>, vector<1x128x128xbf16>
    %117 = vector.shape_cast %116 : vector<1x128x128xbf16> to vector<128x128xbf16>
    %cst_132 = arith.constant dense<0.000000e+00> : vector<80x128xf32>
    %118 = tpu.matmul %115, %117, %cst_132 {dimension_numbers = #tpu.dot_dimension_numbers<[1], [0], [0], [1], [0, 0, 1, 1], [], []>} : vector<80x128xbf16>, vector<128x128xbf16>, vector<80x128xf32> -> vector<80x128xf32>
    %119 = arith.addf %113, %118 : vector<80x128xf32>
    %120 = arith.addf %66, %119 : vector<80x128xf32>
    %c0_133 = arith.constant 0 : index
    %c0_134 = arith.constant 0 : index
    %c0_135 = arith.constant 0 : index
    %c0_136 = arith.constant 0 : index
    %121 = vector.load %arg4[%c0_133, %c0_134, %c0_135, %c0_136] : memref<1x1x104x128xbf16, #tpu.memory_space<vmem>>, vector<1x1x80x128xbf16>
    %122 = vector.shape_cast %121 : vector<1x1x80x128xbf16> to vector<80x128xbf16>
    %c18 = arith.constant 18 : index
    %c0_137 = arith.constant 0 : index
    %c0_138 = arith.constant 0 : index
    %123 = vector.load %arg6[%c18, %c0_137, %c0_138] : memref<27x128x128xbf16, #tpu.memory_space<vmem>>, vector<1x128x128xbf16>
    %124 = vector.shape_cast %123 : vector<1x128x128xbf16> to vector<128x128xbf16>
    %cst_139 = arith.constant dense<0.000000e+00> : vector<80x128xf32>
    %125 = tpu.matmul %122, %124, %cst_139 {dimension_numbers = #tpu.dot_dimension_numbers<[1], [0], [0], [1], [0, 0, 1, 1], [], []>} : vector<80x128xbf16>, vector<128x128xbf16>, vector<80x128xf32> -> vector<80x128xf32>
    %c0_140 = arith.constant 0 : index
    %c0_141 = arith.constant 0 : index
    %c1_142 = arith.constant 1 : index
    %c0_143 = arith.constant 0 : index
    %126 = vector.load %arg4[%c0_140, %c0_141, %c1_142, %c0_143] : memref<1x1x104x128xbf16, #tpu.memory_space<vmem>>, vector<1x1x80x128xbf16>
    %127 = vector.shape_cast %126 : vector<1x1x80x128xbf16> to vector<80x128xbf16>
    %c19 = arith.constant 19 : index
    %c0_144 = arith.constant 0 : index
    %c0_145 = arith.constant 0 : index
    %128 = vector.load %arg6[%c19, %c0_144, %c0_145] : memref<27x128x128xbf16, #tpu.memory_space<vmem>>, vector<1x128x128xbf16>
    %129 = vector.shape_cast %128 : vector<1x128x128xbf16> to vector<128x128xbf16>
    %cst_146 = arith.constant dense<0.000000e+00> : vector<80x128xf32>
    %130 = tpu.matmul %127, %129, %cst_146 {dimension_numbers = #tpu.dot_dimension_numbers<[1], [0], [0], [1], [0, 0, 1, 1], [], []>} : vector<80x128xbf16>, vector<128x128xbf16>, vector<80x128xf32> -> vector<80x128xf32>
    %131 = arith.addf %125, %130 : vector<80x128xf32>
    %c0_147 = arith.constant 0 : index
    %c0_148 = arith.constant 0 : index
    %c2_149 = arith.constant 2 : index
    %c0_150 = arith.constant 0 : index
    %132 = vector.load %arg4[%c0_147, %c0_148, %c2_149, %c0_150] : memref<1x1x104x128xbf16, #tpu.memory_space<vmem>>, vector<1x1x80x128xbf16>
    %133 = vector.shape_cast %132 : vector<1x1x80x128xbf16> to vector<80x128xbf16>
    %c20_151 = arith.constant 20 : index
    %c0_152 = arith.constant 0 : index
    %c0_153 = arith.constant 0 : index
    %134 = vector.load %arg6[%c20_151, %c0_152, %c0_153] : memref<27x128x128xbf16, #tpu.memory_space<vmem>>, vector<1x128x128xbf16>
    %135 = vector.shape_cast %134 : vector<1x128x128xbf16> to vector<128x128xbf16>
    %cst_154 = arith.constant dense<0.000000e+00> : vector<80x128xf32>
    %136 = tpu.matmul %133, %135, %cst_154 {dimension_numbers = #tpu.dot_dimension_numbers<[1], [0], [0], [1], [0, 0, 1, 1], [], []>} : vector<80x128xbf16>, vector<128x128xbf16>, vector<80x128xf32> -> vector<80x128xf32>
    %137 = arith.addf %131, %136 : vector<80x128xf32>
    %c0_155 = arith.constant 0 : index
    %c0_156 = arith.constant 0 : index
    %c10_157 = arith.constant 10 : index
    %c0_158 = arith.constant 0 : index
    %138 = vector.load %arg4[%c0_155, %c0_156, %c10_157, %c0_158] : memref<1x1x104x128xbf16, #tpu.memory_space<vmem>>, vector<1x1x80x128xbf16>
    %139 = vector.shape_cast %138 : vector<1x1x80x128xbf16> to vector<80x128xbf16>
    %c21_159 = arith.constant 21 : index
    %c0_160 = arith.constant 0 : index
    %c0_161 = arith.constant 0 : index
    %140 = vector.load %arg6[%c21_159, %c0_160, %c0_161] : memref<27x128x128xbf16, #tpu.memory_space<vmem>>, vector<1x128x128xbf16>
    %141 = vector.shape_cast %140 : vector<1x128x128xbf16> to vector<128x128xbf16>
    %cst_162 = arith.constant dense<0.000000e+00> : vector<80x128xf32>
    %142 = tpu.matmul %139, %141, %cst_162 {dimension_numbers = #tpu.dot_dimension_numbers<[1], [0], [0], [1], [0, 0, 1, 1], [], []>} : vector<80x128xbf16>, vector<128x128xbf16>, vector<80x128xf32> -> vector<80x128xf32>
    %143 = arith.addf %137, %142 : vector<80x128xf32>
    %c0_163 = arith.constant 0 : index
    %c0_164 = arith.constant 0 : index
    %c11_165 = arith.constant 11 : index
    %c0_166 = arith.constant 0 : index
    %144 = vector.load %arg4[%c0_163, %c0_164, %c11_165, %c0_166] : memref<1x1x104x128xbf16, #tpu.memory_space<vmem>>, vector<1x1x80x128xbf16>
    %145 = vector.shape_cast %144 : vector<1x1x80x128xbf16> to vector<80x128xbf16>
    %c22_167 = arith.constant 22 : index
    %c0_168 = arith.constant 0 : index
    %c0_169 = arith.constant 0 : index
    %146 = vector.load %arg6[%c22_167, %c0_168, %c0_169] : memref<27x128x128xbf16, #tpu.memory_space<vmem>>, vector<1x128x128xbf16>
    %147 = vector.shape_cast %146 : vector<1x128x128xbf16> to vector<128x128xbf16>
    %cst_170 = arith.constant dense<0.000000e+00> : vector<80x128xf32>
    %148 = tpu.matmul %145, %147, %cst_170 {dimension_numbers = #tpu.dot_dimension_numbers<[1], [0], [0], [1], [0, 0, 1, 1], [], []>} : vector<80x128xbf16>, vector<128x128xbf16>, vector<80x128xf32> -> vector<80x128xf32>
    %149 = arith.addf %143, %148 : vector<80x128xf32>
    %c0_171 = arith.constant 0 : index
    %c0_172 = arith.constant 0 : index
    %c12_173 = arith.constant 12 : index
    %c0_174 = arith.constant 0 : index
    %150 = vector.load %arg4[%c0_171, %c0_172, %c12_173, %c0_174] : memref<1x1x104x128xbf16, #tpu.memory_space<vmem>>, vector<1x1x80x128xbf16>
    %151 = vector.shape_cast %150 : vector<1x1x80x128xbf16> to vector<80x128xbf16>
    %c23 = arith.constant 23 : index
    %c0_175 = arith.constant 0 : index
    %c0_176 = arith.constant 0 : index
    %152 = vector.load %arg6[%c23, %c0_175, %c0_176] : memref<27x128x128xbf16, #tpu.memory_space<vmem>>, vector<1x128x128xbf16>
    %153 = vector.shape_cast %152 : vector<1x128x128xbf16> to vector<128x128xbf16>
    %cst_177 = arith.constant dense<0.000000e+00> : vector<80x128xf32>
    %154 = tpu.matmul %151, %153, %cst_177 {dimension_numbers = #tpu.dot_dimension_numbers<[1], [0], [0], [1], [0, 0, 1, 1], [], []>} : vector<80x128xbf16>, vector<128x128xbf16>, vector<80x128xf32> -> vector<80x128xf32>
    %155 = arith.addf %149, %154 : vector<80x128xf32>
    %c0_178 = arith.constant 0 : index
    %c0_179 = arith.constant 0 : index
    %c20_180 = arith.constant 20 : index
    %c0_181 = arith.constant 0 : index
    %156 = vector.load %arg4[%c0_178, %c0_179, %c20_180, %c0_181] : memref<1x1x104x128xbf16, #tpu.memory_space<vmem>>, vector<1x1x80x128xbf16>
    %157 = vector.shape_cast %156 : vector<1x1x80x128xbf16> to vector<80x128xbf16>
    %c24 = arith.constant 24 : index
    %c0_182 = arith.constant 0 : index
    %c0_183 = arith.constant 0 : index
    %158 = vector.load %arg6[%c24, %c0_182, %c0_183] : memref<27x128x128xbf16, #tpu.memory_space<vmem>>, vector<1x128x128xbf16>
    %159 = vector.shape_cast %158 : vector<1x128x128xbf16> to vector<128x128xbf16>
    %cst_184 = arith.constant dense<0.000000e+00> : vector<80x128xf32>
    %160 = tpu.matmul %157, %159, %cst_184 {dimension_numbers = #tpu.dot_dimension_numbers<[1], [0], [0], [1], [0, 0, 1, 1], [], []>} : vector<80x128xbf16>, vector<128x128xbf16>, vector<80x128xf32> -> vector<80x128xf32>
    %161 = arith.addf %155, %160 : vector<80x128xf32>
    %c0_185 = arith.constant 0 : index
    %c0_186 = arith.constant 0 : index
    %c21_187 = arith.constant 21 : index
    %c0_188 = arith.constant 0 : index
    %162 = vector.load %arg4[%c0_185, %c0_186, %c21_187, %c0_188] : memref<1x1x104x128xbf16, #tpu.memory_space<vmem>>, vector<1x1x80x128xbf16>
    %163 = vector.shape_cast %162 : vector<1x1x80x128xbf16> to vector<80x128xbf16>
    %c25 = arith.constant 25 : index
    %c0_189 = arith.constant 0 : index
    %c0_190 = arith.constant 0 : index
    %164 = vector.load %arg6[%c25, %c0_189, %c0_190] : memref<27x128x128xbf16, #tpu.memory_space<vmem>>, vector<1x128x128xbf16>
    %165 = vector.shape_cast %164 : vector<1x128x128xbf16> to vector<128x128xbf16>
    %cst_191 = arith.constant dense<0.000000e+00> : vector<80x128xf32>
    %166 = tpu.matmul %163, %165, %cst_191 {dimension_numbers = #tpu.dot_dimension_numbers<[1], [0], [0], [1], [0, 0, 1, 1], [], []>} : vector<80x128xbf16>, vector<128x128xbf16>, vector<80x128xf32> -> vector<80x128xf32>
    %167 = arith.addf %161, %166 : vector<80x128xf32>
    %c0_192 = arith.constant 0 : index
    %c0_193 = arith.constant 0 : index
    %c22_194 = arith.constant 22 : index
    %c0_195 = arith.constant 0 : index
    %168 = vector.load %arg4[%c0_192, %c0_193, %c22_194, %c0_195] : memref<1x1x104x128xbf16, #tpu.memory_space<vmem>>, vector<1x1x80x128xbf16>
    %169 = vector.shape_cast %168 : vector<1x1x80x128xbf16> to vector<80x128xbf16>
    %c26 = arith.constant 26 : index
    %c0_196 = arith.constant 0 : index
    %c0_197 = arith.constant 0 : index
    %170 = vector.load %arg6[%c26, %c0_196, %c0_197] : memref<27x128x128xbf16, #tpu.memory_space<vmem>>, vector<1x128x128xbf16>
    %171 = vector.shape_cast %170 : vector<1x128x128xbf16> to vector<128x128xbf16>
    %cst_198 = arith.constant dense<0.000000e+00> : vector<80x128xf32>
    %172 = tpu.matmul %169, %171, %cst_198 {dimension_numbers = #tpu.dot_dimension_numbers<[1], [0], [0], [1], [0, 0, 1, 1], [], []>} : vector<80x128xbf16>, vector<128x128xbf16>, vector<80x128xf32> -> vector<80x128xf32>
    %173 = arith.addf %167, %172 : vector<80x128xf32>
    %174 = arith.addf %120, %173 : vector<80x128xf32>
    %175 = vector.broadcast %0 : vector<1x128xf32> to vector<80x128xf32>
    %176 = arith.addf %174, %175 : vector<80x128xf32>
    %177 = tpu.iota {dimensions = array<i32: 0>} : vector<80x128xi32>
    %c11_i32 = arith.constant 11 : i32
    %178 = vector.broadcast %c11_i32 : i32 to vector<80x128xi32>
    %179 = arith.addi %178, %177 : vector<80x128xi32>
    %c10_i32 = arith.constant 10 : i32
    %c0_i32_199 = arith.constant 0 : i32
    %180 = arith.cmpi eq, %c10_i32, %c0_i32_199 : i32
    %c1_i32 = arith.constant 1 : i32
    %181 = arith.select %180, %c1_i32, %c10_i32 : i32
    %182 = vector.broadcast %181 : i32 to vector<80x128xi32>
    %183 = arith.remsi %179, %182 : vector<80x128xi32>
    %c0_i32_200 = arith.constant 0 : i32
    %184 = vector.broadcast %c0_i32_200 : i32 to vector<80x128xi32>
    %185 = arith.cmpi ne, %183, %184 : vector<80x128xi32>
    %c0_i32_201 = arith.constant 0 : i32
    %186 = vector.broadcast %c0_i32_201 : i32 to vector<80x128xi32>
    %187 = arith.cmpi slt, %183, %186 : vector<80x128xi32>
    %c0_i32_202 = arith.constant 0 : i32
    %188 = arith.cmpi slt, %181, %c0_i32_202 : i32
    %189 = vector.broadcast %188 : i1 to vector<80x128xi1>
    %190 = vector.broadcast %189 : vector<80x128xi1> to vector<80x128xi1>
    %191 = arith.xori %187, %190 : vector<80x128xi1>
    %192 = arith.andi %191, %185 : vector<80x128xi1>
    %193 = vector.broadcast %181 : i32 to vector<80x128xi32>
    %194 = arith.addi %183, %193 : vector<80x128xi32>
    %195 = arith.select %192, %194, %183 : vector<80x128xi1>, vector<80x128xi32>
    %c1_i32_203 = arith.constant 1 : i32
    %196 = vector.broadcast %c1_i32_203 : i32 to vector<80x128xi32>
    %197 = arith.cmpi sge, %195, %196 : vector<80x128xi32>
    %c8_i32 = arith.constant 8 : i32
    %198 = vector.broadcast %c8_i32 : i32 to vector<80x128xi32>
    %199 = arith.cmpi sle, %195, %198 : vector<80x128xi32>
    %200 = arith.andi %197, %199 : vector<80x128xi1>
    %cst_204 = arith.constant 0.000000e+00 : f32
    %201 = vector.broadcast %cst_204 : f32 to vector<80x128xf32>
    %202 = arith.select %200, %176, %201 : vector<80x128xi1>, vector<80x128xf32>
    %203 = arith.truncf %202 : vector<80x128xf32> to vector<80x128xbf16>
    %c0_205 = arith.constant 0 : index
    %c0_206 = arith.constant 0 : index
    %c11_207 = arith.constant 11 : index
    %c0_208 = arith.constant 0 : index
    %204 = vector.load %arg8[%c0_205, %c0_206, %c11_207, %c0_208] : memref<1x2x104x128xbf16, #tpu.memory_space<vmem>>, vector<1x1x80x128xbf16>
    %205 = vector.shape_cast %204 : vector<1x1x80x128xbf16> to vector<80x128xbf16>
    %206 = vector.shape_cast %203 : vector<80x128xbf16> to vector<1x1x80x128xbf16>
    tpu.vector_store %arg8[%c0_205, %c0_206, %c11_207, %c0_208], %206 {strides = array<i32>} : memref<1x2x104x128xbf16, #tpu.memory_space<vmem>>, vector<1x1x80x128xbf16>,
    %cst_209 = arith.constant 0.000000e+00 : bf16
    %207 = vector.broadcast %cst_209 : bf16 to vector<11x128xbf16>
    %c0_210 = arith.constant 0 : index
    %c1_211 = arith.constant 1 : index
    %c0_212 = arith.constant 0 : index
    %c0_213 = arith.constant 0 : index
    %208 = vector.load %arg8[%c0_210, %c1_211, %c0_212, %c0_213] : memref<1x2x104x128xbf16, #tpu.memory_space<vmem>>, vector<1x1x11x128xbf16>
    %209 = vector.shape_cast %208 : vector<1x1x11x128xbf16> to vector<11x128xbf16>
    %210 = vector.shape_cast %207 : vector<11x128xbf16> to vector<1x1x11x128xbf16>
    tpu.vector_store %arg8[%c0_210, %c1_211, %c0_212, %c0_213], %210 {strides = array<i32>} : memref<1x2x104x128xbf16, #tpu.memory_space<vmem>>, vector<1x1x11x128xbf16>,
    %cst_214 = arith.constant 0.000000e+00 : bf16
    %211 = vector.broadcast %cst_214 : bf16 to vector<13x128xbf16>
    %c0_215 = arith.constant 0 : index
    %c1_216 = arith.constant 1 : index
    %c91_217 = arith.constant 91 : index
    %c0_218 = arith.constant 0 : index
    %212 = vector.load %arg8[%c0_215, %c1_216, %c91_217, %c0_218] : memref<1x2x104x128xbf16, #tpu.memory_space<vmem>>, vector<1x1x13x128xbf16>
    %213 = vector.shape_cast %212 : vector<1x1x13x128xbf16> to vector<13x128xbf16>
    %214 = vector.shape_cast %211 : vector<13x128xbf16> to vector<1x1x13x128xbf16>
    tpu.vector_store %arg8[%c0_215, %c1_216, %c91_217, %c0_218], %214 {strides = array<i32>} : memref<1x2x104x128xbf16, #tpu.memory_space<vmem>>, vector<1x1x13x128xbf16>,
    %c0_219 = arith.constant 0 : index
    %c0_220 = arith.constant 0 : index
    %c0_221 = arith.constant 0 : index
    %c0_222 = arith.constant 0 : index
    %215 = vector.load %arg3[%c0_219, %c0_220, %c0_221, %c0_222] : memref<1x1x104x128xbf16, #tpu.memory_space<vmem>>, vector<1x1x80x128xbf16>
    %216 = vector.shape_cast %215 : vector<1x1x80x128xbf16> to vector<80x128xbf16>
    %c0_223 = arith.constant 0 : index
    %c0_224 = arith.constant 0 : index
    %c0_225 = arith.constant 0 : index
    %217 = vector.load %arg6[%c0_223, %c0_224, %c0_225] : memref<27x128x128xbf16, #tpu.memory_space<vmem>>, vector<1x128x128xbf16>
    %218 = vector.shape_cast %217 : vector<1x128x128xbf16> to vector<128x128xbf16>
    %cst_226 = arith.constant dense<0.000000e+00> : vector<80x128xf32>
    %219 = tpu.matmul %216, %218, %cst_226 {dimension_numbers = #tpu.dot_dimension_numbers<[1], [0], [0], [1], [0, 0, 1, 1], [], []>} : vector<80x128xbf16>, vector<128x128xbf16>, vector<80x128xf32> -> vector<80x128xf32>
    %c0_227 = arith.constant 0 : index
    %c0_228 = arith.constant 0 : index
    %c1_229 = arith.constant 1 : index
    %c0_230 = arith.constant 0 : index
    %220 = vector.load %arg3[%c0_227, %c0_228, %c1_229, %c0_230] : memref<1x1x104x128xbf16, #tpu.memory_space<vmem>>, vector<1x1x80x128xbf16>
    %221 = vector.shape_cast %220 : vector<1x1x80x128xbf16> to vector<80x128xbf16>
    %c1_231 = arith.constant 1 : index
    %c0_232 = arith.constant 0 : index
    %c0_233 = arith.constant 0 : index
    %222 = vector.load %arg6[%c1_231, %c0_232, %c0_233] : memref<27x128x128xbf16, #tpu.memory_space<vmem>>, vector<1x128x128xbf16>
    %223 = vector.shape_cast %222 : vector<1x128x128xbf16> to vector<128x128xbf16>
    %cst_234 = arith.constant dense<0.000000e+00> : vector<80x128xf32>
    %224 = tpu.matmul %221, %223, %cst_234 {dimension_numbers = #tpu.dot_dimension_numbers<[1], [0], [0], [1], [0, 0, 1, 1], [], []>} : vector<80x128xbf16>, vector<128x128xbf16>, vector<80x128xf32> -> vector<80x128xf32>
    %225 = arith.addf %219, %224 : vector<80x128xf32>
    %c0_235 = arith.constant 0 : index
    %c0_236 = arith.constant 0 : index
    %c2_237 = arith.constant 2 : index
    %c0_238 = arith.constant 0 : index
    %226 = vector.load %arg3[%c0_235, %c0_236, %c2_237, %c0_238] : memref<1x1x104x128xbf16, #tpu.memory_space<vmem>>, vector<1x1x80x128xbf16>
    %227 = vector.shape_cast %226 : vector<1x1x80x128xbf16> to vector<80x128xbf16>
    %c2_239 = arith.constant 2 : index
    %c0_240 = arith.constant 0 : index
    %c0_241 = arith.constant 0 : index
    %228 = vector.load %arg6[%c2_239, %c0_240, %c0_241] : memref<27x128x128xbf16, #tpu.memory_space<vmem>>, vector<1x128x128xbf16>
    %229 = vector.shape_cast %228 : vector<1x128x128xbf16> to vector<128x128xbf16>
    %cst_242 = arith.constant dense<0.000000e+00> : vector<80x128xf32>
    %230 = tpu.matmul %227, %229, %cst_242 {dimension_numbers = #tpu.dot_dimension_numbers<[1], [0], [0], [1], [0, 0, 1, 1], [], []>} : vector<80x128xbf16>, vector<128x128xbf16>, vector<80x128xf32> -> vector<80x128xf32>
    %231 = arith.addf %225, %230 : vector<80x128xf32>
    %c0_243 = arith.constant 0 : index
    %c0_244 = arith.constant 0 : index
    %c10_245 = arith.constant 10 : index
    %c0_246 = arith.constant 0 : index
    %232 = vector.load %arg3[%c0_243, %c0_244, %c10_245, %c0_246] : memref<1x1x104x128xbf16, #tpu.memory_space<vmem>>, vector<1x1x80x128xbf16>
    %233 = vector.shape_cast %232 : vector<1x1x80x128xbf16> to vector<80x128xbf16>
    %c3_247 = arith.constant 3 : index
    %c0_248 = arith.constant 0 : index
    %c0_249 = arith.constant 0 : index
    %234 = vector.load %arg6[%c3_247, %c0_248, %c0_249] : memref<27x128x128xbf16, #tpu.memory_space<vmem>>, vector<1x128x128xbf16>
    %235 = vector.shape_cast %234 : vector<1x128x128xbf16> to vector<128x128xbf16>
    %cst_250 = arith.constant dense<0.000000e+00> : vector<80x128xf32>
    %236 = tpu.matmul %233, %235, %cst_250 {dimension_numbers = #tpu.dot_dimension_numbers<[1], [0], [0], [1], [0, 0, 1, 1], [], []>} : vector<80x128xbf16>, vector<128x128xbf16>, vector<80x128xf32> -> vector<80x128xf32>
    %237 = arith.addf %231, %236 : vector<80x128xf32>
    %c0_251 = arith.constant 0 : index
    %c0_252 = arith.constant 0 : index
    %c11_253 = arith.constant 11 : index
    %c0_254 = arith.constant 0 : index
    %238 = vector.load %arg3[%c0_251, %c0_252, %c11_253, %c0_254] : memref<1x1x104x128xbf16, #tpu.memory_space<vmem>>, vector<1x1x80x128xbf16>
    %239 = vector.shape_cast %238 : vector<1x1x80x128xbf16> to vector<80x128xbf16>
    %c4_255 = arith.constant 4 : index
    %c0_256 = arith.constant 0 : index
    %c0_257 = arith.constant 0 : index
    %240 = vector.load %arg6[%c4_255, %c0_256, %c0_257] : memref<27x128x128xbf16, #tpu.memory_space<vmem>>, vector<1x128x128xbf16>
    %241 = vector.shape_cast %240 : vector<1x128x128xbf16> to vector<128x128xbf16>
    %cst_258 = arith.constant dense<0.000000e+00> : vector<80x128xf32>
    %242 = tpu.matmul %239, %241, %cst_258 {dimension_numbers = #tpu.dot_dimension_numbers<[1], [0], [0], [1], [0, 0, 1, 1], [], []>} : vector<80x128xbf16>, vector<128x128xbf16>, vector<80x128xf32> -> vector<80x128xf32>
    %243 = arith.addf %237, %242 : vector<80x128xf32>
    %c0_259 = arith.constant 0 : index
    %c0_260 = arith.constant 0 : index
    %c12_261 = arith.constant 12 : index
    %c0_262 = arith.constant 0 : index
    %244 = vector.load %arg3[%c0_259, %c0_260, %c12_261, %c0_262] : memref<1x1x104x128xbf16, #tpu.memory_space<vmem>>, vector<1x1x80x128xbf16>
    %245 = vector.shape_cast %244 : vector<1x1x80x128xbf16> to vector<80x128xbf16>
    %c5_263 = arith.constant 5 : index
    %c0_264 = arith.constant 0 : index
    %c0_265 = arith.constant 0 : index
    %246 = vector.load %arg6[%c5_263, %c0_264, %c0_265] : memref<27x128x128xbf16, #tpu.memory_space<vmem>>, vector<1x128x128xbf16>
    %247 = vector.shape_cast %246 : vector<1x128x128xbf16> to vector<128x128xbf16>
    %cst_266 = arith.constant dense<0.000000e+00> : vector<80x128xf32>
    %248 = tpu.matmul %245, %247, %cst_266 {dimension_numbers = #tpu.dot_dimension_numbers<[1], [0], [0], [1], [0, 0, 1, 1], [], []>} : vector<80x128xbf16>, vector<128x128xbf16>, vector<80x128xf32> -> vector<80x128xf32>
    %249 = arith.addf %243, %248 : vector<80x128xf32>
    %c0_267 = arith.constant 0 : index
    %c0_268 = arith.constant 0 : index
    %c20_269 = arith.constant 20 : index
    %c0_270 = arith.constant 0 : index
    %250 = vector.load %arg3[%c0_267, %c0_268, %c20_269, %c0_270] : memref<1x1x104x128xbf16, #tpu.memory_space<vmem>>, vector<1x1x80x128xbf16>
    %251 = vector.shape_cast %250 : vector<1x1x80x128xbf16> to vector<80x128xbf16>
    %c6_271 = arith.constant 6 : index
    %c0_272 = arith.constant 0 : index
    %c0_273 = arith.constant 0 : index
    %252 = vector.load %arg6[%c6_271, %c0_272, %c0_273] : memref<27x128x128xbf16, #tpu.memory_space<vmem>>, vector<1x128x128xbf16>
    %253 = vector.shape_cast %252 : vector<1x128x128xbf16> to vector<128x128xbf16>
    %cst_274 = arith.constant dense<0.000000e+00> : vector<80x128xf32>
    %254 = tpu.matmul %251, %253, %cst_274 {dimension_numbers = #tpu.dot_dimension_numbers<[1], [0], [0], [1], [0, 0, 1, 1], [], []>} : vector<80x128xbf16>, vector<128x128xbf16>, vector<80x128xf32> -> vector<80x128xf32>
    %255 = arith.addf %249, %254 : vector<80x128xf32>
    %c0_275 = arith.constant 0 : index
    %c0_276 = arith.constant 0 : index
    %c21_277 = arith.constant 21 : index
    %c0_278 = arith.constant 0 : index
    %256 = vector.load %arg3[%c0_275, %c0_276, %c21_277, %c0_278] : memref<1x1x104x128xbf16, #tpu.memory_space<vmem>>, vector<1x1x80x128xbf16>
    %257 = vector.shape_cast %256 : vector<1x1x80x128xbf16> to vector<80x128xbf16>
    %c7_279 = arith.constant 7 : index
    %c0_280 = arith.constant 0 : index
    %c0_281 = arith.constant 0 : index
    %258 = vector.load %arg6[%c7_279, %c0_280, %c0_281] : memref<27x128x128xbf16, #tpu.memory_space<vmem>>, vector<1x128x128xbf16>
    %259 = vector.shape_cast %258 : vector<1x128x128xbf16> to vector<128x128xbf16>
    %cst_282 = arith.constant dense<0.000000e+00> : vector<80x128xf32>
    %260 = tpu.matmul %257, %259, %cst_282 {dimension_numbers = #tpu.dot_dimension_numbers<[1], [0], [0], [1], [0, 0, 1, 1], [], []>} : vector<80x128xbf16>, vector<128x128xbf16>, vector<80x128xf32> -> vector<80x128xf32>
    %261 = arith.addf %255, %260 : vector<80x128xf32>
    %c0_283 = arith.constant 0 : index
    %c0_284 = arith.constant 0 : index
    %c22_285 = arith.constant 22 : index
    %c0_286 = arith.constant 0 : index
    %262 = vector.load %arg3[%c0_283, %c0_284, %c22_285, %c0_286] : memref<1x1x104x128xbf16, #tpu.memory_space<vmem>>, vector<1x1x80x128xbf16>
    %263 = vector.shape_cast %262 : vector<1x1x80x128xbf16> to vector<80x128xbf16>
    %c8_287 = arith.constant 8 : index
    %c0_288 = arith.constant 0 : index
    %c0_289 = arith.constant 0 : index
    %264 = vector.load %arg6[%c8_287, %c0_288, %c0_289] : memref<27x128x128xbf16, #tpu.memory_space<vmem>>, vector<1x128x128xbf16>
    %265 = vector.shape_cast %264 : vector<1x128x128xbf16> to vector<128x128xbf16>
    %cst_290 = arith.constant dense<0.000000e+00> : vector<80x128xf32>
    %266 = tpu.matmul %263, %265, %cst_290 {dimension_numbers = #tpu.dot_dimension_numbers<[1], [0], [0], [1], [0, 0, 1, 1], [], []>} : vector<80x128xbf16>, vector<128x128xbf16>, vector<80x128xf32> -> vector<80x128xf32>
    %267 = arith.addf %261, %266 : vector<80x128xf32>
    %c0_291 = arith.constant 0 : index
    %c0_292 = arith.constant 0 : index
    %c0_293 = arith.constant 0 : index
    %c0_294 = arith.constant 0 : index
    %268 = vector.load %arg4[%c0_291, %c0_292, %c0_293, %c0_294] : memref<1x1x104x128xbf16, #tpu.memory_space<vmem>>, vector<1x1x80x128xbf16>
    %269 = vector.shape_cast %268 : vector<1x1x80x128xbf16> to vector<80x128xbf16>
    %c9_295 = arith.constant 9 : index
    %c0_296 = arith.constant 0 : index
    %c0_297 = arith.constant 0 : index
    %270 = vector.load %arg6[%c9_295, %c0_296, %c0_297] : memref<27x128x128xbf16, #tpu.memory_space<vmem>>, vector<1x128x128xbf16>
    %271 = vector.shape_cast %270 : vector<1x128x128xbf16> to vector<128x128xbf16>
    %cst_298 = arith.constant dense<0.000000e+00> : vector<80x128xf32>
    %272 = tpu.matmul %269, %271, %cst_298 {dimension_numbers = #tpu.dot_dimension_numbers<[1], [0], [0], [1], [0, 0, 1, 1], [], []>} : vector<80x128xbf16>, vector<128x128xbf16>, vector<80x128xf32> -> vector<80x128xf32>
    %c0_299 = arith.constant 0 : index
    %c0_300 = arith.constant 0 : index
    %c1_301 = arith.constant 1 : index
    %c0_302 = arith.constant 0 : index
    %273 = vector.load %arg4[%c0_299, %c0_300, %c1_301, %c0_302] : memref<1x1x104x128xbf16, #tpu.memory_space<vmem>>, vector<1x1x80x128xbf16>
    %274 = vector.shape_cast %273 : vector<1x1x80x128xbf16> to vector<80x128xbf16>
    %c10_303 = arith.constant 10 : index
    %c0_304 = arith.constant 0 : index
    %c0_305 = arith.constant 0 : index
    %275 = vector.load %arg6[%c10_303, %c0_304, %c0_305] : memref<27x128x128xbf16, #tpu.memory_space<vmem>>, vector<1x128x128xbf16>
    %276 = vector.shape_cast %275 : vector<1x128x128xbf16> to vector<128x128xbf16>
    %cst_306 = arith.constant dense<0.000000e+00> : vector<80x128xf32>
    %277 = tpu.matmul %274, %276, %cst_306 {dimension_numbers = #tpu.dot_dimension_numbers<[1], [0], [0], [1], [0, 0, 1, 1], [], []>} : vector<80x128xbf16>, vector<128x128xbf16>, vector<80x128xf32> -> vector<80x128xf32>
    %278 = arith.addf %272, %277 : vector<80x128xf32>
    %c0_307 = arith.constant 0 : index
    %c0_308 = arith.constant 0 : index
    %c2_309 = arith.constant 2 : index
    %c0_310 = arith.constant 0 : index
    %279 = vector.load %arg4[%c0_307, %c0_308, %c2_309, %c0_310] : memref<1x1x104x128xbf16, #tpu.memory_space<vmem>>, vector<1x1x80x128xbf16>
    %280 = vector.shape_cast %279 : vector<1x1x80x128xbf16> to vector<80x128xbf16>
    %c11_311 = arith.constant 11 : index
    %c0_312 = arith.constant 0 : index
    %c0_313 = arith.constant 0 : index
    %281 = vector.load %arg6[%c11_311, %c0_312, %c0_313] : memref<27x128x128xbf16, #tpu.memory_space<vmem>>, vector<1x128x128xbf16>
    %282 = vector.shape_cast %281 : vector<1x128x128xbf16> to vector<128x128xbf16>
    %cst_314 = arith.constant dense<0.000000e+00> : vector<80x128xf32>
    %283 = tpu.matmul %280, %282, %cst_314 {dimension_numbers = #tpu.dot_dimension_numbers<[1], [0], [0], [1], [0, 0, 1, 1], [], []>} : vector<80x128xbf16>, vector<128x128xbf16>, vector<80x128xf32> -> vector<80x128xf32>
    %284 = arith.addf %278, %283 : vector<80x128xf32>
    %c0_315 = arith.constant 0 : index
    %c0_316 = arith.constant 0 : index
    %c10_317 = arith.constant 10 : index
    %c0_318 = arith.constant 0 : index
    %285 = vector.load %arg4[%c0_315, %c0_316, %c10_317, %c0_318] : memref<1x1x104x128xbf16, #tpu.memory_space<vmem>>, vector<1x1x80x128xbf16>
    %286 = vector.shape_cast %285 : vector<1x1x80x128xbf16> to vector<80x128xbf16>
    %c12_319 = arith.constant 12 : index
    %c0_320 = arith.constant 0 : index
    %c0_321 = arith.constant 0 : index
    %287 = vector.load %arg6[%c12_319, %c0_320, %c0_321] : memref<27x128x128xbf16, #tpu.memory_space<vmem>>, vector<1x128x128xbf16>
    %288 = vector.shape_cast %287 : vector<1x128x128xbf16> to vector<128x128xbf16>
    %cst_322 = arith.constant dense<0.000000e+00> : vector<80x128xf32>
    %289 = tpu.matmul %286, %288, %cst_322 {dimension_numbers = #tpu.dot_dimension_numbers<[1], [0], [0], [1], [0, 0, 1, 1], [], []>} : vector<80x128xbf16>, vector<128x128xbf16>, vector<80x128xf32> -> vector<80x128xf32>
    %290 = arith.addf %284, %289 : vector<80x128xf32>
    %c0_323 = arith.constant 0 : index
    %c0_324 = arith.constant 0 : index
    %c11_325 = arith.constant 11 : index
    %c0_326 = arith.constant 0 : index
    %291 = vector.load %arg4[%c0_323, %c0_324, %c11_325, %c0_326] : memref<1x1x104x128xbf16, #tpu.memory_space<vmem>>, vector<1x1x80x128xbf16>
    %292 = vector.shape_cast %291 : vector<1x1x80x128xbf16> to vector<80x128xbf16>
    %c13_327 = arith.constant 13 : index
    %c0_328 = arith.constant 0 : index
    %c0_329 = arith.constant 0 : index
    %293 = vector.load %arg6[%c13_327, %c0_328, %c0_329] : memref<27x128x128xbf16, #tpu.memory_space<vmem>>, vector<1x128x128xbf16>
    %294 = vector.shape_cast %293 : vector<1x128x128xbf16> to vector<128x128xbf16>
    %cst_330 = arith.constant dense<0.000000e+00> : vector<80x128xf32>
    %295 = tpu.matmul %292, %294, %cst_330 {dimension_numbers = #tpu.dot_dimension_numbers<[1], [0], [0], [1], [0, 0, 1, 1], [], []>} : vector<80x128xbf16>, vector<128x128xbf16>, vector<80x128xf32> -> vector<80x128xf32>
    %296 = arith.addf %290, %295 : vector<80x128xf32>
    %c0_331 = arith.constant 0 : index
    %c0_332 = arith.constant 0 : index
    %c12_333 = arith.constant 12 : index
    %c0_334 = arith.constant 0 : index
    %297 = vector.load %arg4[%c0_331, %c0_332, %c12_333, %c0_334] : memref<1x1x104x128xbf16, #tpu.memory_space<vmem>>, vector<1x1x80x128xbf16>
    %298 = vector.shape_cast %297 : vector<1x1x80x128xbf16> to vector<80x128xbf16>
    %c14_335 = arith.constant 14 : index
    %c0_336 = arith.constant 0 : index
    %c0_337 = arith.constant 0 : index
    %299 = vector.load %arg6[%c14_335, %c0_336, %c0_337] : memref<27x128x128xbf16, #tpu.memory_space<vmem>>, vector<1x128x128xbf16>
    %300 = vector.shape_cast %299 : vector<1x128x128xbf16> to vector<128x128xbf16>
    %cst_338 = arith.constant dense<0.000000e+00> : vector<80x128xf32>
    %301 = tpu.matmul %298, %300, %cst_338 {dimension_numbers = #tpu.dot_dimension_numbers<[1], [0], [0], [1], [0, 0, 1, 1], [], []>} : vector<80x128xbf16>, vector<128x128xbf16>, vector<80x128xf32> -> vector<80x128xf32>
    %302 = arith.addf %296, %301 : vector<80x128xf32>
    %c0_339 = arith.constant 0 : index
    %c0_340 = arith.constant 0 : index
    %c20_341 = arith.constant 20 : index
    %c0_342 = arith.constant 0 : index
    %303 = vector.load %arg4[%c0_339, %c0_340, %c20_341, %c0_342] : memref<1x1x104x128xbf16, #tpu.memory_space<vmem>>, vector<1x1x80x128xbf16>
    %304 = vector.shape_cast %303 : vector<1x1x80x128xbf16> to vector<80x128xbf16>
    %c15_343 = arith.constant 15 : index
    %c0_344 = arith.constant 0 : index
    %c0_345 = arith.constant 0 : index
    %305 = vector.load %arg6[%c15_343, %c0_344, %c0_345] : memref<27x128x128xbf16, #tpu.memory_space<vmem>>, vector<1x128x128xbf16>
    %306 = vector.shape_cast %305 : vector<1x128x128xbf16> to vector<128x128xbf16>
    %cst_346 = arith.constant dense<0.000000e+00> : vector<80x128xf32>
    %307 = tpu.matmul %304, %306, %cst_346 {dimension_numbers = #tpu.dot_dimension_numbers<[1], [0], [0], [1], [0, 0, 1, 1], [], []>} : vector<80x128xbf16>, vector<128x128xbf16>, vector<80x128xf32> -> vector<80x128xf32>
    %308 = arith.addf %302, %307 : vector<80x128xf32>
    %c0_347 = arith.constant 0 : index
    %c0_348 = arith.constant 0 : index
    %c21_349 = arith.constant 21 : index
    %c0_350 = arith.constant 0 : index
    %309 = vector.load %arg4[%c0_347, %c0_348, %c21_349, %c0_350] : memref<1x1x104x128xbf16, #tpu.memory_space<vmem>>, vector<1x1x80x128xbf16>
    %310 = vector.shape_cast %309 : vector<1x1x80x128xbf16> to vector<80x128xbf16>
    %c16_351 = arith.constant 16 : index
    %c0_352 = arith.constant 0 : index
    %c0_353 = arith.constant 0 : index
    %311 = vector.load %arg6[%c16_351, %c0_352, %c0_353] : memref<27x128x128xbf16, #tpu.memory_space<vmem>>, vector<1x128x128xbf16>
    %312 = vector.shape_cast %311 : vector<1x128x128xbf16> to vector<128x128xbf16>
    %cst_354 = arith.constant dense<0.000000e+00> : vector<80x128xf32>
    %313 = tpu.matmul %310, %312, %cst_354 {dimension_numbers = #tpu.dot_dimension_numbers<[1], [0], [0], [1], [0, 0, 1, 1], [], []>} : vector<80x128xbf16>, vector<128x128xbf16>, vector<80x128xf32> -> vector<80x128xf32>
    %314 = arith.addf %308, %313 : vector<80x128xf32>
    %c0_355 = arith.constant 0 : index
    %c0_356 = arith.constant 0 : index
    %c22_357 = arith.constant 22 : index
    %c0_358 = arith.constant 0 : index
    %315 = vector.load %arg4[%c0_355, %c0_356, %c22_357, %c0_358] : memref<1x1x104x128xbf16, #tpu.memory_space<vmem>>, vector<1x1x80x128xbf16>
    %316 = vector.shape_cast %315 : vector<1x1x80x128xbf16> to vector<80x128xbf16>
    %c17_359 = arith.constant 17 : index
    %c0_360 = arith.constant 0 : index
    %c0_361 = arith.constant 0 : index
    %317 = vector.load %arg6[%c17_359, %c0_360, %c0_361] : memref<27x128x128xbf16, #tpu.memory_space<vmem>>, vector<1x128x128xbf16>
    %318 = vector.shape_cast %317 : vector<1x128x128xbf16> to vector<128x128xbf16>
    %cst_362 = arith.constant dense<0.000000e+00> : vector<80x128xf32>
    %319 = tpu.matmul %316, %318, %cst_362 {dimension_numbers = #tpu.dot_dimension_numbers<[1], [0], [0], [1], [0, 0, 1, 1], [], []>} : vector<80x128xbf16>, vector<128x128xbf16>, vector<80x128xf32> -> vector<80x128xf32>
    %320 = arith.addf %314, %319 : vector<80x128xf32>
    %321 = arith.addf %267, %320 : vector<80x128xf32>
    %c0_363 = arith.constant 0 : index
    %c0_364 = arith.constant 0 : index
    %c0_365 = arith.constant 0 : index
    %c0_366 = arith.constant 0 : index
    %322 = vector.load %arg5[%c0_363, %c0_364, %c0_365, %c0_366] : memref<1x1x104x128xbf16, #tpu.memory_space<vmem>>, vector<1x1x80x128xbf16>
    %323 = vector.shape_cast %322 : vector<1x1x80x128xbf16> to vector<80x128xbf16>
    %c18_367 = arith.constant 18 : index
    %c0_368 = arith.constant 0 : index
    %c0_369 = arith.constant 0 : index
    %324 = vector.load %arg6[%c18_367, %c0_368, %c0_369] : memref<27x128x128xbf16, #tpu.memory_space<vmem>>, vector<1x128x128xbf16>
    %325 = vector.shape_cast %324 : vector<1x128x128xbf16> to vector<128x128xbf16>
    %cst_370 = arith.constant dense<0.000000e+00> : vector<80x128xf32>
    %326 = tpu.matmul %323, %325, %cst_370 {dimension_numbers = #tpu.dot_dimension_numbers<[1], [0], [0], [1], [0, 0, 1, 1], [], []>} : vector<80x128xbf16>, vector<128x128xbf16>, vector<80x128xf32> -> vector<80x128xf32>
    %c0_371 = arith.constant 0 : index
    %c0_372 = arith.constant 0 : index
    %c1_373 = arith.constant 1 : index
    %c0_374 = arith.constant 0 : index
    %327 = vector.load %arg5[%c0_371, %c0_372, %c1_373, %c0_374] : memref<1x1x104x128xbf16, #tpu.memory_space<vmem>>, vector<1x1x80x128xbf16>
    %328 = vector.shape_cast %327 : vector<1x1x80x128xbf16> to vector<80x128xbf16>
    %c19_375 = arith.constant 19 : index
    %c0_376 = arith.constant 0 : index
    %c0_377 = arith.constant 0 : index
    %329 = vector.load %arg6[%c19_375, %c0_376, %c0_377] : memref<27x128x128xbf16, #tpu.memory_space<vmem>>, vector<1x128x128xbf16>
    %330 = vector.shape_cast %329 : vector<1x128x128xbf16> to vector<128x128xbf16>
    %cst_378 = arith.constant dense<0.000000e+00> : vector<80x128xf32>
    %331 = tpu.matmul %328, %330, %cst_378 {dimension_numbers = #tpu.dot_dimension_numbers<[1], [0], [0], [1], [0, 0, 1, 1], [], []>} : vector<80x128xbf16>, vector<128x128xbf16>, vector<80x128xf32> -> vector<80x128xf32>
    %332 = arith.addf %326, %331 : vector<80x128xf32>
    %c0_379 = arith.constant 0 : index
    %c0_380 = arith.constant 0 : index
    %c2_381 = arith.constant 2 : index
    %c0_382 = arith.constant 0 : index
    %333 = vector.load %arg5[%c0_379, %c0_380, %c2_381, %c0_382] : memref<1x1x104x128xbf16, #tpu.memory_space<vmem>>, vector<1x1x80x128xbf16>
    %334 = vector.shape_cast %333 : vector<1x1x80x128xbf16> to vector<80x128xbf16>
    %c20_383 = arith.constant 20 : index
    %c0_384 = arith.constant 0 : index
    %c0_385 = arith.constant 0 : index
    %335 = vector.load %arg6[%c20_383, %c0_384, %c0_385] : memref<27x128x128xbf16, #tpu.memory_space<vmem>>, vector<1x128x128xbf16>
    %336 = vector.shape_cast %335 : vector<1x128x128xbf16> to vector<128x128xbf16>
    %cst_386 = arith.constant dense<0.000000e+00> : vector<80x128xf32>
    %337 = tpu.matmul %334, %336, %cst_386 {dimension_numbers = #tpu.dot_dimension_numbers<[1], [0], [0], [1], [0, 0, 1, 1], [], []>} : vector<80x128xbf16>, vector<128x128xbf16>, vector<80x128xf32> -> vector<80x128xf32>
    %338 = arith.addf %332, %337 : vector<80x128xf32>
    %c0_387 = arith.constant 0 : index
    %c0_388 = arith.constant 0 : index
    %c10_389 = arith.constant 10 : index
    %c0_390 = arith.constant 0 : index
    %339 = vector.load %arg5[%c0_387, %c0_388, %c10_389, %c0_390] : memref<1x1x104x128xbf16, #tpu.memory_space<vmem>>, vector<1x1x80x128xbf16>
    %340 = vector.shape_cast %339 : vector<1x1x80x128xbf16> to vector<80x128xbf16>
    %c21_391 = arith.constant 21 : index
    %c0_392 = arith.constant 0 : index
    %c0_393 = arith.constant 0 : index
    %341 = vector.load %arg6[%c21_391, %c0_392, %c0_393] : memref<27x128x128xbf16, #tpu.memory_space<vmem>>, vector<1x128x128xbf16>
    %342 = vector.shape_cast %341 : vector<1x128x128xbf16> to vector<128x128xbf16>
    %cst_394 = arith.constant dense<0.000000e+00> : vector<80x128xf32>
    %343 = tpu.matmul %340, %342, %cst_394 {dimension_numbers = #tpu.dot_dimension_numbers<[1], [0], [0], [1], [0, 0, 1, 1], [], []>} : vector<80x128xbf16>, vector<128x128xbf16>, vector<80x128xf32> -> vector<80x128xf32>
    %344 = arith.addf %338, %343 : vector<80x128xf32>
    %c0_395 = arith.constant 0 : index
    %c0_396 = arith.constant 0 : index
    %c11_397 = arith.constant 11 : index
    %c0_398 = arith.constant 0 : index
    %345 = vector.load %arg5[%c0_395, %c0_396, %c11_397, %c0_398] : memref<1x1x104x128xbf16, #tpu.memory_space<vmem>>, vector<1x1x80x128xbf16>
    %346 = vector.shape_cast %345 : vector<1x1x80x128xbf16> to vector<80x128xbf16>
    %c22_399 = arith.constant 22 : index
    %c0_400 = arith.constant 0 : index
    %c0_401 = arith.constant 0 : index
    %347 = vector.load %arg6[%c22_399, %c0_400, %c0_401] : memref<27x128x128xbf16, #tpu.memory_space<vmem>>, vector<1x128x128xbf16>
    %348 = vector.shape_cast %347 : vector<1x128x128xbf16> to vector<128x128xbf16>
    %cst_402 = arith.constant dense<0.000000e+00> : vector<80x128xf32>
    %349 = tpu.matmul %346, %348, %cst_402 {dimension_numbers = #tpu.dot_dimension_numbers<[1], [0], [0], [1], [0, 0, 1, 1], [], []>} : vector<80x128xbf16>, vector<128x128xbf16>, vector<80x128xf32> -> vector<80x128xf32>
    %350 = arith.addf %344, %349 : vector<80x128xf32>
    %c0_403 = arith.constant 0 : index
    %c0_404 = arith.constant 0 : index
    %c12_405 = arith.constant 12 : index
    %c0_406 = arith.constant 0 : index
    %351 = vector.load %arg5[%c0_403, %c0_404, %c12_405, %c0_406] : memref<1x1x104x128xbf16, #tpu.memory_space<vmem>>, vector<1x1x80x128xbf16>
    %352 = vector.shape_cast %351 : vector<1x1x80x128xbf16> to vector<80x128xbf16>
    %c23_407 = arith.constant 23 : index
    %c0_408 = arith.constant 0 : index
    %c0_409 = arith.constant 0 : index
    %353 = vector.load %arg6[%c23_407, %c0_408, %c0_409] : memref<27x128x128xbf16, #tpu.memory_space<vmem>>, vector<1x128x128xbf16>
    %354 = vector.shape_cast %353 : vector<1x128x128xbf16> to vector<128x128xbf16>
    %cst_410 = arith.constant dense<0.000000e+00> : vector<80x128xf32>
    %355 = tpu.matmul %352, %354, %cst_410 {dimension_numbers = #tpu.dot_dimension_numbers<[1], [0], [0], [1], [0, 0, 1, 1], [], []>} : vector<80x128xbf16>, vector<128x128xbf16>, vector<80x128xf32> -> vector<80x128xf32>
    %356 = arith.addf %350, %355 : vector<80x128xf32>
    %c0_411 = arith.constant 0 : index
    %c0_412 = arith.constant 0 : index
    %c20_413 = arith.constant 20 : index
    %c0_414 = arith.constant 0 : index
    %357 = vector.load %arg5[%c0_411, %c0_412, %c20_413, %c0_414] : memref<1x1x104x128xbf16, #tpu.memory_space<vmem>>, vector<1x1x80x128xbf16>
    %358 = vector.shape_cast %357 : vector<1x1x80x128xbf16> to vector<80x128xbf16>
    %c24_415 = arith.constant 24 : index
    %c0_416 = arith.constant 0 : index
    %c0_417 = arith.constant 0 : index
    %359 = vector.load %arg6[%c24_415, %c0_416, %c0_417] : memref<27x128x128xbf16, #tpu.memory_space<vmem>>, vector<1x128x128xbf16>
    %360 = vector.shape_cast %359 : vector<1x128x128xbf16> to vector<128x128xbf16>
    %cst_418 = arith.constant dense<0.000000e+00> : vector<80x128xf32>
    %361 = tpu.matmul %358, %360, %cst_418 {dimension_numbers = #tpu.dot_dimension_numbers<[1], [0], [0], [1], [0, 0, 1, 1], [], []>} : vector<80x128xbf16>, vector<128x128xbf16>, vector<80x128xf32> -> vector<80x128xf32>
    %362 = arith.addf %356, %361 : vector<80x128xf32>
    %c0_419 = arith.constant 0 : index
    %c0_420 = arith.constant 0 : index
    %c21_421 = arith.constant 21 : index
    %c0_422 = arith.constant 0 : index
    %363 = vector.load %arg5[%c0_419, %c0_420, %c21_421, %c0_422] : memref<1x1x104x128xbf16, #tpu.memory_space<vmem>>, vector<1x1x80x128xbf16>
    %364 = vector.shape_cast %363 : vector<1x1x80x128xbf16> to vector<80x128xbf16>
    %c25_423 = arith.constant 25 : index
    %c0_424 = arith.constant 0 : index
    %c0_425 = arith.constant 0 : index
    %365 = vector.load %arg6[%c25_423, %c0_424, %c0_425] : memref<27x128x128xbf16, #tpu.memory_space<vmem>>, vector<1x128x128xbf16>
    %366 = vector.shape_cast %365 : vector<1x128x128xbf16> to vector<128x128xbf16>
    %cst_426 = arith.constant dense<0.000000e+00> : vector<80x128xf32>
    %367 = tpu.matmul %364, %366, %cst_426 {dimension_numbers = #tpu.dot_dimension_numbers<[1], [0], [0], [1], [0, 0, 1, 1], [], []>} : vector<80x128xbf16>, vector<128x128xbf16>, vector<80x128xf32> -> vector<80x128xf32>
    %368 = arith.addf %362, %367 : vector<80x128xf32>
    %c0_427 = arith.constant 0 : index
    %c0_428 = arith.constant 0 : index
    %c22_429 = arith.constant 22 : index
    %c0_430 = arith.constant 0 : index
    %369 = vector.load %arg5[%c0_427, %c0_428, %c22_429, %c0_430] : memref<1x1x104x128xbf16, #tpu.memory_space<vmem>>, vector<1x1x80x128xbf16>
    %370 = vector.shape_cast %369 : vector<1x1x80x128xbf16> to vector<80x128xbf16>
    %c26_431 = arith.constant 26 : index
    %c0_432 = arith.constant 0 : index
    %c0_433 = arith.constant 0 : index
    %371 = vector.load %arg6[%c26_431, %c0_432, %c0_433] : memref<27x128x128xbf16, #tpu.memory_space<vmem>>, vector<1x128x128xbf16>
    %372 = vector.shape_cast %371 : vector<1x128x128xbf16> to vector<128x128xbf16>
    %cst_434 = arith.constant dense<0.000000e+00> : vector<80x128xf32>
    %373 = tpu.matmul %370, %372, %cst_434 {dimension_numbers = #tpu.dot_dimension_numbers<[1], [0], [0], [1], [0, 0, 1, 1], [], []>} : vector<80x128xbf16>, vector<128x128xbf16>, vector<80x128xf32> -> vector<80x128xf32>
    %374 = arith.addf %368, %373 : vector<80x128xf32>
    %c1_i32_435 = arith.constant 1 : i32
    %375 = arith.cmpi slt, %arg1, %c1_i32_435 : i32
    %376 = arith.extui %375 : i1 to i32
    %377 = arith.sitofp %376 : i32 to f32
    %378 = vector.broadcast %377 : f32 to vector<80x128xf32>
    %379 = arith.mulf %374, %378 : vector<80x128xf32>
    %380 = arith.addf %321, %379 : vector<80x128xf32>
    %381 = vector.broadcast %0 : vector<1x128xf32> to vector<80x128xf32>
    %382 = arith.addf %380, %381 : vector<80x128xf32>
    %383 = tpu.iota {dimensions = array<i32: 0>} : vector<80x128xi32>
    %c11_i32_436 = arith.constant 11 : i32
    %384 = vector.broadcast %c11_i32_436 : i32 to vector<80x128xi32>
    %385 = arith.addi %384, %383 : vector<80x128xi32>
    %c10_i32_437 = arith.constant 10 : i32
    %c0_i32_438 = arith.constant 0 : i32
    %386 = arith.cmpi eq, %c10_i32_437, %c0_i32_438 : i32
    %c1_i32_439 = arith.constant 1 : i32
    %387 = arith.select %386, %c1_i32_439, %c10_i32_437 : i32
    %388 = vector.broadcast %387 : i32 to vector<80x128xi32>
    %389 = arith.remsi %385, %388 : vector<80x128xi32>
    %c0_i32_440 = arith.constant 0 : i32
    %390 = vector.broadcast %c0_i32_440 : i32 to vector<80x128xi32>
    %391 = arith.cmpi ne, %389, %390 : vector<80x128xi32>
    %c0_i32_441 = arith.constant 0 : i32
    %392 = vector.broadcast %c0_i32_441 : i32 to vector<80x128xi32>
    %393 = arith.cmpi slt, %389, %392 : vector<80x128xi32>
    %c0_i32_442 = arith.constant 0 : i32
    %394 = arith.cmpi slt, %387, %c0_i32_442 : i32
    %395 = vector.broadcast %394 : i1 to vector<80x128xi1>
    %396 = vector.broadcast %395 : vector<80x128xi1> to vector<80x128xi1>
    %397 = arith.xori %393, %396 : vector<80x128xi1>
    %398 = arith.andi %397, %391 : vector<80x128xi1>
    %399 = vector.broadcast %387 : i32 to vector<80x128xi32>
    %400 = arith.addi %389, %399 : vector<80x128xi32>
    %401 = arith.select %398, %400, %389 : vector<80x128xi1>, vector<80x128xi32>
    %c1_i32_443 = arith.constant 1 : i32
    %402 = vector.broadcast %c1_i32_443 : i32 to vector<80x128xi32>
    %403 = arith.cmpi sge, %401, %402 : vector<80x128xi32>
    %c8_i32_444 = arith.constant 8 : i32
    %404 = vector.broadcast %c8_i32_444 : i32 to vector<80x128xi32>
    %405 = arith.cmpi sle, %401, %404 : vector<80x128xi32>
    %406 = arith.andi %403, %405 : vector<80x128xi1>
    %cst_445 = arith.constant 0.000000e+00 : f32
    %407 = vector.broadcast %cst_445 : f32 to vector<80x128xf32>
    %408 = arith.select %406, %382, %407 : vector<80x128xi1>, vector<80x128xf32>
    %409 = arith.truncf %408 : vector<80x128xf32> to vector<80x128xbf16>
    %c0_446 = arith.constant 0 : index
    %c1_447 = arith.constant 1 : index
    %c11_448 = arith.constant 11 : index
    %c0_449 = arith.constant 0 : index
    %410 = vector.load %arg8[%c0_446, %c1_447, %c11_448, %c0_449] : memref<1x2x104x128xbf16, #tpu.memory_space<vmem>>, vector<1x1x80x128xbf16>
    %411 = vector.shape_cast %410 : vector<1x1x80x128xbf16> to vector<80x128xbf16>
    %412 = vector.shape_cast %409 : vector<80x128xbf16> to vector<1x1x80x128xbf16>
    tpu.vector_store %arg8[%c0_446, %c1_447, %c11_448, %c0_449], %412 {strides = array<i32>} : memref<1x2x104x128xbf16, #tpu.memory_space<vmem>>, vector<1x1x80x128xbf16>,
    return
  }
  func.func @transform_0(%arg0: i32, %arg1: i32) -> (i32, i32, i32, i32) {
    %c2_i32 = arith.constant 2 : i32
    %0 = arith.muli %arg1, %c2_i32 : i32
    %c0_i32 = arith.constant 0 : i32
    %1 = arith.addi %0, %c0_i32 : i32
    %c1_i32 = arith.constant 1 : i32
    %2 = arith.subi %1, %c1_i32 : i32
    %c0_i32_0 = arith.constant 0 : i32
    %3 = arith.maxsi %2, %c0_i32_0 : i32
    %c3_i32 = arith.constant 3 : i32
    %4 = arith.minsi %3, %c3_i32 : i32
    %c0_i32_1 = arith.constant 0 : i32
    %c0_i32_2 = arith.constant 0 : i32
    %c0_i32_3 = arith.constant 0 : i32
    return %arg0, %4, %c0_i32_1, %c0_i32_2 : i32, i32, i32, i32
  }
  func.func @transform_1(%arg0: i32, %arg1: i32) -> (i32, i32, i32, i32) {
    %c2_i32 = arith.constant 2 : i32
    %0 = arith.muli %arg1, %c2_i32 : i32
    %c1_i32 = arith.constant 1 : i32
    %1 = arith.addi %0, %c1_i32 : i32
    %c1_i32_0 = arith.constant 1 : i32
    %2 = arith.subi %1, %c1_i32_0 : i32
    %c0_i32 = arith.constant 0 : i32
    %3 = arith.maxsi %2, %c0_i32 : i32
    %c3_i32 = arith.constant 3 : i32
    %4 = arith.minsi %3, %c3_i32 : i32
    %c0_i32_1 = arith.constant 0 : i32
    %c0_i32_2 = arith.constant 0 : i32
    %c0_i32_3 = arith.constant 0 : i32
    return %arg0, %4, %c0_i32_1, %c0_i32_2 : i32, i32, i32, i32
  }
  func.func @transform_2(%arg0: i32, %arg1: i32) -> (i32, i32, i32, i32) {
    %c2_i32 = arith.constant 2 : i32
    %0 = arith.muli %arg1, %c2_i32 : i32
    %c2_i32_0 = arith.constant 2 : i32
    %1 = arith.addi %0, %c2_i32_0 : i32
    %c1_i32 = arith.constant 1 : i32
    %2 = arith.subi %1, %c1_i32 : i32
    %c0_i32 = arith.constant 0 : i32
    %3 = arith.maxsi %2, %c0_i32 : i32
    %c3_i32 = arith.constant 3 : i32
    %4 = arith.minsi %3, %c3_i32 : i32
    %c0_i32_1 = arith.constant 0 : i32
    %c0_i32_2 = arith.constant 0 : i32
    %c0_i32_3 = arith.constant 0 : i32
    return %arg0, %4, %c0_i32_1, %c0_i32_2 : i32, i32, i32, i32
  }
  func.func @transform_3(%arg0: i32, %arg1: i32) -> (i32, i32, i32, i32) {
    %c2_i32 = arith.constant 2 : i32
    %0 = arith.muli %arg1, %c2_i32 : i32
    %c3_i32 = arith.constant 3 : i32
    %1 = arith.addi %0, %c3_i32 : i32
    %c1_i32 = arith.constant 1 : i32
    %2 = arith.subi %1, %c1_i32 : i32
    %c0_i32 = arith.constant 0 : i32
    %3 = arith.maxsi %2, %c0_i32 : i32
    %c3_i32_0 = arith.constant 3 : i32
    %4 = arith.minsi %3, %c3_i32_0 : i32
    %c0_i32_1 = arith.constant 0 : i32
    %c0_i32_2 = arith.constant 0 : i32
    %c0_i32_3 = arith.constant 0 : i32
    return %arg0, %4, %c0_i32_1, %c0_i32_2 : i32, i32, i32, i32
  }
  func.func @transform_4(%arg0: i32, %arg1: i32) -> (i32, i32, i32) {
    %c0_i32 = arith.constant 0 : i32
    %c0_i32_0 = arith.constant 0 : i32
    %c0_i32_1 = arith.constant 0 : i32
    %c0_i32_2 = arith.constant 0 : i32
    return %c0_i32, %c0_i32_0, %c0_i32_1 : i32, i32, i32
  }
  func.func @transform_5(%arg0: i32, %arg1: i32) -> (i32, i32) {
    %c0_i32 = arith.constant 0 : i32
    %c0_i32_0 = arith.constant 0 : i32
    %c0_i32_1 = arith.constant 0 : i32
    return %c0_i32, %c0_i32_0 : i32, i32
  }
  func.func @transform_6(%arg0: i32, %arg1: i32) -> (i32, i32, i32, i32) {
    %c0_i32 = arith.constant 0 : i32
    %c0_i32_0 = arith.constant 0 : i32
    %c0_i32_1 = arith.constant 0 : i32
    return %arg0, %arg1, %c0_i32, %c0_i32_0 : i32, i32, i32, i32
  }
}

</mosaic_0001>

<bundles_post_ra>
// kernel: tpu_custom_call.1
= control target key start
LH: loop header
LB: loop body
LE: loop exit
PB: predicated region body
PF: predicated region fallthrough
CT: control target
= control target key end

     0   :  { %s20753_s0 = inlined_call_operand.hbm [shape: bf16[1,4,104,128], index: 0, kind: input, shape index: {}]   ;;  %s20754_s1 = inlined_call_operand.hbm [shape: bf16[1,4,104,128], index: 1, kind: input, shape index: {}]   ;;  %s20755_s2 = inlined_call_operand.hbm [shape: bf16[1,4,104,128], index: 2, kind: input, shape index: {}]   ;;  %s20756_s3 = inlined_call_operand.hbm [shape: bf16[1,4,104,128], index: 3, kind: input, shape index: {}]   ;;  %s20757_s4 = inlined_call_operand.hbm [shape: bf16[27,128,128], index: 4, kind: input, shape index: {}]   ;;  %s20758_s5 = inlined_call_operand.vmem [shape: f32[1,128], index: 5, kind: input, shape index: {}]   ;;  %s20759_s6 = inlined_call_operand.hbm [shape: bf16[1,4,104,128], index: 6, kind: output, shape index: {}]  }
   0x1   :  { %20815 = sst [smem:[#allocation150_spill]] %s20753_s0 }
   0x2   :  { %20816 = sst [smem:[#allocation151_spill]] %s20754_s1 }
   0x3   :  { %20817 = sst [smem:[#allocation152_spill]] %s20755_s2 }
   0x4   :  { %20818 = sst [smem:[#allocation153_spill]] %s20756_s3 }
   0x5   :  { %20819 = sst [smem:[#allocation154_spill]] %s20757_s4 }
   0x6   :  { %20820 = sst [smem:[#allocation155_spill]] %s20758_s5 }
   0x7   :  { %20821 = sst [smem:[#allocation156_spill]] %s20759_s6 }
   0x8   :  { %11 = vsyncpa [#allocation3], 0 }
   0x9   :  { %13 = vsyncpa [#allocation3 + $0x1], 0 }
   0xa   :  { %14 = vsyncpa [#allocation6], 0 }
   0xb   :  { %16 = vsyncpa [#allocation6 + $0x1], 0 }
   0xc   :  { %17 = vsyncpa [#allocation9], 0 }
   0xd   :  { %19 = vsyncpa [#allocation9 + $0x1], 0 }
   0xe   :  { %20 = vsyncpa [#allocation4], 0 }
   0xf   :  { %22 = vsyncpa [#allocation4 + $0x1], 0  ;;  %s16495_s21 = smov 0   ;;  %s16497_s22 = smov 0  }
  0x10   :  { %s16499_s23 = smov 0   ;;  %s16501_s24 = smov 0  }
  0x11   :  { %s16503_s25 = smov 0   ;;  %s16505_s26 = smov 0  }
  0x12   :  { %s16507_s27 = smov 0   ;;  %s16509_s28 = smov 0  }
  0x13   :  { %s16511_s29 = smov 0   ;;  %s16513_s30 = smov 0  }
  0x14   :  { %s16515_s7 = smov 0   ;;  %s16517_s8 = smov 0  }
  0x15   :  { %s16519_s9 = smov 0   ;;  %s16521_s10 = smov 0  }
  0x16   :  { %s16523_s11 = smov 0   ;;  %s16525_s12 = smov 0  }
  0x17   :  { %s16527_s13 = smov 0   ;;  %s16529_s14 = smov 0  }
  0x18 LB: > { %20822 = sst [smem:[#allocation18_spill]] %s16377_s21  ;;  %s16586_s15 = sadd.s32 4294967295, %s16445_s14   ;;  %s16445_s14 = sphi %s16529_s14, %s28_s14   ;;  %s16441_s13 = sphi %s16527_s13, %s21342_s13   ;;  %s16437_s12 = sphi %s16525_s12, %s21341_s12   ;;  %s16433_s11 = sphi %s16523_s11, %s21355_s11   ;;  %s16429_s10 = sphi %s16521_s10, %s21354_s10   ;;  %s16425_s9 = sphi %s16519_s9, %s21353_s9   ;;  %s16421_s8 = sphi %s16517_s8, %s21352_s8   ;;  %s16417_s7 = sphi %s16515_s7, %s21351_s7   ;;  %s16413_s30 = sphi %s16513_s30, %s21350_s30   ;;  %s16409_s29 = sphi %s16511_s29, %s21349_s29   ;;  %s16405_s28 = sphi %s16509_s28, %s21348_s28   ;;  %s16401_s27 = sphi %s16507_s27, %s21347_s27   ;;  %s16397_s26 = sphi %s16505_s26, %s21346_s26   ;;  %s16393_s25 = sphi %s16503_s25, %s21336_s25   ;;  %s16389_s24 = sphi %s16501_s24, %s21345_s24   ;;  %s16385_s23 = sphi %s16499_s23, %s21344_s23   ;;  %s16381_s22 = sphi %s16497_s22, %s21343_s22   ;;  %s16377_s21 = sphi %s16495_s21, %s21334_s21  }
  0x19   : > { %20823 = sst [smem:[#allocation19_spill]] %s16381_s22  ;;  %s11547_s16 = sadd.s32 4294967294, %s16445_s14  }
  0x1a   : > { %20824 = sst [smem:[#allocation20_spill]] %s16389_s24  ;;  %p20770_p0 = scmp.eq.s32.totalorder %s16586_s15, 0 }
  0x1b   : > { %20825 = sst [smem:[#allocation21_spill]] %s16393_s25  ;;  %p259_p1 = scmp.ne.s32.totalorder %s16385_s23, %s16381_s22 }
  0x1c   : > { %20826 = sst [smem:[#allocation22_spill]] %s16397_s26  ;;  %p260_p2 = scmp.eq.s32.totalorder %s16586_s15, 1 }
  0x1d   : > { %20827 = sst [smem:[#allocation23_spill]] %s16433_s11  ;;  %p265_p3 = scmp.ne.s32.totalorder %s16381_s22, %s16377_s21 }
  0x1e   : > { %20828 = sst [smem:[#allocation24_spill]] %s16437_s12  ;;  %p266_p4 = scmp.eq.s32.totalorder %s11547_s16, 1 }
  0x1f   : > { %20829 = sst [smem:[#allocation25_spill]] %s16441_s13  ;;  %p16596_p5 = por %p260_p2, %p259_p1 }
  0x20   : > { %p11596_p6 = scmp.ge.s32.totalorder %s16445_s14, 1  ;;  %p16601_p7 = por %p266_p4, %p265_p3 }
  0x21   : > { %s20830_s18 = scalar_select %p16596_p5, 1, 0 }
  0x22   : > { %s20832_s19 = scalar_select %p16601_p7, 1, 0 }
  0x23   : > { %20831 = sst [smem:[#allocation26_spill]] %s20830_s18  ;;  %p273_p8 = scmp.lt.s32.totalorder %s16445_s14, 3 }
  0x24   : > { %20833 = sst [smem:[#allocation27_spill]] %s20832_s19  ;;  %s16447_s17 = smov [#allocation10]  }
  0x25   : > { %p16606_p9 = pnand %p11596_p6, %p273_p8  ;;  %s285_s6 = sshll.u32 %s16447_s17, 4  ;;  %s286_s6 = int_to_ptr.vmem [resolvable:$true] %s285_s6 }
  0x26   : > { %s20837_s4 = sld [smem:[#allocation154_spill]] }
  0x27   : > { %s20834_s20 = scalar_select %p16606_p9, 1, 0 }
  0x28   : > { %p15302_p10 = pneg %p16606_p9 }
  0x29   : > { %20835 = sst [smem:[#allocation28_spill]] %s20834_s20 }
  0x2a   : > { %p16615_p12 = pnand %p15302_p10, %p20770_p0 }
  0x2c   : > { %s16103_s19 = scalar_lea.hbm %s20837_s4, 27648  ;;  %p16105_p1 = pneg %p16615_p12 }
  0x2d   : > { %p16104_p13 = scmp.ne.s32.totalorder %s20837_s4, %s16103_s19  ;;  %p16110_p4 = scmp.lt.u32.totalorder %s16103_s19, %s20837_s4 }
  0x2f   : > { %p16106_p2 = pnand %p16105_p1, %p16104_p13 }
  0x31   : > { %p16107_p3 = pneg %p16106_p2 }
  0x33   : > { %p16112_p6 = pnand %p16110_p4, %p16107_p3 }
  0x35   : > { %16115 = shalt.err (!%p16112_p6)
}
  0x36   : > { %s16116_s20 = scalar_lea.vmem %s286_s6, 27648  ;;  %p16124_p0 = scmp.lt.s32.totalorder %s286_s6, %s286_s6 }
  0x37   : > { %p16117_p8 = scmp.ne.s32.totalorder %s286_s6, %s16116_s20  ;;  %p16125_p7 = scmp.lt.s32.totalorder %s16116_s20, %s16116_s20 }
  0x39   : > { %p16119_p10 = pnand %p16117_p8, %p16105_p1  ;;  %p16126_p5 = por %p16125_p7, %p16124_p0 }
  0x3b   : > { %p16120_p11 = pneg %p16119_p10 }
  0x3d   : > { %p16127_p9 = pnand %p16126_p5, %p16120_p11 }
  0x3f   : > { %16130 = shalt.err (!%p16127_p9)
}
  0x40   : > { %s20773_s5 = smov 64   ;;  %s20775_s21 = smov 4  }
  0x41   : > { %15305 = dma.hbm_to_vmem [thread:$0]  (!%p16615_p12), %s20837_s4, 27648, %s286_s6, [#allocation9], %s20773_s5, %s20773_s5, %s20775_s21  }
  0x42   : > { %s37_s18 = sadd.s32 1, %s16441_s13  ;;  %s16640_s19 = sshll.u32 %s16441_s13, 1 }
  0x43   : > { %p38_p0 = scmp.ge.s32.totalorder %s37_s18, 2  ;;  %p20783_p5 = scmp.eq.s32.totalorder %s16445_s14, 0 }
  0x44   : > { %p85_p7 = scmp.gt.s32.totalorder %s16640_s19, 0  ;;  %s99_s17 = sadd.s32 1, %s16421_s8 }
  0x45   : > { %s21357_s18 = smov (%p38_p0, %s37_s18), 0  ;;  %p106_p11 = scmp.ne.s32.totalorder %s16421_s8, %s16417_s7 }
  0x46   : > { %20838 = sst [smem:[#allocation29_spill]] %s21357_s18  ;;  %s16648_s6 = sshll.u32 %s21357_s18, 1 }
  0x47   : > { %s86_s20 = scalar_select %p85_p7, %s16640_s19, 0 }
  0x48   : > { %p90_p9 = scmp.gt.s32.totalorder %s16648_s6, 0  ;;  %p16657_p12 = por %p106_p11, %p20783_p5 }
  0x49   : > { %p112_p13 = scmp.ne.s32.totalorder %s16417_s7, %s16413_s30  ;;  %s245_s5 = ssub.s32 %s16441_s13, %s21357_s18 }
  0x4a   : > { %s91_s16 = scalar_select %p90_p9, %s16648_s6, 0 }
  0x4b   : > { %p20840_p2 = scmp.eq.s32.totalorder %s16586_s15, 0  ;;  %p247_p4 = scmp.eq.s32.totalorder %s245_s5, 0 }
  0x4c   : > { %s95_s12 = ssub.s32 %s86_s20, %s91_s16  ;;  %p20782_p6 = scmp.lt.s32.totalorder %s16445_s14, 2 }
  0x4d   : > { %p97_p1 = scmp.eq.s32.totalorder %s95_s12, 0  ;;  %p16667_p3 = por %p112_p13, %p20840_p2 }
  0x4e   : > { %s20843_s3 = sadd.s32 1, %s16385_s23  ;;  %s20784_s25 = sand.u32 1, %s16445_s14  }
  0x4f   : > { %s20841_s21 = scalar_select %p16667_p3, 1, 0 }
  0x50   : > { %s16673_s4 = scalar_select %p97_p1, %s16421_s8, %s99_s17  }
  0x51   : > { %s16678_s24 = scalar_select %p247_p4, %s16385_s23, %s20843_s3  }
  0x52   : > { %20842 = sst [smem:[#allocation30_spill]] %s16673_s4  ;;  %s333_s26 = sand.u32 1, %s16421_s8  }
  0x53   : > { %s15256_s2 = smul.u32 52, %s333_s26  ;;  %p16686_p8 = pnand %p20782_p6, %p16657_p12 }
  0x54   : > { %s15257_s30 = smul.u32 832, %s86_s20  ;;  %s20845_s1 = sld [smem:[#allocation151_spill]] }
  0x55   : > { %s335_s3 = scalar_lea.vmem [#allocation5], %s15256_s2  ;;  %s16699_s20 = scalar_lea.sflag [#allocation6], %s20784_s25 }
  0x56   : > { %s349_s26 = sshll.u32 %s335_s3, 4  ;;  %p16133_p0 = pneg %p16686_p8  ;;  %s16695_s26 = int_to_ptr.vmem [resolvable:$true] %s349_s26 }
  0x5a   : > { %s16693_s5 = scalar_lea.hbm %s20845_s1, %s15257_s30  ;;  %s16136_s30 = scalar_lea.hbm %s20845_s1, 3328 }
  0x5b   : > { %s16131_s17 = scalar_lea.hbm %s16693_s5, 832  ;;  %p16137_p11 = scmp.lt.u32.totalorder %s16693_s5, %s20845_s1 }
  0x5c   : > { %p16132_p10 = scmp.ne.s32.totalorder %s16693_s5, %s16131_s17  ;;  %p16138_p12 = scmp.lt.u32.totalorder %s16136_s30, %s16131_s17 }
  0x5d   : > { %p16140_p1 = scmp.lt.u32.totalorder %s16131_s17, %s16693_s5 }
  0x5e   : > { %p16134_p7 = pnand %p16133_p0, %p16132_p10  ;;  %p16139_p13 = por %p16138_p12, %p16137_p11 }
  0x60   : > { %p16135_p9 = pneg %p16134_p7  ;;  %p16141_p2 = por %p16140_p1, %p16139_p13 }
  0x62   : > { %p16142_p4 = pnand %p16141_p2, %p16135_p9 }
  0x64   : > { %16145 = shalt.err (!%p16142_p4)
}
  0x65   : > { %s16146_s3 = scalar_lea.vmem %s16695_s26, 832  ;;  %s16450_s18 = smov [#allocation5]  }
  0x66   : > { %p16147_p10 = scmp.ne.s32.totalorder %s16695_s26, %s16146_s3  ;;  %s16151_s22 = sshll.u32 %s16450_s18, 4  ;;  %s16152_s22 = int_to_ptr.vmem [resolvable:$false] %s16151_s22 }
  0x67   : > { %s16153_s12 = scalar_lea.vmem %s16152_s22, 1664  ;;  %p16154_p5 = scmp.lt.s32.totalorder %s16695_s26, %s16152_s22 }
  0x68   : > { %p16149_p7 = pnand %p16147_p10, %p16133_p0  ;;  %p16155_p11 = scmp.lt.s32.totalorder %s16153_s12, %s16146_s3 }
  0x6a   : > { %p16150_p6 = pneg %p16149_p7  ;;  %p16156_p12 = por %p16155_p11, %p16154_p5 }
  0x6c   : > { %p16157_p13 = pnand %p16156_p12, %p16150_p6 }
  0x6e   : > { %16160 = shalt.err (!%p16157_p13)
}
  0x6f   : > { %s20846_s17 = smov 4   ;;  %s20847_s30 = smov 64  }
  0x70   : > { %15312 = dma.hbm_to_vmem [thread:$0]  (!%p16686_p8), %s16693_s5, 832, %s16695_s26, %s16699_s20, %s20847_s30, %s20847_s30, %s20846_s17  }
  0x71   : > { %s45_s2 = sadd.s32 4294967295, %s16640_s19  ;;  %s51_s16 = sadd.s32 4294967295, %s16648_s6 }
  0x72   : > { %p46_p5 = scmp.gt.s32.totalorder %s45_s2, 0  ;;  %p52_p6 = scmp.gt.s32.totalorder %s51_s16, 0 }
  0x73   : > { %s61_s3 = sadd.s32 1, %s16433_s11  ;;  %p68_p0 = scmp.ne.s32.totalorder %s16433_s11, %s16429_s10 }
  0x74   : > { %s21359_s2 = smov (!%p46_p5, %s45_s2), 0  ;;  %s21361_s16 = smov (!%p52_p6, %s51_s16), 0 }
  0x75   : > { %s57_s18 = ssub.s32 %s21359_s2, %s21361_s16  ;;  %p74_p9 = scmp.ne.s32.totalorder %s16429_s10, %s16425_s9 }
  0x76   : > { %p59_p1 = scmp.eq.s32.totalorder %s57_s18, 0  ;;  %p20848_p2 = scmp.eq.s32.totalorder %s16445_s14, 0 }
  0x77   : > { %p20849_p10 = scmp.eq.s32.totalorder %s16586_s15, 0  ;;  %s302_s5 = sand.u32 1, %s16433_s11  }
  0x78   : > { %p70_p4 = por %p20848_p2, %p68_p0  ;;  %s15254_s12 = smul.u32 52, %s302_s5 }
  0x79   : > { %p16741_p7 = por %p20849_p10, %p74_p9  ;;  %s15255_s25 = smul.u32 832, %s21359_s2 }
  0x7a   : > { %s16747_s26 = scalar_select %p59_p1, %s16433_s11, %s61_s3  }
  0x7b   : > { %p20852_p8 = scmp.lt.s32.totalorder %s16445_s14, 2  ;;  %s20854_s0 = sld [smem:[#allocation150_spill]] }
  0x7c   : > { %20851 = sst [smem:[#allocation31_spill]] %s16747_s26  ;;  %s306_s3 = scalar_lea.vmem [#allocation2], %s15254_s12 }
  0x7d   : > { %p16751_p11 = pnand %p20852_p8, %p70_p4  ;;  %s321_s13 = sshll.u32 %s306_s3, 4  ;;  %s16760_s13 = int_to_ptr.vmem [resolvable:$true] %s321_s13 }
  0x7e   : > { %s16762_s2 = scalar_lea.sflag [#allocation3], %s302_s5 }
  0x7f   : > { %p16163_p13 = pneg %p16751_p11 }
  0x81   : > { %s16758_s18 = scalar_lea.hbm %s20854_s0, %s15255_s25  ;;  %s16166_s9 = scalar_lea.hbm %s20854_s0, 3328 }
  0x82   : > { %s16161_s26 = scalar_lea.hbm %s16758_s18, 832  ;;  %p16167_p0 = scmp.lt.u32.totalorder %s16758_s18, %s20854_s0 }
  0x83   : > { %p16162_p12 = scmp.ne.s32.totalorder %s16758_s18, %s16161_s26  ;;  %p16168_p9 = scmp.lt.u32.totalorder %s16166_s9, %s16161_s26 }
  0x84   : > { %p16170_p2 = scmp.lt.u32.totalorder %s16161_s26, %s16758_s18 }
  0x85   : > { %p16164_p5 = pnand %p16163_p13, %p16162_p12  ;;  %p16169_p1 = por %p16168_p9, %p16167_p0 }
  0x87   : > { %p16165_p6 = pneg %p16164_p5  ;;  %p16171_p4 = por %p16170_p2, %p16169_p1 }
  0x89   : > { %p16172_p10 = pnand %p16171_p4, %p16165_p6 }
  0x8b   : > { %16175 = shalt.err (!%p16172_p10)
}
  0x8c   : > { %s16176_s5 = scalar_lea.vmem %s16760_s13, 832  ;;  %s16451_s12 = smov [#allocation2]  }
  0x8d   : > { %p16177_p8 = scmp.ne.s32.totalorder %s16760_s13, %s16176_s5  ;;  %s16181_s3 = sshll.u32 %s16451_s12, 4  ;;  %s16182_s3 = int_to_ptr.vmem [resolvable:$false] %s16181_s3 }
  0x8e   : > { %s16183_s4 = scalar_lea.vmem %s16182_s3, 1664  ;;  %p16184_p3 = scmp.lt.s32.totalorder %s16760_s13, %s16182_s3 }
  0x8f   : > { %p16179_p12 = pnand %p16177_p8, %p16163_p13  ;;  %p16185_p0 = scmp.lt.s32.totalorder %s16183_s4, %s16176_s5 }
  0x91   : > { %p16180_p5 = pneg %p16179_p12  ;;  %p16186_p9 = por %p16185_p0, %p16184_p3 }
  0x93   : > { %p16187_p1 = pnand %p16186_p9, %p16180_p5 }
  0x95   : > { %16190 = shalt.err (!%p16187_p1)
}
  0x96   : > { %15309 = dma.hbm_to_vmem [thread:$0]  (!%p16751_p11), %s16758_s18, 832, %s16760_s13, %s16762_s2, %s20847_s30, %s20847_s30, %s20846_s17  }
  0x97   : > { %s123_s11 = sadd.s32 1, %s16640_s19  ;;  %s129_s1 = sadd.s32 1, %s16648_s6 }
  0x98   : > { %p11573_p3 = scmp.lt.s32.totalorder %s123_s11, 3  ;;  %s139_s26 = sadd.s32 1, %s16409_s29 }
  0x99   : > { %p11579_p13 = scmp.lt.s32.totalorder %s129_s1, 3  ;;  %p146_p6 = scmp.ne.s32.totalorder %s16409_s29, %s16405_s28 }
  0x9a   : > { %s21363_s11 = smov (!%p11573_p3, %s123_s11), 3  ;;  %p152_p2 = scmp.ne.s32.totalorder %s16405_s28, %s16401_s27 }
  0x9b   : > { %s21365_s1 = smov (!%p11579_p13, %s129_s1), 3  ;;  %p20855_p4 = scmp.eq.s32.totalorder %s16445_s14, 0 }
  0x9c   : > { %p20856_p8 = scmp.eq.s32.totalorder %s16586_s15, 0  ;;  %s135_s16 = ssub.s32 %s21363_s11, %s21365_s1 }
  0x9d   : > { %p148_p10 = por %p146_p6, %p20855_p4  ;;  %s361_s13 = sand.u32 1, %s16409_s29  }
  0x9e   : > { %p16804_p12 = por %p152_p2, %p20856_p8  ;;  %p137_p11 = scmp.eq.s32.totalorder %s135_s16, 0 }
  0x9f   : > { %s15258_s18 = smul.u32 52, %s361_s13  ;;  %p20858_p5 = scmp.lt.s32.totalorder %s16445_s14, 2 }
  0xa0   : > { %s20857_s25 = scalar_select %p16804_p12, 1, 0 }
  0xa1   : > { %s15259_s2 = smul.u32 832, %s21363_s11  ;;  %p16811_p0 = pnand %p20858_p5, %p148_p10 }
  0xa2   : > { %s16816_s27 = scalar_select %p137_p11, %s16409_s29, %s139_s26  }
  0xa3   : > { %s20860_s3 = sld [smem:[#allocation152_spill]]  ;;  %s363_s1 = scalar_lea.vmem [#allocation7], %s15258_s18 }
  0xa4   : > { %s378_s11 = sshll.u32 %s363_s1, 4  ;;  %p16193_p1 = pneg %p16811_p0  ;;  %s16823_s11 = int_to_ptr.vmem [resolvable:$true] %s378_s11 }
  0xa9   : > { %s16821_s4 = scalar_lea.hbm %s20860_s3, %s15259_s2  ;;  %s16196_s2 = scalar_lea.hbm %s20860_s3, 3328 }
  0xaa   : > { %s16191_s16 = scalar_lea.hbm %s16821_s4, 832  ;;  %p16197_p6 = scmp.lt.u32.totalorder %s16821_s4, %s20860_s3 }
  0xab   : > { %p16192_p9 = scmp.ne.s32.totalorder %s16821_s4, %s16191_s16  ;;  %p16198_p2 = scmp.lt.u32.totalorder %s16196_s2, %s16191_s16 }
  0xac   : > { %p16200_p10 = scmp.lt.u32.totalorder %s16191_s16, %s16821_s4 }
  0xad   : > { %p16194_p3 = pnand %p16193_p1, %p16192_p9  ;;  %p16199_p4 = por %p16198_p2, %p16197_p6 }
  0xaf   : > { %p16195_p13 = pneg %p16194_p3  ;;  %p16201_p8 = por %p16200_p10, %p16199_p4 }
  0xb1   : > { %p16202_p11 = pnand %p16201_p8, %p16195_p13 }
  0xb3   : > { %16205 = shalt.err (!%p16202_p11)
}
  0xb4   : > { %s16206_s18 = scalar_lea.vmem %s16823_s11, 832  ;;  %s16452_s1 = smov [#allocation7]  }
  0xb5   : > { %p16207_p5 = scmp.ne.s32.totalorder %s16823_s11, %s16206_s18  ;;  %s16211_s26 = sshll.u32 %s16452_s1, 4  ;;  %s16212_s26 = int_to_ptr.vmem [resolvable:$false] %s16211_s26 }
  0xb6   : > { %s16213_s13 = scalar_lea.vmem %s16212_s26, 1664  ;;  %p16214_p12 = scmp.lt.s32.totalorder %s16823_s11, %s16212_s26 }
  0xb7   : > { %p16209_p9 = pnand %p16207_p5, %p16193_p1  ;;  %p16215_p6 = scmp.lt.s32.totalorder %s16213_s13, %s16206_s18 }
  0xb9   : > { %p16210_p3 = pneg %p16209_p9  ;;  %p16216_p2 = por %p16215_p6, %p16214_p12 }
  0xbb   : > { %p16217_p4 = pnand %p16216_p2, %p16210_p3 }
  0xbd   : > { %16220 = shalt.err (!%p16217_p4)
}
  0xbe   : > { %s20861_s16 = sld [smem:[#allocation22_spill]]  ;;  %s20862_s2 = sld [smem:[#allocation21_spill]] }
  0xbf   : > { %s20863_s5 = sld [smem:[#allocation20_spill]]  ;;  %s163_s12 = sadd.s32 2, %s16640_s19 }
  0xc0   : > { %15315 = dma.hbm_to_vmem [thread:$0]  (!%p16811_p0), %s16821_s4, 832, %s16823_s11, %s16699_s20, %s20847_s30, %s20847_s30, %s20846_s17  }
  0xc1   : > { %p11585_p12 = scmp.lt.s32.totalorder %s163_s12, 3  ;;  %s169_s9 = sadd.s32 2, %s16648_s6 }
  0xc2   : > { %p11591_p1 = scmp.lt.s32.totalorder %s169_s9, 3  ;;  %p20864_p8 = scmp.eq.s32.totalorder %s16445_s14, 0 }
  0xc3   : > { %s21367_s12 = smov (!%p11585_p12, %s163_s12), 3  ;;  %p20865_p5 = scmp.eq.s32.totalorder %s16586_s15, 0 }
  0xc4   : > { %s179_s18 = sadd.s32 1, %s20861_s16  ;;  %p186_p13 = scmp.ne.s32.totalorder %s20861_s16, %s20862_s2 }
  0xc5   : > { %p192_p10 = scmp.ne.s32.totalorder %s20862_s2, %s20863_s5  ;;  %s21369_s9 = smov (!%p11591_p1, %s169_s9), 3 }
  0xc6   : > { %p188_p11 = por %p186_p13, %p20864_p8  ;;  %s175_s20 = ssub.s32 %s21367_s12, %s21369_s9 }
  0xc7   : > { %p16865_p9 = por %p192_p10, %p20865_p5  ;;  %s390_s19 = sand.u32 1, %s20861_s16  }
  0xc8   : > { %p177_p0 = scmp.eq.s32.totalorder %s175_s20, 0  ;;  %s15260_s4 = smul.u32 52, %s390_s19 }
  0xc9   : > { %s20866_s1 = scalar_select %p16865_p9, 1, 0 }
  0xca   : > { %s15261_s11 = smul.u32 832, %s21367_s12  ;;  %p20867_p3 = scmp.lt.s32.totalorder %s16445_s14, 2 }
  0xcb   : > { %s21371_s16 = smov (!%p177_p0, %s20861_s16), %s179_s18  ;;  %s20869_s2 = sld [smem:[#allocation153_spill]] }
  0xcc   : > { %p16872_p6 = pnand %p20867_p3, %p188_p11  ;;  %s392_s9 = scalar_lea.vmem [#allocation8], %s15260_s4 }
  0xcd   : > { %s407_s12 = sshll.u32 %s392_s9, 4  ;;  %s20870_s20 = sand.u32 1, %s16445_s14   ;;  %s16884_s12 = int_to_ptr.vmem [resolvable:$true] %s407_s12 }
  0xce   : > { %s16888_s19 = scalar_lea.sflag [#allocation9], %s20870_s20  ;;  %p16223_p4 = pneg %p16872_p6 }
  0xd1   : > { %s16882_s5 = scalar_lea.hbm %s20869_s2, %s15261_s11  ;;  %s16226_s26 = scalar_lea.hbm %s20869_s2, 3328 }
  0xd2   : > { %s16221_s0 = scalar_lea.hbm %s16882_s5, 832  ;;  %p16227_p13 = scmp.lt.u32.totalorder %s16882_s5, %s20869_s2 }
  0xd3   : > { %p16222_p2 = scmp.ne.s32.totalorder %s16882_s5, %s16221_s0  ;;  %p16228_p10 = scmp.lt.u32.totalorder %s16226_s26, %s16221_s0 }
  0xd4   : > { %p16230_p11 = scmp.lt.u32.totalorder %s16221_s0, %s16882_s5 }
  0xd5   : > { %p16224_p12 = pnand %p16223_p4, %p16222_p2  ;;  %p16229_p8 = por %p16228_p10, %p16227_p13 }
  0xd7   : > { %p16225_p1 = pneg %p16224_p12  ;;  %p16231_p5 = por %p16230_p11, %p16229_p8 }
  0xd9   : > { %p16232_p0 = pnand %p16231_p5, %p16225_p1 }
  0xdb   : > { %16235 = shalt.err (!%p16232_p0)
}
  0xdc   : > { %s16236_s9 = scalar_lea.vmem %s16884_s12, 832  ;;  %s16453_s20 = smov [#allocation8]  }
  0xdd   : > { %p16237_p3 = scmp.ne.s32.totalorder %s16884_s12, %s16236_s9  ;;  %s16241_s18 = sshll.u32 %s16453_s20, 4  ;;  %s16242_s18 = int_to_ptr.vmem [resolvable:$false] %s16241_s18 }
  0xde   : > { %s16243_s11 = scalar_lea.vmem %s16242_s18, 1664  ;;  %p16244_p9 = scmp.lt.s32.totalorder %s16884_s12, %s16242_s18 }
  0xdf   : > { %p16239_p2 = pnand %p16237_p3, %p16223_p4  ;;  %p16245_p13 = scmp.lt.s32.totalorder %s16243_s11, %s16236_s9 }
  0xe1   : > { %p16240_p12 = pneg %p16239_p2  ;;  %p16246_p10 = por %p16245_p13, %p16244_p9 }
  0xe3   : > { %p16247_p8 = pnand %p16246_p10, %p16240_p12 }
  0xe5   : > { %16250 = shalt.err (!%p16247_p8)
}
  0xe6   : > { %15318 = dma.hbm_to_vmem [thread:$0]  (!%p16872_p6), %s16882_s5, 832, %s16884_s12, %s16888_s19, %s20847_s30, %s20847_s30, %s20846_s17  }
  0xe7   : > { %s20871_s0 = sld [smem:[#allocation28_spill]] }
  0xed   : > { %p20872_p4 = scmp.ne.s32.totalorder %s20871_s0, 0 }
  0xef   : > { %419 = sbr.rel (%p20872_p4) target bundleno = 1632 (0x660), region = 44 }
  0xf6   : > { %s421_s26 = sand.u32 1, %s16429_s10  }
  0xf7   : > { %s15262_s13 = smul.u32 52, %s421_s26  ;;  %s422_s4 = scalar_lea.sflag [#allocation3], %s421_s26 }
  0xf9   : > { %s16922_s9 = scalar_lea.vmem [#allocation2], %s15262_s13 }
  0xfa   : > { %16352 = dma.done.wait (%p16741_p7), %s422_s4, 832  }
  0xfb   : > { %16354 = vsyncadd (%p16741_p7), %s422_s4, 4294966464  ;;  %s430_s6 = sand.u32 1, %s16586_s15   ;;  %s432_s17 = sand.u32 1, %s16417_s7  }
  0xfc   : > { %s15263_s30 = smul.u32 52, %s432_s17  ;;  %s431_s5 = scalar_lea.sflag [#allocation6], %s430_s6 }
  0xfd   : > { %p20873_p9 = scmp.ne.s32.totalorder %s20841_s21, 0 }
  0xfe   : > { %s16930_s12 = scalar_lea.vmem [#allocation5], %s15263_s30 }
  0xff   : > { %16356 = dma.done.wait (%p20873_p9), %s431_s5, 832  }
 0x100   : > { %16358 = vsyncadd (%p20873_p9), %s431_s5, 4294966464  ;;  %s441_s19 = sand.u32 1, %s16405_s28   ;;  %p20874_p7 = scmp.ne.s32.totalorder %s20857_s25, 0 }
 0x101   : > { %s15264_s20 = smul.u32 52, %s441_s19 }
 0x103   : > { %s16937_s22 = scalar_lea.vmem [#allocation7], %s15264_s20 }
 0x104   : > { %16360 = dma.done.wait (%p20874_p7), %s431_s5, 832  }
 0x105   : > { %16362 = vsyncadd (%p20874_p7), %s431_s5, 4294966464  ;;  %s20875_s18 = sld [smem:[#allocation21_spill]]  ;;  %s449_s26 = scalar_lea.sflag [#allocation9], %s430_s6 }
 0x106   : > { %p20876_p6 = scmp.ne.s32.totalorder %s20866_s1, 0 }
 0x10b   : > { %s450_s11 = sand.u32 1, %s20875_s18  }
 0x10c   : > { %s15265_s0 = smul.u32 52, %s450_s11 }
 0x10e   : > { %s16944_s13 = scalar_lea.vmem [#allocation8], %s15265_s0 }
 0x10f   : > { %16364 = dma.done.wait (%p20876_p6), %s449_s26, 832  }
 0x110   : > { %16366 = vsyncadd (%p20876_p6), %s449_s26, 4294966464  ;;  %p20877_p1 = scmp.eq.s32.totalorder %s16586_s15, 0 }
 0x112   : > { %16368 = dma.done.wait (%p20877_p1), [#allocation9], 27648   ;;  %p20878_p11 = pmov %p20877_p1 }
 0x113   : > { %v20790_v0 = vmov 0.0   ;;  %vm20811_vm0 = vmmov 0   ;;  %v15479_v1 = vld [vmem:[#allocation10 + $0x40] sm:$0xff]   ;;  %v15481_v3 = vld [vmem:[#allocation10 + $0x48] sm:$0xff]   ;;  %v15483_v5 = vld [vmem:[#allocation10 + $0x50] sm:$0xff]   ;;  %vm20809_vm3 = vcmask 1046528  }
 0x114   : > { %16370 = vsyncadd (%p20878_p11), [#allocation9], 4294939648  ;;  %12990 = vmatprep.subr.bf16.mxu0 %v20790_v0  ;;  %13458 = vmatprep.subr.bf16.mxu1 %v20790_v0  ;;  %v15480_v2 = vld [vmem:[#allocation10 + $0x340] sm:$0xff]   ;;  %v15482_v4 = vld [vmem:[#allocation10 + $0x348] sm:$0xff]   ;;  %vm612_vm1 = vsmask.f32 7424 }
 0x115   : > { %13006 = vmatprep.mubr.msk.bf16.mxu0 %vm20811_vm0, %v20790_v0  ;;  %13474 = vmatprep.mubr.msk.bf16.mxu1 %vm20811_vm0, %v20790_v0  ;;  %v15484_v6 = vld [vmem:[#allocation10 + $0x350] sm:$0xff]   ;;  %v15485_v7 = vld [vmem:[#allocation10 + $0x58] sm:$0xff]   ;;  %v15487_v9 = vld [vmem:[#allocation10 + $0x60] sm:$0xff]   ;;  %vm20810_vm2 = vsmask.f32 6400  ;;  %vm20808_vm4 = vcmask 1045504  }
 0x116   : > { %12991 = vmatpush3.bf16.msra.mxu0 %v15479_v1  ;;  %13459 = vmatpush3.bf16.msra.mxu1 %v15480_v2  ;;  %v15486_v8 = vld [vmem:[#allocation10 + $0x358] sm:$0xff]   ;;  %v15488_v10 = vld [vmem:[#allocation10 + $0x360] sm:$0xff]   ;;  %v15489_v11 = vld [vmem:[#allocation10 + $0x68] sm:$0xff]   ;;  %vm20803_vm5 = vcmask 1044480   ;;  %vm20805_vm6 = vsmask.f32 5376 }
 0x117   : > { %12992 = vmatprep.subr.bf16.mxu0 %v20790_v0  ;;  %13460 = vmatprep.subr.bf16.mxu1 %v20790_v0  ;;  %v540_v12 = vld [vmem:[%s16922_s9] sm:$0xf]  ;;  %v16970_v13 = vld [vmem:[%s16922_s9 + $0x4] sm:$0xf]  ;;  %v16976_v15 = vld [vmem:[%s16922_s9 + $0x8] sm:$0xff]   ;;  %s20991_s15 = sld [smem:[#allocation24_spill]] }
 0x118   : > { %v16973_v14 = vcombine.low %v540_v12, %v16970_v13  ;;  %v2795_v16 = vld [vmem:[%s16930_s12 + $0x4] sm:$0xe]  ;;  %v16980_v17 = vld [vmem:[%s16930_s12 + $0x8] sm:$0xf]  ;;  %v16988_v21 = vld [vmem:[%s16930_s12 + $0xc] sm:$0xff]   ;;  %v621_v28 = vshll.u32 %v16976_v15, 16 }
 0x119   : > { %v15490_v18 = vld [vmem:[#allocation10 + $0x368] sm:$0xff]   ;;  %v16985_v20 = vcombine.low %v2795_v16, %v16980_v17  ;;  %v15491_v22 = vld [vmem:[#allocation10 + $0x70] sm:$0xff]   ;;  %v3028_v29 = vshrl.u32 %v16988_v21, 16  ;;  %v3031_v30 = vshll.u32 %v16988_v21, 16  ;;  %v15493_v33 = vld [vmem:[#allocation10 + $0x78] sm:$0xff]   ;;  %v625_v46 = vshrl.u32 %v16976_v15, 16 }
 0x11a   : > { %12993 = vmatpush3.bf16.msra.mxu0 %v15481_v3  ;;  %13461 = vmatpush3.bf16.msra.mxu1 %v15482_v4  ;;  %v616_v19 = vshll.u32 %v16973_v14, 16  ;;  %v15492_v23 = vld [vmem:[#allocation10 + $0x370] sm:$0xff]   ;;  %v614_v24 = vshrl.u32 %v16973_v14, 16  ;;  %v15494_v37 = vld [vmem:[#allocation10 + $0x378] sm:$0xff]   ;;  %v623_v39 = vrot.slane %v621_v28, 1  ;;  %v15499_v45 = vld [vmem:[#allocation10] sm:$0xff]  }
 0x11b   : > { %12994 = vmatprep.subr.bf16.mxu0 %v20790_v0  ;;  %13462 = vmatprep.subr.bf16.mxu1 %v20790_v0  ;;  %v3020_v25 = vshrl.u32 %v16985_v20, 16  ;;  %v3023_v26 = vshll.u32 %v16985_v20, 16  ;;  %v3030_v34 = vrot.slane %v3028_v29, 1  ;;  %v3033_v35 = vrot.slane %v3031_v30, 2  ;;  %v17000_v36 = vld [vmem:[%s16930_s12 + $0x14] sm:$0xff]   ;;  %v17003_v40 = vld [vmem:[%s16922_s9 + $0x10] sm:$0xff]  }
 0x11c   : > { %v618_v27 = vrot.slane %v616_v19, 1  ;;  %v3037_v43 = vshrl.u32 %v17000_v36, 16  ;;  %v3040_v44 = vshll.u32 %v17000_v36, 16  ;;  %v15500_v48 = vld [vmem:[#allocation10 + $0x380] sm:$0xff]   ;;  %v629_v49 = vshll.u32 %v17003_v40, 16  ;;  %v15501_v54 = vld [vmem:[#allocation10 + $0x8] sm:$0xff]  }
 0x11d   : > { %v3022_v31 = vrot.slane %v3020_v25, 1  ;;  %v3025_v32 = vrot.slane %v3023_v26, 2  ;;  %v3034_v42 = vor.u32 %v3033_v35, %v3030_v34  ;;  %v17016_v53 = vld [vmem:[%s16930_s12 + $0x1c] sm:$0xff]   ;;  %v627_v55 = vor.u32 %v625_v46, %v623_v39  ;;  %v17019_v57 = vld [vmem:[%s16922_s9 + $0x18] sm:$0xff]   ;;  %p2244_p5 = scmp.gt.s32.totalorder %s20991_s15, 0  ;;  %s21061_s1 = sld [smem:[#allocation19_spill]] }
 0x11e   : > { %12995 = vmatpush3.bf16.msra.mxu0 %v15483_v5  ;;  %13463 = vmatpush3.bf16.msra.mxu1 %v15484_v6  ;;  %v619_v38 = vor.u32 %v618_v27, %v614_v24  ;;  %v3039_v51 = vrot.slane %v3037_v43, 1  ;;  %v3042_v52 = vrot.slane %v3040_v44, 2  ;;  %v631_v56 = vrot.slane %v629_v49, 1  ;;  %v15504_v60 = vld [vmem:[#allocation10 + $0x388] sm:$0xff]   ;;  %v15505_v62 = vld [vmem:[#allocation10 + $0x10] sm:$0xff]   ;;  %v15510_v12 = vld [vmem:[#allocation10 + $0x398] sm:$0xff]  }
 0x11f   : > { %12996 = vmatprep.subr.bf16.mxu0 %v20790_v0  ;;  %13464 = vmatprep.subr.bf16.mxu1 %v20790_v0  ;;  %v3026_v41 = vor.u32 %v3025_v32, %v3022_v31  ;;  %v3046_v58 = vshrl.u32 %v17016_v53, 16  ;;  %v3049_v61 = vshll.u32 %v17016_v53, 16  ;;  %v15506_v1 = vld [vmem:[#allocation10 + $0x390] sm:$0xff]   ;;  %v633_v2 = vshrl.u32 %v17003_v40, 16  ;;  %v15511_v24 = vld [vmem:[#allocation10 + $0x20] sm:$0xff]   ;;  %s21149_s5 = sld [smem:[#allocation155_spill]] }
 0x120   : > { %v624_v47 = vsel %vm612_vm1, %v619_v38, %v623_v39  ;;  %v3043_v59 = vor.u32 %v3042_v52, %v3039_v51  ;;  %v632_v63 = vsel %vm612_vm1, %v627_v55, %v631_v56  ;;  %v637_v3 = vshll.u32 %v17019_v57, 16  ;;  %v17053_v26 = vld [vmem:[%s16930_s12 + $0x2c] ss:$0 sps:$4 sm:$0x33]   ;;  %v15512_v30 = vld [vmem:[#allocation10 + $0x3a0] sm:$0xff]   ;;  %v15521_v55 = vld [vmem:[#allocation10 + $0x38] sm:$0xff]  }
 0x121   : > { %v3035_v50 = vsel %vm20810_vm2, %v3026_v41, %v3034_v42  ;;  %v3048_v4 = vrot.slane %v3046_v58, 1  ;;  %v3051_v6 = vrot.slane %v3049_v61, 2  ;;  %v641_v25 = vshrl.u32 %v17019_v57, 16  ;;  %v17059_v31 = vld [vmem:[%s16922_s9 + $0x28] ss:$0 sps:$4 sm:$0x11]  }
 0x122   : > { %12997 = vmatpush3.bf16.msra.mxu0 %v15485_v7  ;;  %13465 = vmatpush3.bf16.msra.mxu1 %v15486_v8  ;;  %v3044_v5 = vsel %vm20810_vm2, %v3034_v42, %v3043_v59  ;;  %v17035_v7 = vld [vmem:[%s16930_s12 + $0x24] sm:$0xff]   ;;  %v17039_v8 = vld [vmem:[%s16922_s9 + $0x20] sm:$0xff]   ;;  %v932_v35 = vrot.slane %v16976_v15, 1  ;;  %v3064_v39 = vshrl.u32 %v17053_v26, 16  ;;  %v3067_v41 = vshll.u32 %v17053_v26, 16  ;;  %p11159_p0 = scmp.lt.s32.totalorder %s20991_s15, 1 }
 0x123   : > { %12998 = vmatprep.subr.bf16.mxu0 %v20790_v0  ;;  %13466 = vmatprep.subr.bf16.mxu1 %v20790_v0  ;;  %v3052_v16 = vor.u32 %v3051_v6, %v3048_v4  ;;  %v3058_v19 = vshll.u32 %v17035_v7, 16  ;;  %v15516_v42 = vld [vmem:[#allocation10 + $0x3a8] sm:$0xff]   ;;  %v649_v44 = vshrl.u32 %v17039_v8, 16  ;;  %v15517_v46 = vld [vmem:[#allocation10 + $0x30] sm:$0xff]   ;;  %v15525_v6 = vld [vmem:[#allocation10 + $0x3c0] sm:$0xff]   ;;  %s497_s4 = sand.u32 1, %s21061_s1  }
 0x124   : > { %v3066_v49 = vrot.slane %v3064_v39, 1  ;;  %v15520_v51 = vld [vmem:[#allocation10 + $0x3b0] sm:$0xff]   ;;  %v3208_v58 = vld [vmem:[%s16930_s12 + $0x4] sm:$0xc]  ;;  %s18674_s21 = scalar_select %p2244_p5, 1, 0 }
 0x125   : > { %v3053_v27 = vsel %vm20810_vm2, %v3043_v59, %v3052_v16  ;;  %v3060_v29 = vrot.slane %v3058_v19, 2  ;;  %v15522_v59 = vld [vmem:[#allocation10 + $0x3b8] sm:$0xff]   ;;  %v11778_v61 = vcombine.low %v3208_v58, %v16980_v17  ;;  %v15532_v19 = vld [vmem:[#allocation10 + $0xa0] sm:$0xff]   ;;  %v15547_v58 = vld [vmem:[#allocation10 + $0x408] sm:$0xff]   ;;  %vm527_vm7 = vcmask 1041408   ;;  %s15287_s18 = smul.u32 1664, %s20991_s15 }
 0x126   : > { %12999 = vmatpush3.bf16.msra.mxu0 %v15487_v9  ;;  %13467 = vmatpush3.bf16.msra.mxu1 %v15488_v10  ;;  %v635_v9 = vor.u32 %v633_v2, %v631_v56  ;;  %v639_v10 = vrot.slane %v637_v3, 1  ;;  %v3230_v3 = vrot.slane %v16988_v21, 2  ;;  %v3232_v21 = vrot.slane %v17000_v36, 2  ;;  %v15530_v36 = vld [vmem:[#allocation10 + $0x98] sm:$0xff]   ;;  %s2246_s25 = scvt.s32.f32 %s18674_s21  ;;  %s21325_s0 = sld [smem:[#allocation26_spill]] }
 0x127   : > { %13000 = vmatprep.subr.bf16.mxu0 %v20790_v0  ;;  %13468 = vmatprep.subr.bf16.mxu1 %v20790_v0  ;;  %v3229_v2 = vrot.slane %v11778_v61, 2  ;;  %v15548_v61 = vld [vmem:[#allocation10 + $0xd0] sm:$0xff]   ;;  %vm20807_vm8 = vsmask.f32 1280  ;;  %vm533_vm9 = vcmask 1043457   ;;  %s21326_s21 = sld [smem:[#allocation156_spill]] }
 0x128   : > { %v643_v34 = vor.u32 %v641_v25, %v639_v10  ;;  %vm534_vm10 = vsmask.f32 7942  ;;  %vm18994_vm11 = vmand %vm527_vm7, %vm20807_vm8  ;;  %s20664_s15 = scalar_lea.sflag [#allocation4], %s497_s4  ;;  %s16457_s30 = smov [#allocation11]  }
 0x129   : > { %vm19010_vm12 = vmand %vm533_vm9, %vm534_vm10 }
 0x12a   : > { %13001 = vmatpush3.bf16.msra.mxu0 %v15489_v11  ;;  %13469 = vmatpush3.bf16.msra.mxu1 %v15490_v18  ;;  %v15508_v11 = vld [vmem:[#allocation10 + $0x18] sm:$0xff]   ;;  %v3055_v18 = vshrl.u32 %v17035_v7, 16 }
 0x12b   : > { %13002 = vmatprep.subr.bf16.mxu0 %v20790_v0  ;;  %13470 = vmatprep.subr.bf16.mxu1 %v20790_v0 }
 0x12c   : > { %v3057_v28 = vrot.slane %v3055_v18, 1  ;;  %v15531_v18 = vld [vmem:[#allocation10 + $0x3d8] sm:$0xff]   ;;  %p21328_p2 = scmp.ne.s32.totalorder %s21325_s0, 0 }
 0x12d   : > { %s21327_s17 = smov %s21326_s21 }
 0x12e   : > { %13003 = vmatpush3.bf16.msra.mxu0 %v15491_v22  ;;  %13471 = vmatpush3.bf16.msra.mxu1 %v15492_v23  ;;  %v645_v22 = vshll.u32 %v17039_v8, 16  ;;  %v640_v23 = vsel %vm612_vm1, %v635_v9, %v639_v10  ;;  %v3061_v38 = vor.u32 %v3060_v29, %v3057_v28  ;;  %v15526_v9 = vld [vmem:[#allocation10 + $0x88] sm:$0xff]   ;;  %v15537_v28 = vld [vmem:[#allocation10 + $0x3f0] sm:$0xff]   ;;  %v3238_v29 = vrot.slane %v17053_v26, 2 }
 0x12f   : > { %13004 = vmatprep.subr.bf16.mxu0 %v20790_v0  ;;  %13472 = vmatprep.subr.bf16.mxu1 %v20790_v0  ;;  %v15527_v10 = vld [vmem:[#allocation10 + $0x3c8] sm:$0xff]  }
 0x130   : > { %v647_v32 = vrot.slane %v645_v22, 1  ;;  %v15533_v22 = vld [vmem:[#allocation10 + $0x3e0] sm:$0xff]   ;;  %v17152_v26 = vld [vmem:[%s16930_s12 + $0x10] sm:$0xff]  }
 0x131   : > { %v3433_v39 = vrot.slane %v17152_v26, 2 }
 0x132   : > { %13005 = vmatpush3.bf16.msra.mxu0 %v15493_v33  ;;  %13473 = vmatpush3.bf16.msra.mxu1 %v15494_v37  ;;  %v15515_v33 = vld [vmem:[#allocation10 + $0x28] sm:$0xff]   ;;  %v934_v37 = vrot.slane %v17003_v40, 1  ;;  %v651_v52 = vor.u32 %v649_v44, %v647_v32  ;;  %v17165_v44 = vld [vmem:[%s16930_s12 + $0x18] sm:$0xff]  }
 0x133   : > { %13026 = vmatprep.subr.bf16.mxu0 %v20790_v0  ;;  %13494 = vmatprep.subr.bf16.mxu1 %v20790_v0 }
 0x134   : > { %v17073_v43 = vsel %vm20809_vm3, %v932_v35, %v934_v37 }
 0x135   : > { %13007 = vmatmul.mubr.bf16.vlgmr.msra.gmra.mrb[0].mxu0 %v624_v47  ;;  %13475 = vmatmul.mubr.bf16.vlgmr.msra.gmra.mrb[0].mxu1 %v3035_v50  ;;  %v653_v47 = vshll.u32 %v17059_v31, 16  ;;  %v3069_v50 = vrot.slane %v3067_v41, 2  ;;  %v3789_v41 = vld [vmem:[%s16930_s12 + $0x8] sm:$0x8] }
 0x136   : > { %13027 = vmatpush3.bf16.msra.mxu0 %v15499_v45  ;;  %13495 = vmatpush3.bf16.msra.mxu1 %v15500_v48  ;;  %v648_v45 = vsel %vm612_vm1, %v643_v34, %v647_v32  ;;  %v3062_v48 = vsel %vm20810_vm2, %v3052_v16, %v3061_v38  ;;  %v3234_v16 = vrot.slane %v17016_v53, 2  ;;  %v15534_v53 = vld [vmem:[#allocation10 + $0xa8] sm:$0xff]   ;;  %v3376_v32 = vld [vmem:[%s16930_s12 + $0x8] sm:$0xc] }
 0x137   : > { %13028 = vmatprep.subr.bf16.mxu0 %v20790_v0  ;;  %13010 = vmatprep.mubr.msk.bf16.mxu0 %vm20811_vm0, %v20790_v0  ;;  %v3070_v56 = vor.u32 %v3069_v50, %v3066_v49  ;;  %v3813_v50 = vrot.slane %v17165_v44, 3 }
 0x138   : > { %13478 = vmatprep.mubr.msk.bf16.mxu1 %vm20811_vm0, %v20790_v0  ;;  %13496 = vmatprep.subr.bf16.mxu1 %v20790_v0 }
 0x13a   : > { %13029 = vmatpush3.bf16.msra.mxu0 %v15501_v54  ;;  %13497 = vmatpush3.bf16.msra.mxu1 %v15504_v60  ;;  %v655_v54 = vrot.slane %v653_v47, 1 }
 0x13b   : > { %13030 = vmatprep.subr.bf16.mxu0 %v20790_v0  ;;  %13498 = vmatprep.subr.bf16.mxu1 %v20790_v0 }
 0x13c   : > { %v656_v60 = vsel %vm612_vm1, %v651_v52, %v655_v54  ;;  %v17175_v54 = vld [vmem:[%s16930_s12 + $0x20] sm:$0xff]  }
 0x13d   : > { %13011 = vmatmul.mubr.bf16.gmra.mrb[4].mxu0 %v632_v63  ;;  %13479 = vmatmul.mubr.bf16.gmra.mrb[4].mxu1 %v3044_v5  ;;  %v909_v63 = vld [vmem:[%s16922_s9] sm:$0xe] }
 0x13e   : > { %13031 = vmatpush3.bf16.msra.mxu0 %v15505_v62  ;;  %13499 = vmatpush3.bf16.msra.mxu1 %v15506_v1  ;;  %v3071_v62 = vsel %vm20810_vm2, %v3061_v38, %v3070_v56  ;;  %v11651_v1 = vcombine.low %v909_v63, %v16970_v13  ;;  %v15524_v5 = vld [vmem:[#allocation10 + $0x80] sm:$0xff]   ;;  %v3231_v13 = vsel %vm20808_vm4, %v3229_v2, %v3230_v3  ;;  %v3435_v56 = vrot.slane %v17165_v44, 2 }
 0x13f   : > { %13014 = vmatprep.mubr.msk.bf16.mxu0 %vm20811_vm0, %v20790_v0  ;;  %13032 = vmatprep.subr.bf16.mxu0 %v20790_v0 }
 0x140   : > { %13482 = vmatprep.mubr.msk.bf16.mxu1 %vm20811_vm0, %v20790_v0  ;;  %13500 = vmatprep.subr.bf16.mxu1 %v20790_v0  ;;  %v931_v17 = vrot.slane %v11651_v1, 1  ;;  %v3436_v63 = vsel %vm20808_vm4, %v3433_v39, %v3435_v56  ;;  %v15549_v1 = vld [vmem:[#allocation10 + $0x410] sm:$0xff]  }
 0x142   : > { %13033 = vmatpush3.bf16.msra.mxu0 %v15508_v11  ;;  %13501 = vmatpush3.bf16.msra.mxu1 %v15510_v12  ;;  %v17102_v4 = vsel %vm20809_vm3, %v931_v17, %v932_v35  ;;  %v15528_v11 = vld [vmem:[#allocation10 + $0x90] sm:$0xff]   ;;  %v15550_v17 = vld [vmem:[#allocation10 + $0xd8] sm:$0xff]  }
 0x143   : > { %13034 = vmatprep.subr.bf16.mxu0 %v20790_v0  ;;  %13502 = vmatprep.subr.bf16.mxu1 %v20790_v0  ;;  %v15529_v12 = vld [vmem:[#allocation10 + $0x3d0] sm:$0xff]  }
 0x145   : > { %13015 = vmatmul.mubr.bf16.gmra.mrb[8].mxu0 %v640_v23  ;;  %13483 = vmatmul.mubr.bf16.gmra.mrb[8].mxu1 %v3053_v27  ;;  %v3236_v23 = vrot.slane %v17035_v7, 2  ;;  %v15536_v27 = vld [vmem:[#allocation10 + $0xb0] sm:$0xff]   ;;  %v15538_v7 = vld [vmem:[#allocation10 + $0xb8] sm:$0xff]  }
 0x146   : > { %13035 = vmatpush3.bf16.msra.mxu0 %v15511_v24  ;;  %13018 = vmatprep.mubr.msk.bf16.mxu0 %vm20811_vm0, %v20790_v0  ;;  %v15535_v24 = vld [vmem:[#allocation10 + $0x3e8] sm:$0xff]  }
 0x147   : > { %13486 = vmatprep.mubr.msk.bf16.mxu1 %vm20811_vm0, %v20790_v0  ;;  %13503 = vmatpush3.bf16.msra.mxu1 %v15512_v30  ;;  %v3237_v25 = vsel %vm20808_vm4, %v3234_v16, %v3236_v23  ;;  %v15539_v30 = vld [vmem:[#allocation10 + $0x3f8] sm:$0xff]   ;;  %v3239_v34 = vsel %vm20808_vm4, %v3236_v23, %v3238_v29 }
 0x148   : > { %13036 = vmatprep.subr.bf16.mxu0 %v20790_v0  ;;  %13504 = vmatprep.subr.bf16.mxu1 %v20790_v0 }
 0x14a   : > { %13037 = vmatpush3.bf16.msra.mxu0 %v15515_v33  ;;  %v3377_v33 = vld [vmem:[%s16930_s12 + $0xc] sm:$0xf] }
 0x14b   : > { %13038 = vmatprep.subr.bf16.mxu0 %v20790_v0  ;;  %13505 = vmatpush3.bf16.msra.mxu1 %v15516_v42  ;;  %v17149_v35 = vcombine.low %v3376_v32, %v3377_v33  ;;  %v15543_v42 = vld [vmem:[#allocation10 + $0xc0] sm:$0xff]  }
 0x14c   : > { %13506 = vmatprep.subr.bf16.mxu1 %v20790_v0 }
 0x14d   : > { %13019 = vmatmul.mubr.bf16.gmra.mrb[12].mxu0 %v648_v45  ;;  %13487 = vmatmul.mubr.bf16.gmra.mrb[12].mxu1 %v3062_v48  ;;  %v3432_v38 = vrot.slane %v17149_v35, 2  ;;  %v11810_v45 = vcombine.low %v3789_v41, %v3377_v33  ;;  %v15544_v48 = vld [vmem:[#allocation10 + $0x400] sm:$0xff]   ;;  %v15558_v33 = vld [vmem:[#allocation10 + $0xf0] sm:$0xff]   ;;  %v3609_v41 = vshrl.u32 %v17152_v26, 16 }
 0x14e   : > { %13022 = vmatprep.mubr.msk.bf16.mxu0 %vm20811_vm0, %v20790_v0  ;;  %13039 = vmatpush3.bf16.msra.mxu0 %v15517_v46  ;;  %v3811_v46 = vrot.slane %v17152_v26, 3 }
 0x14f   : > { %13490 = vmatprep.mubr.msk.bf16.mxu1 %vm20811_vm0, %v20790_v0  ;;  %13507 = vmatpush3.bf16.msra.mxu1 %v15520_v51  ;;  %v3434_v47 = vsel %vm20808_vm4, %v3432_v38, %v3433_v39  ;;  %v3810_v49 = vrot.slane %v11810_v45, 3  ;;  %v15545_v51 = vld [vmem:[#allocation10 + $0xc8] sm:$0xff]   ;;  %v15560_v38 = vld [vmem:[#allocation10 + $0x430] sm:$0xff]   ;;  %v3604_v39 = vshll.u32 %v17149_v35, 16  ;;  %v15561_v45 = vld [vmem:[#allocation10 + $0xf8] sm:$0xff]  }
 0x150   : > { %13040 = vmatprep.subr.bf16.mxu0 %v20790_v0  ;;  %13508 = vmatprep.subr.bf16.mxu1 %v20790_v0 }
 0x151   : > { %v17172_v52 = vsel %vm20803_vm5, %v3810_v49, %v3811_v46  ;;  %v3606_v49 = vrot.slane %v3604_v39, 3 }
 0x152   : > { %13041 = vmatpush3.bf16.msra.mxu0 %v15521_v55  ;;  %v17178_v55 = vsel %vm20803_vm5, %v3811_v46, %v3813_v50  ;;  %v1078_v46 = vld [vmem:[%s16922_s9 + $0x4] sm:$0xe] }
 0x153   : > { %13509 = vmatpush3.bf16.msra.mxu1 %v15522_v59  ;;  %13062 = vmatprep.subr.bf16.mxu0 %v20790_v0  ;;  %v3815_v59 = vrot.slane %v17175_v54, 3 }
 0x154   : > { %13530 = vmatprep.subr.bf16.mxu1 %v20790_v0 }
 0x155   : > { %13023 = vmatmul.mubr.bf16.gmra.mrb[16].mxu0 %v656_v60  ;;  %13491 = vmatmul.mubr.bf16.gmra.mrb[16].mxu1 %v3071_v62  ;;  %v17189_v60 = vld [vmem:[%s16930_s12 + $0x28] sm:$0xff]   ;;  %v17192_v62 = vsel %vm20803_vm5, %v3813_v50, %v3815_v59 }
 0x156   : > { %13042 = vmatprep.mubr.msk.bf16.mxu0 %vm20811_vm0, %v20790_v0  ;;  %13510 = vmatprep.mubr.msk.bf16.mxu1 %vm20811_vm0, %v20790_v0  ;;  %v3817_v2 = vrot.slane %v17189_v60, 3 }
 0x15d   : > { %13043 = vmatmul.mubr.bf16.vlgmr.msra.gmra.mrb[0].mxu0 %v16973_v14  ;;  %13511 = vmatmul.mubr.bf16.vlgmr.msra.gmra.mrb[20].mxu1 %v3231_v13  ;;  %v3233_v14 = vsel %vm20808_vm4, %v3230_v3, %v3232_v21  ;;  %v936_v3 = vrot.slane %v17019_v57, 1  ;;  %v15552_v13 = vld [vmem:[#allocation10 + $0x418] sm:$0xff]  }
 0x15e   : > { %13063 = vmatpush3.bf16.msra.mxu0 %v15524_v5  ;;  %13531 = vmatpush3.bf16.msra.mxu1 %v15525_v6  ;;  %v3437_v5 = vrot.slane %v17175_v54, 2  ;;  %v17216_v6 = vld [vmem:[%s16922_s9 + $0xc] sm:$0xff]  }
 0x15f   : > { %13064 = vmatprep.subr.bf16.mxu0 %v20790_v0  ;;  %13046 = vmatprep.mubr.msk.bf16.mxu0 %vm20811_vm0, %v20790_v0 }
 0x160   : > { %13514 = vmatprep.mubr.msk.bf16.mxu1 %vm20811_vm0, %v20790_v0  ;;  %13532 = vmatprep.subr.bf16.mxu1 %v20790_v0 }
 0x162   : > { %13065 = vmatpush3.bf16.msra.mxu0 %v15526_v9  ;;  %13533 = vmatpush3.bf16.msra.mxu1 %v15527_v10  ;;  %v17219_v9 = vld [vmem:[%s16922_s9 + $0x14] sm:$0xff]   ;;  %v1492_v10 = vld [vmem:[%s16922_s9 + $0x4] sm:$0xc] }
 0x163   : > { %13066 = vmatprep.subr.bf16.mxu0 %v20790_v0  ;;  %13534 = vmatprep.subr.bf16.mxu1 %v20790_v0 }
 0x165   : > { %13047 = vmatmul.mubr.bf16.gmra.mrb[4].mxu0 %v16976_v15  ;;  %13515 = vmatmul.mubr.bf16.gmra.mrb[24].mxu1 %v3233_v14  ;;  %v3235_v15 = vsel %vm20808_vm4, %v3232_v21, %v3234_v16  ;;  %v937_v21 = vsel %vm20809_vm3, %v934_v37, %v936_v3  ;;  %v15554_v14 = vld [vmem:[#allocation10 + $0x420] sm:$0xff]   ;;  %v1515_v16 = vrot.slane %v17216_v6, 2 }
 0x166   : > { %13067 = vmatpush3.bf16.msra.mxu0 %v15528_v11  ;;  %13535 = vmatpush3.bf16.msra.mxu1 %v15529_v12  ;;  %v3438_v11 = vsel %vm20808_vm4, %v3435_v56, %v3437_v5  ;;  %v938_v12 = vrot.slane %v17039_v8, 1  ;;  %v17236_v37 = vld [vmem:[%s16922_s9 + $0x24] sm:$0xff]  }
 0x167   : > { %13050 = vmatprep.mubr.msk.bf16.mxu0 %vm20811_vm0, %v20790_v0  ;;  %13068 = vmatprep.subr.bf16.mxu0 %v20790_v0 }
 0x168   : > { %13518 = vmatprep.mubr.msk.bf16.mxu1 %vm20811_vm0, %v20790_v0  ;;  %13536 = vmatprep.subr.bf16.mxu1 %v20790_v0  ;;  %v939_v29 = vsel %vm20809_vm3, %v936_v3, %v938_v12  ;;  %v3621_v3 = vshll.u32 %v17165_v44, 16 }
 0x16a   : > { %13069 = vmatpush3.bf16.msra.mxu0 %v15530_v36  ;;  %13537 = vmatpush3.bf16.msra.mxu1 %v15531_v18  ;;  %v17232_v18 = vld [vmem:[%s16922_s9 + $0x1c] sm:$0xff]  }
 0x16b   : > { %13070 = vmatprep.subr.bf16.mxu0 %v20790_v0  ;;  %13538 = vmatprep.subr.bf16.mxu1 %v20790_v0 }
 0x16d   : > { %13051 = vmatmul.mubr.bf16.gmra.mrb[8].mxu0 %v17003_v40  ;;  %13519 = vmatmul.mubr.bf16.gmra.mrb[28].mxu1 %v3235_v15  ;;  %v1517_v40 = vrot.slane %v17219_v9, 2  ;;  %v15556_v15 = vld [vmem:[#allocation10 + $0xe8] sm:$0xff]  }
 0x16e   : > { %13071 = vmatpush3.bf16.msra.mxu0 %v15532_v19  ;;  %13054 = vmatprep.mubr.msk.bf16.mxu0 %vm20811_vm0, %v20790_v0 }
 0x16f   : > { %13522 = vmatprep.mubr.msk.bf16.mxu1 %vm20811_vm0, %v20790_v0  ;;  %13539 = vmatpush3.bf16.msra.mxu1 %v15533_v22  ;;  %v1519_v22 = vrot.slane %v17232_v18, 2 }
 0x170   : > { %13072 = vmatprep.subr.bf16.mxu0 %v20790_v0  ;;  %13540 = vmatprep.subr.bf16.mxu1 %v20790_v0 }
 0x172   : > { %13073 = vmatpush3.bf16.msra.mxu0 %v15534_v53  ;;  %v3439_v53 = vrot.slane %v17189_v60, 2 }
 0x173   : > { %13074 = vmatprep.subr.bf16.mxu0 %v20790_v0  ;;  %13541 = vmatpush3.bf16.msra.mxu1 %v15535_v24  ;;  %v1521_v24 = vrot.slane %v17236_v37, 2 }
 0x174   : > { %13542 = vmatprep.subr.bf16.mxu1 %v20790_v0  ;;  %v3440_v32 = vsel %vm20808_vm4, %v3437_v5, %v3439_v53  ;;  %v15565_v5 = vld [vmem:[#allocation10 + $0x100] sm:$0xff]  }
 0x175   : > { %13055 = vmatmul.mubr.bf16.gmra.mrb[12].mxu0 %v17019_v57  ;;  %13523 = vmatmul.mubr.bf16.gmra.mrb[32].mxu1 %v3237_v25  ;;  %v15553_v57 = vld [vmem:[#allocation10 + $0xe0] sm:$0xff]   ;;  %v15557_v25 = vld [vmem:[#allocation10 + $0x428] sm:$0xff]  }
 0x176   : > { %13058 = vmatprep.mubr.msk.bf16.mxu0 %vm20811_vm0, %v20790_v0  ;;  %13075 = vmatpush3.bf16.msra.mxu0 %v15536_v27  ;;  %v15559_v27 = vld [vmem:[%s16930_s12 + $0x30] ss:$0 sps:$4 sm:$0x33]  }
 0x177   : > { %13526 = vmatprep.mubr.msk.bf16.mxu1 %vm20811_vm0, %v20790_v0  ;;  %13543 = vmatpush3.bf16.msra.mxu1 %v15537_v28  ;;  %v17254_v28 = vsel %vm20808_vm4, %v1517_v40, %v1519_v22 }
 0x178   : > { %13076 = vmatprep.subr.bf16.mxu0 %v20790_v0  ;;  %13544 = vmatprep.subr.bf16.mxu1 %v20790_v0 }
 0x17a   : > { %13077 = vmatpush3.bf16.msra.mxu0 %v15538_v7  ;;  %v17260_v7 = vsel %vm20808_vm4, %v1519_v22, %v1521_v24 }
 0x17b   : > { %13545 = vmatpush3.bf16.msra.mxu1 %v15539_v30  ;;  %13098 = vmatprep.subr.bf16.mxu0 %v20790_v0  ;;  %v940_v30 = vrot.slane %v17059_v31, 1  ;;  %v3441_v31 = vrot.slane %v15559_v27, 2  ;;  %v3636_v27 = vshrl.u32 %v17189_v60, 16 }
 0x17c   : > { %13566 = vmatprep.subr.bf16.mxu1 %v20790_v0 }
 0x17d   : > { %13059 = vmatmul.mubr.bf16.gmra.mrb[16].mxu0 %v17039_v8  ;;  %13527 = vmatmul.mubr.bf16.gmra.mrb[36].mxu1 %v3239_v34  ;;  %v17239_v8 = vsel %vm20808_vm4, %v1515_v16, %v1517_v40  ;;  %v3601_v34 = vshrl.u32 %v17149_v35, 16  ;;  %v15562_v35 = vld [vmem:[#allocation10 + $0x438] sm:$0xff]   ;;  %v3442_v50 = vsel %vm20808_vm4, %v3439_v53, %v3441_v31  ;;  %v15576_v31 = vld [vmem:[#allocation10 + $0x460] sm:$0xff]  }
 0x17e   : > { %13078 = vmatprep.mubr.msk.bf16.mxu0 %vm20811_vm0, %v20790_v0  ;;  %13546 = vmatprep.mubr.msk.bf16.mxu1 %vm20811_vm0, %v20790_v0  ;;  %v15573_v53 = vld [vmem:[#allocation10 + $0x118] sm:$0xff]  }
 0x185   : > { %13079 = vmatmul.mubr.bf16.vlgmr.msra.gmra.mrb[0].mxu0 %v17102_v4  ;;  %13547 = vmatmul.mubr.bf16.vlgmr.msra.gmra.mrb[40].mxu1 %v3434_v47  ;;  %v17203_v4 = vsel %vm20803_vm5, %v3815_v59, %v3817_v2  ;;  %v941_v47 = vsel %vm20809_vm3, %v938_v12, %v940_v30  ;;  %v1135_v59 = vrot.slane %v17216_v6, 1  ;;  %v15569_v12 = vld [vmem:[#allocation10 + $0x448] sm:$0xff]   ;;  %v15574_v30 = vld [vmem:[#allocation10 + $0x458] sm:$0xff]  }
 0x186   : > { %13099 = vmatpush3.bf16.msra.mxu0 %v15543_v42  ;;  %13567 = vmatpush3.bf16.msra.mxu1 %v15544_v48  ;;  %v3612_v42 = vshll.u32 %v17152_v26, 16  ;;  %v3603_v48 = vrot.slane %v3601_v34, 2 }
 0x187   : > { %13100 = vmatprep.subr.bf16.mxu0 %v20790_v0  ;;  %13082 = vmatprep.mubr.msk.bf16.mxu0 %vm20811_vm0, %v20790_v0 }
 0x188   : > { %13550 = vmatprep.mubr.msk.bf16.mxu1 %vm20811_vm0, %v20790_v0  ;;  %13568 = vmatprep.subr.bf16.mxu1 %v20790_v0  ;;  %v3614_v56 = vrot.slane %v3612_v42, 3 }
 0x18a   : > { %13101 = vmatpush3.bf16.msra.mxu0 %v15545_v51  ;;  %13569 = vmatpush3.bf16.msra.mxu1 %v15547_v58  ;;  %v3611_v51 = vrot.slane %v3609_v41, 2  ;;  %v3638_v41 = vrot.slane %v3636_v27, 2  ;;  %v15589_v27 = vld [vmem:[#allocation10 + $0x148] sm:$0xff]  }
 0x18b   : > { %13102 = vmatprep.subr.bf16.mxu0 %v20790_v0  ;;  %13570 = vmatprep.subr.bf16.mxu1 %v20790_v0 }
 0x18d   : > { %13083 = vmatmul.mubr.bf16.gmra.mrb[4].mxu0 %v17073_v43  ;;  %13551 = vmatmul.mubr.bf16.gmra.mrb[44].mxu1 %v3436_v63  ;;  %v17212_v43 = vld [vmem:[%s16922_s9 + $0x8] sm:$0xf]  ;;  %v3615_v63 = vor.u32 %v3614_v56, %v3611_v51  ;;  %v15580_v56 = vld [vmem:[#allocation10 + $0x130] sm:$0xff]  }
 0x18e   : > { %13103 = vmatpush3.bf16.msra.mxu0 %v15548_v61  ;;  %13571 = vmatpush3.bf16.msra.mxu1 %v15549_v1  ;;  %v11683_v36 = vcombine.low %v1492_v10, %v17212_v43  ;;  %v17280_v26 = vcombine.low %v1078_v46, %v17212_v43  ;;  %v3607_v61 = vor.u32 %v3606_v49, %v3603_v48  ;;  %v3618_v1 = vshrl.u32 %v17165_v44, 16  ;;  %v15567_v10 = vld [vmem:[#allocation10 + $0x108] sm:$0xff]  }
 0x18f   : > { %13086 = vmatprep.mubr.msk.bf16.mxu0 %vm20811_vm0, %v20790_v0  ;;  %13104 = vmatprep.subr.bf16.mxu0 %v20790_v0  ;;  %v15578_v46 = vld [vmem:[#allocation10 + $0x128] sm:$0xff]  }
 0x190   : > { %13554 = vmatprep.mubr.msk.bf16.mxu1 %vm20811_vm0, %v20790_v0  ;;  %13572 = vmatprep.subr.bf16.mxu1 %v20790_v0  ;;  %v1514_v19 = vrot.slane %v11683_v36, 2  ;;  %v1134_v58 = vrot.slane %v17280_v26, 1  ;;  %v3620_v43 = vrot.slane %v3618_v1, 2  ;;  %v3630_v36 = vshll.u32 %v17175_v54, 16 }
 0x192   : > { %13105 = vmatpush3.bf16.msra.mxu0 %v15550_v17  ;;  %13573 = vmatpush3.bf16.msra.mxu1 %v15552_v13  ;;  %v17248_v23 = vsel %vm20808_vm4, %v1514_v19, %v1515_v16  ;;  %v1136_v17 = vsel %vm20809_vm3, %v1134_v58, %v1135_v59  ;;  %v3616_v13 = vsel %vm20805_vm6, %v3607_v61, %v3615_v63  ;;  %v15570_v16 = vld [vmem:[#allocation10 + $0x110] sm:$0xff]  }
 0x193   : > { %13106 = vmatprep.subr.bf16.mxu0 %v20790_v0  ;;  %13574 = vmatprep.subr.bf16.mxu1 %v20790_v0  ;;  %v15571_v19 = vld [vmem:[#allocation10 + $0x450] sm:$0xff]  }
 0x194   : > { %v15583_v58 = vld [vmem:[#allocation10 + $0x470] sm:$0xff]  }
 0x195   : > { %13087 = vmatmul.mubr.bf16.gmra.mrb[8].mxu0 %v937_v21  ;;  %13555 = vmatmul.mubr.bf16.gmra.mrb[48].mxu1 %v3438_v11  ;;  %v3623_v21 = vrot.slane %v3621_v3, 3  ;;  %v1137_v11 = vrot.slane %v17219_v9, 1 }
 0x196   : > { %13107 = vmatpush3.bf16.msra.mxu0 %v15553_v57  ;;  %13090 = vmatprep.mubr.msk.bf16.mxu0 %vm20811_vm0, %v20790_v0  ;;  %v15566_v57 = vld [vmem:[#allocation10 + $0x440] sm:$0xff]  }
 0x197   : > { %13558 = vmatprep.mubr.msk.bf16.mxu1 %vm20811_vm0, %v20790_v0  ;;  %13575 = vmatpush3.bf16.msra.mxu1 %v15554_v14  ;;  %v3627_v14 = vshrl.u32 %v17175_v54, 16  ;;  %v3624_v44 = vor.u32 %v3623_v21, %v3620_v43  ;;  %v1138_v40 = vsel %vm20809_vm3, %v1135_v59, %v1137_v11  ;;  %v3632_v54 = vrot.slane %v3630_v36, 3  ;;  %v15584_v43 = vld [vmem:[#allocation10 + $0x138] sm:$0xff]  }
 0x198   : > { %13108 = vmatprep.subr.bf16.mxu0 %v20790_v0  ;;  %13576 = vmatprep.subr.bf16.mxu1 %v20790_v0  ;;  %v1304_v59 = vshrl.u32 %v17280_v26, 16  ;;  %v1324_v36 = vshll.u32 %v17219_v9, 16 }
 0x199   : > { %v3629_v22 = vrot.slane %v3627_v14, 2 }
 0x19a   : > { %13109 = vmatpush3.bf16.msra.mxu0 %v15556_v15  ;;  %v3625_v15 = vsel %vm20805_vm6, %v3615_v63, %v3624_v44  ;;  %v1306_v21 = vrot.slane %v1304_v59, 1  ;;  %v15598_v59 = vld [vmem:[#allocation10 + $0x4a8] sm:$0xff]  }
 0x19b   : > { %13110 = vmatprep.subr.bf16.mxu0 %v20790_v0  ;;  %13577 = vmatpush3.bf16.msra.mxu1 %v15557_v25  ;;  %v1139_v25 = vrot.slane %v17232_v18, 1 }
 0x19c   : > { %13578 = vmatprep.subr.bf16.mxu1 %v20790_v0 }
 0x19d   : > { %13091 = vmatmul.mubr.bf16.gmra.mrb[12].mxu0 %v939_v29  ;;  %13559 = vmatmul.mubr.bf16.gmra.mrb[52].mxu1 %v3440_v32  ;;  %v3633_v29 = vor.u32 %v3632_v54, %v3629_v22  ;;  %v3639_v32 = vshll.u32 %v17189_v60, 16  ;;  %v1140_v34 = vsel %vm20809_vm3, %v1137_v11, %v1139_v25  ;;  %v1326_v54 = vrot.slane %v1324_v36, 2  ;;  %v15606_v60 = vld [vmem:[#allocation10 + $0x180] sm:$0xff]  }
 0x19e   : > { %13094 = vmatprep.mubr.msk.bf16.mxu0 %vm20811_vm0, %v20790_v0  ;;  %13111 = vmatpush3.bf16.msra.mxu0 %v15558_v33  ;;  %v17317_v33 = vld [vmem:[%s16930_s12 + $0x30] ss:$0 sps:$4 sm:$0x77]  }
 0x19f   : > { %13562 = vmatprep.mubr.msk.bf16.mxu1 %vm20811_vm0, %v20790_v0  ;;  %13579 = vmatpush3.bf16.msra.mxu1 %v15560_v38  ;;  %v15575_v38 = vld [vmem:[#allocation10 + $0x120] sm:$0xff]   ;;  %v3634_v39 = vsel %vm20805_vm6, %v3624_v44, %v3633_v29  ;;  %v3641_v42 = vrot.slane %v3639_v32, 3  ;;  %v3645_v48 = vshrl.u32 %v17317_v33, 16  ;;  %v3648_v49 = vshll.u32 %v17317_v33, 16  ;;  %v15591_v32 = vld [vmem:[#allocation10 + $0x150] sm:$0xff]  }
 0x1a0   : > { %13112 = vmatprep.subr.bf16.mxu0 %v20790_v0  ;;  %13580 = vmatprep.subr.bf16.mxu1 %v20790_v0 }
 0x1a1   : > { %v3647_v63 = vrot.slane %v3645_v48, 2  ;;  %v3650_v1 = vrot.slane %v3648_v49, 3  ;;  %v15596_v49 = vld [vmem:[#allocation10 + $0x4a0] sm:$0xff]  }
 0x1a2   : > { %13113 = vmatpush3.bf16.msra.mxu0 %v15561_v45  ;;  %v1141_v45 = vrot.slane %v17236_v37, 1 }
 0x1a3   : > { %13581 = vmatpush3.bf16.msra.mxu1 %v15562_v35  ;;  %13134 = vmatprep.subr.bf16.mxu0 %v20790_v0  ;;  %v15579_v35 = vld [vmem:[#allocation10 + $0x468] sm:$0xff]  }
 0x1a4   : > { %13602 = vmatprep.subr.bf16.mxu1 %v20790_v0  ;;  %v1142_v51 = vsel %vm20809_vm3, %v1139_v25, %v1141_v45  ;;  %v1333_v25 = vshll.u32 %v17232_v18, 16 }
 0x1a5   : > { %13095 = vmatmul.mubr.bf16.gmra.mrb[16].mxu0 %v941_v47  ;;  %13563 = vmatmul.mubr.bf16.gmra.mrb[56].mxu1 %v3442_v50  ;;  %v15581_v47 = vld [vmem:[%s16922_s9 + $0x2c] ss:$0 sps:$4 sm:$0x11]   ;;  %v3642_v50 = vor.u32 %v3641_v42, %v3638_v41  ;;  %v1339_v42 = vshrl.u32 %v17236_v37, 16 }
 0x1a6   : > { %13114 = vmatprep.mubr.msk.bf16.mxu0 %vm20811_vm0, %v20790_v0  ;;  %13582 = vmatprep.mubr.msk.bf16.mxu1 %vm20811_vm0, %v20790_v0  ;;  %v1143_v3 = vrot.slane %v15581_v47, 1 }
 0x1a7   : > { %v3643_v61 = vsel %vm20805_vm6, %v3633_v29, %v3642_v50  ;;  %v1341_v47 = vrot.slane %v1339_v42, 1 }
 0x1a8   : > { %v1144_v14 = vsel %vm20809_vm3, %v1141_v45, %v1143_v3  ;;  %v15594_v45 = vld [vmem:[#allocation10 + $0x498] sm:$0xff]   ;;  %v15601_v3 = vld [vmem:[#allocation10 + $0x4b0] sm:$0xff]  }
 0x1ad   : > { %13115 = vmatmul.mubr.bf16.vlgmr.msra.gmra.mrb[0].mxu0 %v1136_v17  ;;  %13583 = vmatmul.mubr.bf16.vlgmr.msra.gmra.mrb[60].mxu1 %v3616_v13  ;;  %v1307_v17 = vshll.u32 %v17280_v26, 16  ;;  %v1315_v13 = vshll.u32 %v17216_v6, 16  ;;  %v15585_v26 = vld [vmem:[#allocation10 + $0x478] sm:$0xff]  }
 0x1ae   : > { %13135 = vmatpush3.bf16.msra.mxu0 %v15565_v5  ;;  %13603 = vmatpush3.bf16.msra.mxu1 %v15566_v57  ;;  %v1312_v5 = vshrl.u32 %v17216_v6, 16  ;;  %v3651_v57 = vor.u32 %v3650_v1, %v3647_v63 }
 0x1af   : > { %13136 = vmatprep.subr.bf16.mxu0 %v20790_v0  ;;  %13118 = vmatprep.mubr.msk.bf16.mxu0 %vm20811_vm0, %v20790_v0  ;;  %v1317_v6 = vrot.slane %v1315_v13, 2  ;;  %v15602_v13 = vld [vmem:[#allocation10 + $0x178] sm:$0xff]  }
 0x1b0   : > { %13586 = vmatprep.mubr.msk.bf16.mxu1 %vm20811_vm0, %v20790_v0  ;;  %13604 = vmatprep.subr.bf16.mxu1 %v20790_v0  ;;  %v1314_v11 = vrot.slane %v1312_v5, 1  ;;  %v3652_v44 = vsel %vm20805_vm6, %v3642_v50, %v3651_v57  ;;  %v3819_v5 = vrot.slane %v17317_v33, 3  ;;  %v15603_v57 = vld [vmem:[#allocation10 + $0x4b8] sm:$0xff]   ;;  %v3967_v33 = vld [vmem:[%s16937_s22] sm:$0xf] }
 0x1b2   : > { %13137 = vmatpush3.bf16.msra.mxu0 %v15567_v10  ;;  %13605 = vmatpush3.bf16.msra.mxu1 %v15569_v12  ;;  %v1309_v10 = vrot.slane %v1307_v17, 2  ;;  %v1321_v12 = vshrl.u32 %v17219_v9, 16  ;;  %v1330_v9 = vshrl.u32 %v17232_v18, 16 }
 0x1b3   : > { %13138 = vmatprep.subr.bf16.mxu0 %v20790_v0  ;;  %13606 = vmatprep.subr.bf16.mxu1 %v20790_v0 }
 0x1b4   : > { %v1323_v22 = vrot.slane %v1321_v12, 1  ;;  %v1332_v18 = vrot.slane %v1330_v9, 1  ;;  %v15615_v12 = vld [vmem:[#allocation10 + $0x558] sm:$0xff]  }
 0x1b5   : > { %13119 = vmatmul.mubr.bf16.gmra.mrb[4].mxu0 %v1138_v40  ;;  %13587 = vmatmul.mubr.bf16.gmra.mrb[64].mxu1 %v3625_v15  ;;  %v1318_v40 = vor.u32 %v1317_v6, %v1314_v11  ;;  %v15588_v15 = vld [vmem:[#allocation10 + $0x480] sm:$0xff]   ;;  %v15610_v11 = vld [vmem:[#allocation10 + $0x548] sm:$0xff]  }
 0x1b6   : > { %13139 = vmatpush3.bf16.msra.mxu0 %v15570_v16  ;;  %13607 = vmatpush3.bf16.msra.mxu1 %v15571_v19  ;;  %v1310_v16 = vor.u32 %v1309_v10, %v1306_v21  ;;  %v15587_v19 = vld [vmem:[#allocation10 + $0x140] sm:$0xff]   ;;  %v1327_v29 = vor.u32 %v1326_v54, %v1323_v22  ;;  %v15608_v10 = vld [vmem:[#allocation10 + $0x188] sm:$0xff]  }
 0x1b7   : > { %13122 = vmatprep.mubr.msk.bf16.mxu0 %vm20811_vm0, %v20790_v0  ;;  %13140 = vmatprep.subr.bf16.mxu0 %v20790_v0  ;;  %v15609_v6 = vld [vmem:[%s16937_s22 + $0x8] sm:$0xff]   ;;  %v15617_v22 = vld [vmem:[#allocation10 + $0x560] sm:$0xff]  }
 0x1b8   : > { %13590 = vmatprep.mubr.msk.bf16.mxu1 %vm20811_vm0, %v20790_v0  ;;  %13608 = vmatprep.subr.bf16.mxu1 %v20790_v0  ;;  %v15619_v54 = vld [vmem:[#allocation10 + $0x1a8] sm:$0xff]  }
 0x1ba   : > { %13141 = vmatpush3.bf16.msra.mxu0 %v15573_v53  ;;  %13609 = vmatpush3.bf16.msra.mxu1 %v15574_v30  ;;  %v1319_v53 = vsel %vm20810_vm2, %v1310_v16, %v1318_v40  ;;  %v15590_v30 = vld [vmem:[#allocation10 + $0x488] sm:$0xff]   ;;  %v15614_v16 = vld [vmem:[%s16937_s22 + $0x10] sm:$0xff]  }
 0x1bb   : > { %13142 = vmatprep.subr.bf16.mxu0 %v20790_v0  ;;  %13610 = vmatprep.subr.bf16.mxu1 %v20790_v0 }
 0x1bd   : > { %13123 = vmatmul.mubr.bf16.gmra.mrb[8].mxu0 %v1140_v34  ;;  %13591 = vmatmul.mubr.bf16.gmra.mrb[68].mxu1 %v3634_v39  ;;  %v1335_v34 = vrot.slane %v1333_v25, 2  ;;  %v15593_v39 = vld [vmem:[#allocation10 + $0x158] sm:$0xff]  }
 0x1be   : > { %13143 = vmatpush3.bf16.msra.mxu0 %v15575_v38  ;;  %13126 = vmatprep.mubr.msk.bf16.mxu0 %vm20811_vm0, %v20790_v0  ;;  %v15592_v38 = vld [vmem:[#allocation10 + $0x490] sm:$0xff]  }
 0x1bf   : > { %13594 = vmatprep.mubr.msk.bf16.mxu1 %vm20811_vm0, %v20790_v0  ;;  %13611 = vmatpush3.bf16.msra.mxu1 %v15576_v31  ;;  %v1336_v41 = vor.u32 %v1335_v34, %v1332_v18  ;;  %v1342_v31 = vshll.u32 %v17236_v37, 16  ;;  %v15624_v34 = vld [vmem:[#allocation10 + $0x1b8] sm:$0xff]  }
 0x1c0   : > { %13144 = vmatprep.subr.bf16.mxu0 %v20790_v0  ;;  %13612 = vmatprep.subr.bf16.mxu1 %v20790_v0 }
 0x1c1   : > { %v1344_v48 = vrot.slane %v1342_v31, 2 }
 0x1c2   : > { %13145 = vmatpush3.bf16.msra.mxu0 %v15578_v46  ;;  %v17377_v46 = vld [vmem:[%s16922_s9 + $0x2c] ss:$0 sps:$4 sm:$0x33]  }
 0x1c3   : > { %13146 = vmatprep.subr.bf16.mxu0 %v20790_v0  ;;  %13613 = vmatpush3.bf16.msra.mxu1 %v15579_v35  ;;  %v1337_v35 = vsel %vm20810_vm2, %v1327_v29, %v1336_v41  ;;  %v1348_v50 = vshrl.u32 %v17377_v46, 16  ;;  %v1523_v18 = vrot.slane %v17377_v46, 2 }
 0x1c4   : > { %13614 = vmatprep.subr.bf16.mxu1 %v20790_v0 }
 0x1c5   : > { %13127 = vmatmul.mubr.bf16.gmra.mrb[12].mxu0 %v1142_v51  ;;  %13595 = vmatmul.mubr.bf16.gmra.mrb[72].mxu1 %v3643_v61  ;;  %v1351_v51 = vshll.u32 %v17377_v46, 16  ;;  %v1350_v61 = vrot.slane %v1348_v50, 1  ;;  %v15622_v46 = vld [vmem:[%s16937_s22 + $0x20] sm:$0xff]  }
 0x1c6   : > { %13130 = vmatprep.mubr.msk.bf16.mxu0 %vm20811_vm0, %v20790_v0  ;;  %13147 = vmatpush3.bf16.msra.mxu0 %v15580_v56  ;;  %v1345_v56 = vor.u32 %v1344_v48, %v1341_v47 }
 0x1c7   : > { %13598 = vmatprep.mubr.msk.bf16.mxu1 %vm20811_vm0, %v20790_v0  ;;  %13615 = vmatpush3.bf16.msra.mxu1 %v15583_v58  ;;  %v15597_v58 = vld [vmem:[#allocation10 + $0x168] sm:$0xff]   ;;  %v1353_v63 = vrot.slane %v1351_v51, 2 }
 0x1c8   : > { %13148 = vmatprep.subr.bf16.mxu0 %v20790_v0  ;;  %13616 = vmatprep.subr.bf16.mxu1 %v20790_v0  ;;  %v1346_v1 = vsel %vm20810_vm2, %v1336_v41, %v1345_v56  ;;  %v17472_v41 = vld [vmem:[%s16937_s22 + $0x8] sm:$0xf] }
 0x1c9   : > { %v1354_v17 = vor.u32 %v1353_v63, %v1350_v61 }
 0x1ca   : > { %13149 = vmatpush3.bf16.msra.mxu0 %v15584_v43  ;;  %v3820_v43 = vsel %vm20803_vm5, %v3817_v2, %v3819_v5  ;;  %v15607_v2 = vld [vmem:[#allocation10 + $0x540] sm:$0xff]  }
 0x1cb   : > { %13617 = vmatpush3.bf16.msra.mxu1 %v15585_v26  ;;  %13170 = vmatprep.subr.bf16.mxu0 %v20790_v0  ;;  %v3968_v26 = vld [vmem:[%s16937_s22 + $0x4] sm:$0xf]  ;;  %v17515_v5 = vld [vmem:[%s16937_s22 + $0x14] sm:$0xff]  }
 0x1cc   : > { %13674 = vmatprep.subr.bf16.mxu1 %v20790_v0  ;;  %v17418_v21 = vcombine.low %v3967_v33, %v3968_v26  ;;  %v15635_v33 = vld [vmem:[#allocation10 + $0x5c8] sm:$0xff]  }
 0x1cd   : > { %13131 = vmatmul.mubr.bf16.gmra.mrb[16].mxu0 %v1144_v14  ;;  %13599 = vmatmul.mubr.bf16.gmra.mrb[76].mxu1 %v3652_v44  ;;  %v15611_v14 = vld [vmem:[#allocation10 + $0x190] sm:$0xff]   ;;  %v15613_v44 = vld [vmem:[#allocation10 + $0x198] sm:$0xff]  }
 0x1ce   : > { %13150 = vmatprep.mubr.msk.bf16.mxu0 %vm20811_vm0, %v20790_v0  ;;  %13618 = vmatprep.mubr.msk.bf16.mxu1 %vm20811_vm0, %v20790_v0 }
 0x1d5   : > { %13151 = vmatmul.mubr.bf16.vlgmr.msra.gmra.mrb[0].mxu0 %v1319_v53  ;;  %13619 = vmatmul.mubr.bf16.vlgmr.msra.gmra.mrb[80].mxu1 %v17172_v52  ;;  %v1328_v52 = vsel %vm20810_vm2, %v1318_v40, %v1327_v29  ;;  %v15620_v53 = vld [vmem:[#allocation10 + $0x568] sm:$0xff]   ;;  %v15621_v29 = vld [vmem:[#allocation10 + $0x1b0] sm:$0xff]  }
 0x1d6   : > { %13171 = vmatpush3.bf16.msra.mxu0 %v15587_v19  ;;  %13675 = vmatpush3.bf16.msra.mxu1 %v15588_v15 }
 0x1d7   : > { %13172 = vmatprep.subr.bf16.mxu0 %v20790_v0  ;;  %13154 = vmatprep.mubr.msk.bf16.mxu0 %vm20811_vm0, %v20790_v0 }
 0x1d8   : > { %13622 = vmatprep.mubr.msk.bf16.mxu1 %vm20811_vm0, %v20790_v0  ;;  %13676 = vmatprep.subr.bf16.mxu1 %v20790_v0 }
 0x1da   : > { %13173 = vmatpush3.bf16.msra.mxu0 %v15589_v27  ;;  %13677 = vmatpush3.bf16.msra.mxu1 %v15590_v30 }
 0x1db   : > { %13174 = vmatprep.subr.bf16.mxu0 %v20790_v0  ;;  %13678 = vmatprep.subr.bf16.mxu1 %v20790_v0 }
 0x1dd   : > { %13155 = vmatmul.mubr.bf16.gmra.mrb[4].mxu0 %v1328_v52  ;;  %13623 = vmatmul.mubr.bf16.gmra.mrb[84].mxu1 %v17178_v55  ;;  %v15595_v55 = vld [vmem:[#allocation10 + $0x160] sm:$0xff]   ;;  %v1661_v52 = vld [vmem:[%s16922_s9 + $0x8] sm:$0xc] }
 0x1de   : > { %13175 = vmatpush3.bf16.msra.mxu0 %v15591_v32  ;;  %13679 = vmatpush3.bf16.msra.mxu1 %v15592_v38  ;;  %v15623_v32 = vld [vmem:[#allocation10 + $0x570] sm:$0xff]   ;;  %v15625_v38 = vld [vmem:[#allocation10 + $0x578] sm:$0xff]  }
 0x1df   : > { %13158 = vmatprep.mubr.msk.bf16.mxu0 %vm20811_vm0, %v20790_v0  ;;  %13176 = vmatprep.subr.bf16.mxu0 %v20790_v0 }
 0x1e0   : > { %13626 = vmatprep.mubr.msk.bf16.mxu1 %vm20811_vm0, %v20790_v0  ;;  %13680 = vmatprep.subr.bf16.mxu1 %v20790_v0 }
 0x1e2   : > { %13177 = vmatpush3.bf16.msra.mxu0 %v15593_v39  ;;  %13681 = vmatpush3.bf16.msra.mxu1 %v15594_v45  ;;  %v17467_v39 = vld [vmem:[%s16922_s9 + $0xc] sm:$0xf]  ;;  %v1524_v45 = vsel %vm20808_vm4, %v1521_v24, %v1523_v18  ;;  %v15649_v18 = vld [vmem:[%s16922_s9 + $0x30] ss:$0 sps:$4 sm:$0x33]  }
 0x1e3   : > { %13178 = vmatprep.subr.bf16.mxu0 %v20790_v0  ;;  %13682 = vmatprep.subr.bf16.mxu1 %v20790_v0 }
 0x1e5   : > { %13159 = vmatmul.mubr.bf16.gmra.mrb[8].mxu0 %v1337_v35  ;;  %13627 = vmatmul.mubr.bf16.gmra.mrb[88].mxu1 %v17192_v62  ;;  %v15599_v62 = vld [vmem:[#allocation10 + $0x170] sm:$0xff]  }
 0x1e6   : > { %13179 = vmatpush3.bf16.msra.mxu0 %v15595_v55  ;;  %13162 = vmatprep.mubr.msk.bf16.mxu0 %vm20811_vm0, %v20790_v0  ;;  %v17482_v55 = vcombine.low %v1661_v52, %v17467_v39  ;;  %v17485_v35 = vld [vmem:[%s16922_s9 + $0x10] sm:$0xff]  }
 0x1e7   : > { %13630 = vmatprep.mubr.msk.bf16.mxu1 %vm20811_vm0, %v20790_v0  ;;  %13683 = vmatpush3.bf16.msra.mxu1 %v15596_v49  ;;  %v17493_v49 = vld [vmem:[%s16937_s22 + $0xc] sm:$0xff]   ;;  %v1718_v24 = vrot.slane %v17485_v35, 2 }
 0x1e8   : > { %13180 = vmatprep.subr.bf16.mxu0 %v20790_v0  ;;  %13684 = vmatprep.subr.bf16.mxu1 %v20790_v0  ;;  %v1717_v37 = vrot.slane %v17482_v55, 2 }
 0x1ea   : > { %13181 = vmatpush3.bf16.msra.mxu0 %v15597_v58  ;;  %v1719_v63 = vsel %vm20808_vm4, %v1717_v37, %v1718_v24  ;;  %v15648_v37 = vld [vmem:[#allocation10 + $0x1f0] sm:$0xff]  }
 0x1eb   : > { %13182 = vmatprep.subr.bf16.mxu0 %v20790_v0  ;;  %13685 = vmatpush3.bf16.msra.mxu1 %v15598_v59  ;;  %v15630_v59 = vld [vmem:[#allocation10 + $0x1c0] sm:$0xff]  }
 0x1ec   : > { %13686 = vmatprep.subr.bf16.mxu1 %v20790_v0 }
 0x1ed   : > { %13163 = vmatmul.mubr.bf16.gmra.mrb[12].mxu0 %v1346_v1  ;;  %13631 = vmatmul.mubr.bf16.gmra.mrb[92].mxu1 %v17203_v4  ;;  %v1355_v4 = vsel %vm20810_vm2, %v1345_v56, %v1354_v17  ;;  %v4561_v56 = vrot.slane %v17493_v49, 1  ;;  %v17509_v1 = vld [vmem:[%s16922_s9 + $0x18] sm:$0xff]   ;;  %v15631_v17 = vld [vmem:[#allocation10 + $0x5c0] sm:$0xff]  }
 0x1ee   : > { %13166 = vmatprep.mubr.msk.bf16.mxu0 %vm20811_vm0, %v20790_v0  ;;  %13183 = vmatpush3.bf16.msra.mxu0 %v15599_v62 }
 0x1ef   : > { %13634 = vmatprep.mubr.msk.bf16.mxu1 %vm20811_vm0, %v20790_v0  ;;  %13687 = vmatpush3.bf16.msra.mxu1 %v15601_v3 }
 0x1f0   : > { %13184 = vmatprep.subr.bf16.mxu0 %v20790_v0  ;;  %13688 = vmatprep.subr.bf16.mxu1 %v20790_v0 }
 0x1f2   : > { %13185 = vmatpush3.bf16.msra.mxu0 %v15602_v13 }
 0x1f3   : > { %13689 = vmatpush3.bf16.msra.mxu1 %v15603_v57  ;;  %13206 = vmatprep.subr.bf16.mxu0 %v20790_v0  ;;  %v15632_v57 = vld [vmem:[#allocation10 + $0x1c8] sm:$0xff]  }
 0x1f4   : > { %13746 = vmatprep.subr.bf16.mxu1 %v20790_v0 }
 0x1f5   : > { %13167 = vmatmul.mubr.bf16.gmra.mrb[16].mxu0 %v1355_v4  ;;  %13635 = vmatmul.mubr.bf16.gmra.mrb[96].mxu1 %v3820_v43  ;;  %v1720_v4 = vrot.slane %v17509_v1, 2  ;;  %v4563_v43 = vrot.slane %v17515_v5, 1 }
 0x1f6   : > { %13186 = vmatprep.mubr.msk.bf16.mxu0 %vm20811_vm0, %v20790_v0  ;;  %13690 = vmatprep.mubr.msk.bf16.mxu1 %vm20811_vm0, %v20790_v0 }
 0x1fd   : > { %13187 = vmatmul.mubr.bf16.vlgmr.msra.gmra.mrb[0].mxu0 %v17248_v23  ;;  %13691 = vmatmul.mubr.bf16.vlgmr.msra.gmra.mrb[100].mxu1 %v17418_v21  ;;  %v15612_v23 = vld [vmem:[#allocation10 + $0x550] sm:$0xff]  }
 0x1fe   : > { %13207 = vmatpush3.bf16.msra.mxu0 %v15606_v60  ;;  %13747 = vmatpush3.bf16.msra.mxu1 %v15607_v2  ;;  %v15636_v60 = vld [vmem:[#allocation10 + $0x1d0] sm:$0xff]  }
 0x1ff   : > { %13208 = vmatprep.subr.bf16.mxu0 %v20790_v0  ;;  %13190 = vmatprep.mubr.msk.bf16.mxu0 %vm20811_vm0, %v20790_v0 }
 0x200   : > { %13694 = vmatprep.mubr.msk.bf16.mxu1 %vm20811_vm0, %v20790_v0  ;;  %13748 = vmatprep.subr.bf16.mxu1 %v20790_v0 }
 0x202   : > { %13209 = vmatpush3.bf16.msra.mxu0 %v15608_v10  ;;  %13749 = vmatpush3.bf16.msra.mxu1 %v15610_v11  ;;  %v1721_v10 = vsel %vm20808_vm4, %v1718_v24, %v1720_v4  ;;  %v17529_v11 = vld [vmem:[%s16922_s9 + $0x20] sm:$0xff]   ;;  %v1726_v24 = vrot.slane %v15649_v18, 2 }
 0x203   : > { %13210 = vmatprep.subr.bf16.mxu0 %v20790_v0  ;;  %13750 = vmatprep.subr.bf16.mxu1 %v20790_v0 }
 0x205   : > { %13191 = vmatmul.mubr.bf16.gmra.mrb[4].mxu0 %v17239_v8  ;;  %13695 = vmatmul.mubr.bf16.gmra.mrb[104].mxu1 %v15609_v6  ;;  %v15616_v8 = vld [vmem:[#allocation10 + $0x1a0] sm:$0xff]  }
 0x206   : > { %13211 = vmatpush3.bf16.msra.mxu0 %v15611_v14  ;;  %13751 = vmatpush3.bf16.msra.mxu1 %v15612_v23  ;;  %v4564_v14 = vsel %vm20809_vm3, %v4561_v56, %v4563_v43  ;;  %v15637_v23 = vld [vmem:[#allocation10 + $0x5d0] sm:$0xff]  }
 0x207   : > { %13194 = vmatprep.mubr.msk.bf16.mxu0 %vm20811_vm0, %v20790_v0  ;;  %13212 = vmatprep.subr.bf16.mxu0 %v20790_v0 }
 0x208   : > { %13698 = vmatprep.mubr.msk.bf16.mxu1 %vm20811_vm0, %v20790_v0  ;;  %v17437_v36 = vpop.f32.mrb[0].mxu1  ;;  %13752 = vmatprep.subr.bf16.mxu1 %v20790_v0 }
 0x209   : > { %v13476_v40 = vpop.f32.mrb[1].mxu1 }
 0x20a   : > { %13213 = vmatpush3.bf16.msra.mxu0 %v15613_v44  ;;  %v17441_v19 = vpop.f32.mrb[2].mxu1  ;;  %13753 = vmatpush3.bf16.msra.mxu1 %v15615_v12  ;;  %v17536_v44 = vld [vmem:[%s16937_s22 + $0x1c] sm:$0xff]   ;;  %v15639_v40 = vld [vmem:[#allocation10 + $0x1d8] sm:$0xff]  }
 0x20b   : > { %13214 = vmatprep.subr.bf16.mxu0 %v20790_v0  ;;  %v13477_v15 = vpop.f32.mrb[3].mxu1  ;;  %13754 = vmatprep.subr.bf16.mxu1 %v20790_v0 }
 0x20c   : > { %v15641_v15 = vld [vmem:[#allocation10 + $0x5d8] sm:$0xff]  }
 0x20d   : > { %13195 = vmatmul.mubr.bf16.gmra.mrb[8].mxu0 %v17254_v28  ;;  %13699 = vmatmul.mubr.bf16.gmra.mrb[108].mxu1 %v15614_v16  ;;  %v15618_v28 = vld [vmem:[%s16937_s22 + $0x18] sm:$0xff]   ;;  %v1722_v16 = vrot.slane %v17529_v11, 2 }
 0x20e   : > { %13215 = vmatpush3.bf16.msra.mxu0 %v15616_v8  ;;  %13198 = vmatprep.mubr.msk.bf16.mxu0 %vm20811_vm0, %v20790_v0  ;;  %v4565_v8 = vrot.slane %v17536_v44, 1 }
 0x20f   : > { %13702 = vmatprep.mubr.msk.bf16.mxu1 %vm20811_vm0, %v20790_v0  ;;  %13755 = vmatpush3.bf16.msra.mxu1 %v15617_v22 }
 0x210   : > { %13216 = vmatprep.subr.bf16.mxu0 %v20790_v0  ;;  %v17451_v9 = vpop.f32.mrb[4].mxu1  ;;  %13756 = vmatprep.subr.bf16.mxu1 %v20790_v0 }
 0x211   : > { %v13480_v25 = vpop.f32.mrb[5].mxu1 }
 0x212   : > { %13217 = vmatpush3.bf16.msra.mxu0 %v15619_v54  ;;  %v17455_v27 = vpop.f32.mrb[6].mxu1  ;;  %v15642_v54 = vld [vmem:[#allocation10 + $0x1e0] sm:$0xff]  }
 0x213   : > { %13218 = vmatprep.subr.bf16.mxu0 %v20790_v0  ;;  %v13481_v30 = vpop.f32.mrb[7].mxu1  ;;  %13757 = vmatpush3.bf16.msra.mxu1 %v15620_v53  ;;  %v17550_v53 = vld [vmem:[%s16922_s9 + $0x28] sm:$0xff]  }
 0x214   : > { %13758 = vmatprep.subr.bf16.mxu1 %v20790_v0 }
 0x215   : > { %13199 = vmatmul.mubr.bf16.gmra.mrb[12].mxu0 %v17260_v7  ;;  %13703 = vmatmul.mubr.bf16.gmra.mrb[112].mxu1 %v15618_v28  ;;  %v4504_v7 = vld [vmem:[%s16937_s22 + $0x4] sm:$0xe]  ;;  %v1723_v28 = vsel %vm20808_vm4, %v1720_v4, %v1722_v16 }
 0x216   : > { %13202 = vmatprep.mubr.msk.bf16.mxu0 %vm20811_vm0, %v20790_v0  ;;  %13219 = vmatpush3.bf16.msra.mxu0 %v15621_v29  ;;  %v17490_v48 = vcombine.low %v4504_v7, %v17472_v41  ;;  %v17554_v29 = vld [vmem:[%s16937_s22 + $0x24] sm:$0xff]   ;;  %v1724_v7 = vrot.slane %v17550_v53, 2 }
 0x217   : > { %13706 = vmatprep.mubr.msk.bf16.mxu1 %vm20811_vm0, %v20790_v0  ;;  %13759 = vmatpush3.bf16.msra.mxu1 %v15623_v32  ;;  %v4566_v32 = vsel %vm20809_vm3, %v4563_v43, %v4565_v8  ;;  %v1895_v43 = vshrl.u32 %v17485_v35, 16 }
 0x218   : > { %13220 = vmatprep.subr.bf16.mxu0 %v20790_v0  ;;  %v17474_v42 = vpop.f32.mrb[8].mxu1  ;;  %13760 = vmatprep.subr.bf16.mxu1 %v20790_v0  ;;  %v4560_v51 = vrot.slane %v17490_v48, 1 }
 0x219   : > { %v13484_v31 = vpop.f32.mrb[9].mxu1 }
 0x21a   : > { %v17487_v47 = vpop.f32.mrb[10].mxu1  ;;  %13221 = vmatpush3.bf16.msra.mxu0 %v15624_v34  ;;  %v4562_v3 = vsel %vm20809_vm3, %v4560_v51, %v4561_v56  ;;  %v15650_v34 = vld [vmem:[%s16937_s22 + $0x2c] ss:$0 sps:$4 sm:$0x11]   ;;  %v15646_v31 = vld [vmem:[#allocation10 + $0x1e8] sm:$0xff]  }
 0x21b   : > { %20879 = vst [vmem:[#allocation32_spill] sm:$0xff] %v17487_v47  ;;  %v13485_v50 = vpop.f32.mrb[11].mxu1  ;;  %13761 = vmatpush3.bf16.msra.mxu1 %v15625_v38  ;;  %13242 = vmatprep.subr.bf16.mxu0 %v20790_v0  ;;  %v15643_v38 = vld [vmem:[#allocation10 + $0x5e0] sm:$0xff]   ;;  %v4569_v51 = vrot.slane %v15650_v34, 1 }
 0x21c   : > { %13818 = vmatprep.subr.bf16.mxu1 %v20790_v0 }
 0x21d   : > { %13203 = vmatmul.mubr.bf16.gmra.mrb[16].mxu0 %v1524_v45  ;;  %13707 = vmatmul.mubr.bf16.gmra.mrb[116].mxu1 %v15622_v46  ;;  %v4567_v45 = vrot.slane %v17554_v29, 1  ;;  %v15647_v46 = vld [vmem:[#allocation10 + $0x5e8] sm:$0xff]  }
 0x21e   : > { %13222 = vmatprep.mubr.msk.bf16.mxu0 %vm20811_vm0, %v20790_v0  ;;  %13762 = vmatprep.mubr.msk.bf16.mxu1 %vm20811_vm0, %v20790_v0 }
 0x220   : > { %v17505_v58 = vpop.f32.mrb[12].mxu1 }
 0x221   : > { %20880 = vst [vmem:[#allocation33_spill] sm:$0xff] %v17505_v58  ;;  %v13488_v61 = vpop.f32.mrb[13].mxu1 }
 0x222   : > { %v17511_v62 = vpop.f32.mrb[14].mxu1  ;;  %v15651_v61 = vld [vmem:[#allocation10 + $0x5f0] sm:$0xff]  }
 0x223   : > { %20881 = vst [vmem:[#allocation34_spill] sm:$0xff] %v17511_v62  ;;  %v13489_v13 = vpop.f32.mrb[15].mxu1  ;;  %v15721_v62 = vld [vmem:[#allocation10 + $0xb0] sm:$0xff]  }
 0x224   : > { %v1890_v13 = vshll.u32 %v17482_v55, 16 }
 0x225   : > { %13223 = vmatmul.mubr.bf16.vlgmr.msra.gmra.mrb[0].mxu0 %v1719_v63  ;;  %13763 = vmatmul.mubr.bf16.vlgmr.msra.gmra.mrb[120].mxu1 %v4562_v3  ;;  %v1887_v63 = vshrl.u32 %v17482_v55, 16 }
 0x226   : > { %13243 = vmatpush3.bf16.msra.mxu0 %v15630_v59  ;;  %13819 = vmatpush3.bf16.msra.mxu1 %v15631_v17  ;;  %v1725_v59 = vsel %vm20808_vm4, %v1722_v16, %v1724_v7  ;;  %v4568_v17 = vsel %vm20809_vm3, %v4565_v8, %v4567_v45 }
 0x227   : > { %13244 = vmatprep.subr.bf16.mxu0 %v20790_v0  ;;  %13226 = vmatprep.mubr.msk.bf16.mxu0 %vm20811_vm0, %v20790_v0  ;;  %v1889_v55 = vrot.slane %v1887_v63, 2  ;;  %v15657_v63 = vld [vmem:[#allocation10 + $0x208] sm:$0xff]  }
 0x228   : > { %13766 = vmatprep.mubr.msk.bf16.mxu1 %vm20811_vm0, %v20790_v0  ;;  %v17524_v26 = vpop.f32.mrb[16].mxu1  ;;  %13820 = vmatprep.subr.bf16.mxu1 %v20790_v0 }
 0x229   : > { %20882 = vst [vmem:[#allocation35_spill] sm:$0xff] %v17524_v26  ;;  %v13492_v2 = vpop.f32.mrb[17].mxu1 }
 0x22a   : > { %13245 = vmatpush3.bf16.msra.mxu0 %v15632_v57  ;;  %v17531_v6 = vpop.f32.mrb[18].mxu1  ;;  %13821 = vmatpush3.bf16.msra.mxu1 %v15635_v33  ;;  %v4917_v57 = vld [vmem:[%s16937_s22 + $0x4] sm:$0xc]  ;;  %v15652_v33 = vld [vmem:[#allocation10 + $0x1f8] sm:$0xff]  }
 0x22b   : > { %20883 = vst [vmem:[#allocation36_spill] sm:$0xff] %v17531_v6  ;;  %13246 = vmatprep.subr.bf16.mxu0 %v20790_v0  ;;  %v13493_v12 = vpop.f32.mrb[19].mxu1  ;;  %13822 = vmatprep.subr.bf16.mxu1 %v20790_v0  ;;  %v15653_v2 = vld [vmem:[#allocation10 + $0x5f8] sm:$0xff]  }
 0x22c   : > { %v1897_v12 = vrot.slane %v1895_v43, 2 }
 0x22d   : > { %13227 = vmatmul.mubr.bf16.gmra.mrb[4].mxu0 %v1721_v10  ;;  %13767 = vmatmul.mubr.bf16.gmra.mrb[124].mxu1 %v4564_v14  ;;  %v1892_v10 = vrot.slane %v1890_v13, 3  ;;  %v11873_v14 = vcombine.low %v4917_v57, %v17472_v41  ;;  %v4939_v41 = vrot.slane %v17493_v49, 2  ;;  %v15655_v49 = vld [vmem:[#allocation10 + $0x200] sm:$0xff]   ;;  %v4941_v13 = vrot.slane %v17515_v5, 2  ;;  %v15658_v57 = vld [vmem:[#allocation10 + $0x648] sm:$0xff]  }
 0x22e   : > { %13247 = vmatpush3.bf16.msra.mxu0 %v15636_v60  ;;  %13823 = vmatpush3.bf16.msra.mxu1 %v15637_v23  ;;  %v1898_v60 = vshll.u32 %v17485_v35, 16  ;;  %v1922_v5 = vshrl.u32 %v17550_v53, 16 }
 0x22f   : > { %13230 = vmatprep.mubr.msk.bf16.mxu0 %vm20811_vm0, %v20790_v0  ;;  %13248 = vmatprep.subr.bf16.mxu0 %v20790_v0  ;;  %v4938_v18 = vrot.slane %v11873_v14, 2  ;;  %v1893_v34 = vor.u32 %v1892_v10, %v1889_v55  ;;  %v1925_v14 = vshll.u32 %v17550_v53, 16 }
 0x230   : > { %13770 = vmatprep.mubr.msk.bf16.mxu1 %vm20811_vm0, %v20790_v0  ;;  %v17546_v22 = vpop.f32.mrb[20].mxu1  ;;  %13824 = vmatprep.subr.bf16.mxu1 %v20790_v0  ;;  %v1900_v16 = vrot.slane %v1898_v60, 3  ;;  %v17621_v60 = vld [vmem:[%s16922_s9 + $0x30] ss:$0 sps:$4 sm:$0x77]  }
 0x231   : > { %v13512_v25 = vpop.f32.mrb[21].mxu1 }
 0x232   : > { %13249 = vmatpush3.bf16.msra.mxu0 %v15639_v40  ;;  %v17556_v30 = vpop.f32.mrb[22].mxu1  ;;  %13825 = vmatpush3.bf16.msra.mxu1 %v15641_v15  ;;  %v1904_v40 = vshrl.u32 %v17509_v1, 16  ;;  %v1727_v15 = vsel %vm20808_vm4, %v1724_v7, %v1726_v24  ;;  %v1916_v24 = vshll.u32 %v17529_v11, 16 }
 0x233   : > { %13250 = vmatprep.subr.bf16.mxu0 %v20790_v0  ;;  %v13513_v52 = vpop.f32.mrb[23].mxu1  ;;  %13826 = vmatprep.subr.bf16.mxu1 %v20790_v0 }
 0x234   : > { %v1901_v52 = vor.u32 %v1900_v16, %v1897_v12  ;;  %v1918_v43 = vrot.slane %v1916_v24, 3  ;;  %v4942_v16 = vsel %vm20808_vm4, %v4939_v41, %v4941_v13  ;;  %v1934_v24 = vshll.u32 %v17621_v60, 16 }
 0x235   : > { %13231 = vmatmul.mubr.bf16.gmra.mrb[8].mxu0 %v1723_v28  ;;  %13771 = vmatmul.mubr.bf16.gmra.mrb[128].mxu1 %v4566_v32  ;;  %v4570_v28 = vsel %vm20809_vm3, %v4567_v45, %v4569_v51  ;;  %v1913_v45 = vshrl.u32 %v17529_v11, 16 }
 0x236   : > { %13251 = vmatpush3.bf16.msra.mxu0 %v15642_v54  ;;  %13234 = vmatprep.mubr.msk.bf16.mxu0 %vm20811_vm0, %v20790_v0  ;;  %v1907_v54 = vshll.u32 %v17509_v1, 16 }
 0x237   : > { %13774 = vmatprep.mubr.msk.bf16.mxu1 %vm20811_vm0, %v20790_v0  ;;  %13827 = vmatpush3.bf16.msra.mxu1 %v15643_v38  ;;  %v1906_v38 = vrot.slane %v1904_v40, 2  ;;  %v15660_v40 = vld [vmem:[#allocation10 + $0x650] sm:$0xff]  }
 0x238   : > { %13252 = vmatprep.subr.bf16.mxu0 %v20790_v0  ;;  %v17570_v50 = vpop.f32.mrb[24].mxu1  ;;  %13828 = vmatprep.subr.bf16.mxu1 %v20790_v0  ;;  %v1909_v7 = vrot.slane %v1907_v54, 3  ;;  %v15661_v54 = vld [vmem:[#allocation10 + $0x218] sm:$0xff]  }
 0x239   : > { %v13516_v56 = vpop.f32.mrb[25].mxu1 }
 0x23a   : > { %13253 = vmatpush3.bf16.msra.mxu0 %v15646_v31  ;;  %v17575_v3 = vpop.f32.mrb[26].mxu1  ;;  %v4940_v56 = vsel %vm20808_vm4, %v4938_v18, %v4939_v41 }
 0x23b   : > { %13254 = vmatprep.subr.bf16.mxu0 %v20790_v0  ;;  %v13517_v4 = vpop.f32.mrb[27].mxu1  ;;  %13829 = vmatpush3.bf16.msra.mxu1 %v15647_v46 }
 0x23c   : > { %13830 = vmatprep.subr.bf16.mxu1 %v20790_v0  ;;  %v1915_v4 = vrot.slane %v1913_v45, 2  ;;  %v15664_v45 = vld [vmem:[#allocation10 + $0x660] sm:$0xff]  }
 0x23d   : > { %13235 = vmatmul.mubr.bf16.gmra.mrb[12].mxu0 %v1725_v59  ;;  %13775 = vmatmul.mubr.bf16.gmra.mrb[132].mxu1 %v4568_v17  ;;  %v15656_v59 = vld [vmem:[#allocation10 + $0x640] sm:$0xff]   ;;  %v1910_v17 = vor.u32 %v1909_v7, %v1906_v38  ;;  %v4945_v38 = vrot.slane %v17554_v29, 2  ;;  %v2098_v29 = vrot.slane %v17485_v35, 3 }
 0x23e   : > { %13238 = vmatprep.mubr.msk.bf16.mxu0 %vm20811_vm0, %v20790_v0  ;;  %13255 = vmatpush3.bf16.msra.mxu0 %v15648_v37  ;;  %v1902_v37 = vsel %vm20805_vm6, %v1893_v34, %v1901_v52  ;;  %v1919_v18 = vor.u32 %v1918_v43, %v1915_v4  ;;  %v1927_v34 = vrot.slane %v1925_v14, 3  ;;  %v5086_v4 = vld [vmem:[%s16937_s22 + $0xc] sm:$0xf]  ;;  %v1936_v14 = vrot.slane %v1934_v24, 3  ;;  %v15677_v35 = vld [vmem:[#allocation10 + $0x40] sm:$0xff]  }
 0x23f   : > { %13778 = vmatprep.mubr.msk.bf16.mxu1 %vm20811_vm0, %v20790_v0  ;;  %13831 = vmatpush3.bf16.msra.mxu1 %v15651_v61  ;;  %v1911_v10 = vsel %vm20805_vm6, %v1901_v52, %v1910_v17  ;;  %v1931_v52 = vshrl.u32 %v17621_v60, 16 }
 0x240   : > { %13256 = vmatprep.subr.bf16.mxu0 %v20790_v0  ;;  %v17590_v23 = vpop.f32.mrb[28].mxu1  ;;  %13832 = vmatprep.subr.bf16.mxu1 %v20790_v0 }
 0x241   : > { %20884 = vst [vmem:[#allocation37_spill] sm:$0xff] %v17590_v23  ;;  %v13520_v8 = vpop.f32.mrb[29].mxu1 }
 0x242   : > { %v17596_v25 = vpop.f32.mrb[30].mxu1  ;;  %13257 = vmatpush3.bf16.msra.mxu0 %v15652_v33  ;;  %v15659_v33 = vld [vmem:[#allocation10 + $0x210] sm:$0xff]   ;;  %v4943_v8 = vrot.slane %v17536_v44, 2  ;;  %v15663_v44 = vld [vmem:[#allocation10 + $0x220] sm:$0xff]  }
 0x243   : > { %20885 = vst [vmem:[#allocation38_spill] sm:$0xff] %v17596_v25  ;;  %v13521_v32 = vpop.f32.mrb[31].mxu1  ;;  %13833 = vmatpush3.bf16.msra.mxu1 %v15653_v2  ;;  %13278 = vmatprep.subr.bf16.mxu0 %v20790_v0 }
 0x244   : > { %13890 = vmatprep.subr.bf16.mxu1 %v20790_v0  ;;  %v1924_v32 = vrot.slane %v1922_v5, 2  ;;  %v15675_v5 = vld [vmem:[%s16937_s22 + $0x10] sm:$0xff]  }
 0x245   : > { %13239 = vmatmul.mubr.bf16.gmra.mrb[16].mxu0 %v1727_v15  ;;  %13779 = vmatmul.mubr.bf16.gmra.mrb[136].mxu1 %v4570_v28  ;;  %v15662_v28 = vld [vmem:[#allocation10 + $0x658] sm:$0xff]  }
 0x246   : > { %13258 = vmatprep.mubr.msk.bf16.mxu0 %vm20811_vm0, %v20790_v0  ;;  %13834 = vmatprep.mubr.msk.bf16.mxu1 %vm20811_vm0, %v20790_v0 }
 0x248   : > { %v17606_v31 = vpop.f32.mrb[32].mxu1 }
 0x249   : > { %20886 = vst [vmem:[#allocation39_spill] sm:$0xff] %v17606_v31  ;;  %v13524_v46 = vpop.f32.mrb[33].mxu1 }
 0x24a   : > { %v17611_v51 = vpop.f32.mrb[34].mxu1 }
 0x24b   : > { %20887 = vst [vmem:[#allocation40_spill] sm:$0xff] %v17611_v51  ;;  %v13525_v61 = vpop.f32.mrb[35].mxu1  ;;  %v17848_v51 = vld [vmem:[%s16930_s12 + $0x20] sm:$0xff]  }
 0x24c   : > { %v1933_v61 = vrot.slane %v1931_v52, 2  ;;  %v5318_v52 = vshrl.u32 %v15675_v5, 16 }
 0x24d   : > { %13259 = vmatmul.mubr.bf16.vlgmr.msra.gmra.mrb[0].mxu0 %v1902_v37  ;;  %13835 = vmatmul.mubr.bf16.vlgmr.msra.gmra.mrb[140].mxu1 %v4940_v56  ;;  %v4944_v37 = vsel %vm20808_vm4, %v4941_v13, %v4943_v8  ;;  %v15669_v13 = vld [vmem:[%s16937_s22 + $0x2c] ss:$0 sps:$4 sm:$0x33]  }
 0x24e   : > { %13279 = vmatpush3.bf16.msra.mxu0 %v15655_v49  ;;  %13891 = vmatpush3.bf16.msra.mxu1 %v15656_v59  ;;  %v1920_v49 = vsel %vm20805_vm6, %v1910_v17, %v1919_v18  ;;  %v15665_v59 = vld [vmem:[#allocation10 + $0x228] sm:$0xff]   ;;  %v1928_v17 = vor.u32 %v1927_v34, %v1924_v32  ;;  %v4947_v32 = vrot.slane %v15669_v13, 2  ;;  %v5320_v13 = vrot.slane %v5318_v52, 2 }
 0x24f   : > { %13280 = vmatprep.subr.bf16.mxu0 %v20790_v0  ;;  %13262 = vmatprep.mubr.msk.bf16.mxu0 %vm20811_vm0, %v20790_v0 }
 0x250   : > { %13838 = vmatprep.mubr.msk.bf16.mxu1 %vm20811_vm0, %v20790_v0  ;;  %v17623_v2 = vpop.f32.mrb[36].mxu1  ;;  %13892 = vmatprep.subr.bf16.mxu1 %v20790_v0 }
 0x251   : > { %20888 = vst [vmem:[#allocation41_spill] sm:$0xff] %v17623_v2  ;;  %v13528_v55 = vpop.f32.mrb[37].mxu1  ;;  %v15702_v2 = vld [vmem:[#allocation10 + $0x248] sm:$0xff]  }
 0x252   : > { %13281 = vmatpush3.bf16.msra.mxu0 %v15657_v63  ;;  %v17629_v12 = vpop.f32.mrb[38].mxu1  ;;  %13893 = vmatpush3.bf16.msra.mxu1 %v15658_v57  ;;  %v5085_v63 = vld [vmem:[%s16937_s22 + $0x8] sm:$0xc] }
 0x253   : > { %20889 = vst [vmem:[#allocation42_spill] sm:$0xff] %v17629_v12  ;;  %13282 = vmatprep.subr.bf16.mxu0 %v20790_v0  ;;  %v13529_v15 = vpop.f32.mrb[39].mxu1  ;;  %13894 = vmatprep.subr.bf16.mxu1 %v20790_v0  ;;  %v15666_v57 = vld [vmem:[#allocation10 + $0x668] sm:$0xff]  }
 0x254   : > { %v15667_v15 = vld [vmem:[#allocation10 + $0x230] sm:$0xff]  }
 0x255   : > { %13263 = vmatmul.mubr.bf16.gmra.mrb[4].mxu0 %v1911_v10  ;;  %13839 = vmatmul.mubr.bf16.gmra.mrb[144].mxu1 %v4942_v16  ;;  %v1929_v10 = vsel %vm20805_vm6, %v1919_v18, %v1928_v17 }
 0x256   : > { %13283 = vmatpush3.bf16.msra.mxu0 %v15659_v33  ;;  %13895 = vmatpush3.bf16.msra.mxu1 %v15660_v40  ;;  %v17663_v33 = vcombine.low %v5085_v63, %v5086_v4  ;;  %v4946_v40 = vsel %vm20808_vm4, %v4943_v8, %v4945_v38  ;;  %v1937_v8 = vor.u32 %v1936_v14, %v1933_v61 }
 0x257   : > { %13266 = vmatprep.mubr.msk.bf16.mxu0 %vm20811_vm0, %v20790_v0  ;;  %13284 = vmatprep.subr.bf16.mxu0 %v20790_v0  ;;  %v4948_v4 = vsel %vm20808_vm4, %v4945_v38, %v4947_v32 }
 0x258   : > { %13842 = vmatprep.mubr.msk.bf16.mxu1 %vm20811_vm0, %v20790_v0  ;;  %v17641_v41 = vpop.f32.mrb[40].mxu1  ;;  %13896 = vmatprep.subr.bf16.mxu1 %v20790_v0  ;;  %v5310_v18 = vshrl.u32 %v17663_v33, 16  ;;  %v5313_v34 = vshll.u32 %v17663_v33, 16 }
 0x259   : > { %v13548_v7 = vpop.f32.mrb[41].mxu1 }
 0x25a   : > { %13285 = vmatpush3.bf16.msra.mxu0 %v15661_v54  ;;  %v17646_v46 = vpop.f32.mrb[42].mxu1  ;;  %13897 = vmatpush3.bf16.msra.mxu1 %v15662_v28  ;;  %v15670_v28 = vld [vmem:[#allocation10 + $0x670] sm:$0xff]   ;;  %v2075_v7 = vld [vmem:[%s16922_s9 + $0x8] sm:$0x8]  ;;  %v5312_v24 = vrot.slane %v5310_v18, 2  ;;  %v5315_v63 = vrot.slane %v5313_v34, 3 }
 0x25b   : > { %13286 = vmatprep.subr.bf16.mxu0 %v20790_v0  ;;  %v13549_v56 = vpop.f32.mrb[43].mxu1  ;;  %13898 = vmatprep.subr.bf16.mxu1 %v20790_v0  ;;  %v11715_v61 = vcombine.low %v2075_v7, %v17467_v39  ;;  %v15684_v18 = vld [vmem:[%s16937_s22 + $0x20] sm:$0xff]   ;;  %s15266_s9 = smul.u32 104, %s497_s4 }
 0x25c   : > { %v5316_v38 = vor.u32 %v5315_v63, %v5312_v24  ;;  %v15680_v24 = vld [vmem:[#allocation10 + $0x48] sm:$0xff]  }
 0x25d   : > { %13267 = vmatmul.mubr.bf16.gmra.mrb[8].mxu0 %v1920_v49  ;;  %13843 = vmatmul.mubr.bf16.gmra.mrb[148].mxu1 %v4944_v37  ;;  %v5321_v49 = vshll.u32 %v15675_v5, 16  ;;  %v2097_v39 = vrot.slane %v11715_v61, 3  ;;  %v5339_v61 = vshll.u32 %v15684_v18, 16  ;;  %v15688_v63 = vld [vmem:[%s16937_s22 + $0x28] sm:$0xff]   ;;  %s19005_s6 = scalar_lea.vmem [#allocation11], %s15266_s9 }
 0x25e   : > { %13287 = vmatpush3.bf16.msra.mxu0 %v15663_v44  ;;  %13270 = vmatprep.mubr.msk.bf16.mxu0 %vm20811_vm0, %v20790_v0  ;;  %v15671_v44 = vld [vmem:[#allocation10 + $0x238] sm:$0xff]   ;;  %s11375_s11 = sshll.u32 %s19005_s6, 4  ;;  %s20656_s11 = int_to_ptr.vmem [resolvable:$true] %s11375_s11 }
 0x25f   : > { %13846 = vmatprep.mubr.msk.bf16.mxu1 %vm20811_vm0, %v20790_v0  ;;  %13899 = vmatpush3.bf16.msra.mxu1 %v15664_v45  ;;  %v15672_v45 = vld [vmem:[#allocation10 + $0x678] sm:$0xff]   ;;  %v5323_v5 = vrot.slane %v5321_v49, 3  ;;  %v2099_v32 = vsel %vm20803_vm5, %v2097_v39, %v2098_v29  ;;  %v15678_v49 = vld [vmem:[#allocation10 + $0x288] sm:$0xff]   ;;  %s16251_s9 = scalar_lea.vmem %s20656_s11, 1664 }
 0x260   : > { %13288 = vmatprep.subr.bf16.mxu0 %v20790_v0  ;;  %v17660_v43 = vpop.f32.mrb[44].mxu1  ;;  %13900 = vmatprep.subr.bf16.mxu1 %v20790_v0  ;;  %p16252_p3 = scmp.ne.s32.totalorder %s20656_s11, %s16251_s9 }
 0x261   : > { %v13552_v55 = vpop.f32.mrb[45].mxu1 }
 0x262   : > { %13289 = vmatpush3.bf16.msra.mxu0 %v15665_v59  ;;  %v17667_v16 = vpop.f32.mrb[46].mxu1  ;;  %v1938_v59 = vsel %vm20805_vm6, %v1928_v17, %v1937_v8  ;;  %v15679_v55 = vld [vmem:[%s16937_s22 + $0x18] sm:$0xff]   ;;  %v5324_v17 = vor.u32 %v5323_v5, %v5320_v13  ;;  %v15681_v13 = vld [vmem:[#allocation10 + $0x290] sm:$0xff]   ;;  %p16253_p12 = pnand %p16252_p3, %p21328_p2 }
 0x263   : > { %13290 = vmatprep.subr.bf16.mxu0 %v20790_v0  ;;  %v13553_v54 = vpop.f32.mrb[47].mxu1  ;;  %13901 = vmatpush3.bf16.msra.mxu1 %v15666_v57  ;;  %v5327_v14 = vshrl.u32 %v15679_v55, 16 }
 0x264   : > { %13902 = vmatprep.subr.bf16.mxu1 %v20790_v0  ;;  %v15676_v54 = vld [vmem:[#allocation10 + $0x280] sm:$0xff]   ;;  %v5325_v52 = vsel %vm20805_vm6, %v5316_v38, %v5324_v17  ;;  %v15682_v38 = vld [vmem:[#allocation10 + $0x50] sm:$0xff]   ;;  %p16254_p13 = pneg %p16253_p12 }
 0x265   : > { %13271 = vmatmul.mubr.bf16.gmra.mrb[12].mxu0 %v1929_v10  ;;  %13847 = vmatmul.mubr.bf16.gmra.mrb[152].mxu1 %v4946_v40  ;;  %v5330_v40 = vshll.u32 %v15679_v55, 16  ;;  %v5329_v8 = vrot.slane %v5327_v14, 2  ;;  %v5341_v14 = vrot.slane %v5339_v61, 3 }
 0x266   : > { %13274 = vmatprep.mubr.msk.bf16.mxu0 %vm20811_vm0, %v20790_v0  ;;  %13291 = vmatpush3.bf16.msra.mxu0 %v15667_v15 }
 0x267   : > { %13850 = vmatprep.mubr.msk.bf16.mxu1 %vm20811_vm0, %v20790_v0  ;;  %13903 = vmatpush3.bf16.msra.mxu1 %v15670_v28 }
 0x268   : > { %13292 = vmatprep.subr.bf16.mxu0 %v20790_v0  ;;  %v17682_v37 = vpop.f32.mrb[48].mxu1  ;;  %13904 = vmatprep.subr.bf16.mxu1 %v20790_v0 }
 0x269   : > { %20890 = vst [vmem:[#allocation43_spill] sm:$0xff] %v17682_v37  ;;  %v13556_v56 = vpop.f32.mrb[49].mxu1 }
 0x26a   : > { %v17687_v57 = vpop.f32.mrb[50].mxu1  ;;  %13293 = vmatpush3.bf16.msra.mxu0 %v15671_v44  ;;  %v5332_v44 = vrot.slane %v5330_v40, 3  ;;  %v5336_v56 = vshrl.u32 %v15684_v18, 16  ;;  %v5345_v40 = vshrl.u32 %v15688_v63, 16  ;;  %v15683_v18 = vld [vmem:[#allocation10 + $0x298] sm:$0xff]  }
 0x26b   : > { %20891 = vst [vmem:[#allocation44_spill] sm:$0xff] %v17687_v57  ;;  %v13557_v10 = vpop.f32.mrb[51].mxu1  ;;  %13905 = vmatpush3.bf16.msra.mxu1 %v15672_v45  ;;  %13314 = vmatprep.subr.bf16.mxu0 %v20790_v0  ;;  %v2100_v45 = vrot.slane %v17509_v1, 3 }
 0x26c   : > { %13962 = vmatprep.subr.bf16.mxu1 %v20790_v0  ;;  %v5338_v55 = vrot.slane %v5336_v56, 2  ;;  %v15687_v56 = vld [vmem:[#allocation10 + $0x60] sm:$0xff]  }
 0x26d   : > { %13275 = vmatmul.mubr.bf16.gmra.mrb[16].mxu0 %v1938_v59  ;;  %13851 = vmatmul.mubr.bf16.gmra.mrb[156].mxu1 %v4948_v4  ;;  %v5333_v59 = vor.u32 %v5332_v44, %v5329_v8  ;;  %v2101_v5 = vsel %vm20803_vm5, %v2098_v29, %v2100_v45  ;;  %v2102_v29 = vrot.slane %v17529_v11, 3  ;;  %v15686_v44 = vld [vmem:[#allocation10 + $0x2a0] sm:$0xff]   ;;  %v2104_v11 = vrot.slane %v17550_v53, 3  ;;  %v17802_v53 = vld [vmem:[%s16930_s12 + $0x10] sm:$0xff]  }
 0x26e   : > { %13294 = vmatprep.mubr.msk.bf16.mxu0 %vm20811_vm0, %v20790_v0  ;;  %13906 = vmatprep.mubr.msk.bf16.mxu1 %vm20811_vm0, %v20790_v0 }
 0x26f   : > { %v5334_v39 = vsel %vm20805_vm6, %v5324_v17, %v5333_v59  ;;  %v5342_v17 = vor.u32 %v5341_v14, %v5338_v55  ;;  %v15689_v55 = vld [vmem:[#allocation10 + $0x2a8] sm:$0xff]  }
 0x270   : > { %v17700_v15 = vpop.f32.mrb[52].mxu1  ;;  %v17746_v14 = vld [vmem:[%s16930_s12 + $0x4] sm:$0xf] }
 0x271   : > { %20892 = vst [vmem:[#allocation45_spill] sm:$0xff] %v17700_v15  ;;  %v13560_v28 = vpop.f32.mrb[53].mxu1  ;;  %v17871_v15 = vld [vmem:[%s16930_s12 + $0x28] ss:$0 sps:$4 sm:$0x11]  }
 0x272   : > { %v17704_v34 = vpop.f32.mrb[54].mxu1  ;;  %v5348_v28 = vshll.u32 %v15688_v63, 16  ;;  %v5343_v63 = vsel %vm20805_vm6, %v5333_v59, %v5342_v17 }
 0x273   : > { %20893 = vst [vmem:[#allocation46_spill] sm:$0xff] %v17704_v34  ;;  %v13561_v7 = vpop.f32.mrb[55].mxu1 }
 0x274   : > { %v5350_v7 = vrot.slane %v5348_v28, 3 }
 0x275   : > { %13295 = vmatmul.mubr.bf16.vlgmr.msra.gmra.mrb[0].mxu0 %v2099_v32  ;;  %13907 = vmatmul.mubr.bf16.vlgmr.msra.gmra.mrb[160].mxu1 %v5325_v52  ;;  %v15692_v32 = vld [vmem:[%s16937_s22 + $0x30] ss:$0 sps:$4 sm:$0x77]   ;;  %v15685_v52 = vld [vmem:[#allocation10 + $0x58] sm:$0xff]  }
 0x276   : > { %13315 = vmatpush3.bf16.msra.mxu0 %v15676_v54  ;;  %13963 = vmatpush3.bf16.msra.mxu1 %v15677_v35  ;;  %v5347_v35 = vrot.slane %v5345_v40, 2  ;;  %v15690_v40 = vld [vmem:[#allocation10 + $0x68] sm:$0xff]  }
 0x277   : > { %13316 = vmatprep.subr.bf16.mxu0 %v20790_v0  ;;  %13298 = vmatprep.mubr.msk.bf16.mxu0 %vm20811_vm0, %v20790_v0 }
 0x278   : > { %13910 = vmatprep.mubr.msk.bf16.mxu1 %vm20811_vm0, %v20790_v0  ;;  %v17714_v4 = vpop.f32.mrb[56].mxu1  ;;  %13964 = vmatprep.subr.bf16.mxu1 %v20790_v0  ;;  %v5351_v59 = vor.u32 %v5350_v7, %v5347_v35  ;;  %v2105_v7 = vsel %vm20803_vm5, %v2102_v29, %v2104_v11 }
 0x279   : > { %20894 = vst [vmem:[#allocation47_spill] sm:$0xff] %v17714_v4  ;;  %v13564_v1 = vpop.f32.mrb[57].mxu1 }
 0x27a   : > { %13317 = vmatpush3.bf16.msra.mxu0 %v15678_v49  ;;  %v17718_v10 = vpop.f32.mrb[58].mxu1  ;;  %13965 = vmatpush3.bf16.msra.mxu1 %v15680_v24  ;;  %v2103_v24 = vsel %vm20803_vm5, %v2100_v45, %v2102_v29  ;;  %v2258_v1 = vld [vmem:[%s16930_s12] sm:$0xf]  ;;  %v17776_v29 = vld [vmem:[%s16930_s12 + $0x8] sm:$0xff]  }
 0x27b   : > { %20895 = vst [vmem:[#allocation48_spill] sm:$0xff] %v17718_v10  ;;  %13318 = vmatprep.subr.bf16.mxu0 %v20790_v0  ;;  %v13565_v54 = vpop.f32.mrb[59].mxu1  ;;  %13966 = vmatprep.subr.bf16.mxu1 %v20790_v0  ;;  %v6079_v45 = vld [vmem:[%s16930_s12] sm:$0xf]  ;;  %v17798_v10 = vld [vmem:[%s16930_s12 + $0x10] sm:$0xff]   ;;  %v6162_v4 = vshrl.u32 %v17776_v29, 16 }
 0x27d   : > { %13299 = vmatmul.mubr.bf16.gmra.mrb[4].mxu0 %v2101_v5  ;;  %13911 = vmatmul.mubr.bf16.gmra.mrb[164].mxu1 %v5334_v39  ;;  %v5357_v39 = vshll.u32 %v15692_v32, 16 }
 0x27e   : > { %13319 = vmatpush3.bf16.msra.mxu0 %v15681_v13  ;;  %13967 = vmatpush3.bf16.msra.mxu1 %v15682_v38  ;;  %v5354_v13 = vshrl.u32 %v15692_v32, 16  ;;  %v17742_v38 = vld [vmem:[%s16930_s12 + $0x4] sm:$0xf]  ;;  %v2106_v32 = vrot.slane %v17621_v60, 3  ;;  %v15693_v60 = vld [vmem:[#allocation10 + $0x70] sm:$0xff]  }
 0x27f   : > { %13302 = vmatprep.mubr.msk.bf16.mxu0 %vm20811_vm0, %v20790_v0  ;;  %13320 = vmatprep.subr.bf16.mxu0 %v20790_v0  ;;  %v17754_v54 = vcombine.low %v2258_v1, %v17742_v38 }
 0x280   : > { %13914 = vmatprep.mubr.msk.bf16.mxu1 %vm20811_vm0, %v20790_v0  ;;  %v17730_v8 = vpop.f32.mrb[60].mxu1  ;;  %13968 = vmatprep.subr.bf16.mxu1 %v20790_v0 }
 0x281   : > { %v13584_v49 = vpop.f32.mrb[61].mxu1  ;;  %v2334_v1 = vshll.u32 %v17754_v54, 16 }
 0x282   : > { %13321 = vmatpush3.bf16.msra.mxu0 %v15683_v18  ;;  %v17735_v61 = vpop.f32.mrb[62].mxu1  ;;  %13969 = vmatpush3.bf16.msra.mxu1 %v15685_v52  ;;  %v5356_v18 = vrot.slane %v5354_v13, 2  ;;  %v5359_v52 = vrot.slane %v5357_v39, 3  ;;  %v15691_v49 = vld [vmem:[#allocation10 + $0x2b0] sm:$0xff]   ;;  %v15695_v39 = vld [vmem:[#allocation10 + $0x78] sm:$0xff]  }
 0x283   : > { %13322 = vmatprep.subr.bf16.mxu0 %v20790_v0  ;;  %v13585_v5 = vpop.f32.mrb[63].mxu1  ;;  %13970 = vmatprep.subr.bf16.mxu1 %v20790_v0  ;;  %v17771_v13 = vld [vmem:[%s16930_s12 + $0x8] sm:$0xff]  }
 0x284   : > { %v15694_v5 = vld [vmem:[#allocation10 + $0x2b8] sm:$0xff]  }
 0x285   : > { %13303 = vmatmul.mubr.bf16.gmra.mrb[8].mxu0 %v2103_v24  ;;  %13915 = vmatmul.mubr.bf16.gmra.mrb[168].mxu1 %v5343_v63 }
 0x286   : > { %13323 = vmatpush3.bf16.msra.mxu0 %v15686_v44  ;;  %13306 = vmatprep.mubr.msk.bf16.mxu0 %vm20811_vm0, %v20790_v0  ;;  %v17761_v44 = vcombine.low %v6079_v45, %v17746_v14 }
 0x287   : > { %13918 = vmatprep.mubr.msk.bf16.mxu1 %vm20811_vm0, %v20790_v0  ;;  %13971 = vmatpush3.bf16.msra.mxu1 %v15687_v56  ;;  %v5352_v56 = vsel %vm20805_vm6, %v5342_v17, %v5351_v59  ;;  %v5360_v17 = vor.u32 %v5359_v52, %v5356_v18  ;;  %v2339_v18 = vshll.u32 %v17771_v13, 16 }
 0x288   : > { %13324 = vmatprep.subr.bf16.mxu0 %v20790_v0  ;;  %v17756_v28 = vpop.f32.mrb[64].mxu1  ;;  %13972 = vmatprep.subr.bf16.mxu1 %v20790_v0  ;;  %20896 = vst [vmem:[#allocation49_spill] sm:$0xff] %v17761_v44 }
 0x289   : > { %v13588_v35 = vpop.f32.mrb[65].mxu1 }
 0x28a   : > { %13325 = vmatpush3.bf16.msra.mxu0 %v15689_v55  ;;  %v17766_v24 = vpop.f32.mrb[66].mxu1  ;;  %v6153_v55 = vshll.u32 %v17761_v44, 16  ;;  %v2336_v35 = vrot.slane %v2334_v1, 1 }
 0x28b   : > { %13326 = vmatprep.subr.bf16.mxu0 %v20790_v0  ;;  %v13589_v63 = vpop.f32.mrb[67].mxu1  ;;  %13973 = vmatpush3.bf16.msra.mxu1 %v15690_v40  ;;  %v2332_v40 = vshrl.u32 %v17754_v54, 16 }
 0x28c   : > { %13974 = vmatprep.subr.bf16.mxu1 %v20790_v0  ;;  %v6155_v63 = vrot.slane %v6153_v55, 1  ;;  %v2347_v55 = vshll.u32 %v17798_v10, 16 }
 0x28d   : > { %13307 = vmatmul.mubr.bf16.gmra.mrb[12].mxu0 %v2105_v7  ;;  %13919 = vmatmul.mubr.bf16.gmra.mrb[172].mxu1 %v5352_v56  ;;  %v5361_v56 = vsel %vm20805_vm6, %v5351_v59, %v5360_v17  ;;  %v2341_v59 = vrot.slane %v2339_v18, 1  ;;  %v6166_v17 = vshll.u32 %v17802_v53, 16 }
 0x28e   : > { %13310 = vmatprep.mubr.msk.bf16.mxu0 %vm20811_vm0, %v20790_v0  ;;  %13327 = vmatpush3.bf16.msra.mxu0 %v15691_v49  ;;  %v2107_v49 = vsel %vm20803_vm5, %v2104_v11, %v2106_v32  ;;  %v2337_v11 = vor.u32 %v2336_v35, %v2332_v40  ;;  %v17819_v35 = vld [vmem:[%s16930_s12 + $0x18] sm:$0xff]  }
 0x28f   : > { %13922 = vmatprep.mubr.msk.bf16.mxu1 %vm20811_vm0, %v20790_v0  ;;  %13975 = vmatpush3.bf16.msra.mxu1 %v15693_v60  ;;  %v6151_v60 = vshrl.u32 %v17761_v44, 16  ;;  %v6168_v26 = vrot.slane %v6166_v17, 1 }
 0x290   : > { %13328 = vmatprep.subr.bf16.mxu0 %v20790_v0  ;;  %v17784_v45 = vpop.f32.mrb[68].mxu1  ;;  %13976 = vmatprep.subr.bf16.mxu1 %v20790_v0  ;;  %v6158_v0 = vshll.u32 %v17776_v29, 16  ;;  %v2342_v40 = vsel %vm612_vm1, %v2337_v11, %v2341_v59  ;;  %v2351_v11 = vshrl.u32 %v17798_v10, 16 }
 0x291   : > { %20897 = vst [vmem:[#allocation50_spill] sm:$0xff] %v17784_v45  ;;  %v13592_v7 = vpop.f32.mrb[69].mxu1  ;;  %v6156_v32 = vor.u32 %v6155_v63, %v6151_v60  ;;  %v15701_v60 = vld [vmem:[#allocation10 + $0x80] sm:$0xff]   ;;  %v2349_v63 = vrot.slane %v2347_v55, 1  ;;  %v6170_v55 = vshrl.u32 %v17802_v53, 16 }
 0x292   : > { %v17792_v52 = vpop.f32.mrb[70].mxu1  ;;  %13329 = vmatpush3.bf16.msra.mxu0 %v15694_v5  ;;  %v20899_v7 = vmov 0.0   ;;  %v6160_v5 = vrot.slane %v6158_v0, 1 }
 0x293   : > { %20898 = vst [vmem:[#allocation51_spill] sm:$0xff] %v17792_v52  ;;  %v13593_v1 = vpop.f32.mrb[71].mxu1  ;;  %13977 = vmatpush3.bf16.msra.mxu1 %v15695_v39  ;;  %13350 = vmatprep.subr.bf16.mxu0 %v20899_v7  ;;  %v6446_v52 = vld [vmem:[%s16930_s12] sm:$0xe] }
 0x294   : > { %14034 = vmatprep.subr.bf16.mxu1 %v20899_v7  ;;  %v2343_v1 = vshrl.u32 %v17771_v13, 16  ;;  %v6161_v0 = vsel %vm612_vm1, %v6156_v32, %v6160_v5  ;;  %v6164_v32 = vor.u32 %v6162_v4, %v6160_v5 }
 0x295   : > { %13311 = vmatmul.mubr.bf16.gmra.mrb[16].mxu0 %v2107_v49  ;;  %13923 = vmatmul.mubr.bf16.gmra.mrb[176].mxu1 %v5361_v56  ;;  %v15700_v49 = vld [vmem:[#allocation10 + $0x240] sm:$0xff]  }
 0x296   : > { %13330 = vmatprep.mubr.msk.bf16.mxu0 %vm20811_vm0, %v20899_v7  ;;  %13978 = vmatprep.mubr.msk.bf16.mxu1 %vm20811_vm0, %v20899_v7  ;;  %v17815_v56 = vld [vmem:[%s16930_s12 + $0x18] sm:$0xff]   ;;  %v6169_v5 = vsel %vm612_vm1, %v6164_v32, %v6168_v26  ;;  %v6178_v32 = vshrl.u32 %v17819_v35, 16 }
 0x297   : > { %v2355_v34 = vshll.u32 %v17815_v56, 16 }
 0x298   : > { %v17811_v39 = vpop.f32.mrb[72].mxu1 }
 0x299   : > { %20900 = vst [vmem:[#allocation52_spill] sm:$0xff] %v17811_v39  ;;  %v13596_v12 = vpop.f32.mrb[73].mxu1  ;;  %v2345_v39 = vor.u32 %v2343_v1, %v2341_v59  ;;  %v17839_v1 = vld [vmem:[%s16930_s12 + $0x20] sm:$0xff]  }
 0x29a   : > { %v17821_v18 = vpop.f32.mrb[74].mxu1  ;;  %v15705_v12 = vld [vmem:[#allocation10 + $0x88] sm:$0xff]  }
 0x29b   : > { %20901 = vst [vmem:[#allocation53_spill] sm:$0xff] %v17821_v18  ;;  %v13597_v6 = vpop.f32.mrb[75].mxu1  ;;  %v6174_v18 = vshll.u32 %v17819_v35, 16 }
 0x29c   : > { %v15706_v6 = vld [vmem:[#allocation10 + $0x250] sm:$0xff]  }
 0x29d   : > { %13331 = vmatmul.mubr.bf16.vlgmr.msra.gmra.mrb[20].mxu0 %v2342_v40  ;;  %13979 = vmatmul.mubr.bf16.vlgmr.msra.gmra.mrb[180].mxu1 %v6161_v0  ;;  %v15707_v40 = vld [vmem:[#allocation10 + $0x90] sm:$0xff]   ;;  %v2357_v0 = vrot.slane %v2355_v34, 1  ;;  %v6172_v34 = vor.u32 %v6170_v55, %v6168_v26 }
 0x29e   : > { %13351 = vmatpush3.bf16.msra.mxu0 %v15700_v49  ;;  %14035 = vmatpush3.bf16.msra.mxu1 %v15701_v60  ;;  %v2350_v49 = vsel %vm612_vm1, %v2345_v39, %v2349_v63  ;;  %v6176_v60 = vrot.slane %v6174_v18, 1  ;;  %v2359_v39 = vshrl.u32 %v17815_v56, 16  ;;  %v17867_v55 = vld [vmem:[%s16930_s12 + $0x28] ss:$0 sps:$4 sm:$0x11]  }
 0x29f   : > { %13352 = vmatprep.subr.bf16.mxu0 %v20899_v7  ;;  %13334 = vmatprep.mubr.msk.bf16.mxu0 %vm20811_vm0, %v20899_v7 }
 0x2a0   : > { %13982 = vmatprep.mubr.msk.bf16.mxu1 %vm20811_vm0, %v20899_v7  ;;  %v17833_v59 = vpop.f32.mrb[76].mxu1  ;;  %14036 = vmatprep.subr.bf16.mxu1 %v20899_v7  ;;  %v6177_v26 = vsel %vm612_vm1, %v6172_v34, %v6176_v60 }
 0x2a1   : > { %20902 = vst [vmem:[#allocation54_spill] sm:$0xff] %v17833_v59  ;;  %v13600_v17 = vpop.f32.mrb[77].mxu1 }
 0x2a2   : > { %13353 = vmatpush3.bf16.msra.mxu0 %v15702_v2  ;;  %v17841_v4 = vpop.f32.mrb[78].mxu1  ;;  %14037 = vmatpush3.bf16.msra.mxu1 %v15705_v12  ;;  %v15709_v17 = vld [vmem:[#allocation10 + $0x258] sm:$0xff]   ;;  %v2363_v12 = vshll.u32 %v17839_v1, 16 }
 0x2a3   : > { %20903 = vst [vmem:[#allocation55_spill] sm:$0xff] %v17841_v4  ;;  %13354 = vmatprep.subr.bf16.mxu0 %v20899_v7  ;;  %v13601_v59 = vpop.f32.mrb[79].mxu1  ;;  %14038 = vmatprep.subr.bf16.mxu1 %v20899_v7  ;;  %v15711_v2 = vld [vmem:[#allocation10 + $0x98] sm:$0xff]   ;;  %v2353_v4 = vor.u32 %v2351_v11, %v2349_v63  ;;  %v6182_v63 = vshll.u32 %v17848_v51, 16 }
 0x2a4   : > { %v15712_v59 = vld [vmem:[#allocation10 + $0x260] sm:$0xff]  }
 0x2a5   : > { %13335 = vmatmul.mubr.bf16.gmra.mrb[24].mxu0 %v2350_v49  ;;  %13983 = vmatmul.mubr.bf16.gmra.mrb[184].mxu1 %v6169_v5  ;;  %v6184_v34 = vrot.slane %v6182_v63, 1 }
 0x2a6   : > { %13355 = vmatpush3.bf16.msra.mxu0 %v15706_v6  ;;  %14039 = vmatpush3.bf16.msra.mxu1 %v15707_v40  ;;  %v2358_v6 = vsel %vm612_vm1, %v2353_v4, %v2357_v0  ;;  %v15713_v40 = vld [vmem:[#allocation10 + $0xa0] sm:$0xff]   ;;  %v2361_v4 = vor.u32 %v2359_v39, %v2357_v0  ;;  %v2367_v0 = vshrl.u32 %v17839_v1, 16  ;;  %v2371_v39 = vshll.u32 %v17867_v55, 16 }
 0x2a7   : > { %13338 = vmatprep.mubr.msk.bf16.mxu0 %vm20811_vm0, %v20899_v7  ;;  %13356 = vmatprep.subr.bf16.mxu0 %v20899_v7 }
 0x2a8   : > { %13986 = vmatprep.mubr.msk.bf16.mxu1 %vm20811_vm0, %v20899_v7  ;;  %v17857_v18 = vpop.f32.mrb[80].mxu1  ;;  %14040 = vmatprep.subr.bf16.mxu1 %v20899_v7  ;;  %v2373_v31 = vrot.slane %v2371_v39, 1 }
 0x2a9   : > { %v13620_v11 = vpop.f32.mrb[81].mxu1 }
 0x2aa   : > { %13357 = vmatpush3.bf16.msra.mxu0 %v15709_v17  ;;  %v17862_v49 = vpop.f32.mrb[82].mxu1  ;;  %14041 = vmatpush3.bf16.msra.mxu1 %v15711_v2  ;;  %v2365_v17 = vrot.slane %v2363_v12, 1  ;;  %v15716_v11 = vld [vmem:[#allocation10 + $0x268] sm:$0xff]   ;;  %v6180_v2 = vor.u32 %v6178_v32, %v6176_v60  ;;  %v6186_v12 = vshrl.u32 %v17848_v51, 16  ;;  %v6190_v60 = vshll.u32 %v17871_v15, 16 }
 0x2ab   : > { %13358 = vmatprep.subr.bf16.mxu0 %v20899_v7  ;;  %v13621_v5 = vpop.f32.mrb[83].mxu1  ;;  %14042 = vmatprep.subr.bf16.mxu1 %v20899_v7 }
 0x2ac   : > { %v15717_v5 = vld [vmem:[#allocation10 + $0xa8] sm:$0xff]   ;;  %v6185_v63 = vsel %vm612_vm1, %v6180_v2, %v6184_v34  ;;  %v6192_v2 = vrot.slane %v6190_v60, 1 }
 0x2ad   : > { %13339 = vmatmul.mubr.bf16.gmra.mrb[28].mxu0 %v2358_v6  ;;  %13987 = vmatmul.mubr.bf16.gmra.mrb[188].mxu1 %v6177_v26  ;;  %v2366_v26 = vsel %vm612_vm1, %v2361_v4, %v2365_v17  ;;  %v2369_v4 = vor.u32 %v2367_v0, %v2365_v17 }
 0x2ae   : > { %13359 = vmatpush3.bf16.msra.mxu0 %v15712_v59  ;;  %13342 = vmatprep.mubr.msk.bf16.mxu0 %vm20811_vm0, %v20899_v7 }
 0x2af   : > { %13990 = vmatprep.mubr.msk.bf16.mxu1 %vm20811_vm0, %v20899_v7  ;;  %14043 = vmatpush3.bf16.msra.mxu1 %v15713_v40  ;;  %v15718_v40 = vld [vmem:[#allocation10 + $0x270] sm:$0xff]  }
 0x2b0   : > { %13360 = vmatprep.subr.bf16.mxu0 %v20899_v7  ;;  %v17878_v6 = vpop.f32.mrb[84].mxu1  ;;  %14044 = vmatprep.subr.bf16.mxu1 %v20899_v7 }
 0x2b1   : > { %20904 = vst [vmem:[#allocation56_spill] sm:$0xff] %v17878_v6  ;;  %v13624_v59 = vpop.f32.mrb[85].mxu1  ;;  %v15875_v6 = vld [vmem:[%s16937_s22 + $0x18] sm:$0xff]  }
 0x2b2   : > { %13361 = vmatpush3.bf16.msra.mxu0 %v15716_v11  ;;  %v17886_v32 = vpop.f32.mrb[86].mxu1  ;;  %v15722_v59 = vld [vmem:[#allocation10 + $0x278] sm:$0xff]   ;;  %v6188_v11 = vor.u32 %v6186_v12, %v6184_v34  ;;  %v15725_v12 = vld [vmem:[#allocation10 + $0x2c0] sm:$0xff]  }
 0x2b3   : > { %20905 = vst [vmem:[#allocation57_spill] sm:$0xff] %v17886_v32  ;;  %13362 = vmatprep.subr.bf16.mxu0 %v20899_v7  ;;  %v13625_v44 = vpop.f32.mrb[87].mxu1  ;;  %14045 = vmatpush3.bf16.msra.mxu1 %v15717_v5 }
 0x2b4   : > { %14046 = vmatprep.subr.bf16.mxu1 %v20899_v7  ;;  %v15723_v44 = vld [vmem:[#allocation10 + $0xb8] sm:$0xff]   ;;  %v6193_v0 = vsel %vm612_vm1, %v6188_v11, %v6192_v2  ;;  %v15727_v11 = vld [vmem:[#allocation10 + $0x2c8] sm:$0xff]  }
 0x2b5   : > { %13343 = vmatmul.mubr.bf16.gmra.mrb[32].mxu0 %v2366_v26  ;;  %13991 = vmatmul.mubr.bf16.gmra.mrb[192].mxu1 %v6185_v63  ;;  %v2374_v26 = vsel %vm612_vm1, %v2369_v4, %v2373_v31  ;;  %v11953_v63 = vcombine.low %v6446_v52, %v17746_v14  ;;  %v6467_v31 = vrot.slane %v17776_v29, 1  ;;  %v6469_v29 = vrot.slane %v17802_v53, 1  ;;  %v15728_v2 = vld [vmem:[#allocation10 + $0x108] sm:$0xff]  }
 0x2b6   : > { %13346 = vmatprep.mubr.msk.bf16.mxu0 %vm20811_vm0, %v20899_v7  ;;  %13363 = vmatpush3.bf16.msra.mxu0 %v15718_v40 }
 0x2b7   : > { %13994 = vmatprep.mubr.msk.bf16.mxu1 %vm20811_vm0, %v20899_v7  ;;  %14047 = vmatpush3.bf16.msra.mxu1 %v15721_v62  ;;  %v6466_v62 = vrot.slane %v11953_v63, 1  ;;  %v6470_v53 = vsel %vm20809_vm3, %v6467_v31, %v6469_v29  ;;  %v15730_v63 = vld [vmem:[#allocation10 + $0x110] sm:$0xff]  }
 0x2b8   : > { %13364 = vmatprep.subr.bf16.mxu0 %v20899_v7  ;;  %v17897_v5 = vpop.f32.mrb[88].mxu1  ;;  %14048 = vmatprep.subr.bf16.mxu1 %v20899_v7 }
 0x2b9   : > { %20906 = vst [vmem:[#allocation58_spill] sm:$0xff] %v17897_v5  ;;  %v13628_v39 = vpop.f32.mrb[89].mxu1  ;;  %v6468_v40 = vsel %vm20809_vm3, %v6466_v62, %v6467_v31  ;;  %v6471_v62 = vrot.slane %v17819_v35, 1  ;;  %v18398_v5 = vld [vmem:[%s16937_s22 + $0x14] sm:$0xff]  }
 0x2ba   : > { %v17902_v17 = vpop.f32.mrb[90].mxu1  ;;  %13365 = vmatpush3.bf16.msra.mxu0 %v15722_v59  ;;  %v15726_v59 = vld [vmem:[#allocation10 + $0x100] sm:$0xff]   ;;  %v15729_v39 = vld [vmem:[#allocation10 + $0x2d0] sm:$0xff]  }
 0x2bb   : > { %20907 = vst [vmem:[#allocation59_spill] sm:$0xff] %v17902_v17  ;;  %v13629_v34 = vpop.f32.mrb[91].mxu1  ;;  %14049 = vmatpush3.bf16.msra.mxu1 %v15723_v44  ;;  %13386 = vmatprep.subr.bf16.mxu0 %v20899_v7 }
 0x2bc   : > { %14106 = vmatprep.subr.bf16.mxu1 %v20899_v7  ;;  %v15731_v34 = vld [vmem:[#allocation10 + $0x2d8] sm:$0xff]  }
 0x2bd   : > { %13347 = vmatmul.mubr.bf16.gmra.mrb[36].mxu0 %v2374_v26  ;;  %13995 = vmatmul.mubr.bf16.gmra.mrb[196].mxu1 %v6193_v0 }
 0x2be   : > { %13366 = vmatprep.mubr.msk.bf16.mxu0 %vm20811_vm0, %v20899_v7  ;;  %14050 = vmatprep.mubr.msk.bf16.mxu1 %vm20811_vm0, %v20899_v7 }
 0x2c0   : > { %v17912_v14 = vpop.f32.mrb[92].mxu1 }
 0x2c1   : > { %20908 = vst [vmem:[#allocation60_spill] sm:$0xff] %v17912_v14  ;;  %v13632_v52 = vpop.f32.mrb[93].mxu1 }
 0x2c2   : > { %v17914_v60 = vpop.f32.mrb[94].mxu1  ;;  %v15732_v52 = vld [vmem:[#allocation10 + $0x118] sm:$0xff]  }
 0x2c3   : > { %20909 = vst [vmem:[#allocation61_spill] sm:$0xff] %v17914_v60  ;;  %v13633_v4 = vpop.f32.mrb[95].mxu1 }
 0x2c4   : > { %v6472_v4 = vsel %vm20809_vm3, %v6469_v29, %v6471_v62  ;;  %v6473_v29 = vrot.slane %v17848_v51, 1 }
 0x2c5   : > { %13367 = vmatmul.mubr.bf16.vlgmr.msra.gmra.mrb[40].mxu0 %v17754_v54  ;;  %14051 = vmatmul.mubr.bf16.vlgmr.msra.gmra.mrb[200].mxu1 %v6468_v40 }
 0x2c6   : > { %13387 = vmatpush3.bf16.msra.mxu0 %v15725_v12  ;;  %14107 = vmatpush3.bf16.msra.mxu1 %v15726_v59  ;;  %v6613_v12 = vld [vmem:[%s16930_s12 + $0x4] sm:$0xe]  ;;  %v6474_v51 = vsel %vm20809_vm3, %v6471_v62, %v6473_v29  ;;  %v15740_v62 = vld [vmem:[#allocation10 + $0x138] sm:$0xff]  }
 0x2c7   : > { %13388 = vmatprep.subr.bf16.mxu0 %v20899_v7  ;;  %13370 = vmatprep.mubr.msk.bf16.mxu0 %vm20811_vm0, %v20899_v7  ;;  %v15733_v59 = vld [vmem:[#allocation10 + $0x2e0] sm:$0xff]  }
 0x2c8   : > { %14054 = vmatprep.mubr.msk.bf16.mxu1 %vm20811_vm0, %v20899_v7  ;;  %v17924_v44 = vpop.f32.mrb[96].mxu1  ;;  %14108 = vmatprep.subr.bf16.mxu1 %v20899_v7 }
 0x2c9   : > { %20910 = vst [vmem:[#allocation62_spill] sm:$0xff] %v17924_v44  ;;  %v13636_v54 = vpop.f32.mrb[97].mxu1 }
 0x2ca   : > { %13389 = vmatpush3.bf16.msra.mxu0 %v15727_v11  ;;  %v17927_v26 = vpop.f32.mrb[98].mxu1  ;;  %14109 = vmatpush3.bf16.msra.mxu1 %v15728_v2  ;;  %v6614_v11 = vld [vmem:[%s16930_s12 + $0x8] sm:$0xf] }
 0x2cb   : > { %20911 = vst [vmem:[#allocation63_spill] sm:$0xff] %v17927_v26  ;;  %13390 = vmatprep.subr.bf16.mxu0 %v20899_v7  ;;  %v13637_v0 = vpop.f32.mrb[99].mxu1  ;;  %14110 = vmatprep.subr.bf16.mxu1 %v20899_v7  ;;  %v15734_v54 = vld [vmem:[#allocation10 + $0x120] sm:$0xff]  }
 0x2cc   : > { %v15743_v0 = vld [vmem:[%s16930_s12 + $0xc] sm:$0xff]  }
 0x2cd   : > { %13371 = vmatmul.mubr.bf16.gmra.mrb[44].mxu0 %v17771_v13  ;;  %14055 = vmatmul.mubr.bf16.gmra.mrb[204].mxu1 %v6470_v53  ;;  %v17950_v53 = vcombine.low %v6613_v12, %v6614_v11  ;;  %v6844_v26 = vshrl.u32 %v15743_v0, 16 }
 0x2ce   : > { %13391 = vmatpush3.bf16.msra.mxu0 %v15729_v39  ;;  %14111 = vmatpush3.bf16.msra.mxu1 %v15730_v63  ;;  %v15735_v39 = vld [vmem:[#allocation10 + $0x2e8] sm:$0xff]  }
 0x2cf   : > { %13374 = vmatprep.mubr.msk.bf16.mxu0 %vm20811_vm0, %v20899_v7  ;;  %13392 = vmatprep.subr.bf16.mxu0 %v20899_v7  ;;  %20914 = vst [vmem:[#allocation66_spill] sm:$0xff] %v17950_v53  ;;  %v15736_v63 = vld [vmem:[#allocation10 + $0x128] sm:$0xff]   ;;  %v6846_v44 = vrot.slane %v6844_v26, 1 }
 0x2d0   : > { %14058 = vmatprep.mubr.msk.bf16.mxu1 %vm20811_vm0, %v20899_v7  ;;  %v17939_v31 = vpop.f32.mrb[100].mxu1  ;;  %14112 = vmatprep.subr.bf16.mxu1 %v20899_v7 }
 0x2d1   : > { %20912 = vst [vmem:[#allocation64_spill] sm:$0xff] %v17939_v31  ;;  %v13692_v40 = vpop.f32.mrb[101].mxu1 }
 0x2d2   : > { %13393 = vmatpush3.bf16.msra.mxu0 %v15731_v34  ;;  %v17943_v35 = vpop.f32.mrb[102].mxu1  ;;  %14113 = vmatpush3.bf16.msra.mxu1 %v15732_v52  ;;  %v6475_v52 = vrot.slane %v17871_v15, 1  ;;  %v15737_v40 = vld [vmem:[#allocation10 + $0x2f0] sm:$0xff]   ;;  %v15739_v15 = vld [vmem:[#allocation10 + $0x2f8] sm:$0xff]  }
 0x2d3   : > { %20913 = vst [vmem:[#allocation65_spill] sm:$0xff] %v17943_v35  ;;  %13394 = vmatprep.subr.bf16.mxu0 %v20899_v7  ;;  %v13693_v2 = vpop.f32.mrb[103].mxu1  ;;  %14114 = vmatprep.subr.bf16.mxu1 %v20899_v7 }
 0x2d4   : > { %v6839_v2 = vshll.u32 %v17950_v53, 16 }
 0x2d5   : > { %13375 = vmatmul.mubr.bf16.gmra.mrb[48].mxu0 %v17798_v10  ;;  %14059 = vmatmul.mubr.bf16.gmra.mrb[208].mxu1 %v6472_v4  ;;  %v6836_v4 = vshrl.u32 %v17950_v53, 16 }
 0x2d6   : > { %13395 = vmatpush3.bf16.msra.mxu0 %v15733_v59  ;;  %13378 = vmatprep.mubr.msk.bf16.mxu0 %vm20811_vm0, %v20899_v7  ;;  %v15738_v59 = vld [vmem:[#allocation10 + $0x130] sm:$0xff]  }
 0x2d7   : > { %14062 = vmatprep.mubr.msk.bf16.mxu1 %vm20811_vm0, %v20899_v7  ;;  %14115 = vmatpush3.bf16.msra.mxu1 %v15734_v54 }
 0x2d8   : > { %13396 = vmatprep.subr.bf16.mxu0 %v20899_v7  ;;  %v17959_v34 = vpop.f32.mrb[104].mxu1  ;;  %14116 = vmatprep.subr.bf16.mxu1 %v20899_v7 }
 0x2d9   : > { %20915 = vst [vmem:[#allocation67_spill] sm:$0xff] %v17959_v34  ;;  %v13696_v12 = vpop.f32.mrb[105].mxu1  ;;  %v2627_v34 = vld [vmem:[%s16930_s12] sm:$0xe] }
 0x2da   : > { %13397 = vmatpush3.bf16.msra.mxu0 %v15735_v39  ;;  %v17964_v11 = vpop.f32.mrb[106].mxu1  ;;  %v6847_v39 = vshll.u32 %v15743_v0, 16  ;;  %v15747_v12 = vld [vmem:[%s16930_s12 + $0x14] sm:$0xff]  }
 0x2db   : > { %20916 = vst [vmem:[#allocation68_spill] sm:$0xff] %v17964_v11  ;;  %13398 = vmatprep.subr.bf16.mxu0 %v20899_v7  ;;  %v13697_v54 = vpop.f32.mrb[107].mxu1  ;;  %14117 = vmatpush3.bf16.msra.mxu1 %v15736_v63  ;;  %v11746_v63 = vcombine.low %v2627_v34, %v17742_v38  ;;  %v6841_v11 = vrot.slane %v6839_v2, 2  ;;  %v2649_v38 = vrot.slane %v17771_v13, 1  ;;  %v6853_v34 = vshrl.u32 %v15747_v12, 16  ;;  %v15744_v13 = vld [vmem:[#allocation10 + $0x300] sm:$0xff]  }
 0x2dc   : > { %14118 = vmatprep.subr.bf16.mxu1 %v20899_v7 }
 0x2dd   : > { %13379 = vmatmul.mubr.bf16.gmra.mrb[52].mxu0 %v17815_v56  ;;  %14063 = vmatmul.mubr.bf16.gmra.mrb[212].mxu1 %v6474_v51  ;;  %v6476_v51 = vsel %vm20809_vm3, %v6473_v29, %v6475_v52  ;;  %v2648_v31 = vrot.slane %v11746_v63, 1  ;;  %v6856_v29 = vshll.u32 %v15747_v12, 16  ;;  %v15752_v52 = vld [vmem:[%s16930_s12 + $0x1c] sm:$0xff]   ;;  %v2651_v12 = vrot.slane %v17798_v10, 1 }
 0x2de   : > { %13382 = vmatprep.mubr.msk.bf16.mxu0 %vm20811_vm0, %v20899_v7  ;;  %13399 = vmatpush3.bf16.msra.mxu0 %v15737_v40  ;;  %v6838_v40 = vrot.slane %v6836_v4, 1 }
 0x2df   : > { %14066 = vmatprep.mubr.msk.bf16.mxu1 %vm20811_vm0, %v20899_v7  ;;  %14119 = vmatpush3.bf16.msra.mxu1 %v15738_v59  ;;  %v6849_v59 = vrot.slane %v6847_v39, 2  ;;  %v15745_v39 = vld [vmem:[#allocation10 + $0x180] sm:$0xff]  }
 0x2e0   : > { %13400 = vmatprep.subr.bf16.mxu0 %v20899_v7  ;;  %v17979_v54 = vpop.f32.mrb[108].mxu1  ;;  %14120 = vmatprep.subr.bf16.mxu1 %v20899_v7  ;;  %v6842_v26 = vor.u32 %v6841_v11, %v6838_v40  ;;  %v6862_v11 = vshrl.u32 %v15752_v52, 16  ;;  %v6865_v40 = vshll.u32 %v15752_v52, 16 }
 0x2e1   : > { %20917 = vst [vmem:[#allocation69_spill] sm:$0xff] %v17979_v54  ;;  %v13700_v0 = vpop.f32.mrb[109].mxu1  ;;  %v15746_v54 = vld [vmem:[#allocation10 + $0x308] sm:$0xff]  }
 0x2e2   : > { %v17983_v53 = vpop.f32.mrb[110].mxu1  ;;  %13401 = vmatpush3.bf16.msra.mxu0 %v15739_v15  ;;  %v2650_v15 = vsel %vm20809_vm3, %v2648_v31, %v2649_v38  ;;  %v6855_v0 = vrot.slane %v6853_v34, 1 }
 0x2e3   : > { %20918 = vst [vmem:[#allocation70_spill] sm:$0xff] %v17983_v53  ;;  %v13701_v35 = vpop.f32.mrb[111].mxu1  ;;  %14121 = vmatpush3.bf16.msra.mxu1 %v15740_v62  ;;  %13422 = vmatprep.subr.bf16.mxu0 %v20899_v7 }
 0x2e4   : > { %14178 = vmatprep.subr.bf16.mxu1 %v20899_v7  ;;  %v6850_v35 = vor.u32 %v6849_v59, %v6846_v44  ;;  %v15748_v44 = vld [vmem:[#allocation10 + $0x188] sm:$0xff]  }
 0x2e5   : > { %13383 = vmatmul.mubr.bf16.gmra.mrb[56].mxu0 %v17839_v1  ;;  %14067 = vmatmul.mubr.bf16.gmra.mrb[216].mxu1 %v6476_v51  ;;  %v6858_v51 = vrot.slane %v6856_v29, 2  ;;  %v15756_v59 = vld [vmem:[%s16930_s12 + $0x24] sm:$0xff]   ;;  %v2652_v29 = vsel %vm20809_vm3, %v2649_v38, %v2651_v12 }
 0x2e6   : > { %13402 = vmatprep.mubr.msk.bf16.mxu0 %vm20811_vm0, %v20899_v7  ;;  %14122 = vmatprep.mubr.msk.bf16.mxu1 %vm20811_vm0, %v20899_v7  ;;  %v6851_v63 = vsel %vm20810_vm2, %v6842_v26, %v6850_v35  ;;  %v6871_v52 = vshrl.u32 %v15756_v59, 16  ;;  %v6874_v38 = vshll.u32 %v15756_v59, 16 }
 0x2e7   : > { %v6859_v31 = vor.u32 %v6858_v51, %v6855_v0  ;;  %v2653_v0 = vrot.slane %v17815_v56, 1  ;;  %v15753_v51 = vld [vmem:[#allocation10 + $0x198] sm:$0xff]  }
 0x2e8   : > { %v17994_v4 = vpop.f32.mrb[112].mxu1  ;;  %v6876_v56 = vrot.slane %v6874_v38, 2 }
 0x2e9   : > { %20919 = vst [vmem:[#allocation71_spill] sm:$0xff] %v17994_v4  ;;  %v13704_v2 = vpop.f32.mrb[113].mxu1  ;;  %v2654_v59 = vsel %vm20809_vm3, %v2651_v12, %v2653_v0  ;;  %v15758_v12 = vld [vmem:[#allocation10 + $0x1a8] sm:$0xff]  }
 0x2ea   : > { %v17997_v62 = vpop.f32.mrb[114].mxu1  ;;  %v15750_v2 = vld [vmem:[#allocation10 + $0x190] sm:$0xff]  }
 0x2eb   : > { %20920 = vst [vmem:[#allocation72_spill] sm:$0xff] %v17997_v62  ;;  %v13705_v53 = vpop.f32.mrb[115].mxu1 }
 0x2ec   : > { %v15749_v53 = vld [vmem:[#allocation10 + $0x310] sm:$0xff]  }
 0x2ed   : > { %13403 = vmatmul.mubr.bf16.vlgmr.msra.gmra.mrb[60].mxu0 %v2650_v15  ;;  %14123 = vmatmul.mubr.bf16.vlgmr.msra.gmra.mrb[220].mxu1 %v6851_v63  ;;  %v6864_v15 = vrot.slane %v6862_v11, 1 }
 0x2ee   : > { %13423 = vmatpush3.bf16.msra.mxu0 %v15744_v13  ;;  %14179 = vmatpush3.bf16.msra.mxu1 %v15745_v39  ;;  %v6860_v13 = vsel %vm20810_vm2, %v6850_v35, %v6859_v31  ;;  %v6867_v39 = vrot.slane %v6865_v40, 2  ;;  %v15760_v35 = vld [vmem:[%s16930_s12 + $0x2c] ss:$0 sps:$4 sm:$0x33]  }
 0x2ef   : > { %13424 = vmatprep.subr.bf16.mxu0 %v20899_v7  ;;  %13406 = vmatprep.mubr.msk.bf16.mxu0 %vm20811_vm0, %v20899_v7 }
 0x2f0   : > { %14126 = vmatprep.mubr.msk.bf16.mxu1 %vm20811_vm0, %v20899_v7  ;;  %v18007_v10 = vpop.f32.mrb[116].mxu1  ;;  %14180 = vmatprep.subr.bf16.mxu1 %v20899_v7 }
 0x2f1   : > { %20921 = vst [vmem:[#allocation73_spill] sm:$0xff] %v18007_v10  ;;  %v13708_v34 = vpop.f32.mrb[117].mxu1 }
 0x2f2   : > { %13425 = vmatpush3.bf16.msra.mxu0 %v15746_v54  ;;  %v18011_v26 = vpop.f32.mrb[118].mxu1  ;;  %14181 = vmatpush3.bf16.msra.mxu1 %v15748_v44  ;;  %v15751_v54 = vld [vmem:[#allocation10 + $0x318] sm:$0xff]   ;;  %v6873_v34 = vrot.slane %v6871_v52, 1  ;;  %v6868_v44 = vor.u32 %v6867_v39, %v6864_v15  ;;  %v15755_v15 = vld [vmem:[#allocation10 + $0x1a0] sm:$0xff]   ;;  %v15757_v39 = vld [vmem:[#allocation10 + $0x328] sm:$0xff]  }
 0x2f3   : > { %20922 = vst [vmem:[#allocation74_spill] sm:$0xff] %v18011_v26  ;;  %13426 = vmatprep.subr.bf16.mxu0 %v20899_v7  ;;  %v13709_v63 = vpop.f32.mrb[119].mxu1  ;;  %14182 = vmatprep.subr.bf16.mxu1 %v20899_v7  ;;  %v15785_v26 = vld [vmem:[#allocation10 + $0x230] sm:$0xff]  }
 0x2f4   : > { %v6869_v52 = vsel %vm20810_vm2, %v6859_v31, %v6868_v44  ;;  %v6880_v63 = vshrl.u32 %v15760_v35, 16  ;;  %v6877_v31 = vor.u32 %v6876_v56, %v6873_v34  ;;  %v15759_v34 = vld [vmem:[#allocation10 + $0x330] sm:$0xff]  }
 0x2f5   : > { %13407 = vmatmul.mubr.bf16.gmra.mrb[64].mxu0 %v2652_v29  ;;  %14127 = vmatmul.mubr.bf16.gmra.mrb[224].mxu1 %v6860_v13  ;;  %v2655_v13 = vrot.slane %v17839_v1, 1 }
 0x2f6   : > { %13427 = vmatpush3.bf16.msra.mxu0 %v15749_v53  ;;  %14183 = vmatpush3.bf16.msra.mxu1 %v15750_v2  ;;  %v15754_v53 = vld [vmem:[#allocation10 + $0x320] sm:$0xff]   ;;  %v6882_v38 = vrot.slane %v6880_v63, 1  ;;  %v18055_v63 = vld [vmem:[%s16930_s12 + $0xc] sm:$0xf] }
 0x2f7   : > { %13410 = vmatprep.mubr.msk.bf16.mxu0 %vm20811_vm0, %v20899_v7  ;;  %13428 = vmatprep.subr.bf16.mxu0 %v20899_v7 }
 0x2f8   : > { %14130 = vmatprep.mubr.msk.bf16.mxu1 %vm20811_vm0, %v20899_v7  ;;  %v18023_v11 = vpop.f32.mrb[120].mxu1  ;;  %14184 = vmatprep.subr.bf16.mxu1 %v20899_v7 }
 0x2f9   : > { %20923 = vst [vmem:[#allocation75_spill] sm:$0xff] %v18023_v11  ;;  %v13764_v40 = vpop.f32.mrb[121].mxu1 }
 0x2fa   : > { %13429 = vmatpush3.bf16.msra.mxu0 %v15751_v54  ;;  %v18027_v29 = vpop.f32.mrb[122].mxu1  ;;  %14185 = vmatpush3.bf16.msra.mxu1 %v15753_v51  ;;  %v6883_v54 = vshll.u32 %v15760_v35, 16  ;;  %v2656_v40 = vsel %vm20809_vm3, %v2653_v0, %v2655_v13 }
 0x2fb   : > { %20924 = vst [vmem:[#allocation76_spill] sm:$0xff] %v18027_v29  ;;  %13430 = vmatprep.subr.bf16.mxu0 %v20899_v7  ;;  %v13765_v2 = vpop.f32.mrb[123].mxu1  ;;  %14186 = vmatprep.subr.bf16.mxu1 %v20899_v7 }
 0x2fc   : > { %v6885_v35 = vrot.slane %v6883_v54, 2  ;;  %v2657_v2 = vrot.slane %v17867_v55, 1 }
 0x2fd   : > { %13411 = vmatmul.mubr.bf16.gmra.mrb[68].mxu0 %v2654_v59  ;;  %14131 = vmatmul.mubr.bf16.gmra.mrb[228].mxu1 %v6869_v52  ;;  %v15761_v52 = vld [vmem:[#allocation10 + $0x1b0] sm:$0xff]  }
 0x2fe   : > { %13431 = vmatpush3.bf16.msra.mxu0 %v15754_v53  ;;  %13414 = vmatprep.mubr.msk.bf16.mxu0 %vm20811_vm0, %v20899_v7  ;;  %v6878_v53 = vsel %vm20810_vm2, %v6868_v44, %v6877_v31  ;;  %v6886_v0 = vor.u32 %v6885_v35, %v6882_v38  ;;  %v15762_v44 = vld [vmem:[#allocation10 + $0x338] sm:$0xff]   ;;  %v2658_v54 = vsel %vm20809_vm3, %v2655_v13, %v2657_v2  ;;  %v2851_v13 = vrot.slane %v16985_v20, 1 }
 0x2ff   : > { %14134 = vmatprep.mubr.msk.bf16.mxu1 %vm20811_vm0, %v20899_v7  ;;  %14187 = vmatpush3.bf16.msra.mxu1 %v15755_v15  ;;  %v7191_v15 = vld [vmem:[%s16930_s12 + $0x8] sm:$0xc]  ;;  %v18068_v35 = vld [vmem:[%s16930_s12 + $0x10] sm:$0xff]  }
 0x300   : > { %13432 = vmatprep.subr.bf16.mxu0 %v20899_v7  ;;  %v18038_v1 = vpop.f32.mrb[124].mxu1  ;;  %14188 = vmatprep.subr.bf16.mxu1 %v20899_v7  ;;  %v6887_v38 = vsel %vm20810_vm2, %v6877_v31, %v6886_v0  ;;  %v16049_v31 = vld [vmem:[%s16930_s12 + $0xc] sm:$0xff]  }
 0x301   : > { %20925 = vst [vmem:[#allocation77_spill] sm:$0xff] %v18038_v1  ;;  %v13768_v51 = vpop.f32.mrb[125].mxu1  ;;  %v15783_v1 = vld [vmem:[#allocation10 + $0x4f0] sm:$0xff]  }
 0x302   : > { %13433 = vmatpush3.bf16.msra.mxu0 %v15757_v39  ;;  %v18042_v59 = vpop.f32.mrb[126].mxu1  ;;  %v15763_v39 = vld [vmem:[#allocation10 + $0x1b8] sm:$0xff]  }
 0x303   : > { %20926 = vst [vmem:[#allocation78_spill] sm:$0xff] %v18042_v59  ;;  %13434 = vmatprep.subr.bf16.mxu0 %v20899_v7  ;;  %v13769_v56 = vpop.f32.mrb[127].mxu1  ;;  %14189 = vmatpush3.bf16.msra.mxu1 %v15758_v12 }
 0x304   : > { %14190 = vmatprep.subr.bf16.mxu1 %v20899_v7 }
 0x305   : > { %13415 = vmatmul.mubr.bf16.gmra.mrb[72].mxu0 %v2656_v40  ;;  %14135 = vmatmul.mubr.bf16.gmra.mrb[232].mxu1 %v6878_v53  ;;  %v18065_v40 = vcombine.low %v7191_v15, %v18055_v63  ;;  %v15767_v15 = vld [vmem:[#allocation10 + $0x4c0] sm:$0xff]  }
 0x306   : > { %13418 = vmatprep.mubr.msk.bf16.mxu0 %vm20811_vm0, %v20899_v7  ;;  %13435 = vmatpush3.bf16.msra.mxu0 %v15759_v34  ;;  %v2852_v34 = vrot.slane %v16049_v31, 1  ;;  %v16050_v31 = vld [vmem:[%s16930_s12 + $0x14] sm:$0xff]  }
 0x307   : > { %14138 = vmatprep.mubr.msk.bf16.mxu1 %vm20811_vm0, %v20899_v7  ;;  %14191 = vmatpush3.bf16.msra.mxu1 %v15761_v52  ;;  %v7246_v56 = vrot.slane %v18065_v40, 2  ;;  %v7247_v52 = vrot.slane %v18068_v35, 2 }
 0x308   : > { %13436 = vmatprep.subr.bf16.mxu0 %v20899_v7  ;;  %v18057_v55 = vpop.f32.mrb[128].mxu1  ;;  %14192 = vmatprep.subr.bf16.mxu1 %v20899_v7 }
 0x309   : > { %20927 = vst [vmem:[#allocation79_spill] sm:$0xff] %v18057_v55  ;;  %v13772_v12 = vpop.f32.mrb[129].mxu1  ;;  %v7248_v20 = vsel %vm20808_vm4, %v7246_v56, %v7247_v52  ;;  %v15781_v55 = vld [vmem:[#allocation10 + $0x4e8] sm:$0xff]  }
 0x30a   : > { %v18061_v51 = vpop.f32.mrb[130].mxu1  ;;  %13437 = vmatpush3.bf16.msra.mxu0 %v15762_v44  ;;  %v2853_v44 = vsel %vm20809_vm3, %v2851_v13, %v2852_v34  ;;  %v15768_v12 = vld [vmem:[#allocation10 + $0x200] sm:$0xff]  }
 0x30b   : > { %20928 = vst [vmem:[#allocation80_spill] sm:$0xff] %v18061_v51  ;;  %v13773_v53 = vpop.f32.mrb[131].mxu1  ;;  %14193 = vmatpush3.bf16.msra.mxu1 %v15763_v39  ;;  %13638 = vmatprep.subr.bf16.mxu0 %v20899_v7  ;;  %v2854_v51 = vrot.slane %v16050_v31, 1  ;;  %v15773_v31 = vld [vmem:[#allocation10 + $0x210] sm:$0xff]  }
 0x30c   : > { %14250 = vmatprep.subr.bf16.mxu1 %v20899_v7  ;;  %v15769_v53 = vld [vmem:[#allocation10 + $0x4c8] sm:$0xff]  }
 0x30d   : > { %13419 = vmatmul.mubr.bf16.gmra.mrb[76].mxu0 %v2658_v54  ;;  %14139 = vmatmul.mubr.bf16.gmra.mrb[236].mxu1 %v6887_v38  ;;  %v18087_v54 = vld [vmem:[%s16930_s12 + $0x18] sm:$0xff]  }
 0x30e   : > { %13438 = vmatprep.mubr.msk.bf16.mxu0 %vm20811_vm0, %v20899_v7  ;;  %14194 = vmatprep.mubr.msk.bf16.mxu1 %vm20811_vm0, %v20899_v7  ;;  %v7249_v13 = vrot.slane %v18087_v54, 2 }
 0x310   : > { %v18080_v2 = vpop.f32.mrb[132].mxu1 }
 0x311   : > { %20929 = vst [vmem:[#allocation81_spill] sm:$0xff] %v18080_v2  ;;  %v13776_v0 = vpop.f32.mrb[133].mxu1 }
 0x312   : > { %v18083_v39 = vpop.f32.mrb[134].mxu1  ;;  %v15771_v0 = vld [vmem:[#allocation10 + $0x208] sm:$0xff]  }
 0x313   : > { %20930 = vst [vmem:[#allocation82_spill] sm:$0xff] %v18083_v39  ;;  %v13777_v38 = vpop.f32.mrb[135].mxu1  ;;  %v18105_v39 = vld [vmem:[%s16930_s12 + $0x20] sm:$0xff]  }
 0x314   : > { %v7250_v38 = vsel %vm20808_vm4, %v7247_v52, %v7249_v13  ;;  %v7251_v52 = vrot.slane %v18105_v39, 2 }
 0x315   : > { %13439 = vmatmul.mubr.bf16.vlgmr.msra.gmra.mrb[80].mxu0 %v2853_v44  ;;  %14195 = vmatmul.mubr.bf16.vlgmr.msra.gmra.mrb[240].mxu1 %v7248_v20  ;;  %v15772_v20 = vld [vmem:[#allocation10 + $0x4d0] sm:$0xff]  }
 0x316   : > { %13639 = vmatpush3.bf16.msra.mxu0 %v15767_v15  ;;  %14251 = vmatpush3.bf16.msra.mxu1 %v15768_v12  ;;  %v2855_v15 = vsel %vm20809_vm3, %v2852_v34, %v2854_v51  ;;  %v15774_v34 = vld [vmem:[#allocation10 + $0x4d8] sm:$0xff]  }
 0x317   : > { %13640 = vmatprep.subr.bf16.mxu0 %v20899_v7  ;;  %13442 = vmatprep.mubr.msk.bf16.mxu0 %vm20811_vm0, %v20899_v7 }
 0x318   : > { %14198 = vmatprep.mubr.msk.bf16.mxu1 %vm20811_vm0, %v20899_v7  ;;  %v18096_v56 = vpop.f32.mrb[136].mxu1  ;;  %14252 = vmatprep.subr.bf16.mxu1 %v20899_v7 }
 0x319   : > { %20931 = vst [vmem:[#allocation83_spill] sm:$0xff] %v18096_v56  ;;  %v13780_v44 = vpop.f32.mrb[137].mxu1  ;;  %v15778_v56 = vld [vmem:[#allocation10 + $0x220] sm:$0xff]  }
 0x31a   : > { %13641 = vmatpush3.bf16.msra.mxu0 %v15769_v53  ;;  %v18100_v12 = vpop.f32.mrb[138].mxu1  ;;  %14253 = vmatpush3.bf16.msra.mxu1 %v15771_v0  ;;  %v16051_v53 = vld [vmem:[%s16930_s12 + $0x1c] sm:$0xff]  }
 0x31b   : > { %20932 = vst [vmem:[#allocation84_spill] sm:$0xff] %v18100_v12  ;;  %13642 = vmatprep.subr.bf16.mxu0 %v20899_v7  ;;  %v13781_v2 = vpop.f32.mrb[139].mxu1  ;;  %14254 = vmatprep.subr.bf16.mxu1 %v20899_v7  ;;  %v2856_v44 = vrot.slane %v16051_v53, 1  ;;  %v15776_v0 = vld [vmem:[#allocation10 + $0x218] sm:$0xff]   ;;  %v7252_v53 = vsel %vm20808_vm4, %v7249_v13, %v7251_v52  ;;  %v18124_v12 = vld [vmem:[%s16930_s12 + $0x28] sm:$0xff]  }
 0x31c   : > { %v7253_v13 = vrot.slane %v18124_v12, 2 }
 0x31d   : > { %13443 = vmatmul.mubr.bf16.gmra.mrb[84].mxu0 %v2855_v15  ;;  %14199 = vmatmul.mubr.bf16.gmra.mrb[244].mxu1 %v7250_v38  ;;  %v15777_v38 = vld [vmem:[#allocation10 + $0x4e0] sm:$0xff]  }
 0x31e   : > { %13643 = vmatpush3.bf16.msra.mxu0 %v15772_v20  ;;  %14255 = vmatpush3.bf16.msra.mxu1 %v15773_v31  ;;  %v2857_v20 = vsel %vm20809_vm3, %v2854_v51, %v2856_v44  ;;  %v16052_v51 = vld [vmem:[%s16930_s12 + $0x24] sm:$0xff]   ;;  %v7254_v59 = vsel %vm20808_vm4, %v7251_v52, %v7253_v13 }
 0x31f   : > { %13446 = vmatprep.mubr.msk.bf16.mxu0 %vm20811_vm0, %v20899_v7  ;;  %13644 = vmatprep.subr.bf16.mxu0 %v20899_v7 }
 0x320   : > { %14202 = vmatprep.mubr.msk.bf16.mxu1 %vm20811_vm0, %v20899_v7  ;;  %v18115_v2 = vpop.f32.mrb[140].mxu1  ;;  %14256 = vmatprep.subr.bf16.mxu1 %v20899_v7 }
 0x321   : > { %20933 = vst [vmem:[#allocation85_spill] sm:$0xff] %v18115_v2  ;;  %v13836_v15 = vpop.f32.mrb[141].mxu1 }
 0x322   : > { %13645 = vmatpush3.bf16.msra.mxu0 %v15774_v34  ;;  %v18119_v31 = vpop.f32.mrb[142].mxu1  ;;  %14257 = vmatpush3.bf16.msra.mxu1 %v15776_v0  ;;  %v2858_v34 = vrot.slane %v16052_v51, 1  ;;  %v15780_v15 = vld [vmem:[%s16930_s12 + $0x30] ss:$0 sps:$4 sm:$0x33]  }
 0x323   : > { %20934 = vst [vmem:[#allocation86_spill] sm:$0xff] %v18119_v31  ;;  %13646 = vmatprep.subr.bf16.mxu0 %v20899_v7  ;;  %v13837_v2 = vpop.f32.mrb[143].mxu1  ;;  %14258 = vmatprep.subr.bf16.mxu1 %v20899_v7  ;;  %v15784_v31 = vld [vmem:[%s16930_s12 + $0x2c] ss:$0 sps:$4 sm:$0x11]  }
 0x324   : > { %v15782_v0 = vld [vmem:[#allocation10 + $0x228] sm:$0xff]   ;;  %v2860_v11 = vrot.slane %v15784_v31, 1  ;;  %v4041_v31 = vshrl.u32 %v17418_v21, 16 }
 0x325   : > { %13447 = vmatmul.mubr.bf16.gmra.mrb[88].mxu0 %v2857_v20  ;;  %14203 = vmatmul.mubr.bf16.gmra.mrb[248].mxu1 %v7252_v53  ;;  %v7602_v53 = vld [vmem:[%s16930_s12 + $0x8] sm:$0x8] }
 0x326   : > { %13647 = vmatpush3.bf16.msra.mxu0 %v15777_v38  ;;  %13450 = vmatprep.mubr.msk.bf16.mxu0 %vm20811_vm0, %v20899_v7  ;;  %v2859_v38 = vsel %vm20809_vm3, %v2856_v44, %v2858_v34  ;;  %v15787_v44 = vld [vmem:[#allocation10 + $0x238] sm:$0xff]  }
 0x327   : > { %14206 = vmatprep.mubr.msk.bf16.mxu1 %vm20811_vm0, %v20899_v7  ;;  %14259 = vmatpush3.bf16.msra.mxu1 %v15778_v56  ;;  %v7255_v56 = vrot.slane %v15780_v15, 2 }
 0x328   : > { %13648 = vmatprep.subr.bf16.mxu0 %v20899_v7  ;;  %v18136_v2 = vpop.f32.mrb[144].mxu1  ;;  %14260 = vmatprep.subr.bf16.mxu1 %v20899_v7 }
 0x329   : > { %20935 = vst [vmem:[#allocation87_spill] sm:$0xff] %v18136_v2  ;;  %v13840_v20 = vpop.f32.mrb[145].mxu1  ;;  %v15803_v2 = vld [vmem:[#allocation10 + $0x270] sm:$0xff]  }
 0x32a   : > { %13649 = vmatpush3.bf16.msra.mxu0 %v15781_v55  ;;  %v18141_v51 = vpop.f32.mrb[146].mxu1  ;;  %v15786_v20 = vld [vmem:[#allocation10 + $0x4f8] sm:$0xff]   ;;  %v4043_v55 = vshll.u32 %v17418_v21, 16 }
 0x32b   : > { %20936 = vst [vmem:[#allocation88_spill] sm:$0xff] %v18141_v51  ;;  %13650 = vmatprep.subr.bf16.mxu0 %v20899_v7  ;;  %v13841_v29 = vpop.f32.mrb[147].mxu1  ;;  %14261 = vmatpush3.bf16.msra.mxu1 %v15782_v0  ;;  %v2861_v0 = vsel %vm20809_vm3, %v2858_v34, %v2860_v11  ;;  %v7623_v34 = vrot.slane %v18068_v35, 3  ;;  %v15789_v35 = vld [vmem:[#allocation10 + $0x240] sm:$0xff]  }
 0x32c   : > { %14262 = vmatprep.subr.bf16.mxu1 %v20899_v7  ;;  %v12017_v29 = vcombine.low %v7602_v53, %v18055_v63  ;;  %v7256_v63 = vsel %vm20808_vm4, %v7253_v13, %v7255_v56 }
 0x32d   : > { %13451 = vmatmul.mubr.bf16.gmra.mrb[92].mxu0 %v2859_v38  ;;  %14207 = vmatmul.mubr.bf16.gmra.mrb[252].mxu1 %v7254_v59  ;;  %v4045_v59 = vrot.slane %v4043_v55, 1 }
 0x32e   : > { %13454 = vmatprep.mubr.msk.bf16.mxu0 %vm20811_vm0, %v20899_v7  ;;  %13651 = vmatpush3.bf16.msra.mxu0 %v15783_v1  ;;  %v18159_v1 = vld [vmem:[%s16937_s22 + $0x8] sm:$0xff]   ;;  %v7622_v53 = vrot.slane %v12017_v29, 3  ;;  %v18177_v29 = vld [vmem:[%s16937_s22 + $0x10] sm:$0xff]  }
 0x32f   : > { %14210 = vmatprep.mubr.msk.bf16.mxu1 %vm20811_vm0, %v20899_v7  ;;  %14263 = vmatpush3.bf16.msra.mxu1 %v15785_v26  ;;  %v4048_v38 = vshll.u32 %v18159_v1, 16  ;;  %v4046_v21 = vor.u32 %v4045_v59, %v4041_v31  ;;  %v4052_v55 = vshrl.u32 %v18159_v1, 16 }
 0x330   : > { %13652 = vmatprep.subr.bf16.mxu0 %v20899_v7  ;;  %v18153_v52 = vpop.f32.mrb[148].mxu1  ;;  %14264 = vmatprep.subr.bf16.mxu1 %v20899_v7  ;;  %v7624_v31 = vsel %vm20803_vm5, %v7622_v53, %v7623_v34 }
 0x331   : > { %20937 = vst [vmem:[#allocation89_spill] sm:$0xff] %v18153_v52  ;;  %v13844_v15 = vpop.f32.mrb[149].mxu1  ;;  %v4050_v11 = vrot.slane %v4048_v38, 1  ;;  %v18228_v52 = vld [vmem:[%s16937_s22 + $0x28] ss:$0 sps:$4 sm:$0x11]  }
 0x332   : > { %v18163_v26 = vpop.f32.mrb[150].mxu1  ;;  %13653 = vmatpush3.bf16.msra.mxu0 %v15786_v20  ;;  %v15788_v20 = vld [vmem:[#allocation10 + $0x500] sm:$0xff]  }
 0x333   : > { %20938 = vst [vmem:[#allocation90_spill] sm:$0xff] %v18163_v26  ;;  %v13845_v51 = vpop.f32.mrb[151].mxu1  ;;  %14265 = vmatpush3.bf16.msra.mxu1 %v15787_v44  ;;  %13710 = vmatprep.subr.bf16.mxu0 %v20899_v7  ;;  %v4051_v56 = vsel %vm612_vm1, %v4046_v21, %v4050_v11  ;;  %v4056_v44 = vshll.u32 %v18177_v29, 16  ;;  %v4054_v38 = vor.u32 %v4052_v55, %v4050_v11  ;;  %v7625_v21 = vrot.slane %v18087_v54, 3  ;;  %v15798_v26 = vld [vmem:[#allocation10 + $0x528] sm:$0xff]  }
 0x334   : > { %14322 = vmatprep.subr.bf16.mxu1 %v20899_v7  ;;  %v4060_v55 = vshrl.u32 %v18177_v29, 16 }
 0x335   : > { %13455 = vmatmul.mubr.bf16.gmra.mrb[96].mxu0 %v2861_v0  ;;  %14211 = vmatmul.mubr.bf16.gmra.mrb[0].mxu1 %v7256_v63  ;;  %v15790_v0 = vld [vmem:[#allocation10 + $0x508] sm:$0xff]   ;;  %v4058_v63 = vrot.slane %v4056_v44, 1 }
 0x336   : > { %13654 = vmatprep.mubr.msk.bf16.mxu0 %vm20811_vm0, %v20899_v7  ;;  %14266 = vmatprep.mubr.msk.bf16.mxu1 %vm20811_vm0, %v20899_v7  ;;  %v18195_v44 = vld [vmem:[%s16937_s22 + $0x18] sm:$0xff]  }
 0x337   : > { %v4059_v11 = vsel %vm612_vm1, %v4054_v38, %v4058_v63  ;;  %v4064_v54 = vshll.u32 %v18195_v44, 16 }
 0x338   : > { %v18172_v13 = vpop.f32.mrb[152].mxu1 }
 0x339   : > { %20939 = vst [vmem:[#allocation91_spill] sm:$0xff] %v18172_v13  ;;  %v13848_v51 = vpop.f32.mrb[153].mxu1  ;;  %v4066_v38 = vrot.slane %v4064_v54, 1  ;;  %v4068_v54 = vshrl.u32 %v18195_v44, 16 }
 0x33a   : > { %v18180_v15 = vpop.f32.mrb[154].mxu1  ;;  %v15791_v51 = vld [vmem:[#allocation10 + $0x248] sm:$0xff]  }
 0x33b   : > { %20940 = vst [vmem:[#allocation92_spill] sm:$0xff] %v18180_v15  ;;  %v13849_v59 = vpop.f32.mrb[155].mxu1 }
 0x33c   : > { %v15793_v59 = vld [vmem:[#allocation10 + $0x250] sm:$0xff]  }
 0x33d   : > { %13655 = vmatmul.mubr.bf16.vlgmr.msra.gmra.mrb[100].mxu0 %v4051_v56  ;;  %14267 = vmatmul.mubr.bf16.vlgmr.msra.gmra.mrb[4].mxu1 %v7624_v31 }
 0x33e   : > { %13711 = vmatpush3.bf16.msra.mxu0 %v15788_v20  ;;  %14323 = vmatpush3.bf16.msra.mxu1 %v15789_v35  ;;  %v15792_v20 = vld [vmem:[#allocation10 + $0x510] sm:$0xff]   ;;  %v7626_v35 = vsel %vm20803_vm5, %v7623_v34, %v7625_v21  ;;  %v7627_v34 = vrot.slane %v18105_v39, 3  ;;  %v15796_v39 = vld [vmem:[#allocation10 + $0x520] sm:$0xff]  }
 0x33f   : > { %13712 = vmatprep.subr.bf16.mxu0 %v20899_v7  ;;  %13658 = vmatprep.mubr.msk.bf16.mxu0 %vm20811_vm0, %v20899_v7 }
 0x340   : > { %14270 = vmatprep.mubr.msk.bf16.mxu1 %vm20811_vm0, %v20899_v7  ;;  %v18189_v53 = vpop.f32.mrb[156].mxu1  ;;  %14324 = vmatprep.subr.bf16.mxu1 %v20899_v7 }
 0x341   : > { %20941 = vst [vmem:[#allocation93_spill] sm:$0xff] %v18189_v53  ;;  %v13852_v56 = vpop.f32.mrb[157].mxu1 }
 0x342   : > { %13713 = vmatpush3.bf16.msra.mxu0 %v15790_v0  ;;  %v18198_v31 = vpop.f32.mrb[158].mxu1  ;;  %14325 = vmatpush3.bf16.msra.mxu1 %v15791_v51  ;;  %v4062_v0 = vor.u32 %v4060_v55, %v4058_v63  ;;  %v15794_v56 = vld [vmem:[#allocation10 + $0x518] sm:$0xff]  }
 0x343   : > { %20942 = vst [vmem:[#allocation94_spill] sm:$0xff] %v18198_v31  ;;  %13714 = vmatprep.subr.bf16.mxu0 %v20899_v7  ;;  %v13853_v53 = vpop.f32.mrb[159].mxu1  ;;  %14326 = vmatprep.subr.bf16.mxu1 %v20899_v7  ;;  %v15795_v51 = vld [vmem:[#allocation10 + $0x258] sm:$0xff]  }
 0x344   : > { %v4067_v55 = vsel %vm612_vm1, %v4062_v0, %v4066_v38  ;;  %v15797_v0 = vld [vmem:[#allocation10 + $0x260] sm:$0xff]  }
 0x345   : > { %13659 = vmatmul.mubr.bf16.gmra.mrb[104].mxu0 %v4059_v11  ;;  %14271 = vmatmul.mubr.bf16.gmra.mrb[8].mxu1 %v7626_v35  ;;  %v18219_v35 = vld [vmem:[%s16937_s22 + $0x20] sm:$0xff]  }
 0x346   : > { %13715 = vmatpush3.bf16.msra.mxu0 %v15792_v20  ;;  %14327 = vmatpush3.bf16.msra.mxu1 %v15793_v59  ;;  %v4072_v59 = vshll.u32 %v18219_v35, 16 }
 0x347   : > { %13662 = vmatprep.mubr.msk.bf16.mxu0 %vm20811_vm0, %v20899_v7  ;;  %13716 = vmatprep.subr.bf16.mxu0 %v20899_v7 }
 0x348   : > { %v18206_v31 = vpop.f32.mrb[0].mxu0  ;;  %14274 = vmatprep.mubr.msk.bf16.mxu1 %vm20811_vm0, %v20899_v7  ;;  %v18211_v53 = vpop.f32.mrb[160].mxu1  ;;  %14328 = vmatprep.subr.bf16.mxu1 %v20899_v7  ;;  %v4074_v13 = vrot.slane %v4072_v59, 1 }
 0x349   : > { %20943 = vst [vmem:[#allocation95_spill] sm:$0xff] %v18211_v53  ;;  %v13296_v63 = vpop.f32.mrb[1].mxu0  ;;  %v13908_v11 = vpop.f32.mrb[161].mxu1 }
 0x34a   : > { %v18214_v20 = vpop.f32.mrb[2].mxu0  ;;  %13717 = vmatpush3.bf16.msra.mxu0 %v15794_v56  ;;  %v18222_v15 = vpop.f32.mrb[162].mxu1  ;;  %v7628_v63 = vsel %vm20803_vm5, %v7625_v21, %v7627_v34  ;;  %14329 = vmatpush3.bf16.msra.mxu1 %v15795_v51  ;;  %v4070_v56 = vor.u32 %v4068_v54, %v4066_v38  ;;  %v7629_v21 = vrot.slane %v18124_v12, 3  ;;  %v4076_v12 = vshrl.u32 %v18219_v35, 16 }
 0x34b   : > { %20944 = vst [vmem:[#allocation96_spill] sm:$0xff] %v18222_v15  ;;  %v13297_v53 = vpop.f32.mrb[3].mxu0  ;;  %13718 = vmatprep.subr.bf16.mxu0 %v20899_v7  ;;  %v13909_v11 = vpop.f32.mrb[163].mxu1  ;;  %14330 = vmatprep.subr.bf16.mxu1 %v20899_v7 }
 0x34c   : > { %v15799_v53 = vld [vmem:[#allocation10 + $0x268] sm:$0xff]   ;;  %v4075_v59 = vsel %vm612_vm1, %v4070_v56, %v4074_v13  ;;  %v7630_v15 = vsel %vm20803_vm5, %v7627_v34, %v7629_v21 }
 0x34d   : > { %13663 = vmatmul.mubr.bf16.gmra.mrb[108].mxu0 %v4067_v55  ;;  %14275 = vmatmul.mubr.bf16.gmra.mrb[12].mxu1 %v7628_v63  ;;  %v4080_v63 = vshll.u32 %v18228_v52, 16 }
 0x34e   : > { %13719 = vmatpush3.bf16.msra.mxu0 %v15796_v39  ;;  %13666 = vmatprep.mubr.msk.bf16.mxu0 %vm20811_vm0, %v20899_v7 }
 0x34f   : > { %14278 = vmatprep.mubr.msk.bf16.mxu1 %vm20811_vm0, %v20899_v7  ;;  %14331 = vmatpush3.bf16.msra.mxu1 %v15797_v0  ;;  %v4082_v56 = vrot.slane %v4080_v63, 1 }
 0x350   : > { %v18235_v51 = vpop.f32.mrb[4].mxu0  ;;  %13720 = vmatprep.subr.bf16.mxu0 %v20899_v7  ;;  %v18238_v38 = vpop.f32.mrb[164].mxu1  ;;  %14332 = vmatprep.subr.bf16.mxu1 %v20899_v7 }
 0x351   : > { %20945 = vst [vmem:[#allocation97_spill] sm:$0xff] %v18238_v38  ;;  %v13300_v55 = vpop.f32.mrb[5].mxu0  ;;  %v13912_v39 = vpop.f32.mrb[165].mxu1  ;;  %v15802_v38 = vld [vmem:[%s16930_s12 + $0x30] ss:$0 sps:$4 sm:$0x77]  }
 0x352   : > { %v18241_v54 = vpop.f32.mrb[6].mxu0  ;;  %13721 = vmatpush3.bf16.msra.mxu0 %v15798_v26  ;;  %v18246_v11 = vpop.f32.mrb[166].mxu1  ;;  %v15800_v55 = vld [vmem:[#allocation10 + $0x530] sm:$0xff]   ;;  %v4078_v26 = vor.u32 %v4076_v12, %v4074_v13  ;;  %v7631_v34 = vrot.slane %v15802_v38, 3 }
 0x353   : > { %20946 = vst [vmem:[#allocation98_spill] sm:$0xff] %v18246_v11  ;;  %v13301_v0 = vpop.f32.mrb[7].mxu0  ;;  %13722 = vmatprep.subr.bf16.mxu0 %v20899_v7  ;;  %v13913_v39 = vpop.f32.mrb[167].mxu1  ;;  %14333 = vmatpush3.bf16.msra.mxu1 %v15799_v53  ;;  %v4336_v11 = vld [vmem:[%s16937_s22] sm:$0xe]  ;;  %v15805_v53 = vld [vmem:[#allocation10 + $0x278] sm:$0xff]  }
 0x354   : > { %14334 = vmatprep.subr.bf16.mxu1 %v20899_v7  ;;  %v15804_v0 = vld [vmem:[#allocation10 + $0x538] sm:$0xff]   ;;  %v4083_v63 = vsel %vm612_vm1, %v4078_v26, %v4082_v56  ;;  %v7632_v62 = vsel %vm20803_vm5, %v7629_v21, %v7631_v34  ;;  %v7769_v56 = vld [vmem:[%s16937_s22] sm:$0xf]  ;;  %v7770_v21 = vld [vmem:[%s16937_s22 + $0x4] sm:$0xf] }
 0x355   : > { %13667 = vmatmul.mubr.bf16.gmra.mrb[112].mxu0 %v4075_v59  ;;  %14279 = vmatmul.mubr.bf16.gmra.mrb[16].mxu1 %v7630_v15 }
 0x356   : > { %13670 = vmatprep.mubr.msk.bf16.mxu0 %vm20811_vm0, %v20899_v7  ;;  %13723 = vmatpush3.bf16.msra.mxu0 %v15800_v55  ;;  %v16057_v55 = vld [vmem:[%s16937_s22 + $0x4] sm:$0xf] }
 0x357   : > { %14282 = vmatprep.mubr.msk.bf16.mxu1 %vm20811_vm0, %v20899_v7  ;;  %14335 = vmatpush3.bf16.msra.mxu1 %v15803_v2  ;;  %v11841_v38 = vcombine.low %v4336_v11, %v16057_v55  ;;  %v4358_v11 = vrot.slane %v18159_v1, 1 }
 0x358   : > { %v18257_v39 = vpop.f32.mrb[8].mxu0  ;;  %13724 = vmatprep.subr.bf16.mxu0 %v20899_v7  ;;  %v18260_v15 = vpop.f32.mrb[168].mxu1  ;;  %14336 = vmatprep.subr.bf16.mxu1 %v20899_v7 }
 0x359   : > { %20947 = vst [vmem:[#allocation99_spill] sm:$0xff] %v18257_v39  ;;  %20948 = vst [vmem:[#allocation100_spill] sm:$0xff] %v18260_v15  ;;  %v13304_v59 = vpop.f32.mrb[9].mxu0  ;;  %v13916_v13 = vpop.f32.mrb[169].mxu1  ;;  %v4357_v26 = vrot.slane %v11841_v38, 1  ;;  %v15809_v38 = vld [vmem:[#allocation10 + $0x300] sm:$0xff]  }
 0x35a   : > { %v18263_v12 = vpop.f32.mrb[10].mxu0  ;;  %v18267_v10 = vpop.f32.mrb[170].mxu1  ;;  %13725 = vmatpush3.bf16.msra.mxu0 %v15804_v0  ;;  %v18286_v13 = vcombine.low %v7769_v56, %v7770_v21 }
 0x35b   : > { %20949 = vst [vmem:[#allocation101_spill] sm:$0xff] %v18263_v12  ;;  %20950 = vst [vmem:[#allocation102_spill] sm:$0xff] %v18267_v10  ;;  %v13305_v2 = vpop.f32.mrb[11].mxu0  ;;  %v13917_v4 = vpop.f32.mrb[171].mxu1  ;;  %14337 = vmatpush3.bf16.msra.mxu1 %v15805_v53  ;;  %13782 = vmatprep.subr.bf16.mxu0 %v20899_v7  ;;  %v15814_v10 = vld [vmem:[#allocation10 + $0x310] sm:$0xff]  }
 0x35c   : > { %14394 = vmatprep.subr.bf16.mxu1 %v20899_v7  ;;  %20954 = vst [vmem:[#allocation106_spill] sm:$0xff] %v18286_v13 }
 0x35d   : > { %13671 = vmatmul.mubr.bf16.gmra.mrb[116].mxu0 %v4083_v63  ;;  %14283 = vmatmul.mubr.bf16.gmra.mrb[20].mxu1 %v7632_v62  ;;  %v4359_v62 = vsel %vm20809_vm3, %v4357_v26, %v4358_v11  ;;  %v15808_v63 = vld [vmem:[#allocation10 + $0x580] sm:$0xff]   ;;  %v15812_v26 = vld [vmem:[#allocation10 + $0x308] sm:$0xff]  }
 0x35e   : > { %13726 = vmatprep.mubr.msk.bf16.mxu0 %vm20811_vm0, %v20899_v7  ;;  %14338 = vmatprep.mubr.msk.bf16.mxu1 %vm20811_vm0, %v20899_v7 }
 0x360   : > { %v18279_v34 = vpop.f32.mrb[12].mxu0  ;;  %v18281_v4 = vpop.f32.mrb[172].mxu1 }
 0x361   : > { %20951 = vst [vmem:[#allocation103_spill] sm:$0xff] %v18279_v34  ;;  %20952 = vst [vmem:[#allocation104_spill] sm:$0xff] %v18281_v4  ;;  %v13308_v0 = vpop.f32.mrb[13].mxu0  ;;  %v13920_v53 = vpop.f32.mrb[173].mxu1  ;;  %v15810_v4 = vld [vmem:[#allocation10 + $0x588] sm:$0xff]  }
 0x362   : > { %v18283_v59 = vpop.f32.mrb[14].mxu0  ;;  %v18288_v55 = vpop.f32.mrb[174].mxu1  ;;  %v4360_v0 = vrot.slane %v18177_v29, 1 }
 0x363   : > { %20953 = vst [vmem:[#allocation105_spill] sm:$0xff] %v18283_v59  ;;  %20955 = vst [vmem:[#allocation107_spill] sm:$0xff] %v18288_v55  ;;  %v13309_v1 = vpop.f32.mrb[15].mxu0  ;;  %v13921_v2 = vpop.f32.mrb[175].mxu1 }
 0x364   : > { %v4361_v29 = vsel %vm20809_vm3, %v4358_v11, %v4360_v0  ;;  %v15811_v1 = vld [vmem:[%s16937_s22 + $0x8] sm:$0xff]  }
 0x365   : > { %13727 = vmatmul.mubr.bf16.vlgmr.msra.gmra.mrb[120].mxu0 %v4359_v62  ;;  %14339 = vmatmul.mubr.bf16.vlgmr.msra.gmra.mrb[24].mxu1 %v18286_v13  ;;  %v15817_v11 = vld [vmem:[#allocation10 + $0x318] sm:$0xff]  }
 0x366   : > { %13783 = vmatpush3.bf16.msra.mxu0 %v15808_v63  ;;  %14395 = vmatpush3.bf16.msra.mxu1 %v15809_v38  ;;  %v15813_v38 = vld [vmem:[#allocation10 + $0x590] sm:$0xff]  }
 0x367   : > { %13784 = vmatprep.subr.bf16.mxu0 %v20899_v7  ;;  %13730 = vmatprep.mubr.msk.bf16.mxu0 %vm20811_vm0, %v20899_v7 }
 0x368   : > { %v18293_v56 = vpop.f32.mrb[16].mxu0  ;;  %14342 = vmatprep.mubr.msk.bf16.mxu1 %vm20811_vm0, %v20899_v7  ;;  %v18299_v21 = vpop.f32.mrb[176].mxu1  ;;  %14396 = vmatprep.subr.bf16.mxu1 %v20899_v7 }
 0x369   : > { %20956 = vst [vmem:[#allocation108_spill] sm:$0xff] %v18293_v56  ;;  %20957 = vst [vmem:[#allocation109_spill] sm:$0xff] %v18299_v21  ;;  %v13312_v53 = vpop.f32.mrb[17].mxu0  ;;  %v13924_v62 = vpop.f32.mrb[177].mxu1 }
 0x36a   : > { %v18302_v63 = vpop.f32.mrb[18].mxu0  ;;  %13785 = vmatpush3.bf16.msra.mxu0 %v15810_v4  ;;  %v18306_v2 = vpop.f32.mrb[178].mxu1  ;;  %14397 = vmatpush3.bf16.msra.mxu1 %v15812_v26  ;;  %v4362_v4 = vrot.slane %v18195_v44, 1  ;;  %v15815_v53 = vld [vmem:[#allocation10 + $0x598] sm:$0xff]  }
 0x36b   : > { %20958 = vst [vmem:[#allocation110_spill] sm:$0xff] %v18302_v63  ;;  %20959 = vst [vmem:[#allocation111_spill] sm:$0xff] %v18306_v2  ;;  %v13313_v55 = vpop.f32.mrb[19].mxu0  ;;  %13786 = vmatprep.subr.bf16.mxu0 %v20899_v7  ;;  %v13925_v15 = vpop.f32.mrb[179].mxu1  ;;  %14398 = vmatprep.subr.bf16.mxu1 %v20899_v7 }
 0x36d   : > { %13731 = vmatmul.mubr.bf16.gmra.mrb[124].mxu0 %v4361_v29  ;;  %14343 = vmatmul.mubr.bf16.gmra.mrb[28].mxu1 %v15811_v1  ;;  %v15816_v29 = vld [vmem:[%s16937_s22 + $0x10] sm:$0xff]  }
 0x36e   : > { %13787 = vmatpush3.bf16.msra.mxu0 %v15813_v38  ;;  %14399 = vmatpush3.bf16.msra.mxu1 %v15814_v10  ;;  %v4363_v10 = vsel %vm20809_vm3, %v4360_v0, %v4362_v4  ;;  %v15818_v1 = vld [vmem:[#allocation10 + $0x5a0] sm:$0xff]   ;;  %v15821_v0 = vld [vmem:[#allocation10 + $0x5a8] sm:$0xff]  }
 0x36f   : > { %13734 = vmatprep.mubr.msk.bf16.mxu0 %vm20811_vm0, %v20899_v7  ;;  %13788 = vmatprep.subr.bf16.mxu0 %v20899_v7 }
 0x370   : > { %v18313_v55 = vpop.f32.mrb[20].mxu0  ;;  %14346 = vmatprep.mubr.msk.bf16.mxu1 %vm20811_vm0, %v20899_v7  ;;  %v18318_v15 = vpop.f32.mrb[180].mxu1  ;;  %14400 = vmatprep.subr.bf16.mxu1 %v20899_v7 }
 0x371   : > { %20960 = vst [vmem:[#allocation112_spill] sm:$0xff] %v18318_v15  ;;  %v13332_v26 = vpop.f32.mrb[21].mxu0  ;;  %v13980_v62 = vpop.f32.mrb[181].mxu1 }
 0x372   : > { %v18321_v44 = vpop.f32.mrb[22].mxu0  ;;  %13789 = vmatpush3.bf16.msra.mxu0 %v15815_v53  ;;  %v18325_v38 = vpop.f32.mrb[182].mxu1  ;;  %14401 = vmatpush3.bf16.msra.mxu1 %v15817_v11  ;;  %v15819_v26 = vld [vmem:[#allocation10 + $0x320] sm:$0xff]   ;;  %v4364_v62 = vrot.slane %v18219_v35, 1 }
 0x373   : > { %20961 = vst [vmem:[#allocation113_spill] sm:$0xff] %v18325_v38  ;;  %v13333_v2 = vpop.f32.mrb[23].mxu0  ;;  %13790 = vmatprep.subr.bf16.mxu0 %v20899_v7  ;;  %v13981_v21 = vpop.f32.mrb[183].mxu1  ;;  %14402 = vmatprep.subr.bf16.mxu1 %v20899_v7 }
 0x374   : > { %v15822_v21 = vld [vmem:[#allocation10 + $0x328] sm:$0xff]  }
 0x375   : > { %13735 = vmatmul.mubr.bf16.gmra.mrb[128].mxu0 %v4363_v10  ;;  %14347 = vmatmul.mubr.bf16.gmra.mrb[32].mxu1 %v15816_v29  ;;  %v4365_v29 = vsel %vm20809_vm3, %v4362_v4, %v4364_v62  ;;  %v4729_v4 = vshrl.u32 %v17490_v48, 16 }
 0x376   : > { %13791 = vmatpush3.bf16.msra.mxu0 %v15818_v1  ;;  %13738 = vmatprep.mubr.msk.bf16.mxu0 %vm20811_vm0, %v20899_v7  ;;  %v15820_v1 = vld [vmem:[%s16937_s22 + $0x18] sm:$0xff]  }
 0x377   : > { %14350 = vmatprep.mubr.msk.bf16.mxu1 %vm20811_vm0, %v20899_v7  ;;  %14403 = vmatpush3.bf16.msra.mxu1 %v15819_v26  ;;  %v15823_v26 = vld [vmem:[#allocation10 + $0x5b0] sm:$0xff]   ;;  %v4731_v59 = vrot.slane %v4729_v4, 1 }
 0x378   : > { %v18334_v2 = vpop.f32.mrb[24].mxu0  ;;  %13792 = vmatprep.subr.bf16.mxu0 %v20899_v7  ;;  %v18337_v53 = vpop.f32.mrb[184].mxu1  ;;  %14404 = vmatprep.subr.bf16.mxu1 %v20899_v7 }
 0x379   : > { %20962 = vst [vmem:[#allocation114_spill] sm:$0xff] %v18337_v53  ;;  %v13336_v11 = vpop.f32.mrb[25].mxu0  ;;  %v13984_v10 = vpop.f32.mrb[185].mxu1  ;;  %v15825_v53 = vld [vmem:[#allocation10 + $0x330] sm:$0xff]  }
 0x37a   : > { %v18340_v35 = vpop.f32.mrb[26].mxu0  ;;  %13793 = vmatpush3.bf16.msra.mxu0 %v15821_v0  ;;  %v18344_v38 = vpop.f32.mrb[186].mxu1  ;;  %v4366_v11 = vrot.slane %v18228_v52, 1  ;;  %v16058_v0 = vld [vmem:[%s16937_s22 + $0xc] sm:$0xff]  }
 0x37b   : > { %20963 = vst [vmem:[#allocation115_spill] sm:$0xff] %v18344_v38  ;;  %v13337_v15 = vpop.f32.mrb[27].mxu0  ;;  %13794 = vmatprep.subr.bf16.mxu0 %v20899_v7  ;;  %v13985_v13 = vpop.f32.mrb[187].mxu1  ;;  %14405 = vmatpush3.bf16.msra.mxu1 %v15822_v21  ;;  %v4740_v21 = vshll.u32 %v16058_v0, 16  ;;  %v15826_v52 = vld [vmem:[#allocation10 + $0x5b8] sm:$0xff]  }
 0x37c   : > { %14406 = vmatprep.subr.bf16.mxu1 %v20899_v7  ;;  %v4732_v15 = vshll.u32 %v17490_v48, 16  ;;  %v4737_v13 = vshrl.u32 %v16058_v0, 16  ;;  %v18361_v38 = vld [vmem:[%s16937_s22 + $0x8] sm:$0xf]  ;;  %v4367_v0 = vsel %vm20809_vm3, %v4364_v62, %v4366_v11 }
 0x37d   : > { %13739 = vmatmul.mubr.bf16.gmra.mrb[132].mxu0 %v4365_v29  ;;  %14351 = vmatmul.mubr.bf16.gmra.mrb[36].mxu1 %v15820_v1  ;;  %v15827_v29 = vld [vmem:[#allocation10 + $0x338] sm:$0xff]   ;;  %v8303_v1 = vld [vmem:[%s16937_s22 + $0x4] sm:$0xe]  ;;  %v4742_v34 = vrot.slane %v4740_v21, 2 }
 0x37e   : > { %13742 = vmatprep.mubr.msk.bf16.mxu0 %vm20811_vm0, %v20899_v7  ;;  %13795 = vmatpush3.bf16.msra.mxu0 %v15823_v26  ;;  %v15824_v26 = vld [vmem:[%s16937_s22 + $0x20] sm:$0xff]   ;;  %v4739_v14 = vrot.slane %v4737_v13, 1 }
 0x37f   : > { %14354 = vmatprep.mubr.msk.bf16.mxu1 %vm20811_vm0, %v20899_v7  ;;  %14407 = vmatpush3.bf16.msra.mxu1 %v15825_v53  ;;  %v4734_v53 = vrot.slane %v4732_v15, 2 }
 0x380   : > { %v18356_v10 = vpop.f32.mrb[28].mxu0  ;;  %13796 = vmatprep.subr.bf16.mxu0 %v20899_v7  ;;  %v18363_v48 = vpop.f32.mrb[188].mxu1  ;;  %14408 = vmatprep.subr.bf16.mxu1 %v20899_v7  ;;  %v4743_v11 = vor.u32 %v4742_v34, %v4739_v14  ;;  %v15830_v34 = vld [vmem:[#allocation10 + $0x600] sm:$0xff]  }
 0x381   : > { %20964 = vst [vmem:[#allocation116_spill] sm:$0xff] %v18363_v48  ;;  %v13340_v63 = vpop.f32.mrb[29].mxu0  ;;  %v13988_v56 = vpop.f32.mrb[189].mxu1  ;;  %v18373_v48 = vcombine.low %v8303_v1, %v18361_v38 }
 0x382   : > { %v18368_v60 = vpop.f32.mrb[30].mxu0  ;;  %v18370_v17 = vpop.f32.mrb[190].mxu1  ;;  %13797 = vmatpush3.bf16.msra.mxu0 %v15826_v52  ;;  %v18376_v63 = vld [vmem:[%s16937_s22 + $0xc] sm:$0xff]   ;;  %v4735_v56 = vor.u32 %v4734_v53, %v4731_v59 }
 0x383   : > { %20965 = vst [vmem:[#allocation117_spill] sm:$0xff] %v18370_v17  ;;  %v13341_v12 = vpop.f32.mrb[31].mxu0  ;;  %20966 = vst [vmem:[#allocation118_spill] sm:$0xff] %v18373_v48  ;;  %v13989_v62 = vpop.f32.mrb[191].mxu1  ;;  %14409 = vmatpush3.bf16.msra.mxu1 %v15827_v29  ;;  %13854 = vmatprep.subr.bf16.mxu0 %v20899_v7  ;;  %v8358_v13 = vrot.slane %v18373_v48, 1  ;;  %v8359_v21 = vrot.slane %v18376_v63, 1 }
 0x384   : > { %14466 = vmatprep.subr.bf16.mxu1 %v20899_v7  ;;  %v16059_v12 = vld [vmem:[%s16937_s22 + $0x14] sm:$0xff]   ;;  %v4744_v14 = vsel %vm20810_vm2, %v4735_v56, %v4743_v11 }
 0x385   : > { %13743 = vmatmul.mubr.bf16.gmra.mrb[136].mxu0 %v4367_v0  ;;  %14355 = vmatmul.mubr.bf16.gmra.mrb[40].mxu1 %v15824_v26  ;;  %v4746_v4 = vshrl.u32 %v16059_v12, 16  ;;  %v4749_v15 = vshll.u32 %v16059_v12, 16  ;;  %v8360_v17 = vsel %vm20809_vm3, %v8358_v13, %v8359_v21  ;;  %v15831_v48 = vld [vmem:[#allocation10 + $0x380] sm:$0xff]  }
 0x386   : > { %13798 = vmatprep.mubr.msk.bf16.mxu0 %vm20811_vm0, %v20899_v7  ;;  %14410 = vmatprep.mubr.msk.bf16.mxu1 %vm20811_vm0, %v20899_v7 }
 0x387   : > { %v4748_v59 = vrot.slane %v4746_v4, 1  ;;  %v4751_v53 = vrot.slane %v4749_v15, 2  ;;  %v8361_v4 = vrot.slane %v18398_v5, 1  ;;  %v15834_v15 = vld [vmem:[#allocation10 + $0x388] sm:$0xff]  }
 0x388   : > { %v18387_v52 = vpop.f32.mrb[32].mxu0  ;;  %v18389_v29 = vpop.f32.mrb[192].mxu1 }
 0x389   : > { %20967 = vst [vmem:[#allocation119_spill] sm:$0xff] %v18389_v29  ;;  %v13344_v1 = vpop.f32.mrb[33].mxu0  ;;  %v13992_v0 = vpop.f32.mrb[193].mxu1  ;;  %v16060_v29 = vld [vmem:[%s16937_s22 + $0x1c] sm:$0xff]   ;;  %v8362_v45 = vsel %vm20809_vm3, %v8359_v21, %v8361_v4 }
 0x38a   : > { %v18391_v26 = vpop.f32.mrb[34].mxu0  ;;  %v18394_v62 = vpop.f32.mrb[194].mxu1  ;;  %v15832_v1 = vld [vmem:[#allocation10 + $0x608] sm:$0xff]   ;;  %v4752_v0 = vor.u32 %v4751_v53, %v4748_v59  ;;  %v4755_v58 = vshrl.u32 %v16060_v29, 16  ;;  %v4758_v56 = vshll.u32 %v16060_v29, 16 }
 0x38b   : > { %20968 = vst [vmem:[#allocation120_spill] sm:$0xff] %v18394_v62  ;;  %v13345_v12 = vpop.f32.mrb[35].mxu0  ;;  %v13993_v39 = vpop.f32.mrb[195].mxu1 }
 0x38c   : > { %v4753_v29 = vsel %vm20810_vm2, %v4743_v11, %v4752_v0  ;;  %v4760_v59 = vrot.slane %v4758_v56, 2  ;;  %v15837_v11 = vld [vmem:[#allocation10 + $0x618] sm:$0xff]  }
 0x38d   : > { %13799 = vmatmul.mubr.bf16.vlgmr.msra.gmra.mrb[140].mxu0 %v4744_v14  ;;  %14411 = vmatmul.mubr.bf16.vlgmr.msra.gmra.mrb[44].mxu1 %v8360_v17  ;;  %v15835_v14 = vld [vmem:[#allocation10 + $0x610] sm:$0xff]  }
 0x38e   : > { %13855 = vmatpush3.bf16.msra.mxu0 %v15830_v34  ;;  %14467 = vmatpush3.bf16.msra.mxu1 %v15831_v48  ;;  %v4757_v34 = vrot.slane %v4755_v58, 1 }
 0x38f   : > { %13856 = vmatprep.subr.bf16.mxu0 %v20899_v7  ;;  %13802 = vmatprep.mubr.msk.bf16.mxu0 %vm20811_vm0, %v20899_v7 }
 0x390   : > { %v18403_v12 = vpop.f32.mrb[36].mxu0  ;;  %14414 = vmatprep.mubr.msk.bf16.mxu1 %vm20811_vm0, %v20899_v7  ;;  %v18409_v17 = vpop.f32.mrb[196].mxu1  ;;  %14468 = vmatprep.subr.bf16.mxu1 %v20899_v7  ;;  %v4761_v58 = vor.u32 %v4760_v59, %v4757_v34 }
 0x391   : > { %20969 = vst [vmem:[#allocation121_spill] sm:$0xff] %v18409_v17  ;;  %v13348_v39 = vpop.f32.mrb[37].mxu0  ;;  %v13996_v48 = vpop.f32.mrb[197].mxu1  ;;  %v18420_v17 = vld [vmem:[%s16937_s22 + $0x1c] sm:$0xff]  }
 0x392   : > { %v18412_v13 = vpop.f32.mrb[38].mxu0  ;;  %13857 = vmatpush3.bf16.msra.mxu0 %v15832_v1  ;;  %v18415_v53 = vpop.f32.mrb[198].mxu1  ;;  %14469 = vmatpush3.bf16.msra.mxu1 %v15834_v15  ;;  %v15836_v39 = vld [vmem:[#allocation10 + $0x390] sm:$0xff]   ;;  %v8363_v21 = vrot.slane %v18420_v17, 1 }
 0x393   : > { %20970 = vst [vmem:[#allocation122_spill] sm:$0xff] %v18415_v53  ;;  %v13349_v62 = vpop.f32.mrb[39].mxu0  ;;  %13858 = vmatprep.subr.bf16.mxu0 %v20899_v7  ;;  %v13997_v48 = vpop.f32.mrb[199].mxu1  ;;  %14470 = vmatprep.subr.bf16.mxu1 %v20899_v7  ;;  %v16061_v1 = vld [vmem:[%s16937_s22 + $0x24] sm:$0xff]  }
 0x394   : > { %v4764_v56 = vshrl.u32 %v16061_v1, 16  ;;  %v4767_v53 = vshll.u32 %v16061_v1, 16  ;;  %v15839_v62 = vld [vmem:[#allocation10 + $0x398] sm:$0xff]   ;;  %v15840_v48 = vld [vmem:[#allocation10 + $0x620] sm:$0xff]  }
 0x395   : > { %13803 = vmatmul.mubr.bf16.gmra.mrb[144].mxu0 %v4753_v29  ;;  %14415 = vmatmul.mubr.bf16.gmra.mrb[48].mxu1 %v8362_v45 }
 0x396   : > { %13859 = vmatpush3.bf16.msra.mxu0 %v15835_v14  ;;  %14471 = vmatpush3.bf16.msra.mxu1 %v15836_v39  ;;  %v4762_v39 = vsel %vm20810_vm2, %v4752_v0, %v4761_v58  ;;  %v4766_v1 = vrot.slane %v4764_v56, 1  ;;  %v4769_v57 = vrot.slane %v4767_v53, 2  ;;  %v15841_v0 = vld [vmem:[#allocation10 + $0x3a0] sm:$0xff]  }
 0x397   : > { %13806 = vmatprep.mubr.msk.bf16.mxu0 %vm20811_vm0, %v20899_v7  ;;  %13860 = vmatprep.subr.bf16.mxu0 %v20899_v7 }
 0x398   : > { %v2588_v15 = vpop.f32.mrb[40].mxu0  ;;  %14418 = vmatprep.mubr.msk.bf16.mxu1 %vm20811_vm0, %v20899_v7  ;;  %v18433_v29 = vpop.f32.mrb[200].mxu1  ;;  %14472 = vmatprep.subr.bf16.mxu1 %v20899_v7  ;;  %v4770_v53 = vor.u32 %v4769_v57, %v4766_v1 }
 0x399   : > { %v18431_v45 = vadd.f32 %v2588_v15, %v18313_v55  ;;  %20971 = vst [vmem:[#allocation123_spill] sm:$0xff] %v18433_v29  ;;  %v13368_v14 = vpop.f32.mrb[41].mxu0  ;;  %v14052_v34 = vpop.f32.mrb[201].mxu1  ;;  %v8364_v29 = vsel %vm20809_vm3, %v8361_v4, %v8363_v21 }
 0x39a   : > { %v2591_v59 = vpop.f32.mrb[42].mxu0  ;;  %13861 = vmatpush3.bf16.msra.mxu0 %v15837_v11  ;;  %v18440_v55 = vpop.f32.mrb[202].mxu1  ;;  %14473 = vmatpush3.bf16.msra.mxu1 %v15839_v62  ;;  %v18445_v14 = vld [vmem:[%s16937_s22 + $0x24] sm:$0xff]   ;;  %v16062_v11 = vld [vmem:[%s16937_s22 + $0x2c] ss:$0 sps:$4 sm:$0x33]  }
 0x39b   : > { %v18438_v25 = vadd.f32 %v2591_v59, %v18321_v44  ;;  %20972 = vst [vmem:[#allocation124_spill] sm:$0xff] %v18440_v55  ;;  %v13369_v15 = vpop.f32.mrb[43].mxu0  ;;  %13862 = vmatprep.subr.bf16.mxu0 %v20899_v7  ;;  %v14053_v34 = vpop.f32.mrb[203].mxu1  ;;  %14474 = vmatprep.subr.bf16.mxu1 %v20899_v7  ;;  %v15843_v44 = vld [vmem:[#allocation10 + $0x628] sm:$0xff]   ;;  %v4773_v56 = vshrl.u32 %v16062_v11, 16  ;;  %v4776_v59 = vshll.u32 %v16062_v11, 16 }
 0x39c   : > { %v8365_v4 = vrot.slane %v18445_v14, 1  ;;  %v4771_v34 = vsel %vm20810_vm2, %v4761_v58, %v4770_v53 }
 0x39d   : > { %13807 = vmatmul.mubr.bf16.gmra.mrb[148].mxu0 %v4762_v39  ;;  %14419 = vmatmul.mubr.bf16.gmra.mrb[52].mxu1 %v8364_v29  ;;  %v15844_v39 = vld [vmem:[#allocation10 + $0x3a8] sm:$0xff]   ;;  %v4775_v11 = vrot.slane %v4773_v56, 1  ;;  %v4778_v55 = vrot.slane %v4776_v59, 2 }
 0x39e   : > { %13863 = vmatpush3.bf16.msra.mxu0 %v15840_v48  ;;  %13810 = vmatprep.mubr.msk.bf16.mxu0 %vm20811_vm0, %v20899_v7  ;;  %v8714_v56 = vld [vmem:[%s16937_s22 + $0x4] sm:$0xc] }
 0x39f   : > { %14422 = vmatprep.mubr.msk.bf16.mxu1 %vm20811_vm0, %v20899_v7  ;;  %14475 = vmatpush3.bf16.msra.mxu1 %v15841_v0 }
 0x3a0   : > { %v2596_v62 = vpop.f32.mrb[44].mxu0  ;;  %13864 = vmatprep.subr.bf16.mxu0 %v20899_v7  ;;  %v18458_v57 = vpop.f32.mrb[204].mxu1  ;;  %14476 = vmatprep.subr.bf16.mxu1 %v20899_v7 }
 0x3a1   : > { %v18456_v29 = vadd.f32 %v2596_v62, %v18334_v2  ;;  %20973 = vst [vmem:[#allocation125_spill] sm:$0xff] %v18458_v57  ;;  %v13372_v48 = vpop.f32.mrb[45].mxu0  ;;  %v14056_v1 = vpop.f32.mrb[205].mxu1  ;;  %v8366_v62 = vsel %vm20809_vm3, %v8363_v21, %v8365_v4  ;;  %v15846_v57 = vld [vmem:[%s16937_s22 + $0x2c] ss:$0 sps:$4 sm:$0x11]  }
 0x3a2   : > { %v2599_v15 = vpop.f32.mrb[46].mxu0  ;;  %13865 = vmatpush3.bf16.msra.mxu0 %v15843_v44  ;;  %v18465_v37 = vpop.f32.mrb[206].mxu1  ;;  %v15845_v48 = vld [vmem:[#allocation10 + $0x630] sm:$0xff]   ;;  %v8367_v58 = vrot.slane %v15846_v57, 1  ;;  %v15848_v21 = vld [vmem:[#allocation10 + $0x638] sm:$0xff]  }
 0x3a3   : > { %v18463_v0 = vadd.f32 %v2599_v15, %v18340_v35  ;;  %20974 = vst [vmem:[#allocation126_spill] sm:$0xff] %v18465_v37  ;;  %v13373_v2 = vpop.f32.mrb[47].mxu0  ;;  %13866 = vmatprep.subr.bf16.mxu0 %v20899_v7  ;;  %v14057_v32 = vpop.f32.mrb[207].mxu1  ;;  %14477 = vmatpush3.bf16.msra.mxu1 %v15844_v39  ;;  %v15847_v1 = vld [vmem:[#allocation10 + $0x3b0] sm:$0xff]   ;;  %v4779_v35 = vor.u32 %v4778_v55, %v4775_v11 }
 0x3a4   : > { %14478 = vmatprep.subr.bf16.mxu1 %v20899_v7  ;;  %v15849_v32 = vld [vmem:[#allocation10 + $0x3b8] sm:$0xff]  }
 0x3a5   : > { %13811 = vmatmul.mubr.bf16.gmra.mrb[152].mxu0 %v4771_v34  ;;  %14423 = vmatmul.mubr.bf16.gmra.mrb[56].mxu1 %v8366_v62  ;;  %v4780_v57 = vsel %vm20810_vm2, %v4770_v53, %v4779_v35  ;;  %v18497_v53 = vld [vmem:[%s16937_s22 + $0x10] sm:$0xff]   ;;  %v8735_v35 = vrot.slane %v18376_v63, 2 }
 0x3a6   : > { %13814 = vmatprep.mubr.msk.bf16.mxu0 %vm20811_vm0, %v20899_v7  ;;  %13867 = vmatpush3.bf16.msra.mxu0 %v15845_v48  ;;  %v8368_v48 = vsel %vm20809_vm3, %v8365_v4, %v8367_v58  ;;  %v5142_v4 = vrot.slane %v18497_v53, 2 }
 0x3a7   : > { %14426 = vmatprep.mubr.msk.bf16.mxu1 %vm20811_vm0, %v20899_v7  ;;  %14479 = vmatpush3.bf16.msra.mxu1 %v15847_v1 }
 0x3a8   : > { %v2604_v44 = vpop.f32.mrb[48].mxu0  ;;  %13868 = vmatprep.subr.bf16.mxu0 %v20899_v7  ;;  %v18480_v39 = vpop.f32.mrb[208].mxu1  ;;  %14480 = vmatprep.subr.bf16.mxu1 %v20899_v7 }
 0x3a9   : > { %v18478_v59 = vadd.f32 %v2604_v44, %v18356_v10  ;;  %20975 = vst [vmem:[#allocation127_spill] sm:$0xff] %v18480_v39  ;;  %v13376_v15 = vpop.f32.mrb[49].mxu0  ;;  %v14060_v55 = vpop.f32.mrb[209].mxu1  ;;  %v12080_v10 = vcombine.low %v8714_v56, %v18361_v38 }
 0x3aa   : > { %v2607_v34 = vpop.f32.mrb[50].mxu0  ;;  %v18487_v2 = vpop.f32.mrb[210].mxu1  ;;  %13869 = vmatpush3.bf16.msra.mxu0 %v15848_v21  ;;  %v15851_v55 = vld [vmem:[#allocation10 + $0x680] sm:$0xff]  }
 0x3ab   : > { %v18485_v11 = vadd.f32 %v2607_v34, %v18368_v60  ;;  %20976 = vst [vmem:[#allocation128_spill] sm:$0xff] %v18487_v2  ;;  %v13377_v62 = vpop.f32.mrb[51].mxu0  ;;  %v14061_v1 = vpop.f32.mrb[211].mxu1  ;;  %14481 = vmatpush3.bf16.msra.mxu1 %v15849_v32  ;;  %13926 = vmatprep.subr.bf16.mxu0 %v20899_v7  ;;  %v5141_v60 = vrot.slane %v17663_v33, 2  ;;  %v8734_v38 = vrot.slane %v12080_v10, 2  ;;  %v15853_v10 = vld [vmem:[#allocation10 + $0x688] sm:$0xff]  }
 0x3ac   : > { %14538 = vmatprep.subr.bf16.mxu1 %v20899_v7  ;;  %v18516_v1 = vld [vmem:[%s16937_s22 + $0x18] sm:$0xff]  }
 0x3ad   : > { %13815 = vmatmul.mubr.bf16.gmra.mrb[156].mxu0 %v4780_v57  ;;  %14427 = vmatmul.mubr.bf16.gmra.mrb[60].mxu1 %v8368_v48  ;;  %v5143_v15 = vsel %vm20808_vm4, %v5141_v60, %v5142_v4  ;;  %v8736_v63 = vsel %vm20808_vm4, %v8734_v38, %v8735_v35  ;;  %v15852_v48 = vld [vmem:[#allocation10 + $0x400] sm:$0xff]   ;;  %v15854_v60 = vld [vmem:[#allocation10 + $0x408] sm:$0xff]  }
 0x3ae   : > { %13870 = vmatprep.mubr.msk.bf16.mxu0 %vm20811_vm0, %v20899_v7  ;;  %14482 = vmatprep.mubr.msk.bf16.mxu1 %vm20811_vm0, %v20899_v7 }
 0x3b0   : > { %v2612_v58 = vpop.f32.mrb[52].mxu0  ;;  %v18506_v44 = vpop.f32.mrb[212].mxu1 }
 0x3b1   : > { %v18504_v21 = vadd.f32 %v2612_v58, %v18387_v52  ;;  %20977 = vst [vmem:[#allocation129_spill] sm:$0xff] %v18506_v44  ;;  %v13380_v32 = vpop.f32.mrb[53].mxu0  ;;  %v14064_v56 = vpop.f32.mrb[213].mxu1  ;;  %v5144_v58 = vrot.slane %v18516_v1, 2 }
 0x3b2   : > { %v2615_v33 = vpop.f32.mrb[54].mxu0  ;;  %v18512_v57 = vpop.f32.mrb[214].mxu1 }
 0x3b3   : > { %v18510_v34 = vadd.f32 %v2615_v33, %v18391_v26  ;;  %20978 = vst [vmem:[#allocation130_spill] sm:$0xff] %v18512_v57  ;;  %v13381_v62 = vpop.f32.mrb[55].mxu0  ;;  %v14065_v52 = vpop.f32.mrb[215].mxu1  ;;  %v8737_v26 = vrot.slane %v18398_v5, 2  ;;  %v5145_v5 = vsel %vm20808_vm4, %v5142_v4, %v5144_v58  ;;  %v18541_v4 = vld [vmem:[%s16937_s22 + $0x20] sm:$0xff]   ;;  %v15871_v57 = vld [vmem:[%s16937_s22 + $0x10] sm:$0xff]  }
 0x3b4   : > { %v15855_v62 = vld [vmem:[#allocation10 + $0x690] sm:$0xff]  }
 0x3b5   : > { %13871 = vmatmul.mubr.bf16.vlgmr.msra.gmra.mrb[160].mxu0 %v5143_v15  ;;  %14483 = vmatmul.mubr.bf16.vlgmr.msra.gmra.mrb[64].mxu1 %v8736_v63 }
 0x3b6   : > { %13927 = vmatpush3.bf16.msra.mxu0 %v15851_v55  ;;  %14539 = vmatpush3.bf16.msra.mxu1 %v15852_v48 }
 0x3b7   : > { %13928 = vmatprep.subr.bf16.mxu0 %v20899_v7  ;;  %13874 = vmatprep.mubr.msk.bf16.mxu0 %vm20811_vm0, %v20899_v7 }
 0x3b8   : > { %v2620_v32 = vpop.f32.mrb[56].mxu0  ;;  %14486 = vmatprep.mubr.msk.bf16.mxu1 %vm20811_vm0, %v20899_v7  ;;  %v18528_v56 = vpop.f32.mrb[216].mxu1  ;;  %14540 = vmatprep.subr.bf16.mxu1 %v20899_v7 }
 0x3b9   : > { %v18526_v38 = vadd.f32 %v2620_v32, %v18403_v12  ;;  %20979 = vst [vmem:[#allocation131_spill] sm:$0xff] %v18528_v56  ;;  %v13384_v33 = vpop.f32.mrb[57].mxu0  ;;  %v14068_v15 = vpop.f32.mrb[217].mxu1  ;;  %v8738_v12 = vsel %vm20808_vm4, %v8735_v35, %v8737_v26  ;;  %v15856_v32 = vld [vmem:[#allocation10 + $0x410] sm:$0xff]   ;;  %v8739_v35 = vrot.slane %v18420_v17, 2 }
 0x3ba   : > { %v2623_v55 = vpop.f32.mrb[58].mxu0  ;;  %13929 = vmatpush3.bf16.msra.mxu0 %v15853_v10  ;;  %v18535_v48 = vpop.f32.mrb[218].mxu1  ;;  %14541 = vmatpush3.bf16.msra.mxu1 %v15854_v60  ;;  %v15857_v10 = vld [vmem:[#allocation10 + $0x698] sm:$0xff]  }
 0x3bb   : > { %v18533_v63 = vadd.f32 %v2623_v55, %v18412_v13  ;;  %20980 = vst [vmem:[#allocation132_spill] sm:$0xff] %v18535_v48  ;;  %v13385_v52 = vpop.f32.mrb[59].mxu0  ;;  %13930 = vmatprep.subr.bf16.mxu0 %v20899_v7  ;;  %v14069_v33 = vpop.f32.mrb[219].mxu1  ;;  %14542 = vmatprep.subr.bf16.mxu1 %v20899_v7  ;;  %v5146_v13 = vrot.slane %v18541_v4, 2  ;;  %v15858_v60 = vld [vmem:[#allocation10 + $0x418] sm:$0xff]  }
 0x3bd   : > { %13875 = vmatmul.mubr.bf16.gmra.mrb[164].mxu0 %v5145_v5  ;;  %14487 = vmatmul.mubr.bf16.gmra.mrb[68].mxu1 %v8738_v12  ;;  %v5147_v17 = vsel %vm20808_vm4, %v5144_v58, %v5146_v13  ;;  %v18566_v58 = vld [vmem:[%s16937_s22 + $0x28] sm:$0xff]  }
 0x3be   : > { %13931 = vmatpush3.bf16.msra.mxu0 %v15855_v62  ;;  %14543 = vmatpush3.bf16.msra.mxu1 %v15856_v32  ;;  %v15859_v32 = vld [vmem:[#allocation10 + $0x6a0] sm:$0xff]  }
 0x3bf   : > { %13878 = vmatprep.mubr.msk.bf16.mxu0 %vm20811_vm0, %v20899_v7  ;;  %13932 = vmatprep.subr.bf16.mxu0 %v20899_v7 }
 0x3c0   : > { %v2746_v15 = vpop.f32.mrb[60].mxu0  ;;  %14490 = vmatprep.mubr.msk.bf16.mxu1 %vm20811_vm0, %v20899_v7  ;;  %v18553_v5 = vpop.f32.mrb[220].mxu1  ;;  %14544 = vmatprep.subr.bf16.mxu1 %v20899_v7 }
 0x3c1   : > { %v18551_v55 = vadd.f32 %v2746_v15, %v18431_v45  ;;  %20981 = vst [vmem:[#allocation133_spill] sm:$0xff] %v18553_v5  ;;  %v13404_v62 = vpop.f32.mrb[61].mxu0  ;;  %v14124_v52 = vpop.f32.mrb[221].mxu1  ;;  %v8740_v45 = vsel %vm20808_vm4, %v8737_v26, %v8739_v35  ;;  %v8741_v26 = vrot.slane %v18445_v14, 2 }
 0x3c2   : > { %v2749_v12 = vpop.f32.mrb[62].mxu0  ;;  %13933 = vmatpush3.bf16.msra.mxu0 %v15857_v10  ;;  %v18560_v48 = vpop.f32.mrb[222].mxu1  ;;  %14545 = vmatpush3.bf16.msra.mxu1 %v15858_v60  ;;  %v15860_v62 = vld [vmem:[#allocation10 + $0x420] sm:$0xff]   ;;  %v15862_v60 = vld [vmem:[#allocation10 + $0x428] sm:$0xff]  }
 0x3c3   : > { %v18558_v33 = vadd.f32 %v2749_v12, %v18438_v25  ;;  %20982 = vst [vmem:[#allocation134_spill] sm:$0xff] %v18560_v48  ;;  %v13405_v56 = vpop.f32.mrb[63].mxu0  ;;  %13934 = vmatprep.subr.bf16.mxu0 %v20899_v7  ;;  %v14125_v15 = vpop.f32.mrb[223].mxu1  ;;  %14546 = vmatprep.subr.bf16.mxu1 %v20899_v7  ;;  %v5148_v25 = vrot.slane %v18566_v58, 2  ;;  %v8881_v52 = vld [vmem:[%s16937_s22 + $0x8] sm:$0xc] }
 0x3c4   : > { %v15861_v56 = vld [vmem:[#allocation10 + $0x6a8] sm:$0xff]   ;;  %v8882_v12 = vld [vmem:[%s16937_s22 + $0xc] sm:$0xf]  ;;  %v15864_v15 = vld [vmem:[%s16937_s22 + $0x30] ss:$0 sps:$4 sm:$0x33]  }
 0x3c5   : > { %13879 = vmatmul.mubr.bf16.gmra.mrb[168].mxu0 %v5147_v17  ;;  %14491 = vmatmul.mubr.bf16.gmra.mrb[72].mxu1 %v8740_v45  ;;  %v5149_v5 = vsel %vm20808_vm4, %v5146_v13, %v5148_v25  ;;  %v15866_v13 = vld [vmem:[#allocation10 + $0x430] sm:$0xff]  }
 0x3c6   : > { %13935 = vmatpush3.bf16.msra.mxu0 %v15859_v32  ;;  %13882 = vmatprep.mubr.msk.bf16.mxu0 %vm20811_vm0, %v20899_v7 }
 0x3c7   : > { %14494 = vmatprep.mubr.msk.bf16.mxu1 %vm20811_vm0, %v20899_v7  ;;  %14547 = vmatpush3.bf16.msra.mxu1 %v15860_v62  ;;  %v15865_v62 = vld [vmem:[%s16937_s22 + $0x2c] ss:$0 sps:$4 sm:$0x33]  }
 0x3c8   : > { %v2754_v10 = vpop.f32.mrb[64].mxu0  ;;  %13936 = vmatprep.subr.bf16.mxu0 %v20899_v7  ;;  %v18580_v32 = vpop.f32.mrb[224].mxu1  ;;  %14548 = vmatprep.subr.bf16.mxu1 %v20899_v7 }
 0x3c9   : > { %v18578_v17 = vadd.f32 %v2754_v10, %v18456_v29  ;;  %20983 = vst [vmem:[#allocation135_spill] sm:$0xff] %v18580_v32  ;;  %v13408_v45 = vpop.f32.mrb[65].mxu0  ;;  %v14128_v48 = vpop.f32.mrb[225].mxu1  ;;  %v8742_v10 = vsel %vm20808_vm4, %v8739_v35, %v8741_v26  ;;  %v18594_v32 = vcombine.low %v8881_v52, %v8882_v12  ;;  %v15867_v35 = vld [vmem:[#allocation10 + $0x6b8] sm:$0xff]   ;;  %v9115_v12 = vshll.u32 %v15871_v57, 16 }
 0x3ca   : > { %v2757_v14 = vpop.f32.mrb[66].mxu0  ;;  %13937 = vmatpush3.bf16.msra.mxu0 %v15861_v56  ;;  %v18590_v2 = vpop.f32.mrb[226].mxu1  ;;  %v15863_v45 = vld [vmem:[#allocation10 + $0x6b0] sm:$0xff]   ;;  %v8743_v56 = vrot.slane %v15865_v62, 2  ;;  %v5498_v52 = vld [vmem:[%s16937_s22 + $0x8] sm:$0x8] }
 0x3cb   : > { %v18588_v44 = vadd.f32 %v2757_v14, %v18463_v0  ;;  %20984 = vst [vmem:[#allocation136_spill] sm:$0xff] %v18590_v2  ;;  %v13409_v29 = vpop.f32.mrb[67].mxu0  ;;  %13938 = vmatprep.subr.bf16.mxu0 %v20899_v7  ;;  %20985 = vst [vmem:[#allocation137_spill] sm:$0xff] %v18594_v32  ;;  %v14129_v48 = vpop.f32.mrb[227].mxu1  ;;  %14549 = vmatpush3.bf16.msra.mxu1 %v15862_v60  ;;  %v5150_v0 = vrot.slane %v15864_v15, 2  ;;  %v9112_v14 = vshrl.u32 %v15871_v57, 16 }
 0x3cc   : > { %14550 = vmatprep.subr.bf16.mxu1 %v20899_v7  ;;  %v9104_v60 = vshrl.u32 %v18594_v32, 16  ;;  %v8744_v57 = vsel %vm20808_vm4, %v8741_v26, %v8743_v56  ;;  %v9117_v23 = vrot.slane %v9115_v12, 3  ;;  %v15872_v12 = vld [vmem:[#allocation10] sm:$0xff]  }
 0x3cd   : > { %13883 = vmatmul.mubr.bf16.gmra.mrb[172].mxu0 %v5149_v5  ;;  %14495 = vmatmul.mubr.bf16.gmra.mrb[76].mxu1 %v8742_v10  ;;  %v9107_v5 = vshll.u32 %v18594_v32, 16  ;;  %v15868_v10 = vld [vmem:[#allocation10 + $0x438] sm:$0xff]   ;;  %v5151_v39 = vsel %vm20808_vm4, %v5148_v25, %v5150_v0  ;;  %v9114_v37 = vrot.slane %v9112_v14, 2  ;;  %v9124_v0 = vshll.u32 %v15875_v6, 16 }
 0x3ce   : > { %13886 = vmatprep.mubr.msk.bf16.mxu0 %vm20811_vm0, %v20899_v7  ;;  %13939 = vmatpush3.bf16.msra.mxu0 %v15863_v45  ;;  %v16067_v32 = vld [vmem:[%s16937_s22 + $0xc] sm:$0xf] }
 0x3cf   : > { %14498 = vmatprep.mubr.msk.bf16.mxu1 %vm20811_vm0, %v20899_v7  ;;  %14551 = vmatpush3.bf16.msra.mxu1 %v15866_v13  ;;  %v11905_v13 = vcombine.low %v5498_v52, %v16067_v32  ;;  %v9118_v26 = vor.u32 %v9117_v23, %v9114_v37  ;;  %v9121_v32 = vshrl.u32 %v15875_v6, 16  ;;  %v15873_v6 = vld [vmem:[#allocation10 + $0x4c0] sm:$0xff]  }
 0x3d0   : > { %v2762_v29 = vpop.f32.mrb[68].mxu0  ;;  %13940 = vmatprep.subr.bf16.mxu0 %v20899_v7  ;;  %v18608_v62 = vpop.f32.mrb[228].mxu1  ;;  %14552 = vmatprep.subr.bf16.mxu1 %v20899_v7 }
 0x3d1   : > { %v18606_v15 = vadd.f32 %v2762_v29, %v18478_v59  ;;  %20986 = vst [vmem:[#allocation138_spill] sm:$0xff] %v18608_v62  ;;  %v13412_v45 = vpop.f32.mrb[69].mxu0  ;;  %v14132_v48 = vpop.f32.mrb[229].mxu1  ;;  %v9109_v62 = vrot.slane %v9107_v5, 3 }
 0x3d2   : > { %v2765_v2 = vpop.f32.mrb[70].mxu0  ;;  %v18617_v59 = vpop.f32.mrb[230].mxu1  ;;  %13941 = vmatpush3.bf16.msra.mxu0 %v15867_v35  ;;  %v9106_v45 = vrot.slane %v9104_v60, 2 }
 0x3d3   : > { %v18615_v47 = vadd.f32 %v2765_v2, %v18485_v11  ;;  %20987 = vst [vmem:[#allocation139_spill] sm:$0xff] %v18617_v59  ;;  %v13413_v29 = vpop.f32.mrb[71].mxu0  ;;  %v14133_v48 = vpop.f32.mrb[231].mxu1  ;;  %14553 = vmatpush3.bf16.msra.mxu1 %v15868_v10  ;;  %13998 = vmatprep.subr.bf16.mxu0 %v20899_v7  ;;  %v5519_v11 = vrot.slane %v11905_v13, 3  ;;  %v5520_v2 = vrot.slane %v18497_v53, 3  ;;  %v15880_v53 = vld [vmem:[%s16937_s22 + $0x20] sm:$0xff]  }
 0x3d4   : > { %14610 = vmatprep.subr.bf16.mxu1 %v20899_v7  ;;  %v9110_v25 = vor.u32 %v9109_v62, %v9106_v45  ;;  %v15874_v29 = vld [vmem:[#allocation10 + $0x8] sm:$0xff]   ;;  %v5522_v45 = vrot.slane %v18516_v1, 3  ;;  %v9130_v48 = vshrl.u32 %v15880_v53, 16 }
 0x3d5   : > { %13887 = vmatmul.mubr.bf16.gmra.mrb[176].mxu0 %v5151_v39  ;;  %14499 = vmatmul.mubr.bf16.gmra.mrb[80].mxu1 %v8744_v57  ;;  %v5521_v5 = vsel %vm20803_vm5, %v5519_v11, %v5520_v2  ;;  %v9126_v57 = vrot.slane %v9124_v0, 3  ;;  %v9133_v11 = vshll.u32 %v15880_v53, 16 }
 0x3d6   : > { %13942 = vmatprep.mubr.msk.bf16.mxu0 %vm20811_vm0, %v20899_v7  ;;  %14554 = vmatprep.mubr.msk.bf16.mxu1 %vm20811_vm0, %v20899_v7  ;;  %v9119_v37 = vsel %vm20805_vm6, %v9110_v25, %v9118_v26 }
 0x3d7   : > { %v9135_v53 = vrot.slane %v9133_v11, 3 }
 0x3d8   : > { %v2770_v56 = vpop.f32.mrb[72].mxu0  ;;  %v18630_v14 = vpop.f32.mrb[232].mxu1 }
 0x3d9   : > { %v18628_v39 = vadd.f32 %v2770_v56, %v18504_v21  ;;  %20988 = vst [vmem:[#allocation140_spill] sm:$0xff] %v18630_v14  ;;  %v13416_v35 = vpop.f32.mrb[73].mxu0  ;;  %v14136_v52 = vpop.f32.mrb[233].mxu1  ;;  %v9123_v21 = vrot.slane %v9121_v32, 2  ;;  %v15876_v56 = vld [vmem:[#allocation10 + $0x4c8] sm:$0xff]  }
 0x3da   : > { %v2773_v60 = vpop.f32.mrb[74].mxu0  ;;  %v18637_v62 = vpop.f32.mrb[234].mxu1 }
 0x3db   : > { %v18635_v10 = vadd.f32 %v2773_v60, %v18510_v34  ;;  %20989 = vst [vmem:[#allocation141_spill] sm:$0xff] %v18637_v62  ;;  %v13417_v23 = vpop.f32.mrb[75].mxu0  ;;  %v14137_v13 = vpop.f32.mrb[235].mxu1  ;;  %v9127_v34 = vor.u32 %v9126_v57, %v9123_v21  ;;  %v5523_v60 = vsel %vm20803_vm5, %v5520_v2, %v5522_v45  ;;  %v15878_v21 = vld [vmem:[#allocation10 + $0x4d0] sm:$0xff]   ;;  %v15879_v2 = vld [vmem:[#allocation10 + $0x18] sm:$0xff]  }
 0x3dc   : > { %v15884_v57 = vld [vmem:[%s16937_s22 + $0x28] sm:$0xff]   ;;  %v19389_v62 = vld [vmem:[%s16937_s22 + $0x10] sm:$0xff]  }
 0x3dd   : > { %13943 = vmatmul.mubr.bf16.vlgmr.msra.gmra.mrb[180].mxu0 %v5521_v5  ;;  %14555 = vmatmul.mubr.bf16.vlgmr.msra.gmra.mrb[84].mxu1 %v9119_v37  ;;  %v15877_v5 = vld [vmem:[#allocation10 + $0x10] sm:$0xff]   ;;  %v9142_v11 = vshll.u32 %v15884_v57, 16  ;;  %v7856_v14 = vshll.u32 %v19389_v62, 16 }
 0x3de   : > { %13999 = vmatpush3.bf16.msra.mxu0 %v15872_v12  ;;  %14611 = vmatpush3.bf16.msra.mxu1 %v15873_v6  ;;  %v9132_v12 = vrot.slane %v9130_v48, 2  ;;  %v9128_v6 = vsel %vm20805_vm6, %v9118_v26, %v9127_v34  ;;  %v15881_v26 = vld [vmem:[#allocation10 + $0x4d8] sm:$0xff]   ;;  %v9139_v48 = vshrl.u32 %v15884_v57, 16 }
 0x3df   : > { %14000 = vmatprep.subr.bf16.mxu0 %v20899_v7  ;;  %13946 = vmatprep.mubr.msk.bf16.mxu0 %vm20811_vm0, %v20899_v7 }
 0x3e0   : > { %v2778_v35 = vpop.f32.mrb[76].mxu0  ;;  %14558 = vmatprep.mubr.msk.bf16.mxu1 %vm20811_vm0, %v20899_v7  ;;  %v18649_v32 = vpop.f32.mrb[236].mxu1  ;;  %14612 = vmatprep.subr.bf16.mxu1 %v20899_v7 }
 0x3e1   : > { %v18647_v25 = vadd.f32 %v2778_v35, %v18526_v38  ;;  %20990 = vst [vmem:[#allocation142_spill] sm:$0xff] %v18649_v32  ;;  %v13420_v1 = vpop.f32.mrb[77].mxu0  ;;  %v14140_v0 = vpop.f32.mrb[237].mxu1  ;;  %v15888_v35 = vld [vmem:[%s16937_s22 + $0x30] ss:$0 sps:$4 sm:$0x77]  }
 0x3e2   : > { %v2781_v52 = vpop.f32.mrb[78].mxu0  ;;  %14001 = vmatpush3.bf16.msra.mxu0 %v15874_v29  ;;  %v18656_v38 = vpop.f32.mrb[238].mxu1  ;;  %14613 = vmatpush3.bf16.msra.mxu1 %v15876_v56  ;;  %v18664_v29 = vor.u32 %v9135_v53, %v9132_v12 }
 0x3e3   : > { %v18654_v23 = vadd.f32 %v2781_v52, %v18533_v63  ;;  %20992 = vst [vmem:[#allocation143_spill] sm:$0xff] %v18656_v38  ;;  %v13421_v37 = vpop.f32.mrb[79].mxu0  ;;  %14002 = vmatprep.subr.bf16.mxu0 %v20899_v7  ;;  %v14141_v13 = vpop.f32.mrb[239].mxu1  ;;  %14614 = vmatprep.subr.bf16.mxu1 %v20899_v7  ;;  %v5524_v63 = vrot.slane %v18541_v4, 3  ;;  %v15887_v4 = vld [vmem:[#allocation10 + $0x30] sm:$0xff]  }
 0x3e4   : > { %v9137_v53 = vsel %vm20805_vm6, %v9127_v34, %v18664_v29  ;;  %v15882_v37 = vld [vmem:[#allocation10 + $0x20] sm:$0xff]   ;;  %v9141_v13 = vrot.slane %v9139_v48, 2  ;;  %v7414_v34 = vshrl.u32 %v18065_v40, 16  ;;  %v5526_v48 = vrot.slane %v18566_v58, 3 }
 0x3e5   : > { %13947 = vmatmul.mubr.bf16.gmra.mrb[184].mxu0 %v5523_v60  ;;  %14559 = vmatmul.mubr.bf16.gmra.mrb[88].mxu1 %v9128_v6  ;;  %v5525_v12 = vsel %vm20803_vm5, %v5522_v45, %v5524_v63  ;;  %v15883_v45 = vld [vmem:[#allocation10 + $0x4e0] sm:$0xff]  }
 0x3e6   : > { %14003 = vmatpush3.bf16.msra.mxu0 %v15877_v5  ;;  %14615 = vmatpush3.bf16.msra.mxu1 %v15878_v21 }
 0x3e7   : > { %13950 = vmatprep.mubr.msk.bf16.mxu0 %vm20811_vm0, %v20899_v7  ;;  %14004 = vmatprep.subr.bf16.mxu0 %v20899_v7 }
 0x3e8   : > { %v2949_v56 = vpop.f32.mrb[80].mxu0  ;;  %14562 = vmatprep.mubr.msk.bf16.mxu1 %vm20811_vm0, %v20899_v7  ;;  %v18677_v0 = vpop.f32.mrb[240].mxu1  ;;  %14616 = vmatprep.subr.bf16.mxu1 %v20899_v7 }
 0x3e9   : > { %v2988_v1 = vadd.f32 %v2949_v56, %v18551_v55  ;;  %20993 = vst [vmem:[#allocation144_spill] sm:$0xff] %v18677_v0  ;;  %v13440_v52 = vpop.f32.mrb[81].mxu0  ;;  %v14196_v60 = vpop.f32.mrb[241].mxu1  ;;  %v9144_v56 = vrot.slane %v9142_v11, 3  ;;  %v15885_v11 = vld [vmem:[#allocation10 + $0x28] sm:$0xff]  }
 0x3ea   : > { %v2952_v5 = vpop.f32.mrb[82].mxu0  ;;  %14005 = vmatpush3.bf16.msra.mxu0 %v15879_v2  ;;  %v18687_v21 = vpop.f32.mrb[242].mxu1  ;;  %14617 = vmatpush3.bf16.msra.mxu1 %v15881_v26  ;;  %v9148_v2 = vshrl.u32 %v15888_v35, 16  ;;  %v9151_v60 = vshll.u32 %v15888_v35, 16  ;;  %v7417_v26 = vshll.u32 %v18065_v40, 16 }
 0x3eb   : > { %v3198_v6 = vadd.f32 %v17437_v36, %v2988_v1  ;;  %v2989_v55 = vadd.f32 %v2952_v5, %v18558_v33  ;;  %20994 = vst [vmem:[#allocation145_spill] sm:$0xff] %v18687_v21  ;;  %v13441_v57 = vpop.f32.mrb[83].mxu0  ;;  %14006 = vmatprep.subr.bf16.mxu0 %v20899_v7  ;;  %v14197_v52 = vpop.f32.mrb[243].mxu1  ;;  %14618 = vmatprep.subr.bf16.mxu1 %v20899_v7  ;;  %v18705_v5 = vld [vmem:[%s16944_s13 + $0x4] sm:$0xf] }
 0x3ec   : > { %v18718_v52 = vrot.slane %v7417_v26, 3 }
 0x3ed   : > { %v3366_v36 = vadd.f32 %v17546_v22, %v3198_v6  ;;  %v3199_v33 = vadd.f32 %v17441_v19, %v2989_v55  ;;  %13951 = vmatmul.mubr.bf16.gmra.mrb[188].mxu0 %v5525_v12  ;;  %14563 = vmatmul.mubr.bf16.gmra.mrb[92].mxu1 %v9137_v53  ;;  %v9145_v19 = vor.u32 %v9144_v56, %v9141_v13  ;;  %v9469_v22 = vld [vmem:[%s16944_s13] sm:$0xf]  ;;  %v9150_v53 = vrot.slane %v9148_v2, 2 }
 0x3ee   : > { %14007 = vmatpush3.bf16.msra.mxu0 %v15882_v37  ;;  %13954 = vmatprep.mubr.msk.bf16.mxu0 %vm20811_vm0, %v20899_v7  ;;  %v15886_v12 = vld [vmem:[#allocation10 + $0x4e8] sm:$0xff]   ;;  %v9153_v37 = vrot.slane %v9151_v60, 3  ;;  %v18716_v56 = vrot.slane %v7414_v34, 2 }
 0x3ef   : > { %v3569_v1 = vadd.f32 %v17641_v41, %v3366_v36  ;;  %v3367_v35 = vadd.f32 %v17556_v30, %v3199_v33  ;;  %14566 = vmatprep.mubr.msk.bf16.mxu1 %vm20811_vm0, %v20899_v7  ;;  %14619 = vmatpush3.bf16.msra.mxu1 %v15883_v45  ;;  %v18708_v41 = vstv %s2246_s25  ;;  %v9146_v34 = vsel %vm20805_vm6, %v18664_v29, %v9145_v19  ;;  %s20654_s25 = scalar_lea.hbm %s21326_s21, %s15287_s18 }
 0x3f0   : > { %v2957_v40 = vpop.f32.mrb[84].mxu0  ;;  %14008 = vmatprep.subr.bf16.mxu0 %v20899_v7  ;;  %v18712_v55 = vpop.f32.mrb[244].mxu1  ;;  %14620 = vmatprep.subr.bf16.mxu1 %v20899_v7  ;;  %v2248_v26 = vmul.f32 %v18708_v41, %v18206_v31  ;;  %v18749_v31 = vld [vmem:[%s16944_s13 + $0x8] sm:$0xff]  }
 0x3f1   : > { %v3570_v30 = vadd.f32 %v17646_v46, %v3367_v35  ;;  %v2990_v6 = vadd.f32 %v2957_v40, %v18578_v17  ;;  %20995 = vst [vmem:[#allocation146_spill] sm:$0xff] %v18712_v55  ;;  %v13444_v57 = vpop.f32.mrb[85].mxu0  ;;  %v3779_v13 = vadd.f32 %v17730_v8, %v3569_v1  ;;  %v14200_v45 = vpop.f32.mrb[245].mxu1  ;;  %v5527_v46 = vsel %vm20803_vm5, %v5524_v63, %v5526_v48  ;;  %v15889_v35 = vld [vmem:[#allocation10 + $0x4f0] sm:$0xff]  }
 0x3f2   : > { %v2960_v2 = vpop.f32.mrb[86].mxu0  ;;  %14009 = vmatpush3.bf16.msra.mxu0 %v15885_v11  ;;  %v18726_v17 = vcombine.low %v9469_v22, %v18705_v5  ;;  %v18730_v36 = vpop.f32.mrb[246].mxu1  ;;  %v16069_v40 = vld [vmem:[%s16930_s12 + $0x10] sm:$0xff]  }
 0x3f3   : > { %v3200_v60 = vadd.f32 %v17451_v9, %v2990_v6  ;;  %v2991_v8 = vadd.f32 %v2960_v2, %v18588_v44  ;;  %20996 = vst [vmem:[#allocation147_spill] sm:$0xff] %v18730_v36  ;;  %v13445_v33 = vpop.f32.mrb[87].mxu0  ;;  %14010 = vmatprep.subr.bf16.mxu0 %v20899_v7  ;;  %v3947_v63 = vadd.f32 %v17857_v18, %v3779_v13  ;;  %v14201_v11 = vpop.f32.mrb[247].mxu1  ;;  %v16068_v9 = vld [vmem:[%s16937_s22 + $0x30] ss:$0 sps:$4 sm:$0x77]  }
 0x3f4   : > { %14621 = vmatpush3.bf16.msra.mxu1 %v15886_v12  ;;  %v5528_v1 = vrot.slane %v16068_v9, 3  ;;  %v9154_v44 = vor.u32 %v9153_v37, %v9150_v53  ;;  %v3780_v22 = vadd.f32 %v17735_v61, %v3570_v30  ;;  %v7422_v6 = vshrl.u32 %v16069_v40, 16 }
 0x3f5   : > { %v7425_v29 = vshll.u32 %v16069_v40, 16  ;;  %v3368_v57 = vadd.f32 %v17570_v50, %v3200_v60  ;;  %v3201_v45 = vadd.f32 %v17455_v27, %v2991_v8  ;;  %13955 = vmatmul.mubr.bf16.gmra.mrb[192].mxu0 %v5527_v46  ;;  %14622 = vmatprep.subr.bf16.mxu1 %v20899_v7  ;;  %v2249_v18 = vmul.f32 %v18708_v41, %v18214_v20  ;;  %v15890_v20 = vld [vmem:[#allocation10 + $0x38] sm:$0xff]   ;;  %v21001_v40 = vld [vmem:[#allocation32_spill] sm:$0xff] }
 0x3f6   : > { %14567 = vmatmul.mubr.bf16.gmra.mrb[96].mxu1 %v9146_v34  ;;  %13958 = vmatprep.mubr.msk.bf16.mxu0 %vm20811_vm0, %v20899_v7  ;;  %v9543_v61 = vshll.u32 %v18726_v17, 16  ;;  %v18752_v12 = vadd.f32 %v3947_v63, %v2248_v26  ;;  %v3948_v50 = vadd.f32 %v17862_v49, %v3780_v22  ;;  %v7420_v27 = vor.u32 %v18718_v52, %v18716_v56  ;;  %v15891_v49 = vld [vmem:[#allocation10 + $0x4f8] sm:$0xff]  }
 0x3f7   : > { %v3571_v53 = vadd.f32 %v17660_v43, %v3368_v57  ;;  %v3369_v37 = vadd.f32 %v17575_v3, %v3201_v45  ;;  %14011 = vmatpush3.bf16.msra.mxu0 %v15887_v4  ;;  %14570 = vmatprep.mubr.msk.bf16.mxu1 %vm20811_vm0, %v20899_v7  ;;  %v5529_v13 = vsel %vm20803_vm5, %v5526_v48, %v5528_v1  ;;  %v7424_v58 = vrot.slane %v7422_v6, 2  ;;  %v21002_v57 = vld [vmem:[#allocation57_spill] sm:$0xff] }
 0x3f8   : > { %v2965_v30 = vpop.f32.mrb[88].mxu0  ;;  %v9155_v2 = vsel %vm20805_vm6, %v9145_v19, %v9154_v44  ;;  %14623 = vmatpush3.bf16.msra.mxu1 %v15889_v35  ;;  %14012 = vmatprep.subr.bf16.mxu0 %v20899_v7  ;;  %v18766_v56 = vadd.f32 %v3948_v50, %v2249_v18  ;;  %v18770_v52 = vpop.f32.mrb[248].mxu1  ;;  %v7427_v60 = vrot.slane %v7425_v29, 3  ;;  %v9541_v19 = vshrl.u32 %v18726_v17, 16  ;;  %v21003_v18 = vld [vmem:[#allocation43_spill] sm:$0xff]  ;;  %v21004_v50 = vld [vmem:[#allocation38_spill] sm:$0xff] }
 0x3f9   : > { %v3572_v3 = vadd.f32 %v17667_v16, %v3369_v37  ;;  %v2992_v43 = vadd.f32 %v2965_v30, %v18606_v15  ;;  %20997 = vst [vmem:[#allocation148_spill] sm:$0xff] %v18770_v52  ;;  %v13448_v46 = vpop.f32.mrb[89].mxu0  ;;  %14624 = vmatprep.subr.bf16.mxu1 %v20899_v7  ;;  %v14204_v48 = vpop.f32.mrb[249].mxu1  ;;  %v9545_v33 = vrot.slane %v9543_v61, 1  ;;  %v9548_v34 = vshll.u32 %v18749_v31, 16  ;;  %v18806_v37 = vld [vmem:[%s16944_s13 + $0x10] sm:$0xff]  }
 0x3fa   : > { %v2968_v8 = vpop.f32.mrb[90].mxu0  ;;  %v3781_v4 = vadd.f32 %v17756_v28, %v3571_v53  ;;  %v18778_v63 = vpop.f32.mrb[250].mxu1  ;;  %v18780_v11 = vor.u32 %v7427_v60, %v7424_v58  ;;  %v2250_v1 = vmul.f32 %v18708_v41, %v18235_v51  ;;  %v2251_v44 = vmul.f32 %v18708_v41, %v18241_v54  ;;  %v21000_v28 = vld [vmem:[#allocation37_spill] sm:$0xff]  ;;  %v21005_v30 = vld [vmem:[#allocation44_spill] sm:$0xff]  ;;  %v15894_v60 = vld [vmem:[#allocation10 + $0xc0] sm:$0xff]  }
 0x3fb   : > { %v3202_v16 = vadd.f32 %v17474_v42, %v2992_v43  ;;  %v2993_v15 = vadd.f32 %v2968_v8, %v18615_v47  ;;  %20998 = vst [vmem:[#allocation149_spill] sm:$0xff] %v18778_v63  ;;  %v13449_v26 = vpop.f32.mrb[91].mxu0  ;;  %14013 = vmatpush3.bf16.msra.mxu0 %v15890_v20  ;;  %v3782_v9 = vadd.f32 %v17766_v24, %v3572_v3  ;;  %v14205_v35 = vpop.f32.mrb[251].mxu1  ;;  %v20999_v42 = vld [vmem:[#allocation56_spill] sm:$0xff]  ;;  %v9550_v54 = vrot.slane %v9548_v34, 1  ;;  %v21007_v48 = vld [vmem:[#allocation50_spill] sm:$0xff] }
 0x3fc   : > { %14625 = vmatpush3.bf16.msra.mxu1 %v15891_v49  ;;  %14070 = vmatprep.subr.bf16.mxu0 %v20899_v7  ;;  %v3949_v47 = vadd.f32 %v20999_v42, %v3781_v4  ;;  %v18794_v24 = vsel %vm20805_vm6, %v7420_v27, %v18780_v11  ;;  %v9546_v51 = vor.u32 %v9545_v33, %v9541_v19  ;;  %v21008_v19 = vld [vmem:[#allocation33_spill] sm:$0xff]  ;;  %v9556_v26 = vshll.u32 %v18806_v37, 16  ;;  %v21011_v35 = vld [vmem:[#allocation58_spill] sm:$0xff] }
 0x3fd   : > { %v3370_v22 = vadd.f32 %v21000_v28, %v3202_v16  ;;  %v3203_v6 = vadd.f32 %v21001_v40, %v2993_v15  ;;  %13959 = vmatmul.mubr.bf16.gmra.mrb[196].mxu0 %v5529_v13  ;;  %14646 = vmatprep.subr.bf16.mxu1 %v20899_v7  ;;  %v3950_v45 = vadd.f32 %v21002_v57, %v3782_v9  ;;  %v15895_v15 = vld [vmem:[#allocation10 + $0x480] sm:$0xff]   ;;  %v21010_v9 = vld [vmem:[#allocation99_spill] sm:$0xff]  ;;  %v21016_v57 = vld [vmem:[#allocation101_spill] sm:$0xff] }
 0x3fe   : > { %14571 = vmatmul.mubr.bf16.gmra.mrb[100].mxu1 %v9155_v2  ;;  %14014 = vmatprep.mubr.msk.bf16.mxu0 %vm20811_vm0, %v20899_v7  ;;  %v18798_v29 = vadd.f32 %v3949_v47, %v2250_v1  ;;  %v9551_v58 = vsel %vm612_vm1, %v9546_v51, %v9550_v54  ;;  %v2252_v1 = vmul.f32 %v18708_v41, %v21010_v9  ;;  %v21012_v47 = vld [vmem:[#allocation51_spill] sm:$0xff]  ;;  %v21015_v51 = vld [vmem:[#allocation49_spill] sm:$0xff] }
 0x3ff   : > { %v3573_v61 = vadd.f32 %v21003_v18, %v3370_v22  ;;  %v3371_v53 = vadd.f32 %v21004_v50, %v3203_v6  ;;  %14626 = vmatprep.mubr.msk.bf16.mxu1 %vm20811_vm0, %v20899_v7  ;;  %v18808_v20 = vadd.f32 %v3950_v45, %v2251_v44  ;;  %v21013_v22 = vld [vmem:[#allocation39_spill] sm:$0xff]  ;;  %v2253_v45 = vmul.f32 %v18708_v41, %v21016_v57  ;;  %v21027_v57 = vld [vmem:[#allocation60_spill] sm:$0xff] }
 0x400   : > { %v2973_v27 = vpop.f32.mrb[92].mxu0  ;;  %v18812_v49 = vpop.f32.mrb[252].mxu1  ;;  %v15896_v18 = vld [vmem:[#allocation10 + $0xc8] sm:$0xff]  }
 0x401   : > { %v3574_v13 = vadd.f32 %v21005_v30, %v3371_v53  ;;  %v2994_v2 = vadd.f32 %v2973_v27, %v18628_v39  ;;  %21006 = vst [vmem:[#allocation56_spill] sm:$0xff] %v18812_v49  ;;  %v13452_v3 = vpop.f32.mrb[93].mxu0  ;;  %v14208_v43 = vpop.f32.mrb[253].mxu1  ;;  %v3783_v8 = vadd.f32 %v21007_v48, %v3573_v61  ;;  %v9552_v39 = vshrl.u32 %v18749_v31, 16  ;;  %v18832_v61 = vld [vmem:[%s16944_s13 + $0x18] sm:$0xff]   ;;  %v21018_v30 = vld [vmem:[#allocation45_spill] sm:$0xff] }
 0x402   : > { %v2976_v46 = vpop.f32.mrb[94].mxu0  ;;  %v18818_v4 = vpop.f32.mrb[254].mxu1  ;;  %v21017_v53 = vld [vmem:[#allocation59_spill] sm:$0xff]  ;;  %v9564_v9 = vshll.u32 %v18832_v61, 16 }
 0x403   : > { %v3204_v33 = vadd.f32 %v21008_v19, %v2994_v2  ;;  %v2995_v34 = vadd.f32 %v2976_v46, %v18635_v10  ;;  %21009 = vst [vmem:[#allocation37_spill] sm:$0xff] %v18818_v4  ;;  %v13453_v16 = vpop.f32.mrb[95].mxu0  ;;  %v14209_v44 = vpop.f32.mrb[255].mxu1  ;;  %v3951_v42 = vadd.f32 %v21011_v35, %v3783_v8  ;;  %v3784_v28 = vadd.f32 %v21012_v47, %v3574_v13  ;;  %v21014_v10 = vld [vmem:[#allocation34_spill] sm:$0xff]  ;;  %v21019_v2 = vld [vmem:[#allocation40_spill] sm:$0xff]  ;;  %v15898_v48 = vld [vmem:[#allocation10 + $0x488] sm:$0xff]  }
 0x404   : > { %v9554_v43 = vor.u32 %v9552_v39, %v9550_v54  ;;  %v9558_v46 = vrot.slane %v9556_v26, 1  ;;  %v15899_v39 = vld [vmem:[#allocation10 + $0xd0] sm:$0xff]   ;;  %v9560_v26 = vshrl.u32 %v18806_v37, 16  ;;  %v21024_v35 = vld [vmem:[#allocation35_spill] sm:$0xff] }
 0x405   : > { %v3372_v40 = vadd.f32 %v21013_v22, %v3204_v33  ;;  %v3205_v6 = vadd.f32 %v21014_v10, %v2995_v34  ;;  %14015 = vmatmul.mubr.bf16.vlgmr.msra.gmra.mrb[200].mxu0 %v21015_v51  ;;  %v18834_v50 = vadd.f32 %v3951_v42, %v2252_v1  ;;  %v3952_v27 = vadd.f32 %v21017_v53, %v3784_v28  ;;  %v21023_v1 = vld [vmem:[#allocation52_spill] sm:$0xff]  ;;  %v21026_v10 = vld [vmem:[#allocation103_spill] sm:$0xff] }
 0x406   : > { %14627 = vmatmul.mubr.bf16.vlgmr.msra.gmra.mrb[104].mxu1 %v9551_v58  ;;  %14071 = vmatpush3.bf16.msra.mxu0 %v15894_v60  ;;  %v21021_v60 = vld [vmem:[#allocation46_spill] sm:$0xff]  ;;  %v9559_v22 = vsel %vm612_vm1, %v9554_v43, %v9558_v46 }
 0x407   : > { %v3575_v13 = vadd.f32 %v21018_v30, %v3372_v40  ;;  %v3373_v3 = vadd.f32 %v21019_v2, %v3205_v6  ;;  %14647 = vmatpush3.bf16.msra.mxu1 %v15895_v15  ;;  %14072 = vmatprep.subr.bf16.mxu0 %v20899_v7  ;;  %v18844_v58 = vadd.f32 %v3952_v27, %v2253_v45  ;;  %v15900_v40 = vld [vmem:[#allocation10 + $0x490] sm:$0xff]   ;;  %v21030_v30 = vld [vmem:[#allocation41_spill] sm:$0xff] }
 0x408   : > { %v2981_v8 = vpop.f32.mrb[96].mxu0  ;;  %14018 = vmatprep.mubr.msk.bf16.mxu0 %vm20811_vm0, %v20899_v7  ;;  %14630 = vmatprep.mubr.msk.bf16.mxu1 %vm20811_vm0, %v20899_v7  ;;  %v18848_v34 = vpop.f32.mrb[0].mxu1  ;;  %v2254_v6 = vmul.f32 %v18708_v41, %v21026_v10  ;;  %v21031_v2 = vld [vmem:[#allocation36_spill] sm:$0xff] }
 0x409   : > { %21020 = vst [vmem:[#allocation32_spill] sm:$0xff] %v18844_v58  ;;  %v3576_v19 = vadd.f32 %v21021_v60, %v3373_v3  ;;  %v2996_v33 = vadd.f32 %v2981_v8, %v18647_v25  ;;  %21022 = vst [vmem:[#allocation57_spill] sm:$0xff] %v18848_v34  ;;  %v13456_v16 = vpop.f32.mrb[97].mxu0  ;;  %14648 = vmatprep.subr.bf16.mxu1 %v20899_v7  ;;  %v14212_v54 = vpop.f32.mrb[1].mxu1  ;;  %v3785_v44 = vadd.f32 %v21023_v1, %v3575_v13  ;;  %v16070_v43 = vld [vmem:[%s16930_s12 + $0x8] sm:$0xff]  }
 0x40a   : > { %v2984_v15 = vpop.f32.mrb[98].mxu0  ;;  %14073 = vmatpush3.bf16.msra.mxu0 %v15896_v18  ;;  %v18856_v47 = vpop.f32.mrb[2].mxu1  ;;  %v21028_v18 = vld [vmem:[#allocation53_spill] sm:$0xff]  ;;  %v9562_v8 = vor.u32 %v9560_v26, %v9558_v46  ;;  %v9566_v60 = vrot.slane %v9564_v9, 1  ;;  %v21035_v1 = vld [vmem:[#allocation42_spill] sm:$0xff]  ;;  %v21038_v9 = vld [vmem:[#allocation64_spill] sm:$0xff] }
 0x40b   : > { %v3206_v42 = vadd.f32 %v21024_v35, %v2996_v33  ;;  %v2997_v25 = vadd.f32 %v2984_v15, %v18654_v23  ;;  %21025 = vst [vmem:[#allocation43_spill] sm:$0xff] %v18856_v47  ;;  %v13457_v28 = vpop.f32.mrb[99].mxu0  ;;  %14649 = vmatpush3.bf16.msra.mxu1 %v15898_v48  ;;  %14074 = vmatprep.subr.bf16.mxu0 %v20899_v7  ;;  %v14213_v51 = vpop.f32.mrb[3].mxu1  ;;  %v21029_v23 = vld [vmem:[#allocation105_spill] sm:$0xff]  ;;  %v21135_v58 = vld [vmem:[#allocation104_spill] sm:$0xff] }
 0x40c   : > { %14650 = vmatprep.subr.bf16.mxu1 %v20899_v7  ;;  %v3953_v45 = vadd.f32 %v21027_v57, %v3785_v44  ;;  %v3786_v53 = vadd.f32 %v21028_v18, %v3576_v19  ;;  %v2255_v27 = vmul.f32 %v18708_v41, %v21029_v23  ;;  %v15901_v48 = vld [vmem:[#allocation10 + $0xd8] sm:$0xff]   ;;  %v21034_v19 = vld [vmem:[#allocation47_spill] sm:$0xff]  ;;  %v9567_v51 = vsel %vm612_vm1, %v9562_v8, %v9566_v60  ;;  %v15904_v57 = vld [vmem:[#allocation10 + $0xe0] sm:$0xff]  }
 0x40d   : > { %v3374_v13 = vadd.f32 %v21030_v30, %v3206_v42  ;;  %v3207_v3 = vadd.f32 %v21031_v2, %v2997_v25  ;;  %14019 = vmatmul.mubr.bf16.gmra.mrb[204].mxu0 %v16070_v43  ;;  %v21033_v16 = vld [vmem:[#allocation61_spill] sm:$0xff] }
 0x40e   : > { %14631 = vmatmul.mubr.bf16.gmra.mrb[108].mxu1 %v9559_v22  ;;  %14075 = vmatpush3.bf16.msra.mxu0 %v15899_v39  ;;  %v18870_v33 = vadd.f32 %v3953_v45, %v2254_v6  ;;  %v3954_v54 = vadd.f32 %v21033_v16, %v3786_v53  ;;  %v15903_v35 = vld [vmem:[#allocation10 + $0x498] sm:$0xff]   ;;  %v21037_v39 = vld [vmem:[#allocation48_spill] sm:$0xff]  ;;  %v21040_v45 = vld [vmem:[#allocation54_spill] sm:$0xff] }
 0x40f   : > { %v3577_v15 = vadd.f32 %v21034_v19, %v3374_v13  ;;  %v3375_v44 = vadd.f32 %v21035_v1, %v3207_v3  ;;  %14651 = vmatpush3.bf16.msra.mxu1 %v15900_v40  ;;  %14022 = vmatprep.mubr.msk.bf16.mxu0 %vm20811_vm0, %v20899_v7  ;;  %v18878_v42 = vld [vmem:[%s16944_s13 + $0x20] sm:$0xff]   ;;  %v9568_v13 = vshrl.u32 %v18832_v61, 16  ;;  %v21045_v19 = vld [vmem:[#allocation62_spill] sm:$0xff] }
 0x410   : > { %21032 = vst [vmem:[#allocation38_spill] sm:$0xff] %v18870_v33  ;;  %v4171_v25 = vpop.f32.mrb[100].mxu0  ;;  %14076 = vmatprep.subr.bf16.mxu0 %v20899_v7  ;;  %14634 = vmatprep.mubr.msk.bf16.mxu1 %vm20811_vm0, %v20899_v7  ;;  %v18883_v46 = vadd.f32 %v3954_v54, %v2255_v27  ;;  %v18889_v22 = vpop.f32.mrb[4].mxu1  ;;  %v21041_v53 = vld [vmem:[#allocation65_spill] sm:$0xff]  ;;  %v9572_v2 = vshll.u32 %v18878_v42, 16  ;;  %v21043_v3 = vld [vmem:[#allocation55_spill] sm:$0xff] }
 0x411   : > { %v3578_v26 = vadd.f32 %v21037_v39, %v3375_v44  ;;  %v18887_v28 = vadd.f32 %v21038_v9, %v4171_v25  ;;  %21039 = vst [vmem:[#allocation50_spill] sm:$0xff] %v18889_v22  ;;  %v13656_v40 = vpop.f32.mrb[101].mxu0  ;;  %14652 = vmatprep.subr.bf16.mxu1 %v20899_v7  ;;  %v14268_v10 = vpop.f32.mrb[5].mxu1  ;;  %v3787_v18 = vadd.f32 %v21040_v45, %v3577_v15  ;;  %v15905_v54 = vld [vmem:[#allocation10 + $0x4a0] sm:$0xff]   ;;  %v21047_v25 = vld [vmem:[#allocation63_spill] sm:$0xff] }
 0x412   : > { %21036 = vst [vmem:[#allocation44_spill] sm:$0xff] %v18883_v46  ;;  %v4174_v6 = vpop.f32.mrb[102].mxu0  ;;  %14077 = vmatpush3.bf16.msra.mxu0 %v15901_v48  ;;  %v18897_v27 = vpop.f32.mrb[6].mxu1  ;;  %v21044_v48 = vld [vmem:[#allocation108_spill] sm:$0xff]  ;;  %v21046_v1 = vld [vmem:[#allocation110_spill] sm:$0xff]  ;;  %v9570_v40 = vor.u32 %v9568_v13, %v9566_v60  ;;  %v9574_v10 = vrot.slane %v9572_v2, 1 }
 0x413   : > { %v18895_v23 = vadd.f32 %v21041_v53, %v4174_v6  ;;  %21042 = vst [vmem:[#allocation33_spill] sm:$0xff] %v18897_v27  ;;  %v13657_v30 = vpop.f32.mrb[103].mxu0  ;;  %14653 = vmatpush3.bf16.msra.mxu1 %v15903_v35  ;;  %14078 = vmatprep.subr.bf16.mxu0 %v20899_v7  ;;  %v3788_v43 = vadd.f32 %v21043_v3, %v3578_v26  ;;  %v14269_v16 = vpop.f32.mrb[7].mxu1  ;;  %v16071_v35 = vld [vmem:[%s16930_s12 + $0x10] sm:$0xff]  }
 0x414   : > { %v2256_v8 = vmul.f32 %v18708_v41, %v21044_v48  ;;  %14654 = vmatprep.subr.bf16.mxu1 %v20899_v7  ;;  %v3955_v15 = vadd.f32 %v21045_v19, %v3787_v18  ;;  %v2257_v44 = vmul.f32 %v18708_v41, %v21046_v1  ;;  %v15907_v26 = vld [vmem:[#allocation10 + $0xe8] sm:$0xff]   ;;  %v18918_v6 = vld [vmem:[%s16944_s13 + $0x28] ss:$0 sps:$4 sm:$0x11]  }
 0x415   : > { %14023 = vmatmul.mubr.bf16.gmra.mrb[208].mxu0 %v16071_v35  ;;  %v3956_v39 = vadd.f32 %v21047_v25, %v3788_v43  ;;  %v21051_v53 = vld [vmem:[#allocation67_spill] sm:$0xff]  ;;  %v9575_v43 = vsel %vm612_vm1, %v9570_v40, %v9574_v10  ;;  %v15909_v48 = vld [vmem:[#allocation10 + $0xf0] sm:$0xff]   ;;  %v9580_v16 = vshll.u32 %v18918_v6, 16  ;;  %v15913_v40 = vld [vmem:[#allocation10 + $0x4b8] sm:$0xff]  }
 0x416   : > { %14635 = vmatmul.mubr.bf16.gmra.mrb[112].mxu1 %v9567_v51  ;;  %14079 = vmatpush3.bf16.msra.mxu0 %v15904_v57  ;;  %v18911_v9 = vadd.f32 %v3955_v15, %v2256_v8  ;;  %v15908_v51 = vld [vmem:[#allocation10 + $0x4a8] sm:$0xff]   ;;  %v9576_v8 = vshrl.u32 %v18878_v42, 16  ;;  %v15911_v1 = vld [vmem:[#allocation10 + $0x4b0] sm:$0xff]  }
 0x417   : > { %14026 = vmatprep.mubr.msk.bf16.mxu0 %vm20811_vm0, %v20899_v7  ;;  %14638 = vmatprep.mubr.msk.bf16.mxu1 %vm20811_vm0, %v20899_v7  ;;  %v18920_v41 = vadd.f32 %v3956_v39, %v2257_v44  ;;  %v16072_v44 = vld [vmem:[%s16930_s12 + $0x18] sm:$0xff]   ;;  %v9582_v25 = vrot.slane %v9580_v16, 1 }
 0x418   : > { %21048 = vst [vmem:[#allocation99_spill] sm:$0xff] %v18911_v9  ;;  %v4179_v45 = vpop.f32.mrb[104].mxu0  ;;  %14655 = vmatpush3.bf16.msra.mxu1 %v15905_v54  ;;  %14080 = vmatprep.subr.bf16.mxu0 %v20899_v7  ;;  %v18923_v57 = vpop.f32.mrb[8].mxu1  ;;  %v21053_v54 = vld [vmem:[#allocation68_spill] sm:$0xff]  ;;  %v9578_v35 = vor.u32 %v9576_v8, %v9574_v10  ;;  %v15912_v39 = vld [vmem:[#allocation10 + $0xf8] sm:$0xff]  }
 0x419   : > { %21049 = vst [vmem:[#allocation58_spill] sm:$0xff] %v18920_v41  ;;  %21050 = vst [vmem:[#allocation51_spill] sm:$0xff] %v18923_v57  ;;  %v13660_v18 = vpop.f32.mrb[105].mxu0  ;;  %14656 = vmatprep.subr.bf16.mxu1 %v20899_v7  ;;  %v18927_v30 = vadd.f32 %v21051_v53, %v4179_v45  ;;  %v14272_v60 = vpop.f32.mrb[9].mxu1 }
 0x41a   : > { %v4182_v13 = vpop.f32.mrb[106].mxu0  ;;  %14081 = vmatpush3.bf16.msra.mxu0 %v15907_v26  ;;  %v18929_v2 = vpop.f32.mrb[10].mxu1  ;;  %v21055_v18 = vld [vmem:[#allocation69_spill] sm:$0xff] }
 0x41b   : > { %21052 = vst [vmem:[#allocation39_spill] sm:$0xff] %v18929_v2  ;;  %v13661_v3 = vpop.f32.mrb[107].mxu0  ;;  %14082 = vmatprep.subr.bf16.mxu0 %v20899_v7  ;;  %v18936_v19 = vadd.f32 %v21053_v54, %v4182_v13  ;;  %v14273_v15 = vpop.f32.mrb[11].mxu1  ;;  %v16073_v54 = vld [vmem:[%s16930_s12 + $0x20] sm:$0xff]  }
 0x41c   : > { %14657 = vmatpush3.bf16.msra.mxu1 %v15908_v51  ;;  %v21058_v15 = vld [vmem:[#allocation66_spill] sm:$0xff] }
 0x41d   : > { %14027 = vmatmul.mubr.bf16.gmra.mrb[212].mxu0 %v16072_v44  ;;  %14658 = vmatprep.subr.bf16.mxu1 %v20899_v7  ;;  %v18964_v44 = vld [vmem:[%s16930_s12 + $0xc] sm:$0xff]  }
 0x41e   : > { %14639 = vmatmul.mubr.bf16.gmra.mrb[116].mxu1 %v9575_v43  ;;  %14030 = vmatprep.mubr.msk.bf16.mxu0 %vm20811_vm0, %v20899_v7  ;;  %v9583_v43 = vsel %vm612_vm1, %v9578_v35, %v9582_v25  ;;  %v6669_v35 = vrot.slane %v18964_v44, 1 }
 0x41f   : > { %14083 = vmatpush3.bf16.msra.mxu0 %v15909_v48  ;;  %14642 = vmatprep.mubr.msk.bf16.mxu1 %vm20811_vm0, %v20899_v7  ;;  %v21057_v48 = vld [vmem:[#allocation70_spill] sm:$0xff] }
 0x420   : > { %v4187_v26 = vpop.f32.mrb[108].mxu0  ;;  %14659 = vmatpush3.bf16.msra.mxu1 %v15911_v1  ;;  %14084 = vmatprep.subr.bf16.mxu0 %v20899_v7  ;;  %v18945_v45 = vpop.f32.mrb[12].mxu1  ;;  %v6668_v1 = vrot.slane %v21058_v15, 1 }
 0x421   : > { %21054 = vst [vmem:[#allocation34_spill] sm:$0xff] %v18945_v45  ;;  %v13664_v51 = vpop.f32.mrb[109].mxu0  ;;  %14660 = vmatprep.subr.bf16.mxu1 %v20899_v7  ;;  %v18949_v53 = vadd.f32 %v21055_v18, %v4187_v26  ;;  %v14276_v60 = vpop.f32.mrb[13].mxu1 }
 0x422   : > { %v4190_v13 = vpop.f32.mrb[110].mxu0  ;;  %v18951_v10 = vpop.f32.mrb[14].mxu1 }
 0x423   : > { %21056 = vst [vmem:[#allocation49_spill] sm:$0xff] %v18951_v10  ;;  %v13665_v3 = vpop.f32.mrb[111].mxu0  ;;  %14085 = vmatpush3.bf16.msra.mxu0 %v15912_v39  ;;  %v18955_v8 = vadd.f32 %v21057_v48, %v4190_v13  ;;  %v14277_v16 = vpop.f32.mrb[15].mxu1  ;;  %v6670_v13 = vsel %vm20809_vm3, %v6668_v1, %v6669_v35  ;;  %v15917_v1 = vld [vmem:[#allocation10 + $0x508] sm:$0xff]  }
 0x424   : > { %14661 = vmatpush3.bf16.msra.mxu1 %v15913_v40  ;;  %14142 = vmatprep.subr.bf16.mxu0 %v20899_v7  ;;  %v21060_v40 = vld [vmem:[#allocation71_spill] sm:$0xff]  ;;  %v15914_v3 = vld [vmem:[#allocation10 + $0x140] sm:$0xff]  }
 0x425   : > { %14031 = vmatmul.mubr.bf16.gmra.mrb[216].mxu0 %v16073_v54  ;;  %14682 = vmatprep.subr.bf16.mxu1 %v20899_v7  ;;  %v15915_v16 = vld [vmem:[#allocation10 + $0x500] sm:$0xff]   ;;  %v21063_v54 = vld [vmem:[#allocation72_spill] sm:$0xff] }
 0x426   : > { %14643 = vmatmul.mubr.bf16.gmra.mrb[120].mxu1 %v9583_v43  ;;  %14086 = vmatprep.mubr.msk.bf16.mxu0 %vm20811_vm0, %v20899_v7  ;;  %v530_v10 = vld [vmem:[%s19005_s6 + $0x4] sm:$0x3] }
 0x427   : > { %14662 = vmatprep.mubr.msk.bf16.mxu1 %vm20811_vm0, %v20899_v7  ;;  %v531_v45 = vsel %vm18994_vm11, 0, %v530_v10  ;;  %v15921_v10 = vld [vmem:[#allocation10 + $0x518] sm:$0xff]  }
 0x428   : > { %v4195_v25 = vpop.f32.mrb[112].mxu0  ;;  %v18969_v39 = vpop.f32.mrb[16].mxu1  ;;  %532 = vst [vmem:[%s19005_s6 + $0x4] sm:$0x3] %v531_v45 }
 0x429   : > { %21059 = vst [vmem:[#allocation101_spill] sm:$0xff] %v18969_v39  ;;  %v13668_v26 = vpop.f32.mrb[113].mxu0  ;;  %v18972_v51 = vadd.f32 %v21060_v40, %v4195_v25  ;;  %v14280_v18 = vpop.f32.mrb[17].mxu1  ;;  %v15916_v25 = vld [vmem:[#allocation10 + $0x148] sm:$0xff]  }
 0x42a   : > { %v4198_v60 = vpop.f32.mrb[114].mxu0  ;;  %v18975_v43 = vpop.f32.mrb[18].mxu1  ;;  %v18982_v26 = vld [vmem:[%s16930_s12 + $0x14] sm:$0xff]  }
 0x42b   : > { %21062 = vst [vmem:[#allocation59_spill] sm:$0xff] %v18975_v43  ;;  %v13669_v48 = vpop.f32.mrb[115].mxu0  ;;  %v18978_v15 = vadd.f32 %v21063_v54, %v4198_v60  ;;  %v14281_v39 = vpop.f32.mrb[19].mxu1  ;;  %v6671_v40 = vrot.slane %v18982_v26, 1 }
 0x42d   : > { %14087 = vmatmul.mubr.bf16.vlgmr.msra.gmra.mrb[220].mxu0 %v6670_v13  ;;  %v15918_v13 = vld [vmem:[#allocation10 + $0x150] sm:$0xff]   ;;  %v6672_v43 = vsel %vm20809_vm3, %v6669_v35, %v6671_v40 }
 0x42e   : > { %14663 = vmatmul.mubr.bf16.vlgmr.msra.gmra.mrb[104].mxu1 %v18726_v17  ;;  %14143 = vmatpush3.bf16.msra.mxu0 %v15914_v3  ;;  %v21064_v17 = vmov 0  ;;  %v21068_v3 = vld [vmem:[#allocation73_spill] sm:$0xff]  ;;  %v15919_v35 = vld [vmem:[#allocation10 + $0x510] sm:$0xff]  }
 0x42f   : > { %14683 = vmatpush3.bf16.msra.mxu1 %v15915_v16  ;;  %14144 = vmatprep.subr.bf16.mxu0 %v20899_v7  ;;  %v21065_v17 = vsel %vm18994_vm11, 4294967295, %v21064_v17 }
 0x430   : > { %v4203_v39 = vpop.f32.mrb[116].mxu0  ;;  %14090 = vmatprep.mubr.msk.bf16.mxu0 %vm20811_vm0, %v20899_v7  ;;  %14666 = vmatprep.mubr.msk.bf16.mxu1 %vm20811_vm0, %v20899_v7  ;;  %21066 = vst [vmem:[#allocation45_spill] sm:$0xff] %v21065_v17  ;;  %v18998_v18 = vpop.f32.mrb[20].mxu1 }
 0x431   : > { %21067 = vst [vmem:[#allocation40_spill] sm:$0xff] %v18998_v18  ;;  %v13672_v60 = vpop.f32.mrb[117].mxu0  ;;  %14684 = vmatprep.subr.bf16.mxu1 %v20899_v7  ;;  %v19002_v48 = vadd.f32 %v21068_v3, %v4203_v39  ;;  %v14284_v16 = vpop.f32.mrb[21].mxu1  ;;  %v536_v39 = vld [vmem:[%s19005_s6 + $0x2c] sm:$0xe] }
 0x432   : > { %v4206_v54 = vpop.f32.mrb[118].mxu0  ;;  %14145 = vmatpush3.bf16.msra.mxu0 %v15916_v25  ;;  %v19015_v3 = vpop.f32.mrb[22].mxu1  ;;  %v21072_v16 = vld [vmem:[#allocation74_spill] sm:$0xff]  ;;  %v537_v2 = vsel %vm19010_vm12, 0, %v536_v39 }
 0x433   : > { %21071 = vst [vmem:[#allocation46_spill] sm:$0xff] %v19015_v3  ;;  %v13673_v25 = vpop.f32.mrb[119].mxu0  ;;  %14685 = vmatpush3.bf16.msra.mxu1 %v15917_v1  ;;  %14146 = vmatprep.subr.bf16.mxu0 %v20899_v7  ;;  %v19019_v18 = vadd.f32 %v21072_v16, %v4206_v54  ;;  %v14285_v57 = vpop.f32.mrb[23].mxu1  ;;  %538 = vst [vmem:[%s19005_s6 + $0x2c] sm:$0xe] %v537_v2  ;;  %v19030_v1 = vld [vmem:[%s16930_s12 + $0x1c] sm:$0xff]  }
 0x434   : > { %14686 = vmatprep.subr.bf16.mxu1 %v20899_v7  ;;  %v6673_v54 = vrot.slane %v19030_v1, 1  ;;  %v15920_v25 = vld [vmem:[#allocation10 + $0x158] sm:$0xff]   ;;  %v15922_v16 = vld [vmem:[#allocation10 + $0x160] sm:$0xff]  }
 0x435   : > { %14091 = vmatmul.mubr.bf16.gmra.mrb[224].mxu0 %v6672_v43 }
 0x436   : > { %14667 = vmatmul.mubr.bf16.gmra.mrb[108].mxu1 %v18749_v31  ;;  %14147 = vmatpush3.bf16.msra.mxu0 %v15918_v13 }
 0x437   : > { %14687 = vmatpush3.bf16.msra.mxu1 %v15919_v35  ;;  %14094 = vmatprep.mubr.msk.bf16.mxu0 %vm20811_vm0, %v20899_v7  ;;  %v6674_v35 = vsel %vm20809_vm3, %v6671_v40, %v6673_v54  ;;  %v21076_v40 = vld [vmem:[#allocation76_spill] sm:$0xff] }
 0x438   : > { %v4455_v39 = vpop.f32.mrb[120].mxu0  ;;  %14148 = vmatprep.subr.bf16.mxu0 %v20899_v7  ;;  %14670 = vmatprep.mubr.msk.bf16.mxu1 %vm20811_vm0, %v20899_v7  ;;  %v19039_v2 = vpop.f32.mrb[24].mxu1 }
 0x439   : > { %v4494_v57 = vadd.f32 %v4455_v39, %v18887_v28  ;;  %21073 = vst [vmem:[#allocation52_spill] sm:$0xff] %v19039_v2  ;;  %v13728_v45 = vpop.f32.mrb[121].mxu0  ;;  %14688 = vmatprep.subr.bf16.mxu1 %v20899_v7  ;;  %v14340_v43 = vpop.f32.mrb[25].mxu1  ;;  %v21075_v28 = vld [vmem:[#allocation75_spill] sm:$0xff] }
 0x43a   : > { %v4458_v13 = vpop.f32.mrb[122].mxu0  ;;  %14149 = vmatpush3.bf16.msra.mxu0 %v15920_v25  ;;  %v19044_v27 = vpop.f32.mrb[26].mxu1  ;;  %v15923_v43 = vld [vmem:[#allocation10 + $0x520] sm:$0xff]   ;;  %v15924_v25 = vld [vmem:[#allocation10 + $0x168] sm:$0xff]  }
 0x43b   : > { %v4495_v3 = vadd.f32 %v4458_v13, %v18895_v23  ;;  %21074 = vst [vmem:[#allocation35_spill] sm:$0xff] %v19044_v27  ;;  %v13729_v22 = vpop.f32.mrb[123].mxu0  ;;  %14689 = vmatpush3.bf16.msra.mxu1 %v15921_v10  ;;  %14150 = vmatprep.subr.bf16.mxu0 %v20899_v7  ;;  %v19048_v39 = vadd.f32 %v21075_v28, %v4494_v57  ;;  %v14341_v45 = vpop.f32.mrb[27].mxu1  ;;  %v19056_v23 = vld [vmem:[%s16930_s12 + $0x24] sm:$0xff]  }
 0x43c   : > { %14690 = vmatprep.subr.bf16.mxu1 %v20899_v7  ;;  %v6675_v22 = vrot.slane %v19056_v23, 1  ;;  %v15927_v27 = vld [vmem:[%s16930_s12 + $0x2c] ss:$0 sps:$4 sm:$0x11]  }
 0x43d   : > { %14095 = vmatmul.mubr.bf16.gmra.mrb[228].mxu0 %v6674_v35  ;;  %v19052_v2 = vadd.f32 %v21076_v40, %v4495_v3  ;;  %v15925_v3 = vld [vmem:[#allocation10 + $0x528] sm:$0xff]  }
 0x43e   : > { %14671 = vmatmul.mubr.bf16.gmra.mrb[112].mxu1 %v18806_v37  ;;  %14151 = vmatpush3.bf16.msra.mxu0 %v15922_v16  ;;  %v11928_v16 = vld [vmem:[%s19005_s6 + $0x60] sm:$0xe]  ;;  %v6676_v40 = vsel %vm20809_vm3, %v6673_v54, %v6675_v22  ;;  %v15928_v54 = vld [vmem:[#allocation10 + $0x530] sm:$0xff]  }
 0x43f   : > { %14098 = vmatprep.mubr.msk.bf16.mxu0 %vm20811_vm0, %v20899_v7  ;;  %14674 = vmatprep.mubr.msk.bf16.mxu1 %vm20811_vm0, %v20899_v7 }
 0x440   : > { %v4463_v10 = vpop.f32.mrb[124].mxu0  ;;  %14691 = vmatpush3.bf16.msra.mxu1 %v15923_v43  ;;  %14152 = vmatprep.subr.bf16.mxu0 %v20899_v7  ;;  %v19065_v13 = vpop.f32.mrb[28].mxu1  ;;  %v6076_v43 = vsel %vm19010_vm12, 0, %v11928_v16  ;;  %v6677_v16 = vrot.slane %v15927_v27, 1 }
 0x441   : > { %v4496_v57 = vadd.f32 %v4463_v10, %v18927_v30  ;;  %21077 = vst [vmem:[#allocation103_spill] sm:$0xff] %v19065_v13  ;;  %v13732_v35 = vpop.f32.mrb[125].mxu0  ;;  %14692 = vmatprep.subr.bf16.mxu1 %v20899_v7  ;;  %v14344_v28 = vpop.f32.mrb[29].mxu1  ;;  %v15926_v10 = vld [vmem:[#allocation10 + $0x170] sm:$0xff]   ;;  %11929 = vst [vmem:[%s19005_s6 + $0x60] sm:$0xe] %v6076_v43 }
 0x442   : > { %v4466_v45 = vpop.f32.mrb[126].mxu0  ;;  %14153 = vmatpush3.bf16.msra.mxu0 %v15924_v25  ;;  %v19074_v34 = vpop.f32.mrb[30].mxu1  ;;  %v21079_v35 = vld [vmem:[#allocation77_spill] sm:$0xff]  ;;  %v21080_v25 = vld [vmem:[#allocation78_spill] sm:$0xff] }
 0x443   : > { %v4497_v47 = vadd.f32 %v4466_v45, %v18936_v19  ;;  %21078 = vst [vmem:[#allocation60_spill] sm:$0xff] %v19074_v34  ;;  %v13733_v30 = vpop.f32.mrb[127].mxu0  ;;  %14154 = vmatprep.subr.bf16.mxu0 %v20899_v7  ;;  %v19078_v13 = vadd.f32 %v21079_v35, %v4496_v57  ;;  %v14345_v28 = vpop.f32.mrb[31].mxu1  ;;  %v7024_v57 = vld [vmem:[%s16930_s12 + $0x4] sm:$0xc] }
 0x444   : > { %14693 = vmatpush3.bf16.msra.mxu1 %v15925_v3  ;;  %v15929_v3 = vld [vmem:[#allocation10 + $0x178] sm:$0xff]   ;;  %v6678_v28 = vsel %vm20809_vm3, %v6675_v22, %v6677_v16  ;;  %v21084_v22 = vld [vmem:[#allocation80_spill] sm:$0xff] }
 0x445   : > { %14099 = vmatmul.mubr.bf16.gmra.mrb[232].mxu0 %v6676_v40  ;;  %14694 = vmatprep.subr.bf16.mxu1 %v20899_v7  ;;  %v19083_v19 = vadd.f32 %v21080_v25, %v4497_v47  ;;  %v15930_v40 = vld [vmem:[#allocation10 + $0x538] sm:$0xff]   ;;  %v16078_v25 = vld [vmem:[%s16930_s12 + $0x8] sm:$0xf] }
 0x446   : > { %14675 = vmatmul.mubr.bf16.gmra.mrb[116].mxu1 %v18832_v61  ;;  %14102 = vmatprep.mubr.msk.bf16.mxu0 %vm20811_vm0, %v20899_v7  ;;  %v9836_v47 = vld [vmem:[%s16944_s13] sm:$0xe]  ;;  %v11985_v34 = vcombine.low %v7024_v57, %v16078_v25 }
 0x447   : > { %14155 = vmatpush3.bf16.msra.mxu0 %v15926_v10  ;;  %14678 = vmatprep.mubr.msk.bf16.mxu1 %vm20811_vm0, %v20899_v7  ;;  %v12143_v63 = vcombine.low %v9836_v47, %v18705_v5  ;;  %v7045_v5 = vrot.slane %v18964_v44, 2 }
 0x448   : > { %v4471_v45 = vpop.f32.mrb[128].mxu0  ;;  %14695 = vmatpush3.bf16.msra.mxu1 %v15928_v54  ;;  %14156 = vmatprep.subr.bf16.mxu0 %v20899_v7  ;;  %v19094_v30 = vpop.f32.mrb[32].mxu1 }
 0x449   : > { %v4498_v43 = vadd.f32 %v4471_v45, %v18949_v53  ;;  %21081 = vst [vmem:[#allocation53_spill] sm:$0xff] %v19094_v30  ;;  %v13736_v35 = vpop.f32.mrb[129].mxu0  ;;  %14696 = vmatprep.subr.bf16.mxu1 %v20899_v7  ;;  %v14348_v27 = vpop.f32.mrb[33].mxu1  ;;  %v21083_v53 = vld [vmem:[#allocation79_spill] sm:$0xff] }
 0x44a   : > { %v4474_v10 = vpop.f32.mrb[130].mxu0  ;;  %v19100_v54 = vpop.f32.mrb[34].mxu1 }
 0x44b   : > { %v4499_v4 = vadd.f32 %v4474_v10, %v18955_v8  ;;  %21082 = vst [vmem:[#allocation105_spill] sm:$0xff] %v19100_v54  ;;  %v13737_v49 = vpop.f32.mrb[131].mxu0  ;;  %14157 = vmatpush3.bf16.msra.mxu0 %v15929_v3  ;;  %v19104_v45 = vadd.f32 %v21083_v53, %v4498_v43  ;;  %v14349_v35 = vpop.f32.mrb[35].mxu1  ;;  %v9856_v8 = vrot.slane %v12143_v63, 1  ;;  %v9857_v3 = vrot.slane %v18749_v31, 1  ;;  %v15934_v53 = vld [vmem:[#allocation10 + $0x540] sm:$0xff]  }
 0x44c   : > { %14697 = vmatpush3.bf16.msra.mxu1 %v15930_v40  ;;  %14214 = vmatprep.subr.bf16.mxu0 %v20899_v7  ;;  %v7044_v49 = vrot.slane %v11985_v34, 2  ;;  %v21087_v31 = vld [vmem:[#allocation81_spill] sm:$0xff] }
 0x44d   : > { %14103 = vmatmul.mubr.bf16.gmra.mrb[236].mxu0 %v6678_v28  ;;  %14718 = vmatprep.subr.bf16.mxu1 %v20899_v7  ;;  %v19109_v16 = vadd.f32 %v21084_v22, %v4499_v4  ;;  %v15933_v28 = vld [vmem:[#allocation10 + $0x1c0] sm:$0xff]   ;;  %v9858_v63 = vsel %vm20809_vm3, %v9856_v8, %v9857_v3  ;;  %v15936_v8 = vld [vmem:[#allocation10 + $0x548] sm:$0xff]  }
 0x44e   : > { %14679 = vmatmul.mubr.bf16.gmra.mrb[120].mxu1 %v18878_v42  ;;  %14158 = vmatprep.mubr.msk.bf16.mxu0 %vm20811_vm0, %v20899_v7  ;;  %v7046_v10 = vsel %vm20808_vm4, %v7044_v49, %v7045_v5  ;;  %v21088_v22 = vld [vmem:[#allocation82_spill] sm:$0xff]  ;;  %v15935_v49 = vld [vmem:[#allocation10 + $0x1c8] sm:$0xff]  }
 0x44f   : > { %14698 = vmatprep.mubr.msk.bf16.mxu1 %vm20811_vm0, %v20899_v7 }
 0x450   : > { %v4479_v57 = vpop.f32.mrb[132].mxu0  ;;  %v19119_v47 = vpop.f32.mrb[36].mxu1 }
 0x451   : > { %v4500_v40 = vadd.f32 %v4479_v57, %v18972_v51  ;;  %21085 = vst [vmem:[#allocation41_spill] sm:$0xff] %v19119_v47  ;;  %v13740_v4 = vpop.f32.mrb[133].mxu0  ;;  %v14352_v43 = vpop.f32.mrb[37].mxu1  ;;  %v19330_v47 = vld [vmem:[%s16944_s13 + $0x2c] ss:$0 sps:$4 sm:$0x11]  }
 0x452   : > { %v4482_v27 = vpop.f32.mrb[134].mxu0  ;;  %v19123_v44 = vpop.f32.mrb[38].mxu1  ;;  %v7047_v4 = vrot.slane %v18982_v26, 2 }
 0x453   : > { %v4501_v34 = vadd.f32 %v4482_v27, %v18978_v15  ;;  %21086 = vst [vmem:[#allocation36_spill] sm:$0xff] %v19123_v44  ;;  %v13741_v25 = vpop.f32.mrb[135].mxu0  ;;  %v19127_v35 = vadd.f32 %v21087_v31, %v4500_v40  ;;  %v14353_v51 = vpop.f32.mrb[39].mxu1  ;;  %v9859_v15 = vrot.slane %v18806_v37, 1 }
 0x454   : > { %v7048_v37 = vsel %vm20808_vm4, %v7045_v5, %v7047_v4  ;;  %v21091_v51 = vld [vmem:[#allocation83_spill] sm:$0xff]  ;;  %v21092_v5 = vld [vmem:[#allocation84_spill] sm:$0xff] }
 0x455   : > { %14159 = vmatmul.mubr.bf16.vlgmr.msra.gmra.mrb[240].mxu0 %v7046_v10  ;;  %v19130_v57 = vadd.f32 %v21088_v22, %v4501_v34  ;;  %v15937_v34 = vld [vmem:[#allocation10 + $0x1d0] sm:$0xff]   ;;  %v9860_v31 = vsel %vm20809_vm3, %v9857_v3, %v9859_v15  ;;  %v9861_v3 = vrot.slane %v18832_v61, 1  ;;  %v15941_v61 = vld [vmem:[#allocation10 + $0x1e0] sm:$0xff]  }
 0x456   : > { %14699 = vmatmul.mubr.bf16.vlgmr.msra.gmra.mrb[104].mxu1 %v9858_v63  ;;  %14215 = vmatpush3.bf16.msra.mxu0 %v15933_v28 }
 0x457   : > { %14719 = vmatpush3.bf16.msra.mxu1 %v15934_v53  ;;  %14216 = vmatprep.subr.bf16.mxu0 %v20899_v7 }
 0x458   : > { %v4487_v43 = vpop.f32.mrb[136].mxu0  ;;  %14162 = vmatprep.mubr.msk.bf16.mxu0 %vm20811_vm0, %v20899_v7  ;;  %14702 = vmatprep.mubr.msk.bf16.mxu1 %vm20811_vm0, %v20899_v7  ;;  %v19140_v27 = vpop.f32.mrb[40].mxu1 }
 0x459   : > { %v4502_v40 = vadd.f32 %v4487_v43, %v19002_v48  ;;  %21089 = vst [vmem:[#allocation61_spill] sm:$0xff] %v19140_v27  ;;  %v13744_v10 = vpop.f32.mrb[137].mxu0  ;;  %14720 = vmatprep.subr.bf16.mxu1 %v20899_v7  ;;  %v14356_v26 = vpop.f32.mrb[41].mxu1  ;;  %v15938_v48 = vld [vmem:[#allocation10 + $0x550] sm:$0xff]  }
 0x45a   : > { %v4490_v28 = vpop.f32.mrb[138].mxu0  ;;  %14217 = vmatpush3.bf16.msra.mxu0 %v15935_v49  ;;  %v19145_v63 = vpop.f32.mrb[42].mxu1  ;;  %v15939_v10 = vld [vmem:[#allocation10 + $0x1d8] sm:$0xff]   ;;  %v16082_v27 = vld [vmem:[%s16930_s12 + $0x28] sm:$0xff]  }
 0x45b   : > { %v4503_v25 = vadd.f32 %v4490_v28, %v19019_v18  ;;  %21090 = vst [vmem:[#allocation47_spill] sm:$0xff] %v19145_v63  ;;  %v13745_v53 = vpop.f32.mrb[139].mxu0  ;;  %14721 = vmatpush3.bf16.msra.mxu1 %v15936_v8  ;;  %14218 = vmatprep.subr.bf16.mxu0 %v20899_v7  ;;  %v19150_v22 = vadd.f32 %v21091_v51, %v4502_v40  ;;  %v14357_v43 = vpop.f32.mrb[43].mxu1  ;;  %v7049_v18 = vrot.slane %v19030_v1, 2  ;;  %v15940_v8 = vld [vmem:[#allocation10 + $0x558] sm:$0xff]   ;;  %v21108_v63 = vld [vmem:[#allocation92_spill] sm:$0xff] }
 0x45c   : > { %14722 = vmatprep.subr.bf16.mxu1 %v20899_v7  ;;  %v9862_v51 = vsel %vm20809_vm3, %v9859_v15, %v9861_v3  ;;  %v9863_v15 = vrot.slane %v18878_v42, 1 }
 0x45d   : > { %14163 = vmatmul.mubr.bf16.gmra.mrb[244].mxu0 %v7048_v37  ;;  %v19154_v49 = vadd.f32 %v21092_v5, %v4503_v25  ;;  %v7050_v25 = vsel %vm20808_vm4, %v7047_v4, %v7049_v18  ;;  %v21096_v4 = vld [vmem:[#allocation86_spill] sm:$0xff] }
 0x45e   : > { %14703 = vmatmul.mubr.bf16.gmra.mrb[108].mxu1 %v9860_v31  ;;  %14219 = vmatpush3.bf16.msra.mxu0 %v15937_v34 }
 0x45f   : > { %14723 = vmatpush3.bf16.msra.mxu1 %v15938_v48  ;;  %14166 = vmatprep.mubr.msk.bf16.mxu0 %vm20811_vm0, %v20899_v7 }
 0x460   : > { %v4868_v40 = vpop.f32.mrb[140].mxu0  ;;  %14220 = vmatprep.subr.bf16.mxu0 %v20899_v7  ;;  %14706 = vmatprep.mubr.msk.bf16.mxu1 %vm20811_vm0, %v20899_v7  ;;  %v19164_v28 = vpop.f32.mrb[44].mxu1 }
 0x461   : > { %v4907_v26 = vadd.f32 %v4868_v40, %v19048_v39  ;;  %21093 = vst [vmem:[#allocation42_spill] sm:$0xff] %v19164_v28  ;;  %v13800_v37 = vpop.f32.mrb[141].mxu0  ;;  %14724 = vmatprep.subr.bf16.mxu1 %v20899_v7  ;;  %v14412_v1 = vpop.f32.mrb[45].mxu1  ;;  %v21095_v39 = vld [vmem:[#allocation85_spill] sm:$0xff]  ;;  %v15942_v40 = vld [vmem:[#allocation10 + $0x560] sm:$0xff]  }
 0x462   : > { %v4871_v34 = vpop.f32.mrb[142].mxu0  ;;  %14221 = vmatpush3.bf16.msra.mxu0 %v15939_v10  ;;  %v19169_v31 = vpop.f32.mrb[46].mxu1  ;;  %v15943_v37 = vld [vmem:[#allocation10 + $0x1e8] sm:$0xff]  }
 0x463   : > { %v4908_v53 = vadd.f32 %v4871_v34, %v19052_v2  ;;  %21094 = vst [vmem:[#allocation48_spill] sm:$0xff] %v19169_v31  ;;  %v13801_v48 = vpop.f32.mrb[143].mxu0  ;;  %14725 = vmatpush3.bf16.msra.mxu1 %v15940_v8  ;;  %14222 = vmatprep.subr.bf16.mxu0 %v20899_v7  ;;  %v19174_v43 = vadd.f32 %v21095_v39, %v4907_v26  ;;  %v14413_v5 = vpop.f32.mrb[47].mxu1  ;;  %v7051_v2 = vrot.slane %v19056_v23, 2  ;;  %v15944_v26 = vld [vmem:[#allocation10 + $0x568] sm:$0xff]  }
 0x464   : > { %14726 = vmatprep.subr.bf16.mxu1 %v20899_v7  ;;  %v9864_v39 = vsel %vm20809_vm3, %v9861_v3, %v9863_v15  ;;  %v21099_v5 = vld [vmem:[#allocation87_spill] sm:$0xff]  ;;  %v9865_v3 = vrot.slane %v18918_v6, 1 }
 0x465   : > { %14167 = vmatmul.mubr.bf16.gmra.mrb[248].mxu0 %v7050_v25  ;;  %v19178_v10 = vadd.f32 %v21096_v4, %v4908_v53  ;;  %v7052_v53 = vsel %vm20808_vm4, %v7049_v18, %v7051_v2 }
 0x466   : > { %14707 = vmatmul.mubr.bf16.gmra.mrb[112].mxu1 %v9862_v51  ;;  %14223 = vmatpush3.bf16.msra.mxu0 %v15941_v61 }
 0x467   : > { %14170 = vmatprep.mubr.msk.bf16.mxu0 %vm20811_vm0, %v20899_v7  ;;  %14710 = vmatprep.mubr.msk.bf16.mxu1 %vm20811_vm0, %v20899_v7 }
 0x468   : > { %v4876_v8 = vpop.f32.mrb[144].mxu0  ;;  %14727 = vmatpush3.bf16.msra.mxu1 %v15942_v40  ;;  %14224 = vmatprep.subr.bf16.mxu0 %v20899_v7  ;;  %v19188_v34 = vpop.f32.mrb[48].mxu1 }
 0x469   : > { %v4909_v1 = vadd.f32 %v4876_v8, %v19078_v13  ;;  %21097 = vst [vmem:[#allocation64_spill] sm:$0xff] %v19188_v34  ;;  %v13804_v25 = vpop.f32.mrb[145].mxu0  ;;  %14728 = vmatprep.subr.bf16.mxu1 %v20899_v7  ;;  %v14416_v23 = vpop.f32.mrb[49].mxu1  ;;  %v15945_v13 = vld [vmem:[#allocation10 + $0x1f0] sm:$0xff]  }
 0x46a   : > { %v4879_v61 = vpop.f32.mrb[146].mxu0  ;;  %14225 = vmatpush3.bf16.msra.mxu0 %v15943_v37  ;;  %v19193_v48 = vpop.f32.mrb[50].mxu1  ;;  %v15946_v8 = vld [vmem:[#allocation10 + $0x570] sm:$0xff]   ;;  %v15948_v23 = vld [vmem:[#allocation10 + $0x578] sm:$0xff]  }
 0x46b   : > { %v4910_v42 = vadd.f32 %v4879_v61, %v19083_v19  ;;  %21098 = vst [vmem:[#allocation54_spill] sm:$0xff] %v19193_v48  ;;  %v13805_v51 = vpop.f32.mrb[147].mxu0  ;;  %14226 = vmatprep.subr.bf16.mxu0 %v20899_v7  ;;  %v19198_v40 = vadd.f32 %v21099_v5, %v4909_v1  ;;  %v14417_v4 = vpop.f32.mrb[51].mxu1  ;;  %v21100_v19 = vld [vmem:[#allocation88_spill] sm:$0xff] }
 0x46c   : > { %14729 = vmatpush3.bf16.msra.mxu1 %v15944_v26  ;;  %v16079_v37 = vld [vmem:[%s16930_s12 + $0x2c] ss:$0 sps:$4 sm:$0x33]   ;;  %v15947_v26 = vld [vmem:[#allocation10 + $0x1f8] sm:$0xff]  }
 0x46d   : > { %14171 = vmatmul.mubr.bf16.gmra.mrb[252].mxu0 %v7052_v53  ;;  %14730 = vmatprep.subr.bf16.mxu1 %v20899_v7  ;;  %v19202_v18 = vadd.f32 %v21100_v19, %v4910_v42  ;;  %v7053_v25 = vrot.slane %v16079_v37, 2  ;;  %v10003_v61 = vld [vmem:[%s16944_s13 + $0x4] sm:$0xe]  ;;  %v19213_v53 = vld [vmem:[%s16944_s13 + $0x8] sm:$0xf]  ;;  %v9866_v37 = vsel %vm20809_vm3, %v9863_v15, %v9865_v3 }
 0x46e   : > { %14711 = vmatmul.mubr.bf16.gmra.mrb[116].mxu1 %v9864_v39  ;;  %14174 = vmatprep.mubr.msk.bf16.mxu0 %vm20811_vm0, %v20899_v7  ;;  %v21104_v15 = vld [vmem:[#allocation90_spill] sm:$0xff] }
 0x46f   : > { %14227 = vmatpush3.bf16.msra.mxu0 %v15945_v13  ;;  %14714 = vmatprep.mubr.msk.bf16.mxu1 %vm20811_vm0, %v20899_v7  ;;  %v7054_v13 = vsel %vm20808_vm4, %v7051_v2, %v7053_v25 }
 0x470   : > { %v4884_v1 = vpop.f32.mrb[148].mxu0  ;;  %14731 = vmatpush3.bf16.msra.mxu1 %v15946_v8  ;;  %14228 = vmatprep.subr.bf16.mxu0 %v20899_v7  ;;  %v19216_v51 = vpop.f32.mrb[52].mxu1 }
 0x471   : > { %v4911_v42 = vadd.f32 %v4884_v1, %v19104_v45  ;;  %21101 = vst [vmem:[#allocation65_spill] sm:$0xff] %v19216_v51  ;;  %v13808_v39 = vpop.f32.mrb[149].mxu0  ;;  %14732 = vmatprep.subr.bf16.mxu1 %v20899_v7  ;;  %v14420_v6 = vpop.f32.mrb[53].mxu1  ;;  %v19225_v45 = vcombine.low %v10003_v61, %v19213_v53  ;;  %v19228_v1 = vld [vmem:[%s16944_s13 + $0xc] sm:$0xff]  }
 0x472   : > { %v4887_v5 = vpop.f32.mrb[150].mxu0  ;;  %v19221_v8 = vpop.f32.mrb[54].mxu1  ;;  %v21103_v39 = vld [vmem:[#allocation89_spill] sm:$0xff]  ;;  %v10237_v54 = vshll.u32 %v19228_v1, 16 }
 0x473   : > { %v4912_v4 = vadd.f32 %v4887_v5, %v19109_v16  ;;  %21102 = vst [vmem:[#allocation55_spill] sm:$0xff] %v19221_v8  ;;  %v13809_v19 = vpop.f32.mrb[151].mxu0  ;;  %14229 = vmatpush3.bf16.msra.mxu0 %v15947_v26  ;;  %v19231_v51 = vadd.f32 %v21103_v39, %v4911_v42  ;;  %v14421_v2 = vpop.f32.mrb[55].mxu1  ;;  %v16080_v16 = vld [vmem:[%s16930_s12 + $0x18] sm:$0xff]   ;;  %v10058_v26 = vrot.slane %v19225_v45, 1 }
 0x474   : > { %14733 = vmatpush3.bf16.msra.mxu1 %v15948_v23  ;;  %14286 = vmatprep.subr.bf16.mxu0 %v20899_v7  ;;  %v7431_v25 = vshrl.u32 %v16080_v16, 16  ;;  %v7434_v6 = vshll.u32 %v16080_v16, 16  ;;  %v10059_v23 = vrot.slane %v19228_v1, 1  ;;  %v15951_v2 = vld [vmem:[#allocation10 + $0x280] sm:$0xff]  }
 0x475   : > { %14175 = vmatmul.mubr.bf16.gmra.mrb[0].mxu0 %v7054_v13  ;;  %14754 = vmatprep.subr.bf16.mxu1 %v20899_v7  ;;  %v19237_v3 = vadd.f32 %v21104_v15, %v4912_v4  ;;  %v19249_v16 = vld [vmem:[%s16944_s13 + $0x14] sm:$0xff]  }
 0x476   : > { %14715 = vmatmul.mubr.bf16.gmra.mrb[120].mxu1 %v9866_v37  ;;  %14230 = vmatprep.mubr.msk.bf16.mxu0 %vm20811_vm0, %v20899_v7  ;;  %v7433_v4 = vrot.slane %v7431_v25, 2  ;;  %v7436_v19 = vrot.slane %v7434_v6, 3  ;;  %v16081_v15 = vld [vmem:[%s16930_s12 + $0x20] sm:$0xff]  }
 0x477   : > { %14734 = vmatprep.mubr.msk.bf16.mxu1 %vm20811_vm0, %v20899_v7  ;;  %v7440_v8 = vshrl.u32 %v16081_v15, 16  ;;  %v7443_v48 = vshll.u32 %v16081_v15, 16  ;;  %v21107_v25 = vld [vmem:[#allocation91_spill] sm:$0xff] }
 0x478   : > { %v4892_v61 = vpop.f32.mrb[152].mxu0  ;;  %v19246_v13 = vpop.f32.mrb[56].mxu1 }
 0x479   : > { %v4913_v42 = vadd.f32 %v4892_v61, %v19127_v35  ;;  %21105 = vst [vmem:[#allocation108_spill] sm:$0xff] %v19246_v13  ;;  %v13812_v5 = vpop.f32.mrb[153].mxu0  ;;  %v14424_v39 = vpop.f32.mrb[57].mxu1  ;;  %v10060_v35 = vsel %vm20809_vm3, %v10058_v26, %v10059_v23  ;;  %v15952_v61 = vld [vmem:[#allocation10 + $0x580] sm:$0xff]   ;;  %v7437_v13 = vor.u32 %v7436_v19, %v7433_v4  ;;  %v19265_v26 = vld [vmem:[%s16944_s13 + $0x1c] sm:$0xff]  }
 0x47a   : > { %v4895_v37 = vpop.f32.mrb[154].mxu0  ;;  %v19253_v31 = vpop.f32.mrb[58].mxu1  ;;  %v5692_v5 = vlaneseq }
 0x47b   : > { %v4914_v34 = vadd.f32 %v4895_v37, %v19130_v57  ;;  %21106 = vst [vmem:[#allocation62_spill] sm:$0xff] %v19253_v31  ;;  %v13813_v28 = vpop.f32.mrb[155].mxu0  ;;  %v19257_v6 = vadd.f32 %v21107_v25, %v4913_v42  ;;  %v14425_v39 = vpop.f32.mrb[59].mxu1  ;;  %v15953_v57 = vld [vmem:[#allocation10 + $0x288] sm:$0xff]   ;;  %v7442_v37 = vrot.slane %v7440_v8, 2  ;;  %v7445_v31 = vrot.slane %v7443_v48, 3 }
 0x47c   : > { %v10061_v28 = vrot.slane %v19249_v16, 1  ;;  %v7449_v42 = vshrl.u32 %v16082_v27, 16  ;;  %v15955_v25 = vld [vmem:[#allocation10 + $0x588] sm:$0xff]   ;;  %v19269_v4 = vshrl.u32 %v5692_v5, 7  ;;  %v7438_v19 = vsel %vm20805_vm6, %v18780_v11, %v7437_v13  ;;  %v15957_v11 = vld [vmem:[#allocation10 + $0x590] sm:$0xff]  }
 0x47d   : > { %14231 = vmatmul.mubr.bf16.vlgmr.msra.gmra.mrb[4].mxu0 %v18794_v24  ;;  %v19261_v15 = vadd.f32 %v21108_v63, %v4914_v34  ;;  %v7452_v24 = vshll.u32 %v16082_v27, 16  ;;  %v19282_v5 = vor.u32 %v7445_v31, %v7442_v37 }
 0x47e   : > { %14735 = vmatmul.mubr.bf16.vlgmr.msra.gmra.mrb[104].mxu1 %v10060_v35  ;;  %14287 = vmatpush3.bf16.msra.mxu0 %v15951_v2  ;;  %v10062_v35 = vsel %vm20809_vm3, %v10059_v23, %v10061_v28  ;;  %v7451_v39 = vrot.slane %v7449_v42, 2  ;;  %v21111_v23 = vld [vmem:[#allocation93_spill] sm:$0xff]  ;;  %v5694_v31 = vadd.s32 8, %v19269_v4 }
 0x47f   : > { %14755 = vmatpush3.bf16.msra.mxu1 %v15952_v61  ;;  %14288 = vmatprep.subr.bf16.mxu0 %v20899_v7  ;;  %v15956_v61 = vld [vmem:[#allocation10 + $0x290] sm:$0xff]   ;;  %v16083_v42 = vld [vmem:[%s16930_s12 + $0x30] ss:$0 sps:$4 sm:$0x77]   ;;  %s11160_s12 = scalar_select %p11159_p0, 1, 0 }
 0x480   : > { %v4900_v63 = vpop.f32.mrb[156].mxu0  ;;  %14234 = vmatprep.mubr.msk.bf16.mxu0 %vm20811_vm0, %v20899_v7  ;;  %14738 = vmatprep.mubr.msk.bf16.mxu1 %vm20811_vm0, %v20899_v7  ;;  %v19276_v48 = vpop.f32.mrb[60].mxu1 }
 0x481   : > { %v4915_v34 = vadd.f32 %v4900_v63, %v19150_v22  ;;  %21109 = vst [vmem:[#allocation110_spill] sm:$0xff] %v19276_v48  ;;  %v13816_v8 = vpop.f32.mrb[157].mxu0  ;;  %14756 = vmatprep.subr.bf16.mxu1 %v20899_v7  ;;  %v14428_v27 = vpop.f32.mrb[61].mxu1  ;;  %v21113_v22 = vld [vmem:[#allocation106_spill] sm:$0xff]  ;;  %s11161_s19 = scvt.s32.f32 %s11160_s12  ;;  %s16255_s12 = sshll.u32 %s16457_s30, 4  ;;  %s16256_s12 = int_to_ptr.vmem [resolvable:$false] %s16255_s12 }
 0x482   : > { %v4903_v2 = vpop.f32.mrb[158].mxu0  ;;  %14289 = vmatpush3.bf16.msra.mxu0 %v15953_v57  ;;  %v19286_v8 = vpop.f32.mrb[62].mxu1  ;;  %v7454_v27 = vrot.slane %v7452_v24, 3  ;;  %v19290_v57 = vld [vmem:[%s16944_s13 + $0x24] sm:$0xff]   ;;  %v7447_v24 = vsel %vm20805_vm6, %v7437_v13, %v19282_v5  ;;  %p16258_p10 = scmp.lt.s32.totalorder %s20656_s11, %s16256_s12 }
 0x483   : > { %v4916_v63 = vadd.f32 %v4903_v2, %v19154_v49  ;;  %21110 = vst [vmem:[#allocation63_spill] sm:$0xff] %v19286_v8  ;;  %v13817_v48 = vpop.f32.mrb[159].mxu0  ;;  %14757 = vmatpush3.bf16.msra.mxu1 %v15955_v25  ;;  %14290 = vmatprep.subr.bf16.mxu0 %v20899_v7  ;;  %v19293_v44 = vadd.f32 %v21111_v23, %v4915_v34  ;;  %v14429_v37 = vpop.f32.mrb[63].mxu1  ;;  %v7458_v49 = vshrl.u32 %v16083_v42, 16  ;;  %v21112_v2 = vld [vmem:[#allocation94_spill] sm:$0xff]  ;;  %v19302_v25 = vadd.s32 11, %v19269_v4 }
 0x484   : > { %14758 = vmatprep.subr.bf16.mxu1 %v20899_v7  ;;  %v15958_v34 = vld [vmem:[#allocation10 + $0x298] sm:$0xff]   ;;  %v7461_v23 = vshll.u32 %v16083_v42, 16  ;;  %v7843_v37 = vshll.u32 %v21113_v22, 16  ;;  %v19312_v8 = vor.u32 %v7454_v27, %v7451_v39  ;;  %v10226_v42 = vshrl.u32 %v19225_v45, 16 }
 0x485   : > { %14235 = vmatmul.mubr.bf16.gmra.mrb[8].mxu0 %v7438_v19  ;;  %v19299_v48 = vadd.f32 %v21112_v2, %v4916_v63  ;;  %v21114_v19 = vrot.slane %v19265_v26, 1  ;;  %v15960_v2 = vld [vmem:[#allocation10 + $0x598] sm:$0xff]  }
 0x486   : > { %14739 = vmatmul.mubr.bf16.gmra.mrb[108].mxu1 %v10062_v35  ;;  %14291 = vmatpush3.bf16.msra.mxu0 %v15956_v61  ;;  %v19315_v61 = vadd.s32 11, %v5694_v31  ;;  %v15961_v35 = vld [vmem:[#allocation10 + $0x2a0] sm:$0xff]   ;;  %v19337_v36 = vrot.slane %v7461_v23, 3  ;;  %v7456_v38 = vsel %vm20805_vm6, %v19282_v5, %v19312_v8 }
 0x487   : > { %14759 = vmatpush3.bf16.msra.mxu1 %v15957_v11  ;;  %14238 = vmatprep.mubr.msk.bf16.mxu0 %vm20811_vm0, %v20899_v7  ;;  %v10064_v63 = vsel %vm20809_vm3, %v10061_v28, %v21114_v19  ;;  %v19320_v11 = vrot.slane %v7458_v49, 2  ;;  %v10229_v28 = vshll.u32 %v19225_v45, 16  ;;  %v10234_v19 = vshrl.u32 %v19228_v1, 16 }
 0x488   : > { %v5239_v13 = vpop.f32.mrb[160].mxu0  ;;  %14292 = vmatprep.subr.bf16.mxu0 %v20899_v7  ;;  %14742 = vmatprep.mubr.msk.bf16.mxu1 %vm20811_vm0, %v20899_v7  ;;  %v19326_v27 = vpop.f32.mrb[64].mxu1  ;;  %v19334_v49 = vmul.u32.u64.low 3435973837, %v19302_v25  ;;  %v19335_v30 = vmul.u32.u64.high 3435973837, %v19302_v25, %v19334_v49 }
 0x489   : > { %v5278_v39 = vadd.f32 %v5239_v13, %v19174_v43  ;;  %21115 = vst [vmem:[#allocation67_spill] sm:$0xff] %v19326_v27  ;;  %v13872_v31 = vpop.f32.mrb[161].mxu0  ;;  %14760 = vmatprep.subr.bf16.mxu1 %v20899_v7  ;;  %v14484_v52 = vpop.f32.mrb[65].mxu1  ;;  %v7841_v43 = vshrl.u32 %v21113_v22, 16  ;;  %v7845_v13 = vrot.slane %v7843_v37, 1  ;;  %v21117_v49 = vld [vmem:[#allocation95_spill] sm:$0xff]  ;;  %v7464_v5 = vor.u32 %v19337_v36, %v19320_v11 }
 0x48a   : > { %v5242_v45 = vpop.f32.mrb[162].mxu0  ;;  %14293 = vmatpush3.bf16.msra.mxu0 %v15958_v34  ;;  %v5695_v31 = vadd.s32 16, %v19269_v4  ;;  %v19342_v55 = vpop.f32.mrb[66].mxu1  ;;  %v19349_v34 = vmul.u32.u64.low 3435973837, %v19315_v61  ;;  %v19350_v23 = vmul.u32.u64.high 3435973837, %v19315_v61, %v19349_v34  ;;  %v15962_v22 = vld [vmem:[#allocation10 + $0x5a0] sm:$0xff]  }
 0x48b   : > { %v5279_v27 = vadd.f32 %v5242_v45, %v19178_v10  ;;  %21116 = vst [vmem:[#allocation68_spill] sm:$0xff] %v19342_v55  ;;  %v13873_v21 = vpop.f32.mrb[163].mxu0  ;;  %14761 = vmatpush3.bf16.msra.mxu1 %v15960_v2  ;;  %14294 = vmatprep.subr.bf16.mxu0 %v20899_v7  ;;  %v19346_v52 = vadd.f32 %v21117_v49, %v5278_v39  ;;  %v14485_v0 = vpop.f32.mrb[67].mxu1  ;;  %v19354_v37 = vld [vmem:[%s16937_s22 + $0x8] sm:$0xff]   ;;  %v19357_v45 = vrot.slane %v10226_v42, 1  ;;  %v5696_v2 = vadd.s32 24, %v19269_v4 }
 0x48c   : > { %14762 = vmatprep.subr.bf16.mxu1 %v20899_v7  ;;  %v7848_v10 = vshll.u32 %v19354_v37, 16  ;;  %v19359_v21 = vrot.slane %v10229_v28, 2  ;;  %v10236_v39 = vrot.slane %v10234_v19, 1  ;;  %v10239_v49 = vrot.slane %v10237_v54, 2  ;;  %v21118_v34 = vld [vmem:[#allocation96_spill] sm:$0xff] }
 0x48d   : > { %14239 = vmatmul.mubr.bf16.gmra.mrb[12].mxu0 %v7447_v24  ;;  %v10243_v55 = vshrl.u32 %v19249_v16, 16  ;;  %v19364_v0 = vadd.f32 %v21118_v34, %v5279_v27  ;;  %v21119_v42 = vrot.slane %v19290_v57, 1  ;;  %v21120_v28 = vrot.slane %v19265_v26, 1  ;;  %v15964_v24 = vld [vmem:[#allocation10 + $0x2a8] sm:$0xff]  }
 0x48e   : > { %14743 = vmatmul.mubr.bf16.gmra.mrb[112].mxu1 %v10064_v63  ;;  %14295 = vmatpush3.bf16.msra.mxu0 %v15961_v35  ;;  %v10246_v54 = vshll.u32 %v19249_v16, 16  ;;  %v19375_v19 = vadd.s32 11, %v5695_v31  ;;  %v10067_v63 = vrot.slane %v19330_v47, 1  ;;  %v7846_v35 = vor.u32 %v7845_v13, %v7841_v43  ;;  %v15965_v31 = vld [vmem:[#allocation10 + $0x5a8] sm:$0xff]  }
 0x48f   : > { %v10066_v32 = vsel %vm20809_vm3, %v21120_v28, %v21119_v42  ;;  %14242 = vmatprep.mubr.msk.bf16.mxu0 %vm20811_vm0, %v20899_v7  ;;  %14746 = vmatprep.mubr.msk.bf16.mxu1 %vm20811_vm0, %v20899_v7  ;;  %v7852_v27 = vshrl.u32 %v19354_v37, 16  ;;  %v7850_v42 = vrot.slane %v7848_v10, 1  ;;  %v10232_v28 = vor.u32 %v19359_v21, %v19357_v45 }
 0x490   : > { %v5247_v34 = vpop.f32.mrb[164].mxu0  ;;  %14763 = vmatpush3.bf16.msra.mxu1 %v15962_v22  ;;  %14296 = vmatprep.subr.bf16.mxu0 %v20899_v7  ;;  %v19392_v59 = vadd.s32 11, %v5696_v2  ;;  %v19395_v47 = vpop.f32.mrb[68].mxu1  ;;  %v19398_v43 = vor.u32 %v10239_v49, %v10236_v39  ;;  %v10245_v13 = vrot.slane %v10243_v55, 1  ;;  %v5719_v22 = vshrl.u32 %v19335_v30, 3  ;;  %v15966_v55 = vld [vmem:[#allocation10 + $0x2b0] sm:$0xff]  }
 0x491   : > { %v5280_v36 = vadd.f32 %v5247_v34, %v19198_v40  ;;  %21121 = vst [vmem:[#allocation69_spill] sm:$0xff] %v19395_v47  ;;  %v13876_v11 = vpop.f32.mrb[165].mxu0  ;;  %14764 = vmatprep.subr.bf16.mxu1 %v20899_v7  ;;  %v14488_v10 = vpop.f32.mrb[69].mxu1  ;;  %v10248_v21 = vrot.slane %v10246_v54, 2  ;;  %v19402_v17 = vmul.u32.u64.low 3435973837, %v19375_v19  ;;  %v19403_v2 = vmul.u32.u64.high 3435973837, %v19375_v19, %v19402_v17 }
 0x492   : > { %v5250_v45 = vpop.f32.mrb[166].mxu0  ;;  %14297 = vmatpush3.bf16.msra.mxu0 %v15964_v24  ;;  %v5697_v40 = vadd.s32 32, %v19269_v4  ;;  %v19407_v11 = vpop.f32.mrb[70].mxu1  ;;  %v7854_v39 = vor.u32 %v7852_v27, %v7850_v42  ;;  %v5730_v30 = vshrl.u32 %v19350_v23, 3  ;;  %v21123_v49 = vld [vmem:[#allocation97_spill] sm:$0xff]  ;;  %v15968_v10 = vld [vmem:[#allocation10 + $0x5b0] sm:$0xff]  }
 0x493   : > { %v5281_v34 = vadd.f32 %v5250_v45, %v19202_v18  ;;  %21122 = vst [vmem:[#allocation70_spill] sm:$0xff] %v19407_v11  ;;  %v13877_v47 = vpop.f32.mrb[167].mxu0  ;;  %14298 = vmatprep.subr.bf16.mxu0 %v20899_v7  ;;  %v19412_v24 = vadd.f32 %v21123_v49, %v5280_v36  ;;  %v14489_v54 = vpop.f32.mrb[71].mxu1  ;;  %v7858_v17 = vrot.slane %v7856_v14, 1  ;;  %v5698_v18 = vadd.s32 40, %v19269_v4  ;;  %v21124_v23 = vld [vmem:[#allocation98_spill] sm:$0xff] }
 0x494   : > { %14765 = vmatpush3.bf16.msra.mxu1 %v15965_v31  ;;  %v19415_v41 = vmul.u32.u64.low 3435973837, %v19392_v59  ;;  %v19416_v9 = vmul.u32.u64.high 3435973837, %v19392_v59, %v19415_v41  ;;  %v5720_v47 = vmul.u32 10, %v5719_v22  ;;  %v10252_v27 = vshrl.u32 %v19265_v26, 16  ;;  %v15969_v36 = vld [vmem:[#allocation10 + $0x2b8] sm:$0xff]  }
 0x495   : > { %14243 = vmatmul.mubr.bf16.gmra.mrb[16].mxu0 %v7456_v38  ;;  %14766 = vmatprep.subr.bf16.mxu1 %v20899_v7  ;;  %v19422_v45 = vadd.f32 %v21124_v23, %v5281_v34  ;;  %v7465_v14 = vsel %vm20805_vm6, %v19312_v8, %v7464_v5  ;;  %v21125_v41 = vrot.slane %v19290_v57, 1  ;;  %v19431_v38 = vadd.s32 11, %v5697_v40  ;;  %v19460_v54 = vld [vmem:[%s16937_s22 + $0x18] sm:$0xff]  }
 0x496   : > { %14747 = vmatmul.mubr.bf16.gmra.mrb[116].mxu1 %v10066_v32  ;;  %14246 = vmatprep.mubr.msk.bf16.mxu0 %vm20811_vm0, %v20899_v7  ;;  %v19436_v22 = vsel %vm612_vm1, %v7846_v35, %v7850_v42  ;;  %v19440_v32 = vsel %vm20810_vm2, %v10232_v28, %v19398_v43  ;;  %v5731_v8 = vmul.u32 10, %v5730_v30  ;;  %v10255_v5 = vshll.u32 %v19265_v26, 16  ;;  %21127 = vst [vmem:[#allocation71_spill] sm:$0xff] %v19460_v54 }
 0x497   : > { %v10068_v31 = vsel %vm20809_vm3, %v21125_v41, %v10067_v63  ;;  %14299 = vmatpush3.bf16.msra.mxu0 %v15966_v55  ;;  %14750 = vmatprep.mubr.msk.bf16.mxu1 %vm20811_vm0, %v20899_v7  ;;  %v15970_v63 = vld [vmem:[#allocation10 + $0x5b8] sm:$0xff]   ;;  %v19445_v40 = vsel %vm612_vm1, %v7854_v39, %v7858_v17  ;;  %v19447_v55 = vor.u32 %v10248_v21, %v10245_v13  ;;  %v7860_v35 = vshrl.u32 %v19389_v62, 16 }
 0x498   : > { %v5255_v34 = vpop.f32.mrb[168].mxu0  ;;  %14767 = vmatpush3.bf16.msra.mxu1 %v15968_v10  ;;  %14300 = vmatprep.subr.bf16.mxu0 %v20899_v7  ;;  %v19450_v42 = vadd.s32 11, %v5698_v18  ;;  %v19453_v49 = vpop.f32.mrb[72].mxu1  ;;  %v19457_v26 = vsub.s32 %v19302_v25, %v5720_v47  ;;  %v7864_v39 = vshll.u32 %v19460_v54, 16  ;;  %v10254_v13 = vrot.slane %v10252_v27, 1 }
 0x499   : > { %v5282_v28 = vadd.f32 %v5255_v34, %v19231_v51  ;;  %21126 = vst [vmem:[#allocation66_spill] sm:$0xff] %v19453_v49  ;;  %v13880_v30 = vpop.f32.mrb[169].mxu0  ;;  %14768 = vmatprep.subr.bf16.mxu1 %v20899_v7  ;;  %v14492_v21 = vpop.f32.mrb[73].mxu1  ;;  %v5741_v18 = vshrl.u32 %v19403_v2, 3  ;;  %v19465_v23 = vmul.u32.u64.low 3435973837, %v19431_v38  ;;  %v19466_v51 = vmul.u32.u64.high 3435973837, %v19431_v38, %v19465_v23 }
 0x49a   : > { %v5258_v10 = vpop.f32.mrb[170].mxu0  ;;  %v5699_v41 = vadd.s32 48, %v19269_v4  ;;  %v19470_v30 = vpop.f32.mrb[74].mxu1  ;;  %v19473_v47 = vsub.s32 %v19315_v61, %v5731_v8  ;;  %v10257_v27 = vrot.slane %v10255_v5, 2  ;;  %v21129_v21 = vld [vmem:[#allocation100_spill] sm:$0xff]  ;;  %v5752_v23 = vshrl.u32 %v19416_v9, 3 }
 0x49b   : > { %v5283_v34 = vadd.f32 %v5258_v10, %v19237_v3  ;;  %21128 = vst [vmem:[#allocation72_spill] sm:$0xff] %v19470_v30  ;;  %v13881_v25 = vpop.f32.mrb[171].mxu0  ;;  %14301 = vmatpush3.bf16.msra.mxu0 %v15969_v36  ;;  %v19476_v49 = vadd.f32 %v21129_v21, %v5282_v28  ;;  %v14493_v2 = vpop.f32.mrb[75].mxu1  ;;  %v19481_v11 = vmul.u32.u64.low 3435973837, %v19450_v42  ;;  %v19482_v3 = vmul.u32.u64.high 3435973837, %v19450_v42, %v19481_v11  ;;  %v21130_v5 = vld [vmem:[#allocation102_spill] sm:$0xff] }
 0x49c   : > { %14769 = vmatpush3.bf16.msra.mxu1 %v15970_v63  ;;  %14358 = vmatprep.subr.bf16.mxu0 %v20899_v7  ;;  %v5700_v10 = vadd.s32 56, %v19269_v4  ;;  %v19489_v61 = vsel %vm20810_vm2, %v19398_v43, %v19447_v55  ;;  %v7862_v36 = vor.u32 %v7860_v35, %v7858_v17  ;;  %v7866_v8 = vrot.slane %v7864_v39, 1  ;;  %v15971_v30 = vld [vmem:[#allocation10 + $0x2c0] sm:$0xff]  }
 0x49d   : > { %14247 = vmatmul.mubr.bf16.gmra.mrb[20].mxu0 %v7465_v14  ;;  %14790 = vmatprep.subr.bf16.mxu1 %v20899_v7  ;;  %v19492_v63 = vadd.f32 %v21130_v5, %v5283_v34  ;;  %vm5823_vm13 = vcmp.ne.s32.totalorder %v19457_v26, 0  ;;  %vm5833_vm14 = vcmp.lt.s32.totalorder %v19457_v26, 0  ;;  %v5742_v9 = vmul.u32 10, %v5741_v18 }
 0x49e   : > { %14751 = vmatmul.mubr.bf16.gmra.mrb[120].mxu1 %v10068_v31  ;;  %14302 = vmatprep.mubr.msk.bf16.mxu0 %vm20811_vm0, %v20899_v7  ;;  %v19498_v11 = vadd.s32 11, %v5699_v41  ;;  %v5853_v43 = vadd.s32 10, %v19457_v26  ;;  %v19503_v17 = vor.u32 %v10257_v27, %v10254_v13  ;;  %v7868_v14 = vshrl.u32 %v19460_v54, 16  ;;  %v19507_v31 = vld [vmem:[%s16937_s22 + $0x20] sm:$0xff]   ;;  %vm19524_vm9 = vmand %vm5833_vm14, %vm5823_vm13 }
 0x49f   : > { %14770 = vmatprep.mubr.msk.bf16.mxu1 %vm20811_vm0, %v20899_v7  ;;  %v7872_v35 = vshll.u32 %v19507_v31, 16  ;;  %vm5824_vm15 = vcmp.ne.s32.totalorder %v19473_v47, 0  ;;  %v5753_v39 = vmul.u32 10, %v5752_v23  ;;  %v10261_v18 = vshrl.u32 %v19290_v57, 16  ;;  %v15972_v54 = vld [vmem:[#allocation10 + $0x5c0] sm:$0xff]  }
 0x4a0   : > { %v5263_v28 = vpop.f32.mrb[172].mxu0  ;;  %v19512_v41 = vadd.s32 11, %v5700_v10  ;;  %v19515_v25 = vpop.f32.mrb[76].mxu1  ;;  %vm5834_vm7 = vcmp.lt.s32.totalorder %v19473_v47, 0  ;;  %v5854_v27 = vadd.s32 10, %v19473_v47  ;;  %v10264_v21 = vshll.u32 %v19290_v57, 16 }
 0x4a1   : > { %v5284_v34 = vadd.f32 %v5263_v28, %v19257_v6  ;;  %21131 = vst [vmem:[#allocation73_spill] sm:$0xff] %v19515_v25  ;;  %v13884_v13 = vpop.f32.mrb[173].mxu0  ;;  %v14496_v2 = vpop.f32.mrb[77].mxu1  ;;  %v19529_v6 = vsub.s32 %v19375_v19, %v5742_v9  ;;  %v5763_v10 = vshrl.u32 %v19466_v51, 3  ;;  %v7870_v46 = vor.u32 %v7868_v14, %v7866_v8  ;;  %vm19548_vm10 = vmand %vm5834_vm7, %vm5824_vm15 }
 0x4a2   : > { %v5266_v5 = vpop.f32.mrb[174].mxu0  ;;  %v19533_v28 = vmul.u32.u64.low 3435973837, %v19498_v11  ;;  %v19534_v13 = vmul.u32.u64.high 3435973837, %v19498_v11, %v19533_v28  ;;  %v19537_v2 = vpop.f32.mrb[78].mxu1  ;;  %v19539_v33 = vrot.slane %v7872_v35, 1 }
 0x4a3   : > { %v5285_v57 = vadd.f32 %v5266_v5, %v19261_v15  ;;  %21134 = vst [vmem:[#allocation74_spill] sm:$0xff] %v19537_v2  ;;  %v13885_v25 = vpop.f32.mrb[175].mxu0  ;;  %v19542_v19 = vadd.f32 %v21135_v58, %v5284_v34  ;;  %v14497_v9 = vpop.f32.mrb[79].mxu1  ;;  %v19553_v15 = vsub.s32 %v19392_v59, %v5753_v39  ;;  %v19564_v58 = vsel %vm19524_vm9, %v5853_v43, %v19457_v26  ;;  %v19578_v39 = vld [vmem:[%s16944_s13 + $0x2c] ss:$0 sps:$4 sm:$0x33]  }
 0x4a4   : > { %v5774_v25 = vshrl.u32 %v19482_v3, 3  ;;  %v19557_v14 = vmul.u32.u64.low 3435973837, %v19512_v41  ;;  %v19558_v35 = vmul.u32.u64.high 3435973837, %v19512_v41, %v19557_v14  ;;  %v19567_v34 = vsel %vm612_vm1, %v7862_v36, %v7866_v8  ;;  %v19575_v3 = vld [vmem:[%s16937_s22 + $0x28] ss:$0 sps:$4 sm:$0x11]  }
 0x4a5   : > { %14303 = vmatmul.mubr.bf16.vlgmr.msra.gmra.mrb[24].mxu0 %v19436_v22  ;;  %v19572_v59 = vsel %vm20810_vm2, %v19447_v55, %v19503_v17  ;;  %21138 = vst [vmem:[#allocation75_spill] sm:$0xff] %v19575_v3  ;;  %21139 = vst [vmem:[#allocation76_spill] sm:$0xff] %v19578_v39  ;;  %v21140_v5 = vld [vmem:[#allocation107_spill] sm:$0xff]  ;;  %vm5825_vm13 = vcmp.ne.s32.totalorder %v19529_v6, 0  ;;  %vm5835_vm14 = vcmp.lt.s32.totalorder %v19529_v6, 0  ;;  %v10263_v26 = vrot.slane %v10261_v18, 1 }
 0x4a6   : > { %v19581_v28 = vadd.f32 %v21140_v5, %v5285_v57  ;;  %14771 = vmatmul.mubr.bf16.vlgmr.msra.gmra.mrb[104].mxu1 %v19440_v32  ;;  %14359 = vmatpush3.bf16.msra.mxu0 %v15971_v30  ;;  %v15973_v22 = vld [vmem:[#allocation10 + $0x2c8] sm:$0xff]   ;;  %v5764_v36 = vmul.u32 10, %v5763_v10  ;;  %v19590_v8 = vsel %vm19548_vm10, %v5854_v27, %v19473_v47  ;;  %v5855_v43 = vadd.s32 10, %v19529_v6  ;;  %vm19614_vm5 = vmand %vm5835_vm14, %vm5825_vm13 }
 0x4a7   : > { %14791 = vmatpush3.bf16.msra.mxu1 %v15972_v54  ;;  %14360 = vmatprep.subr.bf16.mxu0 %v20899_v7  ;;  %v15974_v55 = vld [vmem:[#allocation10 + $0x5c8] sm:$0xff]   ;;  %v10266_v32 = vrot.slane %v10264_v21, 2  ;;  %v5701_v30 = vadd.s32 64, %v19269_v4  ;;  %vm5826_vm15 = vcmp.ne.s32.totalorder %v19553_v15, 0  ;;  %vm5836_vm7 = vcmp.lt.s32.totalorder %v19553_v15, 0 }
 0x4a8   : > { %v5271_v23 = vpop.f32.mrb[176].mxu0  ;;  %14306 = vmatprep.mubr.msk.bf16.mxu0 %vm20811_vm0, %v20899_v7  ;;  %14774 = vmatprep.mubr.msk.bf16.mxu1 %vm20811_vm0, %v20899_v7  ;;  %v19602_v54 = vsel %vm612_vm1, %v7870_v46, %v19539_v33  ;;  %v5775_v47 = vmul.u32 10, %v5774_v25  ;;  %v19605_v27 = vpop.f32.mrb[80].mxu1  ;;  %vm5873_vm9 = vcmp.ge.s32.totalorder %v19564_v58, 1  ;;  %vm5883_vm10 = vcmp.le.s32.totalorder %v19564_v58, 8  ;;  %v15975_v25 = vld [vmem:[#allocation10 + $0x2d0] sm:$0xff]   ;;  %vm19637_vm6 = vmand %vm5836_vm7, %vm5826_vm15 }
 0x4a9   : > { %v5286_v18 = vadd.f32 %v5271_v23, %v19293_v44  ;;  %21141 = vst [vmem:[#allocation77_spill] sm:$0xff] %v19605_v27  ;;  %v13888_v21 = vpop.f32.mrb[177].mxu0  ;;  %14792 = vmatprep.subr.bf16.mxu1 %v20899_v7  ;;  %v7876_v46 = vshrl.u32 %v19507_v31, 16  ;;  %v7880_v44 = vshll.u32 %v19575_v3, 16  ;;  %v10270_v57 = vshrl.u32 %v19578_v39, 16  ;;  %v14500_v9 = vpop.f32.mrb[81].mxu1  ;;  %vm19747_vm4 = vmand %vm5873_vm9, %vm5883_vm10 }
 0x4aa   : > { %v5274_v51 = vpop.f32.mrb[178].mxu0  ;;  %14361 = vmatpush3.bf16.msra.mxu0 %v15973_v22  ;;  %v5856_v14 = vadd.s32 10, %v19553_v15  ;;  %v19623_v5 = vsub.s32 %v19431_v38, %v5764_v36  ;;  %v10273_v23 = vshll.u32 %v19578_v39, 16  ;;  %v5785_v21 = vshrl.u32 %v19534_v13, 3  ;;  %v19628_v2 = vpop.f32.mrb[82].mxu1  ;;  %v15976_v22 = vld [vmem:[#allocation10 + $0x5d0] sm:$0xff]  }
 0x4ab   : > { %v5287_v27 = vadd.f32 %v5274_v51, %v19299_v48  ;;  %21144 = vst [vmem:[#allocation78_spill] sm:$0xff] %v19628_v2  ;;  %v13889_v3 = vpop.f32.mrb[179].mxu0  ;;  %14793 = vmatpush3.bf16.msra.mxu1 %v15974_v55  ;;  %14362 = vmatprep.subr.bf16.mxu0 %v20899_v7  ;;  %vm5874_vm13 = vcmp.ge.s32.totalorder %v19590_v8, 1  ;;  %vm5884_vm14 = vcmp.le.s32.totalorder %v19590_v8, 8  ;;  %v21147_v48 = vld [vmem:[#allocation109_spill] sm:$0xff]  ;;  %v5702_v36 = vadd.s32 72, %v19269_v4 }
 0x4ac   : > { %v19642_v13 = vadd.f32 %v21147_v48, %v5286_v18  ;;  %v19644_v3 = vadd.s32 11, %v5701_v30  ;;  %v14501_v55 = vpop.f32.mrb[83].mxu1  ;;  %14794 = vmatprep.subr.bf16.mxu1 %v20899_v7  ;;  %v19651_v9 = vsel %vm19614_vm5, %v5855_v43, %v19529_v6  ;;  %v19653_v51 = vor.u32 %v10266_v32, %v10263_v26  ;;  %v21148_v39 = vld [vmem:[#allocation111_spill] sm:$0xff]  ;;  %v15977_v6 = vld [vmem:[#allocation10 + $0x2d8] sm:$0xff]  }
 0x4ad   : > { %v19656_v2 = vsub.s32 %v19450_v42, %v5775_v47  ;;  %v5796_v18 = vshrl.u32 %v19558_v35, 3  ;;  %14307 = vmatmul.mubr.bf16.gmra.mrb[28].mxu0 %v19445_v40  ;;  %v7878_v4 = vor.u32 %v7876_v46, %v19539_v33  ;;  %v7882_v30 = vrot.slane %v7880_v44, 1  ;;  %v8136_v55 = vld [vmem:[%s16937_s22] sm:$0xe]  ;;  %v10414_v35 = vld [vmem:[%s16944_s13 + $0x4] sm:$0xc] }
 0x4ae   : > { %v19661_v48 = vrot.slane %v10270_v57, 1  ;;  %v19665_v10 = vadd.f32 %v21148_v39, %v5287_v27  ;;  %14775 = vmatmul.mubr.bf16.gmra.mrb[108].mxu1 %v19489_v61  ;;  %14363 = vmatpush3.bf16.msra.mxu0 %v15975_v25  ;;  %v19671_v42 = vsel %vm19637_vm6, %v5856_v14, %v19553_v15  ;;  %vm5827_vm5 = vcmp.ne.s32.totalorder %v19623_v5, 0  ;;  %v15978_v39 = vld [vmem:[#allocation10 + $0x5d8] sm:$0xff]   ;;  %v16088_v47 = vld [vmem:[%s16937_s22 + $0x4] sm:$0xf] }
 0x4af   : > { %v19674_v33 = vrot.slane %v10273_v23, 2  ;;  %v5786_v40 = vmul.u32 10, %v5785_v21  ;;  %14795 = vmatpush3.bf16.msra.mxu1 %v15976_v22  ;;  %14310 = vmatprep.mubr.msk.bf16.mxu0 %vm20811_vm0, %v20899_v7  ;;  %vm5837_vm15 = vcmp.lt.s32.totalorder %v19623_v5, 0  ;;  %v19684_v15 = vadd.s32 11, %v5702_v36  ;;  %v19695_v46 = vld [vmem:[%s21149_s5] ss:$0 sm:$0xff] }
 0x4b0   : > { %v19681_v61 = vmul.u32.u64.low 3435973837, %v19644_v3  ;;  %v19682_v26 = vmul.u32.u64.high 3435973837, %v19644_v3, %v19681_v61  ;;  %v5617_v43 = vpop.f32.mrb[180].mxu0  ;;  %14364 = vmatprep.subr.bf16.mxu0 %v20899_v7  ;;  %14778 = vmatprep.mubr.msk.bf16.mxu1 %vm20811_vm0, %v20899_v7  ;;  %vm5828_vm6 = vcmp.ne.s32.totalorder %v19656_v2, 0  ;;  %vm5838_vm7 = vcmp.lt.s32.totalorder %v19656_v2, 0  ;;  %v19698_v57 = vpop.f32.mrb[84].mxu1  ;;  %vm19713_vm3 = vmand %vm5837_vm15, %vm5827_vm5 }
 0x4b1   : > { %v5797_v32 = vmul.u32 10, %v5796_v18  ;;  %v12048_v27 = vcombine.low %v8136_v55, %v16088_v47  ;;  %v5656_v44 = vadd.f32 %v5617_v43, %v19346_v52  ;;  %v13944_v25 = vpop.f32.mrb[181].mxu0  ;;  %14796 = vmatprep.subr.bf16.mxu1 %v20899_v7  ;;  %v19706_v14 = vsel %vm20810_vm2, %v19503_v17, %v19653_v51  ;;  %v14556_v21 = vpop.f32.mrb[85].mxu1  ;;  %v15979_v52 = vld [vmem:[#allocation10 + $0x2e0] sm:$0xff]   ;;  %vm19735_vm8 = vmand %vm5838_vm7, %vm5828_vm6 }
 0x4b2   : > { %v12175_v23 = vcombine.low %v10414_v35, %v19213_v53  ;;  %v5620_v22 = vpop.f32.mrb[182].mxu0  ;;  %14365 = vmatpush3.bf16.msra.mxu0 %v15977_v6  ;;  %v5857_v36 = vadd.s32 10, %v19623_v5  ;;  %v5858_v18 = vadd.s32 10, %v19656_v2  ;;  %v10276_v17 = vor.u32 %v19674_v33, %v19661_v48  ;;  %v19726_v35 = vpop.f32.mrb[86].mxu1 }
 0x4b3   : > { %v19722_v53 = vsub.s32 %v19498_v11, %v5786_v40  ;;  %v5666_v55 = vadd.f32 %v5656_v44, %v18752_v12  ;;  %v5657_v6 = vadd.f32 %v5620_v22, %v19364_v0  ;;  %v13945_v61 = vpop.f32.mrb[183].mxu0  ;;  %14797 = vmatpush3.bf16.msra.mxu1 %v15978_v39  ;;  %14366 = vmatprep.subr.bf16.mxu0 %v20899_v7  ;;  %vm5886_vm15 = vcmp.le.s32.totalorder %v19671_v42, 8  ;;  %v14557_v33 = vpop.f32.mrb[87].mxu1  ;;  %v15980_v40 = vld [vmem:[#allocation10 + $0x5e0] sm:$0xff]  }
 0x4b4   : > { %v19740_v12 = vmul.u32.u64.low 3435973837, %v19684_v15  ;;  %v19741_v0 = vmul.u32.u64.high 3435973837, %v19684_v15, %v19740_v12  ;;  %vm5943_vm5 = vsmask.f32 5392  ;;  %14798 = vmatprep.subr.bf16.mxu1 %v20899_v7  ;;  %v19753_v39 = vsel %vm612_vm1, %v7878_v4, %v7882_v30  ;;  %vm19767_vm1 = vmand %vm5874_vm13, %vm5884_vm14 }
 0x4b5   : > { %v19756_v43 = vsub.s32 %v19512_v41, %v5797_v32  ;;  %v8156_v47 = vrot.slane %v12048_v27, 1  ;;  %v8157_v44 = vrot.slane %v19354_v37, 1  ;;  %v5682_v58 = vadd.f32 %v19695_v46, %v5666_v55  ;;  %14311 = vmatmul.mubr.bf16.gmra.mrb[32].mxu0 %v19567_v34  ;;  %v15981_v41 = vld [vmem:[#allocation10 + $0x2e8] sm:$0xff]  }
 0x4b6   : > { %v5667_v25 = vadd.f32 %v5657_v6, %v18766_v56  ;;  %v10434_v21 = vrot.slane %v12175_v23, 2  ;;  %v10435_v22 = vrot.slane %v19228_v1, 2  ;;  %14779 = vmatmul.mubr.bf16.gmra.mrb[112].mxu1 %v19572_v59  ;;  %14367 = vmatpush3.bf16.msra.mxu0 %v15979_v52  ;;  %v19775_v56 = vsel %vm19713_vm3, %v5857_v36, %v19623_v5  ;;  %v15982_v32 = vld [vmem:[#allocation10 + $0x5e8] sm:$0xff]  }
 0x4b7   : > { %v19780_v34 = vsel %vm19735_vm8, %v5858_v18, %v19656_v2  ;;  %v19784_v8 = vsel %vm20810_vm2, %v19653_v51, %v10276_v17  ;;  %vm5829_vm9 = vcmp.ne.s32.totalorder %v19722_v53, 0  ;;  %v5903_v59 = vsel %vm19747_vm4, %v5682_v58, 0.0  ;;  %14314 = vmatprep.mubr.msk.bf16.mxu0 %vm20811_vm0, %v20899_v7  ;;  %14782 = vmatprep.mubr.msk.bf16.mxu1 %vm20811_vm0, %v20899_v7 }
 0x4b8   : > { %v5683_v30 = vadd.f32 %v19695_v46, %v5667_v25  ;;  %vm5839_vm3 = vcmp.lt.s32.totalorder %v19722_v53, 0  ;;  %v5807_v2 = vshrl.u32 %v19682_v26, 3  ;;  %v12268_v5 = vpack.c.bf16 %v5903_v59, %v5903_v59  ;;  %v5625_v51 = vpop.f32.mrb[184].mxu0  ;;  %14799 = vmatpush3.bf16.msra.mxu1 %v15980_v40  ;;  %14368 = vmatprep.subr.bf16.mxu0 %v20899_v7  ;;  %v19807_v52 = vpop.f32.mrb[88].mxu1  ;;  %v15983_v25 = vld [vmem:[#allocation10 + $0x2f0] sm:$0xff]  }
 0x4b9   : > { %vm5830_vm8 = vcmp.ne.s32.totalorder %v19756_v43, 0  ;;  %vm5840_vm10 = vcmp.lt.s32.totalorder %v19756_v43, 0  ;;  %vm21158_vm13 = vcmask 1046528   ;;  %v5658_v26 = vadd.f32 %v5625_v51, %v19412_v24  ;;  %v13948_v38 = vpop.f32.mrb[185].mxu0  ;;  %14800 = vmatprep.subr.bf16.mxu1 %v20899_v7  ;;  %v14560_v24 = vpop.f32.mrb[89].mxu1 }
 0x4ba   : > { %v19802_v27 = vsel %vm21158_vm13, %v8156_v47, %v8157_v44  ;;  %v5904_v23 = vsel %vm19767_vm1, %v5683_v30, 0.0  ;;  %vm5877_vm14 = vcmp.ge.s32.totalorder %v19775_v56, 1  ;;  %vm5887_vm6 = vcmp.le.s32.totalorder %v19775_v56, 8  ;;  %v5628_v61 = vpop.f32.mrb[186].mxu0  ;;  %14369 = vmatpush3.bf16.msra.mxu0 %v15981_v41  ;;  %vm19822_vm13 = vmand %vm5839_vm3, %vm5829_vm9  ;;  %v19829_v47 = vpop.f32.mrb[90].mxu1 }
 0x4bb   : > { %v5859_v36 = vadd.s32 10, %v19722_v53  ;;  %vm21159_vm7 = vcmask 1045504   ;;  %v5946_v17 = vshrl.u32 %v12268_v5, 16  ;;  %v5949_v55 = vshll.u32 %v12268_v5, 16  ;;  %v13949_v58 = vpop.f32.mrb[187].mxu0  ;;  %14370 = vmatprep.subr.bf16.mxu0 %v20899_v7  ;;  %vm19838_vm9 = vmand %vm5840_vm10, %vm5830_vm8 }
 0x4bc   : > { %v19816_v18 = vsel %vm21159_vm7, %v10434_v21, %v10435_v22  ;;  %v12269_v6 = vpack.c.bf16 %v5904_v23, %v5904_v23  ;;  %v5860_v12 = vadd.s32 10, %v19756_v43  ;;  %v5668_v33 = vadd.f32 %v5658_v26, %v18798_v29  ;;  %v14561_v23 = vpop.f32.mrb[91].mxu1  ;;  %14801 = vmatpush3.bf16.msra.mxu1 %v15982_v32  ;;  %v15986_v26 = vld [vmem:[#allocation10 + $0x5f0] sm:$0xff]   ;;  %v6055_v38 = vld [vmem:[%s19005_s6 + $0x4] sm:$0xe]  ;;  %v15988_v58 = vld [vmem:[#allocation10 + $0x5f8] sm:$0xff]  }
 0x4bd   : > { %v5659_v40 = vadd.f32 %v5628_v61, %v19422_v45  ;;  %v5808_v29 = vmul.u32 10, %v5807_v2  ;;  %v5818_v45 = vshrl.u32 %v19741_v0, 3  ;;  %v5948_v41 = vrot.slane %v5946_v17, 6  ;;  %14315 = vmatmul.mubr.bf16.gmra.mrb[36].mxu0 %v19602_v54  ;;  %14802 = vmatprep.subr.bf16.mxu1 %v20899_v7 }
 0x4be   : > { %v5951_v59 = vrot.slane %v5949_v55, 7  ;;  %v5955_v30 = vshrl.u32 %v12269_v6, 16  ;;  %v5958_v5 = vshll.u32 %v12269_v6, 16  ;;  %vm21164_vm3 = vcmp.le.s32.totalorder %v19651_v9, 8  ;;  %14783 = vmatmul.mubr.bf16.gmra.mrb[116].mxu1 %v19706_v14  ;;  %14318 = vmatprep.mubr.msk.bf16.mxu0 %vm20811_vm0, %v20899_v7 }
 0x4bf   : > { %vm21165_vm7 = vcmp.ge.s32.totalorder %v19651_v9, 1  ;;  %v5684_v2 = vadd.f32 %v19695_v46, %v5668_v33  ;;  %v5669_v0 = vadd.f32 %v5659_v40, %v18808_v20  ;;  %v19859_v9 = vsel %vm19822_vm13, %v5859_v36, %v19722_v53  ;;  %14371 = vmatpush3.bf16.msra.mxu0 %v15983_v25  ;;  %14786 = vmatprep.mubr.msk.bf16.mxu1 %vm20811_vm0, %v20899_v7  ;;  %v15987_v36 = vld [vmem:[#allocation10 + $0x2f8] sm:$0xff]  }
 0x4c0   : > { %vm19847_vm2 = vmand %vm21165_vm7, %vm21164_vm3  ;;  %v8159_v17 = vrot.slane %v19389_v62, 1  ;;  %v5952_v55 = vor.u32 %v5951_v59, %v5948_v41  ;;  %v5957_v6 = vrot.slane %v5955_v30, 6  ;;  %v5960_v32 = vrot.slane %v5958_v5, 7  ;;  %v5633_v40 = vpop.f32.mrb[188].mxu0  ;;  %14803 = vmatpush3.bf16.msra.mxu1 %v15986_v26  ;;  %14372 = vmatprep.subr.bf16.mxu0 %v20899_v7  ;;  %v19899_v21 = vpop.f32.mrb[92].mxu1 }
 0x4c1   : > { %vm21168_vm8 = vcmp.ge.s32.totalorder %v19671_v42, 1  ;;  %v19876_v54 = vsel %vm19838_vm9, %v5860_v12, %v19756_v43  ;;  %vm21171_vm13 = vsmask.f32 1280  ;;  %v5905_v42 = vsel %vm19847_vm2, %v5684_v2, 0.0  ;;  %14804 = vmatprep.subr.bf16.mxu1 %v20899_v7  ;;  %v14564_v5 = vpop.f32.mrb[93].mxu1  ;;  %vm19917_vm3 = vmand %vm5877_vm14, %vm5887_vm6 }
 0x4c2   : > { %vm19866_vm10 = vmand %vm21168_vm8, %vm5886_vm15  ;;  %v5685_v14 = vadd.f32 %v19695_v46, %v5669_v0  ;;  %v19890_v43 = vsub.s32 %v19644_v3, %v5808_v29  ;;  %v5819_v24 = vmul.u32 10, %v5818_v45  ;;  %v5953_v61 = vrot.slane %v5952_v55, 4  ;;  %v13952_v29 = vpop.f32.mrb[189].mxu0  ;;  %v19910_v2 = vpop.f32.mrb[94].mxu1 }
 0x4c3   : > { %vm19880_vm7 = vmor %vm21171_vm13, %vm5943_vm5  ;;  %v6056_v11 = vsel %vm19010_vm12, %v5952_v55, %v6055_v38  ;;  %v5961_v12 = vor.u32 %v5960_v32, %v5957_v6  ;;  %v12270_v33 = vpack.c.bf16 %v5905_v42, %v5905_v42  ;;  %v5660_v3 = vadd.f32 %v5633_v40, %v19476_v49  ;;  %v5636_v23 = vpop.f32.mrb[190].mxu0  ;;  %14373 = vmatpush3.bf16.msra.mxu0 %v15987_v36  ;;  %v14565_v42 = vpop.f32.mrb[95].mxu1 }
 0x4c4   : > { %6057 = vst [vmem:[%s19005_s6 + $0x4] sm:$0xe] %v6056_v11  ;;  %v5906_v25 = vsel %vm19866_vm10, %v5685_v14, 0.0  ;;  %vm5879_vm5 = vcmp.ge.s32.totalorder %v19859_v9, 1  ;;  %v10437_v45 = vrot.slane %v19249_v16, 2  ;;  %vm5889_vm15 = vcmp.le.s32.totalorder %v19859_v9, 8  ;;  %14805 = vmatpush3.bf16.msra.mxu1 %v15988_v58  ;;  %14430 = vmatprep.subr.bf16.mxu0 %v20899_v7 }
 0x4c5   : > { %v5962_v41 = vsel %vm19880_vm7, %v5953_v61, %v5961_v12  ;;  %v5965_v59 = vshrl.u32 %v12270_v33, 16  ;;  %v5968_v30 = vshll.u32 %v12270_v33, 16  ;;  %v12271_v49 = vpack.c.bf16 %v5906_v25, %v5906_v25  ;;  %v13953_v0 = vpop.f32.mrb[191].mxu0  ;;  %v21176_v61 = vld [vmem:[#allocation32_spill] sm:$0xff]  ;;  %14319 = vmatmul.mubr.bf16.gmra.mrb[40].mxu0 %v19753_v39  ;;  %14826 = vmatprep.subr.bf16.mxu1 %v20899_v7  ;;  %v21183_v42 = vld [vmem:[#allocation38_spill] sm:$0xff] }
 0x4c6   : > { %6058 = vst [vmem:[%s19005_s6 + $0x8] sm:$0xf] %v5962_v41  ;;  %v5670_v26 = vadd.f32 %v5660_v3, %v18834_v50  ;;  %v5661_v38 = vadd.f32 %v5636_v23, %v19492_v63  ;;  %vm5831_vm8 = vcmp.ne.s32.totalorder %v19890_v43, 0  ;;  %v19924_v50 = vsub.s32 %v19684_v15, %v5819_v24  ;;  %14787 = vmatmul.mubr.bf16.gmra.mrb[120].mxu1 %v19784_v8 }
 0x4c7   : > { %v5967_v55 = vrot.slane %v5965_v59, 6  ;;  %v5970_v6 = vrot.slane %v5968_v30, 7  ;;  %v5975_v63 = vshrl.u32 %v12271_v49, 16  ;;  %v5978_v14 = vshll.u32 %v12271_v49, 16  ;;  %14374 = vmatprep.mubr.msk.bf16.mxu0 %vm20811_vm0, %v20899_v7  ;;  %14806 = vmatprep.mubr.msk.bf16.mxu1 %vm20811_vm0, %v20899_v7 }
 0x4c8   : > { %v5686_v36 = vadd.f32 %v19695_v46, %v5670_v26  ;;  %v5671_v11 = vadd.f32 %v5661_v38, %v21176_v61  ;;  %v5963_v56 = vrot.slane %v5961_v12, 4  ;;  %vm21177_vm14 = vcmp.le.s32.totalorder %v19780_v34, 8  ;;  %v5641_v3 = vpop.f32.mrb[192].mxu0 }
 0x4c9   : > { %v5971_v33 = vor.u32 %v5970_v6, %v5967_v55  ;;  %vm21178_vm6 = vcmp.ge.s32.totalorder %v19780_v34, 1  ;;  %vm5841_vm9 = vcmp.lt.s32.totalorder %v19890_v43, 0  ;;  %v5861_v39 = vadd.s32 10, %v19890_v43  ;;  %v19955_v30 = vpop.f32.mrb[96].mxu1  ;;  %v13956_v5 = vpop.f32.mrb[193].mxu0  ;;  %v15991_v55 = vld [vmem:[#allocation10 + $0x340] sm:$0xff]  }
 0x4ca   : > { %vm19934_vm13 = vmand %vm21178_vm6, %vm21177_vm14  ;;  %v5977_v24 = vrot.slane %v5975_v63, 6  ;;  %v5980_v12 = vrot.slane %v5978_v14, 7  ;;  %v5907_v40 = vsel %vm19917_vm3, %v5686_v36, 0.0  ;;  %v5687_v34 = vadd.f32 %v19695_v46, %v5671_v11  ;;  %v14568_v38 = vpop.f32.mrb[97].mxu1  ;;  %v5644_v0 = vpop.f32.mrb[194].mxu0 }
 0x4cb   : > { %v5972_v8 = vsel %vm19880_vm7, %v5963_v56, %v5971_v33  ;;  %v5973_v58 = vrot.slane %v5971_v33, 4  ;;  %v12272_v25 = vpack.c.bf16 %v5907_v40, %v5907_v40  ;;  %v5662_v59 = vadd.f32 %v5641_v3, %v19542_v19  ;;  %vm19963_vm14 = vmand %vm5841_vm9, %vm5831_vm8  ;;  %v19979_v61 = vpop.f32.mrb[98].mxu1  ;;  %v13957_v11 = vpop.f32.mrb[195].mxu0  ;;  %v15992_v56 = vld [vmem:[#allocation10 + $0x600] sm:$0xff]  }
 0x4cc   : > { %6059 = vst [vmem:[%s19005_s6 + $0xc] sm:$0xf] %v5972_v8  ;;  %v5981_v29 = vor.u32 %v5980_v12, %v5977_v24  ;;  %v5908_v41 = vsel %vm19934_vm13, %v5687_v34, 0.0  ;;  %vm5890_vm0 = vcmp.le.s32.totalorder %v19876_v54, 8  ;;  %vm19974_vm6 = vmand %vm5879_vm5, %vm5889_vm15  ;;  %v5663_v36 = vadd.f32 %v5644_v0, %v19581_v28  ;;  %v14569_v8 = vpop.f32.mrb[99].mxu1 }
 0x4cd   : > { %v5985_v23 = vshrl.u32 %v12272_v25, 16  ;;  %v5988_v49 = vshll.u32 %v12272_v25, 16  ;;  %v12273_v26 = vpack.c.bf16 %v5908_v41, %v5908_v41  ;;  %v5672_v63 = vadd.f32 %v5662_v59, %v21183_v42  ;;  %14375 = vmatmul.mubr.bf16.vlgmr.msra.gmra.mrb[44].mxu0 %v19802_v27  ;;  %v15996_v8 = vld [vmem:[#allocation10 + $0x610] sm:$0xff]  }
 0x4ce   : > { %v5982_v6 = vsel %vm19880_vm7, %v5973_v58, %v5981_v29  ;;  %v5862_v33 = vadd.s32 10, %v19924_v50  ;;  %vm21186_vm9 = vcmp.ne.s32.totalorder %v19924_v50, 0  ;;  %vm21187_vm5 = vcmp.lt.s32.totalorder %v19924_v50, 0  ;;  %v21190_v58 = vld [vmem:[#allocation44_spill] sm:$0xff]  ;;  %14807 = vmatmul.mubr.bf16.vlgmr.msra.gmra.mrb[104].mxu1 %v19816_v18  ;;  %14431 = vmatpush3.bf16.msra.mxu0 %v15991_v55 }
 0x4cf   : > { %6060 = vst [vmem:[%s19005_s6 + $0x10] sm:$0xf] %v5982_v6  ;;  %v5987_v24 = vrot.slane %v5985_v23, 6  ;;  %v5990_v12 = vrot.slane %v5988_v49, 7  ;;  %v5995_v40 = vshrl.u32 %v12273_v26, 16  ;;  %v5998_v34 = vshll.u32 %v12273_v26, 16  ;;  %vm19987_vm15 = vmand %vm21187_vm5, %vm21186_vm9  ;;  %14827 = vmatpush3.bf16.msra.mxu1 %v15992_v56  ;;  %14432 = vmatprep.subr.bf16.mxu0 %v20899_v7 }
 0x4d0   : > { %v5688_v28 = vadd.f32 %v19695_v46, %v5672_v63  ;;  %v5673_v25 = vadd.f32 %v5663_v36, %v21190_v58  ;;  %v5871_v3 = vsel %vm19963_vm14, %v5861_v39, %v19890_v43  ;;  %vm21191_vm8 = vcmask 1046528   ;;  %v15993_v43 = vld [vmem:[#allocation10 + $0x348] sm:$0xff]   ;;  %v5649_v55 = vpop.f32.mrb[196].mxu0  ;;  %14828 = vmatprep.subr.bf16.mxu1 %v20899_v7  ;;  %v15995_v56 = vld [vmem:[#allocation10 + $0x350] sm:$0xff]  }
 0x4d1   : > { %v8160_v41 = vsel %vm21191_vm8, %v8157_v44, %v8159_v17  ;;  %v5983_v59 = vrot.slane %v5981_v29, 4  ;;  %v5991_v5 = vor.u32 %v5990_v12, %v5987_v24  ;;  %v5997_v23 = vrot.slane %v5995_v40, 6  ;;  %v13960_v19 = vpop.f32.mrb[197].mxu0 }
 0x4d2   : > { %v6000_v49 = vrot.slane %v5998_v34, 7  ;;  %vm21192_vm9 = vcmp.ge.s32.totalorder %v19876_v54, 1  ;;  %v21193_v27 = vmov 0  ;;  %v5909_v37 = vsel %vm19974_vm6, %v5688_v28, 0.0  ;;  %v15994_v54 = vld [vmem:[#allocation10 + $0x608] sm:$0xff]   ;;  %v5652_v11 = vpop.f32.mrb[198].mxu0  ;;  %14433 = vmatpush3.bf16.msra.mxu0 %v15993_v43 }
 0x4d3   : > { %vm20006_vm5 = vmand %vm21192_vm9, %vm5890_vm0  ;;  %v5689_v44 = vadd.f32 %v19695_v46, %v5673_v25  ;;  %v5872_v39 = vsel %vm19987_vm15, %v5862_v33, %v19924_v50  ;;  %vm21195_vm0 = vcmask 1045504   ;;  %v5992_v29 = vsel %vm19880_vm7, %v5983_v59, %v5991_v5  ;;  %v20033_v50 = vpop.f32.mrb[100].mxu1  ;;  %v13961_v34 = vpop.f32.mrb[199].mxu0  ;;  %14829 = vmatpush3.bf16.msra.mxu1 %v15994_v54  ;;  %14434 = vmatprep.subr.bf16.mxu0 %v20899_v7  ;;  %v21201_v43 = vld [vmem:[#allocation58_spill] sm:$0xff] }
 0x4d4   : > { %v21194_v27 = vsel %vm20006_vm5, 4294967295, %v21193_v27  ;;  %v10438_v18 = vsel %vm21195_vm0, %v10435_v22, %v10437_v45  ;;  %v5993_v26 = vrot.slane %v5991_v5, 4  ;;  %v6001_v38 = vor.u32 %v6000_v49, %v5997_v23  ;;  %6061 = vst [vmem:[%s19005_s6 + $0x14] sm:$0xf] %v5992_v29  ;;  %v14572_v36 = vpop.f32.mrb[101].mxu1  ;;  %14830 = vmatprep.subr.bf16.mxu1 %v20899_v7  ;;  %v15997_v29 = vld [vmem:[#allocation10 + $0x358] sm:$0xff]  }
 0x4d5   : > { %v12274_v0 = vpack.c.bf16 %v5909_v37, %v5909_v37  ;;  %vm21196_vm14 = vmmov 0   ;;  %v5910_v1 = vsel %vm20006_vm5, %v5689_v44, 0.0  ;;  %v5664_v22 = vadd.f32 %v5649_v55, %v19642_v13  ;;  %v21197_v13 = vld [vmem:[#allocation99_spill] sm:$0xff]  ;;  %v20041_v40 = vpop.f32.mrb[102].mxu1 }
 0x4d6   : > { %14378 = vmatprep.mubr.msk.bf16.mxu0 %vm21196_vm14, %v20899_v7  ;;  %14810 = vmatprep.mubr.msk.bf16.mxu1 %vm21196_vm14, %v20899_v7  ;;  %vm5881_vm15 = vcmp.ge.s32.totalorder %v5871_v3, 1  ;;  %vm5891_vm8 = vcmp.le.s32.totalorder %v5871_v3, 8  ;;  %v6002_v6 = vsel %vm19880_vm7, %v5993_v26, %v6001_v38  ;;  %v12275_v33 = vpack.c.bf16 %v5910_v1, %v5910_v1  ;;  %v14573_v25 = vpop.f32.mrb[103].mxu1  ;;  %v20061_v26 = vld [vmem:[%s16944_s13 + $0x1c] sm:$0xff]  }
 0x4d7   : > { %v6005_v42 = vshrl.u32 %v12274_v0, 16  ;;  %v6008_v63 = vshll.u32 %v12274_v0, 16  ;;  %6062 = vst [vmem:[%s19005_s6 + $0x18] sm:$0xf] %v6002_v6  ;;  %v5674_v24 = vadd.f32 %v5664_v22, %v21197_v13  ;;  %v5665_v12 = vadd.f32 %v5652_v11, %v19665_v10  ;;  %vm20046_vm9 = vmand %vm5881_vm15, %vm5891_vm8  ;;  %v21200_v10 = vld [vmem:[#allocation71_spill] sm:$0xff]  ;;  %14379 = vmatmul.mubr.bf16.gmra.mrb[48].mxu0 %v8160_v41  ;;  %14811 = vmatmul.mubr.bf16.gmra.mrb[108].mxu1 %v10438_v18 }
 0x4d8   : > { %vm5892_vm0 = vcmp.le.s32.totalorder %v5872_v39, 8  ;;  %v8161_v59 = vrot.slane %v21200_v10, 1  ;;  %v6015_v5 = vshrl.u32 %v12275_v33, 16  ;;  %v6018_v23 = vshll.u32 %v12275_v33, 16  ;;  %14435 = vmatpush3.bf16.msra.mxu0 %v15995_v56  ;;  %14831 = vmatpush3.bf16.msra.mxu1 %v15996_v8  ;;  %v6407_v6 = vpop.f32.mrb[200].mxu0  ;;  %v15999_v8 = vld [vmem:[#allocation10 + $0x360] sm:$0xff]  }
 0x4d9   : > { %v6007_v9 = vrot.slane %v6005_v42, 6  ;;  %v6010_v28 = vrot.slane %v6008_v63, 7  ;;  %v5690_v49 = vadd.f32 %v19695_v46, %v5674_v24  ;;  %v5675_v37 = vadd.f32 %v5665_v12, %v21201_v43  ;;  %14382 = vmatprep.mubr.msk.bf16.mxu0 %vm21196_vm14, %v20899_v7  ;;  %14436 = vmatprep.subr.bf16.mxu0 %v20899_v7  ;;  %v21206_v63 = vld [vmem:[#allocation112_spill] sm:$0xff]  ;;  %v14016_v11 = vpop.f32.mrb[201].mxu0  ;;  %v21210_v25 = vld [vmem:[#allocation123_spill] sm:$0xff] }
 0x4da   : > { %v6003_v44 = vrot.slane %v6001_v38, 4  ;;  %vm21202_vm5 = vcmp.ge.s32.totalorder %v5872_v39, 1  ;;  %v21203_v3 = vmov 0  ;;  %v10439_v0 = vrot.slane %v20061_v26, 2  ;;  %v15998_v39 = vld [vmem:[#allocation10 + $0x618] sm:$0xff]   ;;  %14814 = vmatprep.mubr.msk.bf16.mxu1 %vm21196_vm14, %v20899_v7  ;;  %14832 = vmatprep.subr.bf16.mxu1 %v20899_v7  ;;  %v6410_v12 = vpop.f32.mrb[202].mxu0 }
 0x4db   : > { %v6011_v54 = vor.u32 %v6010_v28, %v6007_v9  ;;  %vm20056_vm15 = vmand %vm21202_vm5, %vm5892_vm0  ;;  %v6017_v55 = vrot.slane %v6015_v5, 6  ;;  %v6020_v1 = vrot.slane %v6018_v23, 7  ;;  %v5911_v41 = vsel %vm20046_vm9, %v5690_v49, 0.0  ;;  %v21209_v9 = vld [vmem:[#allocation113_spill] sm:$0xff]  ;;  %v21219_v26 = vld [vmem:[#allocation126_spill] sm:$0xff] }
 0x4dc   : > { %v21204_v3 = vsel %vm20056_vm15, 4294967295, %v21203_v3  ;;  %v5691_v38 = vadd.f32 %v19695_v46, %v5675_v37  ;;  %v12276_v19 = vpack.c.bf16 %v5911_v41, %v5911_v41  ;;  %v6408_v36 = vadd.f32 %v6407_v6, %v21206_v63  ;;  %14437 = vmatpush3.bf16.msra.mxu0 %v15997_v29  ;;  %14833 = vmatpush3.bf16.msra.mxu1 %v15998_v39  ;;  %v20107_v39 = vld [vmem:[%s16944_s13 + $0x24] sm:$0xff]  }
 0x4dd   : > { %21205 = vst [vmem:[#allocation79_spill] sm:$0xff] %v21204_v3  ;;  %v6012_v18 = vsel %vm19880_vm7, %v6003_v44, %v6011_v54  ;;  %v6013_v22 = vrot.slane %v6011_v54, 4  ;;  %v6021_v42 = vor.u32 %v6020_v1, %v6017_v55  ;;  %vm21207_vm5 = vcmask 1046528   ;;  %14438 = vmatprep.subr.bf16.mxu0 %v20899_v7  ;;  %14834 = vmatprep.subr.bf16.mxu1 %v20899_v7  ;;  %v21211_v44 = vld [vmem:[#allocation124_spill] sm:$0xff] }
 0x4de   : > { %6063 = vst [vmem:[%s19005_s6 + $0x1c] sm:$0xf] %v6012_v18  ;;  %v5912_v46 = vsel %vm20056_vm15, %v5691_v38, 0.0  ;;  %v8162_v56 = vsel %vm21207_vm5, %v8159_v17, %v8161_v59  ;;  %v6025_v33 = vshrl.u32 %v12276_v19, 16  ;;  %v6028_v13 = vshll.u32 %v12276_v19, 16  ;;  %v14017_v17 = vpop.f32.mrb[203].mxu0  ;;  %vm21213_vm0 = vmmov %vm21207_vm5 }
 0x4df   : > { %v12277_v24 = vpack.c.bf16 %v5912_v46, %v5912_v46  ;;  %vm21208_vm8 = vcmask 1045504   ;;  %v6022_v62 = vsel %vm19880_vm7, %v6013_v22, %v6021_v42  ;;  %v6411_v28 = vadd.f32 %v6410_v12, %v21209_v9  ;;  %14383 = vmatmul.mubr.bf16.gmra.mrb[52].mxu0 %v8162_v56  ;;  %v16001_v38 = vld [vmem:[#allocation10 + $0x368] sm:$0xff]   ;;  %v21216_v17 = vld [vmem:[#allocation125_spill] sm:$0xff] }
 0x4e0   : > { %v10440_v34 = vsel %vm21208_vm8, %v10437_v45, %v10439_v0  ;;  %v20094_v5 = vadd.f32 %v21210_v25, %v6408_v36  ;;  %6064 = vst [vmem:[%s19005_s6 + $0x20] sm:$0xf] %v6022_v62  ;;  %v6027_v23 = vrot.slane %v6025_v33, 6  ;;  %v6030_v49 = vrot.slane %v6028_v13, 7  ;;  %v16000_v45 = vld [vmem:[#allocation10 + $0x620] sm:$0xff]   ;;  %14439 = vmatpush3.bf16.msra.mxu0 %v15999_v8  ;;  %14386 = vmatprep.mubr.msk.bf16.mxu0 %vm21196_vm14, %v20899_v7  ;;  %v16002_v46 = vld [vmem:[#allocation10 + $0x628] sm:$0xff]   ;;  %vm21215_vm5 = vmmov %vm21208_vm8 }
 0x4e1   : > { %v6035_v43 = vshrl.u32 %v12277_v24, 16  ;;  %v6038_v16 = vshll.u32 %v12277_v24, 16  ;;  %v8163_v37 = vrot.slane %v19507_v31, 1  ;;  %v20100_v54 = vadd.f32 %v21211_v44, %v6411_v28  ;;  %14815 = vmatmul.mubr.bf16.gmra.mrb[112].mxu1 %v10440_v34  ;;  %14440 = vmatprep.subr.bf16.mxu0 %v20899_v7  ;;  %v6067_v63 = vld [vmem:[%s19005_s6 + $0x2c] sm:$0x3]  ;;  %v21212_v36 = vld [vmem:[#allocation114_spill] sm:$0xff]  ;;  %vm21223_vm8 = vmmov %vm21213_vm0 }
 0x4e2   : > { %v6023_v29 = vrot.slane %v6021_v42, 4  ;;  %v6031_v55 = vor.u32 %v6030_v49, %v6027_v23  ;;  %14818 = vmatprep.mubr.msk.bf16.mxu1 %vm21196_vm14, %v20899_v7  ;;  %v10441_v18 = vrot.slane %v20107_v39, 2  ;;  %v6415_v42 = vpop.f32.mrb[204].mxu0  ;;  %14835 = vmatpush3.bf16.msra.mxu1 %v16000_v45  ;;  %v21214_v34 = vld [vmem:[#allocation115_spill] sm:$0xff]  ;;  %v16003_v28 = vld [vmem:[#allocation10 + $0x370] sm:$0xff]   ;;  %v16005_v39 = vld [vmem:[#allocation10 + $0x378] sm:$0xff]  }
 0x4e3   : > { %v6037_v1 = vrot.slane %v6035_v43, 6  ;;  %v6040_v41 = vrot.slane %v6038_v16, 7  ;;  %v6416_v11 = vadd.f32 %v6415_v42, %v21212_v36  ;;  %v14020_v56 = vpop.f32.mrb[205].mxu0  ;;  %14836 = vmatprep.subr.bf16.mxu1 %v20899_v7  ;;  %v8164_v12 = vsel %vm21213_vm0, %v8161_v59, %v8163_v37  ;;  %v16004_v59 = vld [vmem:[#allocation10 + $0x630] sm:$0xff]   ;;  %v21218_v49 = vld [vmem:[#allocation75_spill] sm:$0xff]  ;;  %v21220_v16 = vld [vmem:[#allocation118_spill] sm:$0xff] }
 0x4e4   : > { %v6032_v22 = vsel %vm19880_vm7, %v6023_v29, %v6031_v55  ;;  %v6033_v19 = vrot.slane %v6031_v55, 4  ;;  %v6418_v24 = vpop.f32.mrb[206].mxu0  ;;  %14441 = vmatpush3.bf16.msra.mxu0 %v16001_v38  ;;  %v10442_v9 = vsel %vm21215_vm5, %v10439_v0, %v10441_v18  ;;  %v8165_v43 = vrot.slane %v21218_v49, 1  ;;  %v16091_v29 = vld [vmem:[%s16937_s22 + $0xc] sm:$0xff]   ;;  %v20152_v42 = vld [vmem:[%s16944_s13 + $0xc] sm:$0xf]  ;;  %vm21225_vm0 = vmmov %vm21215_vm5 }
 0x4e5   : > { %v6041_v6 = vor.u32 %v6040_v41, %v6037_v1  ;;  %6065 = vst [vmem:[%s19005_s6 + $0x24] sm:$0xf] %v6032_v22  ;;  %v6419_v8 = vadd.f32 %v6418_v24, %v21214_v34  ;;  %v14021_v62 = vpop.f32.mrb[207].mxu0  ;;  %14442 = vmatprep.subr.bf16.mxu0 %v20899_v7  ;;  %v20131_v25 = vadd.f32 %v21216_v17, %v6416_v11  ;;  %v8526_v45 = vshrl.u32 %v21220_v16, 16  ;;  %v21221_v41 = vld [vmem:[#allocation76_spill] sm:$0xff]  ;;  %v21224_v34 = vld [vmem:[#allocation117_spill] sm:$0xff] }
 0x4e6   : > { %14837 = vmatpush3.bf16.msra.mxu1 %v16002_v46  ;;  %v8529_v44 = vshll.u32 %v21220_v16, 16  ;;  %v8534_v55 = vshrl.u32 %v16091_v29, 16  ;;  %v8537_v1 = vshll.u32 %v16091_v29, 16  ;;  %v10443_v38 = vrot.slane %v21221_v41, 2  ;;  %v21222_v46 = vld [vmem:[#allocation116_spill] sm:$0xff]  ;;  %v20165_v31 = vld [vmem:[%s16944_s13 + $0x10] sm:$0xff]  }
 0x4e7   : > { %v6042_v33 = vsel %vm19880_vm7, %v6033_v19, %v6041_v6  ;;  %v6043_v13 = vrot.slane %v6041_v6, 4  ;;  %14387 = vmatmul.mubr.bf16.gmra.mrb[56].mxu0 %v8164_v12  ;;  %14838 = vmatprep.subr.bf16.mxu1 %v20899_v7  ;;  %v20139_v0 = vadd.f32 %v21219_v26, %v6419_v8  ;;  %v16006_v19 = vld [vmem:[#allocation10 + $0x638] sm:$0xff]   ;;  %v10581_v6 = vld [vmem:[%s16944_s13 + $0x8] sm:$0xc]  ;;  %v8166_v11 = vsel %vm21223_vm8, %v8163_v37, %v8165_v43  ;;  %v21226_v37 = vld [vmem:[#allocation127_spill] sm:$0xff] }
 0x4e8   : > { %6066 = vst [vmem:[%s19005_s6 + $0x28] sm:$0xf] %v6042_v33  ;;  %14390 = vmatprep.mubr.msk.bf16.mxu0 %vm21196_vm14, %v20899_v7  ;;  %14443 = vmatpush3.bf16.msra.mxu0 %v16003_v28  ;;  %v6423_v22 = vpop.f32.mrb[208].mxu0  ;;  %v8528_v33 = vrot.slane %v8526_v45, 1  ;;  %v8536_v24 = vrot.slane %v8534_v55, 1  ;;  %v8539_v12 = vrot.slane %v8537_v1, 2  ;;  %v20162_v28 = vcombine.low %v10581_v6, %v20152_v42  ;;  %vm21231_vm8 = vmmov %vm21225_vm0 }
 0x4e9   : > { %v6068_v10 = vsel %vm18994_vm11, %v6043_v13, %v6067_v63  ;;  %14819 = vmatmul.mubr.bf16.gmra.mrb[116].mxu1 %v10442_v9  ;;  %14444 = vmatprep.subr.bf16.mxu0 %v20899_v7  ;;  %v6424_v63 = vadd.f32 %v6423_v22, %v21222_v46  ;;  %v14024_v36 = vpop.f32.mrb[209].mxu0  ;;  %v8531_v13 = vrot.slane %v8529_v44, 2  ;;  %v10444_v9 = vsel %vm21225_vm0, %v10441_v18, %v10443_v38  ;;  %v16092_v43 = vld [vmem:[%s16937_s22 + $0x14] sm:$0xff]   ;;  %v21230_v46 = vld [vmem:[#allocation120_spill] sm:$0xff] }
 0x4ea   : > { %6069 = vst [vmem:[%s19005_s6 + $0x2c] sm:$0x3] %v6068_v10  ;;  %14822 = vmatprep.mubr.msk.bf16.mxu1 %vm21196_vm14, %v20899_v7  ;;  %14839 = vmatpush3.bf16.msra.mxu1 %v16004_v59  ;;  %v6426_v56 = vpop.f32.mrb[210].mxu0  ;;  %v21227_v10 = vld [vmem:[#allocation128_spill] sm:$0xff]  ;;  %v8540_v49 = vor.u32 %v8539_v12, %v8536_v24  ;;  %v8543_v26 = vshrl.u32 %v16092_v43, 16  ;;  %v8546_v16 = vshll.u32 %v16092_v43, 16 }
 0x4eb   : > { %14840 = vmatprep.subr.bf16.mxu1 %v20899_v7  ;;  %v6427_v8 = vadd.f32 %v6426_v56, %v21224_v34  ;;  %v14025_v62 = vpop.f32.mrb[211].mxu0  ;;  %v20168_v17 = vadd.f32 %v21226_v37, %v6424_v63  ;;  %v8532_v18 = vor.u32 %v8531_v13, %v8528_v33  ;;  %v10636_v45 = vrot.slane %v20162_v28, 2  ;;  %v21228_v55 = vld [vmem:[#allocation119_spill] sm:$0xff]  ;;  %v16009_v22 = vld [vmem:[#allocation10 + $0x3c0] sm:$0xff]   ;;  %v21232_v13 = vld [vmem:[#allocation129_spill] sm:$0xff] }
 0x4ec   : > { %14445 = vmatpush3.bf16.msra.mxu0 %v16005_v39  ;;  %v10637_v44 = vrot.slane %v20165_v31, 2  ;;  %vm21229_vm5 = vsmask.f32 6400  ;;  %v8548_v6 = vrot.slane %v8546_v16, 2  ;;  %v16010_v56 = vld [vmem:[#allocation10 + $0x640] sm:$0xff]   ;;  %v16013_v43 = vld [vmem:[#allocation10 + $0x648] sm:$0xff]  }
 0x4ed   : > { %14502 = vmatprep.subr.bf16.mxu0 %v20899_v7  ;;  %v20173_v59 = vadd.f32 %v21227_v10, %v6427_v8  ;;  %v8541_v39 = vsel %vm21229_vm5, %v8532_v18, %v8540_v49  ;;  %v20187_v33 = vld [vmem:[%s16944_s13 + $0x18] sm:$0xff]   ;;  %v21234_v16 = vld [vmem:[#allocation121_spill] sm:$0xff]  ;;  %vm21235_vm0 = vmmov %vm21229_vm5 }
 0x4ee   : > { %14841 = vmatpush3.bf16.msra.mxu1 %v16006_v19  ;;  %v8545_v19 = vrot.slane %v8543_v26, 1  ;;  %v21233_v12 = vld [vmem:[#allocation130_spill] sm:$0xff]  ;;  %v16011_v8 = vld [vmem:[#allocation10 + $0x3c8] sm:$0xff]   ;;  %v10639_v18 = vrot.slane %v20187_v33, 2  ;;  %vm21237_vm5 = vmmov %vm21231_vm8 }
 0x4ef   : > { %14391 = vmatmul.mubr.bf16.gmra.mrb[60].mxu0 %v8166_v11  ;;  %14862 = vmatprep.subr.bf16.mxu1 %v20899_v7  ;;  %v10638_v11 = vsel %vm21231_vm8, %v10636_v45, %v10637_v44  ;;  %vm21240_vm8 = vmmov %vm21235_vm0 }
 0x4f0   : > { %14446 = vmatprep.mubr.msk.bf16.mxu0 %vm21196_vm14, %v20899_v7  ;;  %v6431_v29 = vpop.f32.mrb[212].mxu0  ;;  %v8549_v62 = vor.u32 %v8548_v6, %v8545_v19 }
 0x4f1   : > { %14823 = vmatmul.mubr.bf16.gmra.mrb[120].mxu1 %v10444_v9  ;;  %v6432_v1 = vadd.f32 %v6431_v29, %v21228_v55  ;;  %v14028_v41 = vpop.f32.mrb[213].mxu0  ;;  %v16093_v9 = vld [vmem:[%s16937_s22 + $0x1c] sm:$0xff]  }
 0x4f2   : > { %14842 = vmatprep.mubr.msk.bf16.mxu1 %vm21196_vm14, %v20899_v7  ;;  %v6434_v38 = vpop.f32.mrb[214].mxu0  ;;  %v8552_v37 = vshrl.u32 %v16093_v9, 16  ;;  %v8555_v10 = vshll.u32 %v16093_v9, 16  ;;  %v16014_v41 = vld [vmem:[#allocation10 + $0x3d0] sm:$0xff]  }
 0x4f3   : > { %v6435_v63 = vadd.f32 %v6434_v38, %v21230_v46  ;;  %v14029_v36 = vpop.f32.mrb[215].mxu0  ;;  %v20190_v24 = vadd.f32 %v21232_v13, %v6432_v1  ;;  %v8550_v1 = vsel %vm21235_vm0, %v8540_v49, %v8549_v62  ;;  %v10640_v46 = vsel %vm21237_vm5, %v10637_v44, %v10639_v18  ;;  %v21239_v49 = vld [vmem:[#allocation132_spill] sm:$0xff]  ;;  %vm21241_vm0 = vmmov %vm21237_vm5 }
 0x4f4   : > { %v8554_v38 = vrot.slane %v8552_v37, 1  ;;  %v20209_v36 = vld [vmem:[%s16944_s13 + $0x20] sm:$0xff]   ;;  %vm21244_vm5 = vmmov %vm21240_vm8 }
 0x4f5   : > { %v20193_v34 = vadd.f32 %v21233_v12, %v6435_v63  ;;  %v16015_v63 = vld [vmem:[#allocation10 + $0x650] sm:$0xff]  }
 0x4f6   : > { %v16094_v44 = vld [vmem:[%s16937_s22 + $0x24] sm:$0xff]  }
 0x4f7   : > { %14447 = vmatmul.mubr.bf16.vlgmr.msra.gmra.mrb[64].mxu0 %v8541_v39  ;;  %v8557_v39 = vrot.slane %v8555_v10, 2  ;;  %v8561_v9 = vshrl.u32 %v16094_v44, 16  ;;  %v8564_v37 = vshll.u32 %v16094_v44, 16  ;;  %v10641_v10 = vrot.slane %v20209_v36, 2 }
 0x4f8   : > { %14503 = vmatpush3.bf16.msra.mxu0 %v16009_v22  ;;  %v6439_v26 = vpop.f32.mrb[216].mxu0  ;;  %14450 = vmatprep.mubr.msk.bf16.mxu0 %vm21196_vm14, %v20899_v7  ;;  %v21236_v22 = vld [vmem:[#allocation122_spill] sm:$0xff] }
 0x4f9   : > { %14843 = vmatmul.mubr.bf16.vlgmr.msra.gmra.mrb[104].mxu1 %v10638_v11  ;;  %14504 = vmatprep.subr.bf16.mxu0 %v20899_v7  ;;  %v6440_v45 = vadd.f32 %v6439_v26, %v21234_v16  ;;  %v14032_v29 = vpop.f32.mrb[217].mxu0  ;;  %v21238_v11 = vld [vmem:[#allocation131_spill] sm:$0xff]  ;;  %v8558_v12 = vor.u32 %v8557_v39, %v8554_v38  ;;  %v8566_v38 = vrot.slane %v8564_v37, 2 }
 0x4fa   : > { %14863 = vmatpush3.bf16.msra.mxu1 %v16010_v56  ;;  %14846 = vmatprep.mubr.msk.bf16.mxu1 %vm21196_vm14, %v20899_v7  ;;  %v6442_v55 = vpop.f32.mrb[218].mxu0 }
 0x4fb   : > { %14864 = vmatprep.subr.bf16.mxu1 %v20899_v7  ;;  %v6443_v19 = vadd.f32 %v6442_v55, %v21236_v22  ;;  %v14033_v6 = vpop.f32.mrb[219].mxu0  ;;  %v20212_v56 = vadd.f32 %v21238_v11, %v6440_v45  ;;  %v8559_v55 = vsel %vm21240_vm8, %v8549_v62, %v8558_v12  ;;  %v16020_v62 = vld [vmem:[#allocation10 + $0x660] sm:$0xff]   ;;  %vm21245_vm8 = vmmov %vm21241_vm0 }
 0x4fc   : > { %14505 = vmatpush3.bf16.msra.mxu0 %v16011_v8  ;;  %v16016_v8 = vld [vmem:[#allocation10 + $0x3d8] sm:$0xff]  }
 0x4fd   : > { %14506 = vmatprep.subr.bf16.mxu0 %v20899_v7  ;;  %v20216_v13 = vadd.f32 %v21239_v49, %v6443_v19  ;;  %v10642_v19 = vsel %vm21241_vm0, %v10639_v18, %v10641_v10  ;;  %v21242_v6 = vld [vmem:[#allocation133_spill] sm:$0xff]  ;;  %v16022_v49 = vld [vmem:[#allocation10 + $0x3e8] sm:$0xff]   ;;  %vm21248_vm0 = vmmov %vm21244_vm5 }
 0x4fe   : > { %14865 = vmatpush3.bf16.msra.mxu1 %v16013_v43  ;;  %v16018_v43 = vld [vmem:[#allocation10 + $0x658] sm:$0xff]  }
 0x4ff   : > { %14866 = vmatprep.subr.bf16.mxu1 %v20899_v7  ;;  %14451 = vmatmul.mubr.bf16.gmra.mrb[68].mxu0 %v8550_v1  ;;  %v16019_v1 = vld [vmem:[#allocation10 + $0x3e0] sm:$0xff]   ;;  %v16095_v18 = vld [vmem:[%s16937_s22 + $0x2c] ss:$0 sps:$4 sm:$0x33]  }
 0x500   : > { %14507 = vmatpush3.bf16.msra.mxu0 %v16014_v41  ;;  %14454 = vmatprep.mubr.msk.bf16.mxu0 %vm21196_vm14, %v20899_v7  ;;  %v6766_v26 = vpop.f32.mrb[220].mxu0  ;;  %v8563_v41 = vrot.slane %v8561_v9, 1  ;;  %v8573_v44 = vshll.u32 %v16095_v18, 16 }
 0x501   : > { %14847 = vmatmul.mubr.bf16.gmra.mrb[108].mxu1 %v10640_v46  ;;  %14508 = vmatprep.subr.bf16.mxu0 %v20899_v7  ;;  %v6805_v16 = vadd.f32 %v6766_v26, %v20094_v5  ;;  %v14088_v45 = vpop.f32.mrb[221].mxu0  ;;  %v20232_v5 = vld [vmem:[%s16944_s13 + $0x28] sm:$0xff]  }
 0x502   : > { %14867 = vmatpush3.bf16.msra.mxu1 %v16015_v63  ;;  %14850 = vmatprep.mubr.msk.bf16.mxu1 %vm21196_vm14, %v20899_v7  ;;  %v6769_v29 = vpop.f32.mrb[222].mxu0  ;;  %v21243_v63 = vld [vmem:[#allocation134_spill] sm:$0xff]  ;;  %v10643_v9 = vrot.slane %v20232_v5, 2 }
 0x503   : > { %14868 = vmatprep.subr.bf16.mxu1 %v20899_v7  ;;  %v6806_v39 = vadd.f32 %v6769_v29, %v20100_v54  ;;  %v14089_v22 = vpop.f32.mrb[223].mxu0  ;;  %v20235_v46 = vadd.f32 %v21242_v6, %v6805_v16  ;;  %v8567_v54 = vor.u32 %v8566_v38, %v8563_v41  ;;  %v16025_v41 = vld [vmem:[%s16944_s13 + $0x30] ss:$0 sps:$4 sm:$0x33]  }
 0x504   : > { %14509 = vmatpush3.bf16.msra.mxu0 %v16016_v8  ;;  %v8570_v8 = vshrl.u32 %v16095_v18, 16  ;;  %v10644_v22 = vsel %vm21245_vm8, %v10641_v10, %v10643_v9  ;;  %v21246_v6 = vld [vmem:[#allocation135_spill] sm:$0xff]  ;;  %v10645_v10 = vrot.slane %v16025_v41, 2  ;;  %v10807_v18 = vshll.u32 %v20162_v28, 16 }
 0x505   : > { %14510 = vmatprep.subr.bf16.mxu0 %v20899_v7  ;;  %v20239_v11 = vadd.f32 %v21243_v63, %v6806_v39  ;;  %v8568_v29 = vsel %vm21244_vm5, %v8558_v12, %v8567_v54  ;;  %v21247_v12 = vld [vmem:[#allocation136_spill] sm:$0xff]  ;;  %vm21249_vm5 = vmmov %vm21245_vm8 }
 0x506   : > { %14869 = vmatpush3.bf16.msra.mxu1 %v16018_v43  ;;  %v16023_v43 = vld [vmem:[#allocation10 + $0x668] sm:$0xff]   ;;  %v10809_v41 = vrot.slane %v10807_v18, 3  ;;  %vm21253_vm8 = vmmov %vm21249_vm5 }
 0x507   : > { %14870 = vmatprep.subr.bf16.mxu1 %v20899_v7  ;;  %14455 = vmatmul.mubr.bf16.gmra.mrb[72].mxu0 %v8559_v55  ;;  %v8572_v55 = vrot.slane %v8570_v8, 1  ;;  %v16027_v8 = vld [vmem:[#allocation10 + $0x3f8] sm:$0xff]  }
 0x508   : > { %14511 = vmatpush3.bf16.msra.mxu0 %v16019_v1  ;;  %14458 = vmatprep.mubr.msk.bf16.mxu0 %vm21196_vm14, %v20899_v7  ;;  %v6774_v37 = vpop.f32.mrb[224].mxu0  ;;  %v8575_v1 = vrot.slane %v8573_v44, 2  ;;  %v10812_v44 = vshrl.u32 %v20165_v31, 16 }
 0x509   : > { %14851 = vmatmul.mubr.bf16.gmra.mrb[112].mxu1 %v10642_v19  ;;  %14512 = vmatprep.subr.bf16.mxu0 %v20899_v7  ;;  %v6807_v26 = vadd.f32 %v6774_v37, %v20131_v25  ;;  %v14092_v16 = vpop.f32.mrb[225].mxu0  ;;  %v16024_v19 = vld [vmem:[#allocation10 + $0x3f0] sm:$0xff]   ;;  %v10815_v37 = vshll.u32 %v20165_v31, 16 }
 0x50a   : > { %14854 = vmatprep.mubr.msk.bf16.mxu1 %vm21196_vm14, %v20899_v7  ;;  %14871 = vmatpush3.bf16.msra.mxu1 %v16020_v62  ;;  %v6777_v45 = vpop.f32.mrb[226].mxu0  ;;  %v16026_v62 = vld [vmem:[#allocation10 + $0x670] sm:$0xff]  }
 0x50b   : > { %14872 = vmatprep.subr.bf16.mxu1 %v20899_v7  ;;  %v6808_v38 = vadd.f32 %v6777_v45, %v20139_v0  ;;  %v14093_v39 = vpop.f32.mrb[227].mxu0  ;;  %v20256_v25 = vadd.f32 %v21246_v6, %v6807_v26  ;;  %v8576_v0 = vor.u32 %v8575_v1, %v8572_v55  ;;  %v16028_v26 = vld [vmem:[#allocation10 + $0x678] sm:$0xff]   ;;  %v10646_v55 = vsel %vm21249_vm5, %v10643_v9, %v10645_v10  ;;  %v21250_v6 = vld [vmem:[#allocation138_spill] sm:$0xff] }
 0x50c   : > { %14513 = vmatpush3.bf16.msra.mxu0 %v16022_v49  ;;  %v10804_v49 = vshrl.u32 %v20162_v28, 16  ;;  %v10821_v10 = vshrl.u32 %v20187_v33, 16 }
 0x50d   : > { %14514 = vmatprep.subr.bf16.mxu0 %v20899_v7  ;;  %v20260_v63 = vadd.f32 %v21247_v12, %v6808_v38  ;;  %v20288_v12 = vld [vmem:[%s16937_s22 + $0x10] sm:$0xff]  }
 0x50e   : > { %14873 = vmatpush3.bf16.msra.mxu1 %v16023_v43  ;;  %v10806_v1 = vrot.slane %v10804_v49, 2  ;;  %v10824_v49 = vshll.u32 %v20187_v33, 16 }
 0x50f   : > { %14459 = vmatmul.mubr.bf16.gmra.mrb[76].mxu0 %v8568_v29  ;;  %14874 = vmatprep.subr.bf16.mxu1 %v20899_v7  ;;  %v8577_v29 = vsel %vm21248_vm0, %v8567_v54, %v8576_v0  ;;  %v8937_v0 = vrot.slane %v20288_v12, 2  ;;  %vm21254_vm0 = vsmask.f32 5376 }
 0x510   : > { %14462 = vmatprep.mubr.msk.bf16.mxu0 %vm21196_vm14, %v20899_v7  ;;  %14515 = vmatpush3.bf16.msra.mxu0 %v16024_v19  ;;  %v6782_v43 = vpop.f32.mrb[228].mxu0  ;;  %v10817_v19 = vrot.slane %v10815_v37, 3  ;;  %v10810_v18 = vor.u32 %v10809_v41, %v10806_v1  ;;  %v21256_v41 = vld [vmem:[#allocation141_spill] sm:$0xff] }
 0x511   : > { %14855 = vmatmul.mubr.bf16.gmra.mrb[116].mxu1 %v10644_v22  ;;  %14516 = vmatprep.subr.bf16.mxu0 %v20899_v7  ;;  %v6809_v16 = vadd.f32 %v6782_v43, %v20168_v17  ;;  %v14096_v45 = vpop.f32.mrb[229].mxu0  ;;  %v10814_v22 = vrot.slane %v10812_v44, 2  ;;  %v21251_v17 = vld [vmem:[#allocation139_spill] sm:$0xff] }
 0x512   : > { %14858 = vmatprep.mubr.msk.bf16.mxu1 %vm21196_vm14, %v20899_v7  ;;  %14875 = vmatpush3.bf16.msra.mxu1 %v16026_v62  ;;  %v6785_v28 = vpop.f32.mrb[230].mxu0  ;;  %v16029_v45 = vld [vmem:[#allocation10 + $0x440] sm:$0xff]  }
 0x513   : > { %14876 = vmatprep.subr.bf16.mxu1 %v20899_v7  ;;  %v6810_v38 = vadd.f32 %v6785_v28, %v20173_v59  ;;  %v14097_v39 = vpop.f32.mrb[231].mxu0  ;;  %v20277_v62 = vadd.f32 %v21250_v6, %v6809_v16  ;;  %v21252_v59 = vld [vmem:[#allocation137_spill] sm:$0xff]  ;;  %v10823_v28 = vrot.slane %v10821_v10, 2  ;;  %v16030_v6 = vld [vmem:[#allocation10 + $0x680] sm:$0xff]   ;;  %v10830_v10 = vshrl.u32 %v20209_v36, 16 }
 0x514   : > { %14517 = vmatpush3.bf16.msra.mxu0 %v16027_v8  ;;  %v8936_v9 = vrot.slane %v21252_v59, 2  ;;  %v10818_v8 = vor.u32 %v10817_v19, %v10814_v22  ;;  %v16031_v22 = vld [vmem:[#allocation10 + $0x448] sm:$0xff]  }
 0x515   : > { %14574 = vmatprep.subr.bf16.mxu0 %v20899_v7  ;;  %v20282_v54 = vadd.f32 %v21251_v17, %v6810_v38  ;;  %v21255_v17 = vld [vmem:[#allocation140_spill] sm:$0xff]  ;;  %v20306_v19 = vld [vmem:[%s16937_s22 + $0x18] sm:$0xff]  }
 0x516   : > { %14877 = vmatpush3.bf16.msra.mxu1 %v16028_v26  ;;  %v8938_v16 = vsel %vm21253_vm8, %v8936_v9, %v8937_v0  ;;  %v10819_v39 = vsel %vm21254_vm0, %v10810_v18, %v10818_v8  ;;  %v8939_v59 = vrot.slane %v20306_v19, 2  ;;  %vm21257_vm8 = vmmov %vm21254_vm0 }
 0x517   : > { %14463 = vmatmul.mubr.bf16.gmra.mrb[80].mxu0 %v8577_v29  ;;  %14898 = vmatprep.subr.bf16.mxu1 %v20899_v7  ;;  %v10826_v29 = vrot.slane %v10824_v49, 3  ;;  %v10833_v49 = vshll.u32 %v20209_v36, 16  ;;  %vm21260_vm0 = vmmov %vm21249_vm5 }
 0x518   : > { %14518 = vmatprep.mubr.msk.bf16.mxu0 %vm21196_vm14, %v20899_v7  ;;  %v6790_v44 = vpop.f32.mrb[232].mxu0 }
 0x519   : > { %14859 = vmatmul.mubr.bf16.gmra.mrb[120].mxu1 %v10646_v55  ;;  %v6811_v37 = vadd.f32 %v6790_v44, %v20190_v24  ;;  %v14100_v43 = vpop.f32.mrb[233].mxu0  ;;  %v10827_v9 = vor.u32 %v10826_v29, %v10823_v28 }
 0x51a   : > { %14878 = vmatprep.mubr.msk.bf16.mxu1 %vm21196_vm14, %v20899_v7  ;;  %v6793_v26 = vpop.f32.mrb[234].mxu0 }
 0x51b   : > { %v6812_v55 = vadd.f32 %v6793_v26, %v20193_v34  ;;  %v14101_v38 = vpop.f32.mrb[235].mxu0  ;;  %v20300_v1 = vadd.f32 %v21255_v17, %v6811_v37  ;;  %v16032_v34 = vld [vmem:[#allocation10 + $0x688] sm:$0xff]   ;;  %v8940_v26 = vsel %vm21249_vm5, %v8937_v0, %v8939_v59  ;;  %vm21261_vm5 = vmmov %vm21257_vm8 }
 0x51c   : > { %v10832_v38 = vrot.slane %v10830_v10, 2  ;;  %v21259_v0 = vld [vmem:[#allocation143_spill] sm:$0xff] }
 0x51d   : > { %v20303_v24 = vadd.f32 %v21256_v41, %v6812_v55  ;;  %v16034_v55 = vld [vmem:[#allocation10 + $0x690] sm:$0xff]   ;;  %v16035_v41 = vld [vmem:[#allocation10 + $0x458] sm:$0xff]  }
 0x51f   : > { %14519 = vmatmul.mubr.bf16.vlgmr.msra.gmra.mrb[84].mxu0 %v8938_v16  ;;  %v10828_v16 = vsel %vm21257_vm8, %v10818_v8, %v10827_v9  ;;  %v20330_v8 = vld [vmem:[%s16937_s22 + $0x20] sm:$0xff]   ;;  %vm21264_vm8 = vmmov %vm21260_vm0 }
 0x520   : > { %14575 = vmatpush3.bf16.msra.mxu0 %v16029_v45  ;;  %v6798_v18 = vpop.f32.mrb[236].mxu0  ;;  %14522 = vmatprep.mubr.msk.bf16.mxu0 %vm21196_vm14, %v20899_v7  ;;  %v16033_v45 = vld [vmem:[#allocation10 + $0x450] sm:$0xff]  }
 0x521   : > { %14879 = vmatmul.mubr.bf16.vlgmr.msra.gmra.mrb[104].mxu1 %v10819_v39  ;;  %14576 = vmatprep.subr.bf16.mxu0 %v20899_v7  ;;  %v6813_v44 = vadd.f32 %v6798_v18, %v20212_v56  ;;  %v14104_v37 = vpop.f32.mrb[237].mxu0  ;;  %v10835_v56 = vrot.slane %v10833_v49, 3  ;;  %v21258_v39 = vld [vmem:[#allocation142_spill] sm:$0xff]  ;;  %v16036_v49 = vld [vmem:[#allocation10 + $0x698] sm:$0xff]  }
 0x522   : > { %14899 = vmatpush3.bf16.msra.mxu1 %v16030_v6  ;;  %14882 = vmatprep.mubr.msk.bf16.mxu1 %vm21196_vm14, %v20899_v7  ;;  %v6801_v43 = vpop.f32.mrb[238].mxu0 }
 0x523   : > { %14900 = vmatprep.subr.bf16.mxu1 %v20899_v7  ;;  %v6814_v28 = vadd.f32 %v6801_v43, %v20216_v13  ;;  %v14105_v29 = vpop.f32.mrb[239].mxu0  ;;  %v20323_v6 = vadd.f32 %v21258_v39, %v6813_v44  ;;  %v8941_v13 = vrot.slane %v20330_v8, 2  ;;  %v10836_v10 = vor.u32 %v10835_v56, %v10832_v38  ;;  %v21262_v56 = vld [vmem:[#allocation144_spill] sm:$0xff] }
 0x524   : > { %14577 = vmatpush3.bf16.msra.mxu0 %v16031_v22  ;;  %v10839_v22 = vshrl.u32 %v20232_v5, 16 }
 0x525   : > { %14578 = vmatprep.subr.bf16.mxu0 %v20899_v7  ;;  %v20327_v17 = vadd.f32 %v21259_v0, %v6814_v28  ;;  %v10837_v38 = vsel %vm21261_vm5, %v10827_v9, %v10836_v10  ;;  %v21263_v0 = vld [vmem:[#allocation145_spill] sm:$0xff] }
 0x526   : > { %14901 = vmatpush3.bf16.msra.mxu1 %v16032_v34  ;;  %v10842_v34 = vshll.u32 %v20232_v5, 16 }
 0x527   : > { %14902 = vmatprep.subr.bf16.mxu1 %v20899_v7  ;;  %14523 = vmatmul.mubr.bf16.gmra.mrb[88].mxu0 %v8940_v26  ;;  %v8942_v26 = vsel %vm21260_vm0, %v8939_v59, %v8941_v13  ;;  %v16038_v59 = vld [vmem:[#allocation10 + $0x6a0] sm:$0xff]   ;;  %vm21265_vm0 = vmmov %vm21261_vm5 }
 0x528   : > { %14579 = vmatpush3.bf16.msra.mxu0 %v16033_v45  ;;  %14526 = vmatprep.mubr.msk.bf16.mxu0 %vm21196_vm14, %v20899_v7  ;;  %v7142_v18 = vpop.f32.mrb[240].mxu0  ;;  %v10841_v45 = vrot.slane %v10839_v22, 2  ;;  %v10844_v28 = vrot.slane %v10842_v34, 3  ;;  %v16039_v34 = vld [vmem:[#allocation10 + $0x468] sm:$0xff]   ;;  %vm21268_vm5 = vmmov %vm21264_vm8 }
 0x529   : > { %14883 = vmatmul.mubr.bf16.gmra.mrb[108].mxu1 %v10828_v16  ;;  %14580 = vmatprep.subr.bf16.mxu0 %v20899_v7  ;;  %v7181_v44 = vadd.f32 %v7142_v18, %v20235_v46  ;;  %v14160_v37 = vpop.f32.mrb[241].mxu0  ;;  %v16037_v16 = vld [vmem:[#allocation10 + $0x460] sm:$0xff]   ;;  %v20347_v46 = vld [vmem:[%s16944_s13 + $0x30] ss:$0 sps:$4 sm:$0x77]  }
 0x52a   : > { %14903 = vmatpush3.bf16.msra.mxu1 %v16034_v55  ;;  %14886 = vmatprep.mubr.msk.bf16.mxu1 %vm21196_vm14, %v20899_v7  ;;  %v7145_v43 = vpop.f32.mrb[242].mxu0  ;;  %v10845_v22 = vor.u32 %v10844_v28, %v10841_v45  ;;  %v10851_v18 = vshll.u32 %v20347_v46, 16  ;;  %v16040_v37 = vld [vmem:[#allocation10 + $0x6a8] sm:$0xff]  }
 0x52b   : > { %14904 = vmatprep.subr.bf16.mxu1 %v20899_v7  ;;  %v7182_v29 = vadd.f32 %v7145_v43, %v20239_v11  ;;  %v14161_v55 = vpop.f32.mrb[243].mxu0  ;;  %v20350_v39 = vadd.f32 %v21262_v56, %v7181_v44  ;;  %v20357_v11 = vld [vmem:[%s16937_s22 + $0x28] sm:$0xff]  }
 0x52c   : > { %14581 = vmatpush3.bf16.msra.mxu0 %v16035_v41  ;;  %v8943_v9 = vrot.slane %v20357_v11, 2  ;;  %v10846_v28 = vsel %vm21265_vm0, %v10836_v10, %v10845_v22  ;;  %v16041_v56 = vld [vmem:[#allocation10 + $0x470] sm:$0xff]  }
 0x52d   : > { %14582 = vmatprep.subr.bf16.mxu0 %v20899_v7  ;;  %v20354_v41 = vadd.f32 %v21263_v0, %v7182_v29  ;;  %v16042_v29 = vld [vmem:[%s16937_s22 + $0x30] ss:$0 sps:$4 sm:$0x33]   ;;  %v10853_v0 = vrot.slane %v10851_v18, 3  ;;  %v9292_v18 = vld [vmem:[%s16937_s22 + $0x8] sm:$0x8] }
 0x52e   : > { %14905 = vmatpush3.bf16.msra.mxu1 %v16036_v49  ;;  %v10848_v49 = vshrl.u32 %v20347_v46, 16  ;;  %v8944_v45 = vsel %vm21264_vm8, %v8941_v13, %v8943_v9  ;;  %v21267_v13 = vld [vmem:[#allocation147_spill] sm:$0xff]  ;;  %vm21269_vm8 = vmmov %vm21265_vm0  ;;  %vm21272_vm0 = vcmask 1044480  }
 0x52f   : > { %14906 = vmatprep.subr.bf16.mxu1 %v20899_v7  ;;  %14527 = vmatmul.mubr.bf16.gmra.mrb[92].mxu0 %v8942_v26 }
 0x530   : > { %14583 = vmatpush3.bf16.msra.mxu0 %v16037_v16  ;;  %14530 = vmatprep.mubr.msk.bf16.mxu0 %vm21196_vm14, %v20899_v7  ;;  %v7150_v44 = vpop.f32.mrb[244].mxu0 }
 0x531   : > { %14887 = vmatmul.mubr.bf16.gmra.mrb[112].mxu1 %v10837_v38  ;;  %14584 = vmatprep.subr.bf16.mxu0 %v20899_v7  ;;  %v7183_v43 = vadd.f32 %v7150_v44, %v20256_v25  ;;  %v14164_v26 = vpop.f32.mrb[245].mxu0  ;;  %v21266_v25 = vld [vmem:[#allocation146_spill] sm:$0xff] }
 0x532   : > { %14890 = vmatprep.mubr.msk.bf16.mxu1 %vm21196_vm14, %v20899_v7  ;;  %14907 = vmatpush3.bf16.msra.mxu1 %v16038_v59  ;;  %v7153_v16 = vpop.f32.mrb[246].mxu0  ;;  %v10850_v59 = vrot.slane %v10848_v49, 2  ;;  %v16044_v26 = vld [vmem:[#allocation10 + $0x6b0] sm:$0xff]   ;;  %v16045_v49 = vld [vmem:[#allocation10 + $0x478] sm:$0xff]  }
 0x533   : > { %14908 = vmatprep.subr.bf16.mxu1 %v20899_v7  ;;  %v7184_v55 = vadd.f32 %v7153_v16, %v20260_v63  ;;  %v14165_v38 = vpop.f32.mrb[247].mxu0  ;;  %v20375_v44 = vadd.f32 %v21266_v25, %v7183_v43  ;;  %v8945_v63 = vrot.slane %v16042_v29, 2  ;;  %v16046_v43 = vld [vmem:[#allocation10 + $0x6b8] sm:$0xff]   ;;  %v10992_v16 = vld [vmem:[%s16944_s13 + $0x8] sm:$0x8] }
 0x534   : > { %14585 = vmatpush3.bf16.msra.mxu0 %v16039_v34  ;;  %v10854_v34 = vor.u32 %v10853_v0, %v10850_v59  ;;  %v16100_v38 = vld [vmem:[%s16937_s22 + $0xc] sm:$0xf] }
 0x535   : > { %14586 = vmatprep.subr.bf16.mxu0 %v20899_v7  ;;  %v20379_v10 = vadd.f32 %v21267_v13, %v7184_v55  ;;  %v8946_v55 = vsel %vm21268_vm5, %v8943_v9, %v8945_v63  ;;  %v21270_v13 = vld [vmem:[#allocation148_spill] sm:$0xff]  ;;  %vm21273_vm5 = vmmov %vm21272_vm0 }
 0x536   : > { %14909 = vmatpush3.bf16.msra.mxu1 %v16040_v37  ;;  %v10855_v25 = vsel %vm21269_vm8, %v10845_v22, %v10854_v34  ;;  %vm21276_vm8 = vmmov %vm21272_vm0 }
 0x537   : > { %14531 = vmatmul.mubr.bf16.gmra.mrb[96].mxu0 %v8944_v45  ;;  %14910 = vmatprep.subr.bf16.mxu1 %v20899_v7 }
 0x538   : > { %14534 = vmatprep.mubr.msk.bf16.mxu0 %vm21196_vm14, %v20899_v7  ;;  %14587 = vmatpush3.bf16.msra.mxu0 %v16041_v56  ;;  %v7158_v37 = vpop.f32.mrb[248].mxu0  ;;  %v12112_v56 = vcombine.low %v9292_v18, %v16100_v38 }
 0x539   : > { %14891 = vmatmul.mubr.bf16.gmra.mrb[116].mxu1 %v10846_v28  ;;  %14588 = vmatprep.subr.bf16.mxu0 %v20899_v7  ;;  %v7185_v45 = vadd.f32 %v7158_v37, %v20277_v62  ;;  %v14168_v28 = vpop.f32.mrb[249].mxu0  ;;  %v21271_v62 = vld [vmem:[#allocation149_spill] sm:$0xff] }
 0x53a   : > { %14894 = vmatprep.mubr.msk.bf16.mxu1 %vm21196_vm14, %v20899_v7  ;;  %14911 = vmatpush3.bf16.msra.mxu1 %v16044_v26  ;;  %v7161_v29 = vpop.f32.mrb[250].mxu0  ;;  %v12207_v26 = vcombine.low %v10992_v16, %v20152_v42  ;;  %v9312_v9 = vrot.slane %v12112_v56, 3  ;;  %v11013_v42 = vrot.slane %v20165_v31, 3  ;;  %v9315_v31 = vrot.slane %v20306_v19, 3  ;;  %v21278_v19 = vld [vmem:[#allocation43_spill] sm:$0xff] }
 0x53b   : > { %14912 = vmatprep.subr.bf16.mxu1 %v20899_v7  ;;  %v7186_v59 = vadd.f32 %v7161_v29, %v20282_v54  ;;  %v14169_v0 = vpop.f32.mrb[251].mxu0  ;;  %v20396_v3 = vadd.f32 %v21270_v13, %v7185_v45  ;;  %v9313_v54 = vrot.slane %v20288_v12, 3  ;;  %v21274_v29 = vld [vmem:[#allocation56_spill] sm:$0xff] }
 0x53c   : > { %14589 = vmatpush3.bf16.msra.mxu0 %v16045_v49  ;;  %v11012_v22 = vrot.slane %v12207_v26, 3 }
 0x53d   : > { %v20399_v37 = vadd.f32 %v21271_v62, %v7186_v59 }
 0x53e   : > { %14913 = vmatpush3.bf16.msra.mxu1 %v16046_v43  ;;  %v9314_v43 = vsel %vm21272_vm0, %v9312_v9, %v9313_v54  ;;  %v11014_v28 = vsel %vm21273_vm5, %v11012_v22, %v11013_v42  ;;  %v21277_v9 = vld [vmem:[#allocation57_spill] sm:$0xff]  ;;  %vm21279_vm5 = vmmov %vm21272_vm0 }
 0x53f   : > { %14535 = vmatmul.mubr.bf16.gmra.mrb[100].mxu0 %v8946_v55  ;;  %v21275_v55 = vld [vmem:[#allocation37_spill] sm:$0xff] }
 0x540   : > { %14590 = vmatprep.mubr.msk.bf16.mxu0 %vm21196_vm14, %v20899_v7  ;;  %v7166_v63 = vpop.f32.mrb[252].mxu0 }
 0x541   : > { %14895 = vmatmul.mubr.bf16.gmra.mrb[120].mxu1 %v10855_v25  ;;  %v7187_v34 = vadd.f32 %v7166_v63, %v20300_v1  ;;  %v14172_v49 = vpop.f32.mrb[253].mxu0  ;;  %v11015_v1 = vrot.slane %v20187_v33, 3  ;;  %v9316_v25 = vsel %vm21276_vm8, %v9313_v54, %v9315_v31  ;;  %v9317_v33 = vrot.slane %v20330_v8, 3  ;;  %vm21281_vm8 = vmmov %vm21272_vm0 }
 0x542   : > { %14914 = vmatprep.mubr.msk.bf16.mxu1 %vm21196_vm14, %v20899_v7  ;;  %v7169_v18 = vpop.f32.mrb[254].mxu0 }
 0x543   : > { %v7188_v16 = vadd.f32 %v7169_v18, %v20303_v24  ;;  %v14173_v45 = vpop.f32.mrb[255].mxu0  ;;  %v20412_v12 = vadd.f32 %v21274_v29, %v7187_v34  ;;  %v11016_v62 = vsel %vm21272_vm0, %v11013_v42, %v11015_v1  ;;  %v9318_v49 = vsel %vm21279_vm5, %v9315_v31, %v9317_v33  ;;  %v21280_v18 = vld [vmem:[#allocation50_spill] sm:$0xff]  ;;  %vm21284_vm5 = vmmov %vm21272_vm0 }
 0x545   : > { %v20415_v38 = vadd.f32 %v21275_v55, %v7188_v16 }
 0x547   : > { %14591 = vmatmul.mubr.bf16.vlgmr.msra.gmra.mrb[104].mxu0 %v9314_v43 }
 0x548   : > { %14594 = vmatprep.mubr.msk.bf16.mxu0 %vm21196_vm14, %v20899_v7  ;;  %v7174_v24 = vpop.f32.mrb[0].mxu0 }
 0x549   : > { %14915 = vmatmul.mubr.bf16.vlgmr.msra.gmra.mrb[104].mxu1 %v11014_v28  ;;  %v7189_v56 = vadd.f32 %v7174_v24, %v20323_v6  ;;  %v14176_v59 = vpop.f32.mrb[1].mxu0  ;;  %v11017_v6 = vrot.slane %v20209_v36, 3  ;;  %v21282_v28 = vld [vmem:[#allocation33_spill] sm:$0xff]  ;;  %v9319_v36 = vrot.slane %v20357_v11, 3 }
 0x54a   : > { %14918 = vmatprep.mubr.msk.bf16.mxu1 %vm21196_vm14, %v20899_v7  ;;  %v7177_v0 = vpop.f32.mrb[2].mxu0 }
 0x54b   : > { %v7190_v26 = vadd.f32 %v7177_v0, %v20327_v17  ;;  %v14177_v13 = vpop.f32.mrb[3].mxu0  ;;  %v7391_v22 = vadd.f32 %v21277_v9, %v7189_v56  ;;  %v11018_v8 = vsel %vm21281_vm8, %v11015_v1, %v11017_v6  ;;  %v9320_v24 = vsel %vm21272_vm0, %v9317_v33, %v9319_v36  ;;  %v21283_v56 = vld [vmem:[#allocation51_spill] sm:$0xff]  ;;  %vm21286_vm8 = vmmov %vm21272_vm0 }
 0x54d   : > { %v20429_v63 = vadd.f32 %v21278_v19, %v7190_v26  ;;  %v21285_v26 = vld [vmem:[#allocation39_spill] sm:$0xff] }
 0x54f   : > { %14595 = vmatmul.mubr.bf16.gmra.mrb[108].mxu0 %v9316_v25 }
 0x550   : > { %14598 = vmatprep.mubr.msk.bf16.mxu0 %vm21196_vm14, %v20899_v7  ;;  %v7553_v17 = vpop.f32.mrb[4].mxu0 }
 0x551   : > { %14919 = vmatmul.mubr.bf16.gmra.mrb[108].mxu1 %v11016_v62  ;;  %v7592_v54 = vadd.f32 %v7553_v17, %v20350_v39  ;;  %v14232_v42 = vpop.f32.mrb[5].mxu0  ;;  %v11019_v39 = vrot.slane %v20232_v5, 3  ;;  %v16101_v5 = vld [vmem:[%s16937_s22 + $0x30] ss:$0 sps:$4 sm:$0x77]   ;;  %v11021_v62 = vrot.slane %v20347_v46, 3 }
 0x552   : > { %14922 = vmatprep.mubr.msk.bf16.mxu1 %vm21196_vm14, %v20899_v7  ;;  %v7556_v34 = vpop.f32.mrb[6].mxu0  ;;  %v21287_v17 = vld [vmem:[#allocation34_spill] sm:$0xff] }
 0x553   : > { %v20440_v43 = vadd.f32 %v21280_v18, %v7592_v54  ;;  %v7593_v16 = vadd.f32 %v7556_v34, %v20354_v41  ;;  %v14233_v45 = vpop.f32.mrb[7].mxu0  ;;  %v11020_v11 = vsel %vm21284_vm5, %v11017_v6, %v11019_v39  ;;  %v21288_v18 = vld [vmem:[#allocation49_spill] sm:$0xff] }
 0x555   : > { %v20445_v29 = vadd.f32 %v21282_v28, %v7593_v16 }
 0x557   : > { %14599 = vmatmul.mubr.bf16.gmra.mrb[112].mxu0 %v9318_v49  ;;  %v11022_v49 = vsel %vm21272_vm0, %v11019_v39, %v11021_v62 }
 0x558   : > { %14602 = vmatprep.mubr.msk.bf16.mxu0 %vm21196_vm14, %v20899_v7  ;;  %v7561_v41 = vpop.f32.mrb[8].mxu0 }
 0x559   : > { %14923 = vmatmul.mubr.bf16.gmra.mrb[112].mxu1 %v11018_v8  ;;  %v7594_v55 = vadd.f32 %v7561_v41, %v20375_v44  ;;  %v14236_v31 = vpop.f32.mrb[9].mxu0  ;;  %v9321_v44 = vrot.slane %v16101_v5, 3  ;;  %v21289_v8 = vld [vmem:[#allocation101_spill] sm:$0xff] }
 0x55a   : > { %14926 = vmatprep.mubr.msk.bf16.mxu1 %vm21196_vm14, %v20899_v7  ;;  %v7564_v1 = vpop.f32.mrb[10].mxu0 }
 0x55b   : > { %v20456_v59 = vadd.f32 %v21283_v56, %v7594_v55  ;;  %v7595_v0 = vadd.f32 %v7564_v1, %v20379_v10  ;;  %v14237_v25 = vpop.f32.mrb[11].mxu0  ;;  %v9322_v6 = vsel %vm21286_vm8, %v9319_v36, %v9321_v44  ;;  %v21291_v56 = vld [vmem:[#allocation40_spill] sm:$0xff] }
 0x55c   : > { %v21293_v44 = vld [vmem:[#allocation52_spill] sm:$0xff] }
 0x55d   : > { %v20461_v13 = vadd.f32 %v21285_v26, %v7595_v0 }
 0x55f   : > { %14603 = vmatmul.mubr.bf16.gmra.mrb[116].mxu0 %v9320_v24 }
 0x560   : > { %14606 = vmatprep.mubr.msk.bf16.mxu0 %vm21196_vm14, %v20899_v7  ;;  %v7569_v9 = vpop.f32.mrb[12].mxu0 }
 0x561   : > { %14927 = vmatmul.mubr.bf16.gmra.mrb[116].mxu1 %v11020_v11  ;;  %v7596_v10 = vadd.f32 %v7569_v9, %v20396_v3  ;;  %v14240_v19 = vpop.f32.mrb[13].mxu0  ;;  %v21292_v11 = vld [vmem:[#allocation46_spill] sm:$0xff] }
 0x562   : > { %14930 = vmatprep.mubr.msk.bf16.mxu1 %vm21196_vm14, %v20899_v7  ;;  %v7572_v33 = vpop.f32.mrb[14].mxu0 }
 0x563   : > { %v20472_v54 = vadd.f32 %v21287_v17, %v7596_v10  ;;  %v7597_v42 = vadd.f32 %v7572_v33, %v20399_v37  ;;  %v14241_v34 = vpop.f32.mrb[15].mxu0  ;;  %v21290_v37 = vld [vmem:[#allocation59_spill] sm:$0xff] }
 0x564   : > { %v21294_v10 = vld [vmem:[#allocation35_spill] sm:$0xff] }
 0x565   : > { %v20477_v16 = vadd.f32 %v21288_v18, %v7597_v42 }
 0x567   : > { %14607 = vmatmul.mubr.bf16.gmra.mrb[120].mxu0 %v9322_v6  ;;  %v21295_v6 = vld [vmem:[#allocation103_spill] sm:$0xff] }
 0x568   : > { %v7577_v7 = vpop.f32.mrb[16].mxu0 }
 0x569   : > { %14931 = vmatmul.mubr.bf16.gmra.mrb[120].mxu1 %v11022_v49  ;;  %v7598_v3 = vadd.f32 %v7577_v7, %v20412_v12  ;;  %v14244_v46 = vpop.f32.mrb[17].mxu0  ;;  %v21296_v49 = vld [vmem:[#allocation60_spill] sm:$0xff] }
 0x56a   : > { %v7580_v45 = vpop.f32.mrb[18].mxu0 }
 0x56b   : > { %v20481_v28 = vadd.f32 %v21289_v8, %v7598_v3  ;;  %v7599_v36 = vadd.f32 %v7580_v45, %v20415_v38  ;;  %v14245_v41 = vpop.f32.mrb[19].mxu0  ;;  %v21297_v3 = vld [vmem:[#allocation53_spill] sm:$0xff] }
 0x56d   : > { %v20485_v55 = vadd.f32 %v21290_v37, %v7599_v36  ;;  %v21298_v36 = vld [vmem:[#allocation105_spill] sm:$0xff] }
 0x570   : > { %v7585_v39 = vpop.f32.mrb[20].mxu0 }
 0x571   : > { %v7600_v31 = vadd.f32 %v7585_v39, %v7391_v22  ;;  %v14248_v1 = vpop.f32.mrb[21].mxu0 }
 0x572   : > { %v7588_v24 = vpop.f32.mrb[22].mxu0 }
 0x573   : > { %v20488_v0 = vadd.f32 %v21291_v56, %v7600_v31  ;;  %v7601_v12 = vadd.f32 %v7588_v24, %v20429_v63  ;;  %v14249_v25 = vpop.f32.mrb[23].mxu0  ;;  %v21299_v31 = vld [vmem:[#allocation41_spill] sm:$0xff] }
 0x575   : > { %v20492_v26 = vadd.f32 %v21292_v11, %v7601_v12  ;;  %v21300_v12 = vld [vmem:[#allocation36_spill] sm:$0xff] }
 0x578   : > { %v7971_v5 = vpop.f32.mrb[24].mxu0 }
 0x579   : > { %v8098_v38 = vadd.f32 %v21293_v44, %v7971_v5  ;;  %v14304_v62 = vpop.f32.mrb[25].mxu0  ;;  %v21301_v44 = vld [vmem:[#allocation61_spill] sm:$0xff] }
 0x57a   : > { %v7974_v9 = vpop.f32.mrb[26].mxu0 }
 0x57b   : > { %v8101_v19 = vadd.f32 %v21294_v10, %v7974_v9  ;;  %v14305_v33 = vpop.f32.mrb[27].mxu0 }
 0x57c   : > { %v21302_v33 = vld [vmem:[#allocation47_spill] sm:$0xff] }
 0x580   : > { %v7979_v22 = vpop.f32.mrb[28].mxu0 }
 0x581   : > { %v8106_v17 = vadd.f32 %v21295_v6, %v7979_v22  ;;  %v14308_v42 = vpop.f32.mrb[29].mxu0 }
 0x582   : > { %v7982_v34 = vpop.f32.mrb[30].mxu0  ;;  %v11926_v42 = vld [vmem:[%s19005_s6 + $0x38] sm:$0x3] }
 0x583   : > { %v8109_v18 = vadd.f32 %v21296_v49, %v7982_v34  ;;  %v14309_v63 = vpop.f32.mrb[31].mxu0  ;;  %v6073_v34 = vsel %vm18994_vm11, 0, %v11926_v42 }
 0x584   : > { %11927 = vst [vmem:[%s19005_s6 + $0x38] sm:$0x3] %v6073_v34 }
 0x588   : > { %v7987_v7 = vpop.f32.mrb[32].mxu0 }
 0x589   : > { %v8114_v46 = vadd.f32 %v21297_v3, %v7987_v7  ;;  %v14312_v45 = vpop.f32.mrb[33].mxu0 }
 0x58a   : > { %v7990_v8 = vpop.f32.mrb[34].mxu0 }
 0x58b   : > { %v8117_v41 = vadd.f32 %v21298_v36, %v7990_v8  ;;  %v14313_v37 = vpop.f32.mrb[35].mxu0  ;;  %v21303_v36 = vld [vmem:[#allocation42_spill] sm:$0xff] }
 0x590   : > { %v7995_v39 = vpop.f32.mrb[36].mxu0 }
 0x591   : > { %v8122_v1 = vadd.f32 %v21299_v31, %v7995_v39  ;;  %v14316_v24 = vpop.f32.mrb[37].mxu0  ;;  %v21304_v39 = vld [vmem:[#allocation48_spill] sm:$0xff] }
 0x592   : > { %v7998_v56 = vpop.f32.mrb[38].mxu0 }
 0x593   : > { %v8125_v25 = vadd.f32 %v21300_v12, %v7998_v56  ;;  %v14317_v11 = vpop.f32.mrb[39].mxu0 }
 0x598   : > { %v8003_v5 = vpop.f32.mrb[40].mxu0 }
 0x599   : > { %v8130_v62 = vadd.f32 %v21301_v44, %v8003_v5  ;;  %v14320_v9 = vpop.f32.mrb[41].mxu0 }
 0x59a   : > { %v8006_v10 = vpop.f32.mrb[42].mxu0  ;;  %v21305_v9 = vld [vmem:[#allocation64_spill] sm:$0xff] }
 0x59b   : > { %v8133_v22 = vadd.f32 %v21302_v33, %v8006_v10  ;;  %v14321_v6 = vpop.f32.mrb[43].mxu0  ;;  %v21306_v33 = vld [vmem:[#allocation54_spill] sm:$0xff] }
 0x5a0   : > { %v8254_v49 = vpop.f32.mrb[44].mxu0 }
 0x5a1   : > { %v8293_v63 = vadd.f32 %v8254_v49, %v8098_v38  ;;  %v14376_v7 = vpop.f32.mrb[45].mxu0 }
 0x5a2   : > { %v8257_v3 = vpop.f32.mrb[46].mxu0 }
 0x5a3   : > { %v8294_v45 = vadd.f32 %v8257_v3, %v8101_v19  ;;  %v14377_v8 = vpop.f32.mrb[47].mxu0  ;;  %v8495_v37 = vadd.f32 %v21303_v36, %v8293_v63  ;;  %v21307_v3 = vld [vmem:[#allocation65_spill] sm:$0xff] }
 0x5a4   : > { %v21308_v8 = vld [vmem:[#allocation55_spill] sm:$0xff] }
 0x5a5   : > { %v8496_v31 = vadd.f32 %v21304_v39, %v8294_v45 }
 0x5aa   : > { %v8262_v24 = vpop.f32.mrb[48].mxu0 }
 0x5ab   : > { %v8295_v56 = vadd.f32 %v8262_v24, %v8106_v17  ;;  %v14380_v12 = vpop.f32.mrb[49].mxu0 }
 0x5ac   : > { %v8265_v11 = vpop.f32.mrb[50].mxu0 }
 0x5ad   : > { %v8296_v5 = vadd.f32 %v8265_v11, %v8109_v18  ;;  %v14381_v44 = vpop.f32.mrb[51].mxu0  ;;  %v8497_v10 = vadd.f32 %v21305_v9, %v8295_v56  ;;  %v21309_v11 = vld [vmem:[#allocation108_spill] sm:$0xff] }
 0x5ae   : > { %v21310_v44 = vld [vmem:[#allocation62_spill] sm:$0xff] }
 0x5af   : > { %v8498_v6 = vadd.f32 %v21306_v33, %v8296_v5 }
 0x5b2   : > { %v8270_v42 = vpop.f32.mrb[52].mxu0 }
 0x5b3   : > { %v8297_v38 = vadd.f32 %v8270_v42, %v8114_v46  ;;  %v14384_v34 = vpop.f32.mrb[53].mxu0 }
 0x5b4   : > { %v8273_v49 = vpop.f32.mrb[54].mxu0 }
 0x5b5   : > { %v8298_v19 = vadd.f32 %v8273_v49, %v8117_v41  ;;  %v14385_v7 = vpop.f32.mrb[55].mxu0  ;;  %v8499_v63 = vadd.f32 %v21307_v3, %v8297_v38  ;;  %v21311_v38 = vld [vmem:[#allocation110_spill] sm:$0xff] }
 0x5b7   : > { %v8500_v45 = vadd.f32 %v21308_v8, %v8298_v19  ;;  %v21312_v19 = vld [vmem:[#allocation63_spill] sm:$0xff] }
 0x5ba   : > { %v8278_v36 = vpop.f32.mrb[56].mxu0 }
 0x5bb   : > { %v8299_v17 = vadd.f32 %v8278_v36, %v8122_v1  ;;  %v14388_v39 = vpop.f32.mrb[57].mxu0 }
 0x5bc   : > { %v8281_v24 = vpop.f32.mrb[58].mxu0  ;;  %v21313_v39 = vld [vmem:[#allocation67_spill] sm:$0xff] }
 0x5bd   : > { %v8300_v18 = vadd.f32 %v8281_v24, %v8125_v25  ;;  %v14389_v12 = vpop.f32.mrb[59].mxu0  ;;  %v8501_v56 = vadd.f32 %v21309_v11, %v8299_v17  ;;  %v21314_v24 = vld [vmem:[#allocation68_spill] sm:$0xff] }
 0x5bf   : > { %v8502_v5 = vadd.f32 %v21310_v44, %v8300_v18  ;;  %v16456_v44 = vmov 0  }
 0x5c0   : > { %526 = vst [vmem:[%s19005_s6] sm:$0xf] %v16456_v44  ;;  %539 = vst [vmem:[%s19005_s6 + $0x30] sm:$0xf] %v16456_v44 }
 0x5c1   : > { %11925 = vst [vmem:[%s19005_s6 + $0x34] sm:$0xf] %v16456_v44  ;;  %11930 = vst [vmem:[%s19005_s6 + $0x64] sm:$0xf] %v16456_v44 }
 0x5c2   : > { %v8286_v9 = vpop.f32.mrb[60].mxu0 }
 0x5c3   : > { %v8301_v46 = vadd.f32 %v8286_v9, %v8130_v62  ;;  %v14392_v33 = vpop.f32.mrb[61].mxu0 }
 0x5c4   : > { %v8289_v42 = vpop.f32.mrb[62].mxu0 }
 0x5c5   : > { %v8302_v41 = vadd.f32 %v8289_v42, %v8133_v22  ;;  %v14393_v34 = vpop.f32.mrb[63].mxu0  ;;  %v8503_v49 = vadd.f32 %v21311_v38, %v8301_v46 }
 0x5c7   : > { %v8504_v1 = vadd.f32 %v21312_v19, %v8302_v41  ;;  %v21316_v41 = vld [vmem:[#allocation70_spill] sm:$0xff] }
 0x5ca   : > { %v8665_v25 = vpop.f32.mrb[64].mxu0 }
 0x5cb   : > { %v8704_v7 = vadd.f32 %v8665_v25, %v8495_v37  ;;  %v14448_v3 = vpop.f32.mrb[65].mxu0  ;;  %v21315_v37 = vld [vmem:[#allocation69_spill] sm:$0xff] }
 0x5cc   : > { %v8668_v8 = vpop.f32.mrb[66].mxu0 }
 0x5cd   : > { %v8705_v36 = vadd.f32 %v8668_v8, %v8496_v31  ;;  %v14449_v17 = vpop.f32.mrb[67].mxu0  ;;  %v8871_v62 = vadd.f32 %v21313_v39, %v8704_v7 }
 0x5cf   : > { %v8872_v18 = vadd.f32 %v21314_v24, %v8705_v36  ;;  %v21318_v36 = vld [vmem:[#allocation72_spill] sm:$0xff] }
 0x5d2   : > { %v8673_v22 = vpop.f32.mrb[68].mxu0 }
 0x5d3   : > { %v8706_v12 = vadd.f32 %v8673_v22, %v8497_v10  ;;  %v14452_v11 = vpop.f32.mrb[69].mxu0  ;;  %v21317_v10 = vld [vmem:[#allocation66_spill] sm:$0xff] }
 0x5d4   : > { %v8676_v9 = vpop.f32.mrb[70].mxu0 }
 0x5d5   : > { %v8707_v46 = vadd.f32 %v8676_v9, %v8498_v6  ;;  %v14453_v33 = vpop.f32.mrb[71].mxu0  ;;  %v8873_v42 = vadd.f32 %v21315_v37, %v8706_v12  ;;  %v21319_v9 = vld [vmem:[#allocation73_spill] sm:$0xff] }
 0x5d6   : > { %v21320_v33 = vld [vmem:[#allocation74_spill] sm:$0xff] }
 0x5d7   : > { %v8874_v31 = vadd.f32 %v21316_v41, %v8707_v46 }
 0x5da   : > { %v8681_v34 = vpop.f32.mrb[72].mxu0 }
 0x5db   : > { %v8708_v38 = vadd.f32 %v8681_v34, %v8499_v63  ;;  %v14456_v19 = vpop.f32.mrb[73].mxu0 }
 0x5dc   : > { %v8684_v25 = vpop.f32.mrb[74].mxu0 }
 0x5dd   : > { %v8709_v7 = vadd.f32 %v8684_v25, %v8500_v45  ;;  %v14457_v3 = vpop.f32.mrb[75].mxu0  ;;  %v8875_v8 = vadd.f32 %v21317_v10, %v8708_v38  ;;  %v21321_v25 = vld [vmem:[#allocation77_spill] sm:$0xff] }
 0x5de   : > { %v21322_v3 = vld [vmem:[#allocation78_spill] sm:$0xff] }
 0x5df   : > { %v8876_v17 = vadd.f32 %v21318_v36, %v8709_v7 }
 0x5e2   : > { %v8689_v39 = vpop.f32.mrb[76].mxu0 }
 0x5e3   : > { %v8710_v24 = vadd.f32 %v8689_v39, %v8501_v56  ;;  %v14460_v22 = vpop.f32.mrb[77].mxu0 }
 0x5e4   : > { %v8692_v11 = vpop.f32.mrb[78].mxu0 }
 0x5e5   : > { %v8711_v6 = vadd.f32 %v8692_v11, %v8502_v5  ;;  %v14461_v44 = vpop.f32.mrb[79].mxu0  ;;  %v8877_v12 = vadd.f32 %v21319_v9, %v8710_v24 }
 0x5e7   : > { %v8878_v46 = vadd.f32 %v21320_v33, %v8711_v6 }
 0x5ea   : > { %v8697_v37 = vpop.f32.mrb[80].mxu0 }
 0x5eb   : > { %v8712_v63 = vadd.f32 %v8697_v37, %v8503_v49  ;;  %v14464_v41 = vpop.f32.mrb[81].mxu0 }
 0x5ec   : > { %v8700_v34 = vpop.f32.mrb[82].mxu0 }
 0x5ed   : > { %v8713_v45 = vadd.f32 %v8700_v34, %v8504_v1  ;;  %v14465_v19 = vpop.f32.mrb[83].mxu0  ;;  %v8879_v38 = vadd.f32 %v21321_v25, %v8712_v63 }
 0x5ef   : > { %v8880_v7 = vadd.f32 %v21322_v3, %v8713_v45 }
 0x5f2   : > { %v9034_v10 = vpop.f32.mrb[84].mxu0 }
 0x5f3   : > { %v9073_v56 = vadd.f32 %v9034_v10, %v8871_v62  ;;  %v14520_v36 = vpop.f32.mrb[85].mxu0 }
 0x5f4   : > { %v9037_v39 = vpop.f32.mrb[86].mxu0 }
 0x5f5   : > { %v9074_v5 = vadd.f32 %v9037_v39, %v8872_v18  ;;  %v14521_v22 = vpop.f32.mrb[87].mxu0  ;;  %v9282_v24 = vadd.f32 %v19698_v57, %v9073_v56 }
 0x5f7   : > { %v9283_v11 = vadd.f32 %v19726_v35, %v9074_v5  ;;  %v20555_v5 = vstv %s11161_s19  ;;  %s16257_s19 = scalar_lea.vmem %s16256_s12, 3328 }
 0x5f8   : > { %p16259_p8 = scmp.lt.s32.totalorder %s16257_s19, %s16251_s9 }
 0x5fa   : > { %v9042_v6 = vpop.f32.mrb[88].mxu0  ;;  %p16260_p4 = por %p16259_p8, %p16258_p10 }
 0x5fb   : > { %v9075_v49 = vadd.f32 %v9042_v6, %v8873_v42  ;;  %v14524_v44 = vpop.f32.mrb[89].mxu0 }
 0x5fc   : > { %v9045_v9 = vpop.f32.mrb[90].mxu0  ;;  %p16261_p9 = pnand %p16260_p4, %p16254_p13 }
 0x5fd   : > { %v9076_v1 = vadd.f32 %v9045_v9, %v8874_v31  ;;  %v14525_v33 = vpop.f32.mrb[91].mxu0  ;;  %v9284_v37 = vadd.f32 %v19807_v52, %v9075_v49 }
 0x5ff   : > { %v9285_v63 = vadd.f32 %v19829_v47, %v9076_v1 }
 0x602   : > { %v9050_v62 = vpop.f32.mrb[92].mxu0 }
 0x603   : > { %v9077_v41 = vadd.f32 %v9050_v62, %v8875_v8  ;;  %v14528_v34 = vpop.f32.mrb[93].mxu0 }
 0x604   : > { %v9053_v18 = vpop.f32.mrb[94].mxu0 }
 0x605   : > { %v9078_v45 = vadd.f32 %v9053_v18, %v8876_v17  ;;  %v14529_v19 = vpop.f32.mrb[95].mxu0  ;;  %v20537_v57 = vadd.f32 %v19899_v21, %v9077_v41 }
 0x607   : > { %v20540_v35 = vadd.f32 %v19910_v2, %v9078_v45 }
 0x60a   : > { %v9058_v42 = vpop.f32.mrb[96].mxu0 }
 0x60b   : > { %v9079_v31 = vadd.f32 %v9058_v42, %v8877_v12  ;;  %v14532_v25 = vpop.f32.mrb[97].mxu0 }
 0x60c   : > { %v9061_v3 = vpop.f32.mrb[98].mxu0 }
 0x60d   : > { %v9080_v52 = vadd.f32 %v9061_v3, %v8878_v46  ;;  %v14533_v10 = vpop.f32.mrb[99].mxu0  ;;  %v20543_v47 = vadd.f32 %v19955_v30, %v9079_v31 }
 0x60f   : > { %v20547_v8 = vadd.f32 %v19979_v61, %v9080_v52 }
 0x612   : > { %v9066_v17 = vpop.f32.mrb[100].mxu0 }
 0x613   : > { %v9081_v21 = vadd.f32 %v9066_v17, %v8879_v38  ;;  %v14536_v56 = vpop.f32.mrb[101].mxu0 }
 0x614   : > { %v9069_v36 = vpop.f32.mrb[102].mxu0 }
 0x615   : > { %v9082_v2 = vadd.f32 %v9069_v36, %v8880_v7  ;;  %v14537_v39 = vpop.f32.mrb[103].mxu0  ;;  %v20550_v12 = vadd.f32 %v20033_v50, %v9081_v21 }
 0x617   : > { %v20553_v46 = vadd.f32 %v20041_v40, %v9082_v2 }
 0x61a   : > { %v9410_v30 = vpop.f32.mrb[104].mxu0 }
 0x61b   : > { %v9449_v22 = vadd.f32 %v9410_v30, %v9282_v24  ;;  %v14592_v6 = vpop.f32.mrb[105].mxu0  ;;  %v20564_v24 = vld [vmem:[%s21149_s5] ss:$0 sm:$0xff] }
 0x61c   : > { %v11110_v61 = vpop.f32.mrb[104].mxu1  ;;  %v9413_v44 = vpop.f32.mrb[106].mxu0 }
 0x61d   : > { %v14916_v49 = vpop.f32.mrb[105].mxu1  ;;  %v9459_v38 = vadd.f32 %v9449_v22, %v20440_v43  ;;  %v11163_v7 = vmul.f32 %v20555_v5, %v11110_v61  ;;  %v9450_v9 = vadd.f32 %v9413_v44, %v9283_v11  ;;  %v14593_v50 = vpop.f32.mrb[107].mxu0 }
 0x61e   : > { %v11113_v1 = vpop.f32.mrb[106].mxu1 }
 0x61f   : > { %v14917_v33 = vpop.f32.mrb[107].mxu1  ;;  %v11173_v62 = vadd.f32 %v11163_v7, %v9459_v38  ;;  %v9460_v40 = vadd.f32 %v9450_v9, %v20445_v29  ;;  %v11164_v41 = vmul.f32 %v20555_v5, %v11113_v1 }
 0x621   : > { %v11183_v34 = vadd.f32 %v20564_v24, %v11173_v62  ;;  %v11174_v18 = vadd.f32 %v11164_v41, %v9460_v40 }
 0x622   : > { %v9418_v43 = vpop.f32.mrb[108].mxu0 }
 0x623   : > { %v11193_v11 = vsel %vm19747_vm4, %v11183_v34, 0.0  ;;  %v11184_v45 = vadd.f32 %v20564_v24, %v11174_v18  ;;  %v9451_v19 = vadd.f32 %v9418_v43, %v9284_v37  ;;  %v14596_v31 = vpop.f32.mrb[109].mxu0 }
 0x624   : > { %v11118_v42 = vpop.f32.mrb[108].mxu1  ;;  %v12278_v29 = vpack.c.bf16 %v11193_v11, %v11193_v11  ;;  %v9421_v3 = vpop.f32.mrb[110].mxu0 }
 0x625   : > { %v14920_v25 = vpop.f32.mrb[109].mxu1  ;;  %v11194_v52 = vsel %vm19767_vm1, %v11184_v45, 0.0  ;;  %v9461_v10 = vadd.f32 %v9451_v19, %v20456_v59  ;;  %v11165_v17 = vmul.f32 %v20555_v5, %v11118_v42  ;;  %v9452_v21 = vadd.f32 %v9421_v3, %v9285_v63  ;;  %v14597_v48 = vpop.f32.mrb[111].mxu0  ;;  %v12226_v59 = vld [vmem:[%s19005_s6 + $0x38] sm:$0xe] }
 0x626   : > { %v11121_v56 = vpop.f32.mrb[110].mxu1  ;;  %v11234_v36 = vshrl.u32 %v12278_v29, 16  ;;  %v11237_v2 = vshll.u32 %v12278_v29, 16  ;;  %v12279_v39 = vpack.c.bf16 %v11194_v52, %v11194_v52 }
 0x627   : > { %v14921_v37 = vpop.f32.mrb[111].mxu1  ;;  %v11175_v30 = vadd.f32 %v11165_v17, %v9461_v10  ;;  %v9462_v22 = vadd.f32 %v9452_v21, %v20461_v13  ;;  %v11166_v61 = vmul.f32 %v20555_v5, %v11121_v56 }
 0x628   : > { %v11236_v6 = vrot.slane %v11234_v36, 6  ;;  %v11239_v4 = vrot.slane %v11237_v2, 7  ;;  %v11243_v49 = vshrl.u32 %v12279_v39, 16  ;;  %v11246_v44 = vshll.u32 %v12279_v39, 16 }
 0x629   : > { %v11185_v38 = vadd.f32 %v20564_v24, %v11175_v30  ;;  %v11176_v7 = vadd.f32 %v11166_v61, %v9462_v22 }
 0x62a   : > { %v11240_v63 = vor.u32 %v11239_v4, %v11236_v6  ;;  %v11245_v9 = vrot.slane %v11243_v49, 6  ;;  %v11248_v1 = vrot.slane %v11246_v44, 7  ;;  %v9426_v50 = vpop.f32.mrb[112].mxu0 }
 0x62b   : > { %v11195_v33 = vsel %vm19847_vm2, %v11185_v38, 0.0  ;;  %v11186_v13 = vadd.f32 %v20564_v24, %v11176_v7  ;;  %v9453_v62 = vadd.f32 %v9426_v50, %v20537_v57  ;;  %v14600_v41 = vpop.f32.mrb[113].mxu0  ;;  %vm21323_vm2 = vnez %v21194_v27 }
 0x62c   : > { %v11126_v40 = vpop.f32.mrb[112].mxu1  ;;  %v11241_v34 = vrot.slane %v11240_v63, 4  ;;  %v11344_v18 = vsel %vm19010_vm12, %v11240_v63, %v12226_v59  ;;  %v11249_v43 = vor.u32 %v11248_v1, %v11245_v9  ;;  %v12280_v11 = vpack.c.bf16 %v11195_v33, %v11195_v33  ;;  %v9429_v19 = vpop.f32.mrb[114].mxu0 }
 0x62d   : > { %v14924_v45 = vpop.f32.mrb[113].mxu1  ;;  %12227 = vst [vmem:[%s19005_s6 + $0x38] sm:$0xe] %v11344_v18  ;;  %v11196_v51 = vsel %vm19866_vm10, %v11186_v13, 0.0  ;;  %v9463_v42 = vadd.f32 %v9453_v62, %v20472_v54  ;;  %v11167_v31 = vmul.f32 %v20555_v5, %v11126_v40  ;;  %v9454_v57 = vadd.f32 %v9429_v19, %v20540_v35  ;;  %v14601_v25 = vpop.f32.mrb[115].mxu0 }
 0x62e   : > { %v11129_v29 = vpop.f32.mrb[114].mxu1  ;;  %v11250_v60 = vsel %vm19880_vm7, %v11241_v34, %v11249_v43  ;;  %v11253_v3 = vshrl.u32 %v12280_v11, 16  ;;  %v11256_v52 = vshll.u32 %v12280_v11, 16  ;;  %v12281_v17 = vpack.c.bf16 %v11196_v51, %v11196_v51 }
 0x62f   : > { %v14925_v10 = vpop.f32.mrb[115].mxu1  ;;  %12228 = vst [vmem:[%s19005_s6 + $0x3c] sm:$0xf] %v11250_v60  ;;  %v11177_v21 = vadd.f32 %v11167_v31, %v9463_v42  ;;  %v9464_v20 = vadd.f32 %v9454_v57, %v20477_v16  ;;  %v11168_v56 = vmul.f32 %v20555_v5, %v11129_v29  ;;  %v11251_v37 = vrot.slane %v11249_v43, 4 }
 0x630   : > { %v11255_v54 = vrot.slane %v11253_v3, 6  ;;  %v11258_v48 = vrot.slane %v11256_v52, 7  ;;  %v11263_v36 = vshrl.u32 %v12281_v17, 16  ;;  %v11266_v2 = vshll.u32 %v12281_v17, 16 }
 0x631   : > { %v11187_v35 = vadd.f32 %v20564_v24, %v11177_v21  ;;  %v11178_v39 = vadd.f32 %v11168_v56, %v9464_v20 }
 0x632   : > { %v11259_v30 = vor.u32 %v11258_v48, %v11255_v54  ;;  %v9434_v22 = vpop.f32.mrb[116].mxu0  ;;  %v11265_v61 = vrot.slane %v11263_v36, 6  ;;  %v11268_v6 = vrot.slane %v11266_v2, 7 }
 0x633   : > { %v11197_v4 = vsel %vm19917_vm3, %v11187_v35, 0.0  ;;  %v11188_v16 = vadd.f32 %v20564_v24, %v11178_v39  ;;  %v14604_v44 = vpop.f32.mrb[117].mxu0  ;;  %v9455_v63 = vadd.f32 %v9434_v22, %v20543_v47 }
 0x634   : > { %v11134_v49 = vpop.f32.mrb[116].mxu1  ;;  %v11260_v59 = vsel %vm19880_vm7, %v11251_v37, %v11259_v30  ;;  %v11261_v38 = vrot.slane %v11259_v30, 4  ;;  %v12282_v7 = vpack.c.bf16 %v11197_v4, %v11197_v4  ;;  %v9437_v1 = vpop.f32.mrb[118].mxu0  ;;  %v11269_v50 = vor.u32 %v11268_v6, %v11265_v61 }
 0x635   : > { %v14928_v9 = vpop.f32.mrb[117].mxu1  ;;  %12229 = vst [vmem:[%s19005_s6 + $0x40] sm:$0xf] %v11260_v59  ;;  %v11198_v32 = vsel %vm19934_vm13, %v11188_v16, 0.0  ;;  %v9456_v33 = vadd.f32 %v9437_v1, %v20547_v8  ;;  %v14605_v62 = vpop.f32.mrb[119].mxu0  ;;  %v9465_v18 = vadd.f32 %v9455_v63, %v20481_v28  ;;  %v11169_v11 = vmul.f32 %v20555_v5, %v11134_v49 }
 0x636   : > { %v11137_v13 = vpop.f32.mrb[118].mxu1  ;;  %v11273_v40 = vshrl.u32 %v12282_v7, 16  ;;  %v11276_v41 = vshll.u32 %v12282_v7, 16  ;;  %v12283_v34 = vpack.c.bf16 %v11198_v32, %v11198_v32  ;;  %v11270_v47 = vsel %vm19880_vm7, %v11261_v38, %v11269_v50 }
 0x637   : > { %v14929_v43 = vpop.f32.mrb[119].mxu1  ;;  %v9466_v45 = vadd.f32 %v9456_v33, %v20485_v55  ;;  %v11170_v15 = vmul.f32 %v20555_v5, %v11137_v13  ;;  %12230 = vst [vmem:[%s19005_s6 + $0x44] sm:$0xf] %v11270_v47  ;;  %v11179_v31 = vadd.f32 %v11169_v11, %v9465_v18  ;;  %v11271_v29 = vrot.slane %v11269_v50, 4 }
 0x638   : > { %v11275_v19 = vrot.slane %v11273_v40, 6  ;;  %v11278_v8 = vrot.slane %v11276_v41, 7  ;;  %v11283_v51 = vshrl.u32 %v12283_v34, 16  ;;  %v11286_v42 = vshll.u32 %v12283_v34, 16 }
 0x639   : > { %v11180_v57 = vadd.f32 %v11170_v15, %v9466_v45  ;;  %v11189_v52 = vadd.f32 %v20564_v24, %v11179_v31 }
 0x63a   : > { %v11279_v28 = vor.u32 %v11278_v8, %v11275_v19  ;;  %v11285_v25 = vrot.slane %v11283_v51, 6  ;;  %v11288_v60 = vrot.slane %v11286_v42, 7  ;;  %v9442_v3 = vpop.f32.mrb[120].mxu0 }
 0x63b   : > { %v11190_v10 = vadd.f32 %v20564_v24, %v11180_v57  ;;  %v9457_v55 = vadd.f32 %v9442_v3, %v20550_v12  ;;  %v14608_v21 = vpop.f32.mrb[121].mxu0  ;;  %v11199_v35 = vsel %vm19974_vm6, %v11189_v52, 0.0 }
 0x63c   : > { %v11142_v17 = vpop.f32.mrb[120].mxu1  ;;  %v11280_v20 = vsel %vm19880_vm7, %v11271_v29, %v11279_v28  ;;  %v11281_v56 = vrot.slane %v11279_v28, 4  ;;  %v11289_v54 = vor.u32 %v11288_v60, %v11285_v25  ;;  %v9445_v2 = vpop.f32.mrb[122].mxu0  ;;  %v12284_v6 = vpack.c.bf16 %v11199_v35, %v11199_v35  ;;  %v12237_v25 = vld [vmem:[%s19005_s6 + $0x60] sm:$0x3] }
 0x63d   : > { %v11171_v48 = vmul.f32 %v20555_v5, %v11142_v17  ;;  %v14932_v36 = vpop.f32.mrb[121].mxu1  ;;  %12231 = vst [vmem:[%s19005_s6 + $0x48] sm:$0xf] %v11280_v20  ;;  %v11200_v39 = vsel %vm21323_vm2, %v11190_v10, 0.0  ;;  %v9467_v12 = vadd.f32 %v9457_v55, %v20488_v0  ;;  %v9458_v37 = vadd.f32 %v9445_v2, %v20553_v46  ;;  %v14609_v22 = vpop.f32.mrb[123].mxu0 }
 0x63e   : > { %v11145_v30 = vpop.f32.mrb[122].mxu1  ;;  %v11290_v61 = vsel %vm19880_vm7, %v11281_v56, %v11289_v54  ;;  %v12285_v4 = vpack.c.bf16 %v11200_v39, %v11200_v39  ;;  %v11293_v27 = vshrl.u32 %v12284_v6, 16  ;;  %v11296_v59 = vshll.u32 %v12284_v6, 16 }
 0x63f   : > { %v14933_v16 = vpop.f32.mrb[123].mxu1  ;;  %12232 = vst [vmem:[%s19005_s6 + $0x4c] sm:$0xf] %v11290_v61  ;;  %v11181_v49 = vadd.f32 %v11171_v48, %v9467_v12  ;;  %v9468_v14 = vadd.f32 %v9458_v37, %v20492_v26  ;;  %v11172_v44 = vmul.f32 %v20555_v5, %v11145_v30  ;;  %v11291_v33 = vrot.slane %v11289_v54, 4 }
 0x640   : > { %v11303_v38 = vshrl.u32 %v12285_v4, 16  ;;  %v11306_v0 = vshll.u32 %v12285_v4, 16  ;;  %v11295_v63 = vrot.slane %v11293_v27, 6  ;;  %v11298_v9 = vrot.slane %v11296_v59, 7 }
 0x641   : > { %v11191_v46 = vadd.f32 %v20564_v24, %v11181_v49  ;;  %v11182_v7 = vadd.f32 %v11172_v44, %v9468_v14 }
 0x642   : > { %v11305_v1 = vrot.slane %v11303_v38, 6  ;;  %v11308_v50 = vrot.slane %v11306_v0, 7  ;;  %v11299_v5 = vor.u32 %v11298_v9, %v11295_v63 }
 0x643   : > { %v11201_v32 = vsel %vm20046_vm9, %v11191_v46, 0.0  ;;  %v11192_v26 = vadd.f32 %v20564_v24, %v11182_v7 }
 0x644   : > { %v11309_v13 = vor.u32 %v11308_v50, %v11305_v1  ;;  %v12286_v62 = vpack.c.bf16 %v11201_v32, %v11201_v32  ;;  %v11300_v34 = vsel %vm19880_vm7, %v11291_v33, %v11299_v5  ;;  %v11301_v18 = vrot.slane %v11299_v5, 4 }
 0x645   : > { %v11202_v41 = vsel %vm20056_vm15, %v11192_v26, 0.0  ;;  %12233 = vst [vmem:[%s19005_s6 + $0x50] sm:$0xf] %v11300_v34 }
 0x646   : > { %v11313_v43 = vshrl.u32 %v12286_v62, 16  ;;  %v11316_v58 = vshll.u32 %v12286_v62, 16  ;;  %v12287_v47 = vpack.c.bf16 %v11202_v41, %v11202_v41  ;;  %v11310_v24 = vsel %vm19880_vm7, %v11301_v18, %v11309_v13 }
 0x647   : > { %12234 = vst [vmem:[%s19005_s6 + $0x54] sm:$0xf] %v11310_v24  ;;  %v11311_v8 = vrot.slane %v11309_v13, 4 }
 0x648   : > { %v11315_v11 = vrot.slane %v11313_v43, 6  ;;  %v11318_v45 = vrot.slane %v11316_v58, 7  ;;  %v11323_v15 = vshrl.u32 %v12287_v47, 16  ;;  %v11326_v19 = vshll.u32 %v12287_v47, 16 }
 0x64a   : > { %v11319_v51 = vor.u32 %v11318_v45, %v11315_v11  ;;  %v11325_v42 = vrot.slane %v11323_v15, 6  ;;  %v11328_v31 = vrot.slane %v11326_v19, 7 }
 0x64c   : > { %v11320_v57 = vsel %vm19880_vm7, %v11311_v8, %v11319_v51  ;;  %v11321_v29 = vrot.slane %v11319_v51, 4  ;;  %v11329_v28 = vor.u32 %v11328_v31, %v11325_v42 }
 0x64d   : > { %12235 = vst [vmem:[%s19005_s6 + $0x58] sm:$0xf] %v11320_v57 }
 0x64e   : > { %v11330_v60 = vsel %vm19880_vm7, %v11321_v29, %v11329_v28  ;;  %v11331_v3 = vrot.slane %v11329_v28, 4 }
 0x64f   : > { %12236 = vst [vmem:[%s19005_s6 + $0x5c] sm:$0xf] %v11330_v60 }
 0x650   : > { %v11356_v52 = vsel %vm18994_vm11, %v11331_v3, %v12237_v25 }
 0x651   : > { %12238 = vst [vmem:[%s19005_s6 + $0x60] sm:$0x3] %v11356_v52 }
 0x652   : > { %16264 = shalt.err (!%p16261_p9)
}
 0x653   : > { %s16265_s1 = scalar_lea.hbm %s20654_s25, 1664  ;;  %s16269_s20 = scalar_lea.hbm %s21327_s17, 3328 }
 0x654   : > { %p16266_p7 = scmp.ne.s32.totalorder %s20654_s25, %s16265_s1  ;;  %p16270_p11 = scmp.lt.u32.totalorder %s20654_s25, %s21327_s17 }
 0x655   : > { %p16271_p5 = scmp.lt.u32.totalorder %s16269_s20, %s16265_s1  ;;  %p16273_p3 = scmp.lt.u32.totalorder %s16265_s1, %s20654_s25 }
 0x656   : > { %p16267_p6 = pnand %p16266_p7, %p21328_p2 }
 0x657   : > { %p16272_p0 = por %p16271_p5, %p16270_p11 }
 0x658   : > { %p16268_p1 = pneg %p16267_p6 }
 0x659   : > { %p16274_p12 = por %p16273_p3, %p16272_p0 }
 0x65b   : > { %p16275_p13 = pnand %p16274_p12, %p16268_p1 }
 0x65d   : > { %16278 = shalt.err (!%p16275_p13)
}
 0x65e   : > { %s16458_s26 = smov 64   ;;  %s16459_s13 = smov 4  }
 0x65f   : > { %15300 = dma.vmem_to_hbm [thread:$0]  (%p21328_p2), %s20656_s11, 1664, %s20654_s25, %s20664_s15, %s16458_s26, %s16458_s26, %s16459_s13  }
 0x660 PF: > { %s21329_s21 = sld [smem:[#allocation18_spill]]  ;;  %s21330_s9 = sld [smem:[#allocation27_spill]] }
 0x661   : > { %p21332_p8 = scmp.ge.s32.totalorder %s16445_s14, 2 }
 0x666   : > { %s11390_s30 = sand.u32 1, %s21329_s21   ;;  %p21331_p10 = scmp.ne.s32.totalorder %s21330_s9, 0 }
 0x667   : > { %s11391_s12 = scalar_lea.sflag [#allocation4], %s11390_s30 }
 0x668   : > { %p15320_p4 = pnand %p21332_p8, %p21331_p10 }
 0x66a   : > { %16372 = dma.done.wait (!%p15320_p4), %s11391_s12, 1664  }
 0x66b   : > { %16374 = vsyncadd (!%p15320_p4), %s11391_s12, 4294965632  ;;  %s28_s14 = sadd.s32 1, %s16445_s14   ;;  %s21334_s21 = sld [smem:[#allocation19_spill]] }
 0x66c   : > { %p20694_p9 = scmp.ge.s32.totalorder %s28_s14, 4   ;;  %s21335_s11 = sld [smem:[#allocation21_spill]] }
 0x66d   : > { %s21336_s25 = sld [smem:[#allocation22_spill]]  ;;  %s21337_s0 = smov %s16816_s27 }
 0x66e   : > { %s21338_s15 = sld [smem:[#allocation30_spill]]  ;;  %s21339_s1 = sld [smem:[#allocation23_spill]] }
 0x66f   : > { %s21340_s4 = sld [smem:[#allocation31_spill]]  ;;  %s21341_s12 = sld [smem:[#allocation25_spill]] }
 0x670   : > { %s21342_s13 = sld [smem:[#allocation29_spill]]  ;;  %s21343_s22 = smov %s16385_s23 }
 0x671   : > { %s21344_s23 = smov %s16678_s24  ;;  %s21346_s26 = smov %s21371_s16 }
 0x672   : > { %s21345_s24 = smov %s21335_s11  ;;  %s21347_s27 = smov %s16405_s28 }
 0x673   : > { %s21348_s28 = smov %s16409_s29  ;;  %s21349_s29 = smov %s21337_s0 }
 0x674   : > { %s21350_s30 = smov %s16417_s7  ;;  %s21351_s7 = smov %s16421_s8 }
 0x675   : > { %s21352_s8 = smov %s21338_s15  ;;  %s21353_s9 = smov %s16429_s10 }
 0x676   : > { %s21354_s10 = smov %s21339_s1  ;;  %s21355_s11 = smov %s21340_s4 }
 0x677   :  { %27 = sbr.rel (!%p20694_p9) target bundleno = 24 (0x18), region = 157 }
 0x67e   :  { %11396 = vsyncpa [#allocation3], 1 }
 0x67f   :  { %11398 = vsyncpa [#allocation3 + $0x1], 1 }
 0x680   :  { %11399 = vsyncpa [#allocation6], 1 }
 0x681   :  { %11401 = vsyncpa [#allocation6 + $0x1], 1 }
 0x682   :  { %11402 = vsyncpa [#allocation9], 1 }
 0x683   :  { %11404 = vsyncpa [#allocation9 + $0x1], 1 }
 0x684   :  { %11405 = vsyncpa [#allocation4], 1 }
 0x685   :  { %11407 = vsyncpa [#allocation4 + $0x1], 1 }

</bundles_post_ra>
